<compile_context>
chip_gen: v7x
topology: tpu7x:2x2x1
jax: 0.10.0
libtpu: 0.0.40
codegen_flags: <defaults>
</compile_context>

<pallas_src>
import jax
import jax.numpy as jnp
from jax.experimental import pallas as pl
from jax.experimental.pallas import tpu as pltpu

# The module hardcodes AvgPool2d(kernel_size=(11, 11), stride=1, padding=0) as
# its "global pooling", so the spatial patch must be 11x11.
_H = 11
_W = 11
_HP = _H + 2                  # 13: zero-padded spatial extent (for the 3x3 convs)
_NQ = _HP * _HP               # 169: padded spatial positions, flattened
_QP = 176                     # 169 rounded up to a multiple of 8 (per-sample row block)
_SHIFT = 16                   # >= max |row shift| (14) of a 3x3 tap, sublane aligned
_C3 = 12                      # every 3x3 conv has 12 output channels
_W3L = 9 * _C3                # 108 lanes: all 9 taps packed side by side
_POOL_DIV = float(_H * _W)    # AvgPool2d((11,11)) divisor
_BN_EPS = 1e-5                # PyTorch BatchNorm2d default eps
_VEC_LANES = 96               # widest per-channel vector (bn14: 96 channels)
_REF_PREC = jax.lax.Precision.HIGHEST   # reference only


# --------------------------- host-side packing helpers ----------------------- #

def _stack_rows(blocks, lanes):
    """Stack (K_i, N_i) blocks along sublanes; each block starts 8-aligned."""
    offs, parts, row = {}, [], 0
    for name, w in blocks:
        offs[name] = row
        k, n = w.shape
        kp = -(-k // 8) * 8
        parts.append(jnp.pad(w.astype(jnp.float32), ((0, kp - k), (0, lanes - n))))
        row += kp
    return jnp.concatenate(parts, axis=0), offs


def _build_vecslab(vec_list):
    """Pack 1-D per-channel vectors as rows of a single (n, 96) slab."""
    idx, rows = {}, []
    for name, v in vec_list:
        idx[name] = len(rows)
        v = jnp.asarray(v).reshape(1, -1).astype(jnp.float32)
        rows.append(jnp.pad(v, ((0, 0), (0, _VEC_LANES - v.shape[1]))))
    return jnp.concatenate(rows, axis=0), idx


# ------------------------------- fused forward -------------------------------- #

def dbda_forward(params, X, tb=None):
    B, band, H, W = X.shape
    assert H == _H and W == _W, "global_pooling is a fixed 11x11 AvgPool -> use 11x11 patches"
    classes = params['fc2_w'].shape[0]

    # Samples per grid step (amortizes the ~600-cycle step overhead); default
    # keeps the grid length >= 2 so both v7x TensorCores get work.  Raise tb
    # (e.g. 16-32 on v7x, up to 64 on v5e/v6e) for large batches.
    if tb is None:
        tb = max(1, min(8, B // 2))
    Bp = -(-B // tb) * tb
    R = tb * _QP                               # activation rows per grid step

    # ---- input: zero-pad spatially, channels-last, flatten padded 13x13 grid
    # onto the sublane axis, pad each sample block to 176 rows, stack the batch.
    xpad = jnp.pad(X.astype(jnp.float32), ((0, Bp - B), (0, 0), (1, 1), (1, 1)))
    xp = xpad.transpose(0, 2, 3, 1).reshape(Bp, _NQ, band)
    xp = jnp.pad(xp, ((0, 0), (0, _QP - _NQ), (0, 0))).reshape(Bp * _QP, band)

    line = (jnp.arange(_HP) >= 1) & (jnp.arange(_HP) <= _H)
    vm = (line[:, None] & line[None, :]).reshape(_NQ).astype(jnp.float32)
    vmq = jnp.pad(vm, (0, _QP - _NQ))                                   # (176,)
    vmask_rows = jnp.tile(vmq, tb).reshape(R, 1)                        # (R, 1)
    pool_sel = jnp.kron(jnp.eye(tb, dtype=jnp.float32),
                        (vmq / _POOL_DIV)[None, :])                     # (tb, R)

    # ---- weights ----
    def w1x1(name):   # torch Conv2d weight (O, I, 1, 1) -> (I, O)
        w = params[name + '_w']
        return jnp.transpose(w[:, :, 0, 0], (1, 0)).astype(jnp.float32)

    def w3pack(name):  # (O, I, 3, 3) -> (I, 9*O), lane block k*O:(k+1)*O, k = ky*3+kx
        w = params[name + '_w']
        O, I = w.shape[0], w.shape[1]
        return jnp.transpose(w, (1, 2, 3, 0)).reshape(I, 9 * O).astype(jnp.float32)

    def bn(name, extra_bias=None):
        g, b, m, v = (params[name + '_g'], params[name + '_b'],
                      params[name + '_m'], params[name + '_v'])
        s = g / jnp.sqrt(v + _BN_EPS)
        t = b - m * s
        if extra_bias is not None:         # fold the preceding conv bias in
            t = t + extra_bias * s
        return s, t

    b11, b12, b13, b14 = (params['conv11_b'], params['conv12_b'],
                          params['conv13_b'], params['conv14_b'])
    s11, t11 = bn('bn11', b11)
    s12, t12 = bn('bn12', jnp.concatenate([b11, b12]))
    s13, t13 = bn('bn13', jnp.concatenate([b11, b12, b13]))
    s14, t14 = bn('bn14', jnp.concatenate([b11, b12, b13, b14]))
    s21, t21 = bn('bn21')
    s22, t22 = bn('bn22')
    s23, t23 = bn('bn23')

    w1slab, w1off = _stack_rows(
        [('c11', w1x1('conv11')), ('c12', w1x1('conv12')), ('c13', w1x1('conv13')),
         ('c14', w1x1('conv14')), ('c15', w1x1('conv15')), ('c21', w1x1('conv21'))],
        lanes=64)
    w3slab, w3off = _stack_rows(
        [('c22', w3pack('conv22')), ('c23', w3pack('conv23')), ('c24', w3pack('conv24'))],
        lanes=_W3L)
    vecslab, vidx = _build_vecslab(
        [('s11', s11), ('t11', t11), ('s12', s12), ('t12', t12),
         ('s13', s13), ('t13', t13), ('s14', s14), ('t14', t14),
         ('b15', params['conv15_b']),
         ('s21', s21), ('t21', t21), ('b21', params['conv21_b']),
         ('s22', s22), ('t22', t22), ('b22', params['conv22_b']),
         ('s23', s23), ('t23', t23), ('b23', params['conv23_b']),
         ('b24', params['conv24_b'])])

    # Fused head-1 weight: rows = [p1 ; p2], columns = [ W_spec | W_spat | W_fc1 ]
    whead = jnp.zeros((120, 2 * classes + 60), jnp.float32)
    whead = whead.at[0:60, 0:classes].set(w1x1('fc_spec'))
    whead = whead.at[60:120, classes:2 * classes].set(w1x1('fc_spat'))
    whead = whead.at[:, 2 * classes:].set(w1x1('fc1'))
    bhead = jnp.concatenate([params['fc_spec_b'], params['fc_spat_b'],
                             params['fc1_b']]).reshape(1, -1).astype(jnp.float32)
    wf2 = w1x1('fc2')
    bf2 = params['fc2_b'].reshape(1, -1).astype(jnp.float32)

    # -------------------------------- kernel --------------------------------- #
    def kernel(xp_ref, vm_ref, sel_ref, w1_ref, w3_ref, vec_ref,
               wh_ref, bh_ref, wf2_ref, bf2_ref, out_ref,
               spec_sc, spat_sc, sh_sc):
        f32 = jnp.float32

        def dot(a, b):                       # default (single-pass) MXU precision
            return jnp.dot(a, b, preferred_element_type=f32)

        def vec(name, w):
            r = vidx[name]
            return vec_ref[r:r + 1, 0:w]

        def wblk(ref, off, k, n):
            return ref[off:off + k, 0:n]

        def bnrelu(a, sname, tname, w):      # eval-mode BN folded to scale/shift + ReLU
            return jnp.maximum(a * vec(sname, w) + vec(tname, w), 0.0)

        # Border rows of the shift scratch are never written (every conv3x3
        # fully rewrites rows [_SHIFT, _SHIFT+R)); keep them zero every step so
        # out-of-sample taps always read finite zeros, independent of how the
        # parallel grid axis is sharded across TensorCores.
        sh_sc[0:_SHIFT, :] = jnp.zeros((_SHIFT, _W3L), f32)
        sh_sc[_SHIFT + R:_SHIFT + R + _SHIFT, :] = jnp.zeros((_SHIFT, _W3L), f32)

        x = xp_ref[...]                      # (R, band): zero rows at spatial-pad positions
        vmask = vm_ref[...]                  # (R, 1)   : 1.0 at the 121 valid positions/sample

        # ---------------- spectral branch: dense chain of 1x1 convs ----------
        # (conv11..conv14 biases are folded into the BN shifts host-side)
        spec_sc[:, 0:24] = dot(x, wblk(w1_ref, w1off['c11'], band, 24))
        a = bnrelu(spec_sc[:, 0:24], 's11', 't11', 24)
        spec_sc[:, 24:48] = dot(a, wblk(w1_ref, w1off['c12'], 24, 24))
        a = bnrelu(spec_sc[:, 0:48], 's12', 't12', 48)
        spec_sc[:, 48:72] = dot(a, wblk(w1_ref, w1off['c13'], 48, 24))
        a = bnrelu(spec_sc[:, 0:72], 's13', 't13', 72)
        spec_sc[:, 72:96] = dot(a, wblk(w1_ref, w1off['c14'], 72, 24))
        a = bnrelu(spec_sc[:, 0:96], 's14', 't14', 96)
        x1 = dot(a, wblk(w1_ref, w1off['c15'], 96, 60)) + vec('b15', 60)   # (R, 60)

        # -------- spatial branch: 1x1 conv + three fused-tap 3x3 convs --------
        spat_sc[:, 0:24] = dot(x, wblk(w1_ref, w1off['c21'], band, 24)) + vec('b21', 24)

        def conv3x3(act, wname, cin, bname):
            # One wide matmul over all 9 taps, then 9 row-shifted 12-lane adds.
            # act rows at spatial-pad positions are zero (vmask applied by the
            # caller) -> zero-padded conv semantics; contaminated pad-row
            # outputs are masked again before any later use.
            y = dot(act, wblk(w3_ref, w3off[wname], cin, _W3L))            # (R, 108)
            sh_sc[_SHIFT:_SHIFT + R, :] = y
            acc = jnp.zeros((R, _C3), f32) + vec(bname, _C3)
            for ky in range(3):
                for kx in range(3):
                    k = ky * 3 + kx
                    sh = (ky - 1) * _HP + (kx - 1)
                    acc = acc + sh_sc[_SHIFT + sh:_SHIFT + sh + R,
                                      k * _C3:(k + 1) * _C3]
            return acc

        a = bnrelu(spat_sc[:, 0:24], 's21', 't21', 24) * vmask
        spat_sc[:, 24:36] = conv3x3(a, 'c22', 24, 'b22')
        a = bnrelu(spat_sc[:, 0:36], 's22', 't22', 36) * vmask
        spat_sc[:, 36:48] = conv3x3(a, 'c23', 36, 'b23')
        a = bnrelu(spat_sc[:, 0:48], 's23', 't23', 48) * vmask
        spat_sc[:, 48:60] = conv3x3(a, 'c24', 48, 'b24')

        # -------- per-sample average pool over the 121 valid positions --------
        sel = sel_ref[...]                         # (tb, R): vmask / 121 per sample block
        p1 = dot(sel, x1)                          # (tb, 60)
        p2 = dot(sel, spat_sc[:, 0:60])            # (tb, 60)

        # ------------------- fused classifier heads ---------------------------
        h = dot(jnp.concatenate([p1, p2], axis=1), wh_ref[...]) + bh_ref[...]
        o_spec = h[:, 0:classes]
        o_spat = h[:, classes:2 * classes]
        hid = jnp.maximum(h[:, 2 * classes:], 0.0)
        o_main = dot(hid, wf2_ref[...]) + bf2_ref[...]
        out_ref[...] = jnp.concatenate([o_main, o_spec, o_spat], axis=1)[:, None, :]

    # ------------------------------ pallas_call ------------------------------- #
    def cspec(arr):
        nd = arr.ndim
        return pl.BlockSpec(arr.shape, lambda i, _nd=nd: (0,) * _nd)

    consts = [vmask_rows, pool_sel, w1slab, w3slab, vecslab, whead, bhead, wf2, bf2]
    in_specs = [pl.BlockSpec((R, band), lambda i: (i, 0))] + [cspec(c) for c in consts]

    out = pl.pallas_call(
        kernel,
        grid=(Bp // tb,),
        in_specs=in_specs,
        out_specs=pl.BlockSpec((tb, 1, 3 * classes), lambda i: (i, 0, 0)),
        out_shape=jax.ShapeDtypeStruct((Bp, 1, 3 * classes), jnp.float32),
        scratch_shapes=[pltpu.VMEM((R, 96), jnp.float32),               # spectral concat
                        pltpu.VMEM((R, 60), jnp.float32),               # spatial concat
                        pltpu.VMEM((R + 2 * _SHIFT, _W3L), jnp.float32)],  # 3x3 shift buffer
        compiler_params=pltpu.CompilerParams(
            dimension_semantics=("parallel",),
            vmem_limit_bytes=(64 << 20) if tb >= 4 else None),
    )(xp, *consts)

    out = out[:B, 0, :]
    return (out[:, 0:classes],              # output
            out[:, classes:2 * classes],    # output_spec
            out[:, 2 * classes:])           # output_spat


# ----------------------------- pure-JAX reference ---------------------------- #

def reference_forward(params, X):
    P = _REF_PREC

    def conv1x1(x, w, b):
        return jnp.einsum('bchw,oc->bohw', x, w[:, :, 0, 0],
                          precision=P) + b[None, :, None, None]

    def conv3x3(x, w, b):
        y = jax.lax.conv_general_dilated(
            x, w, window_strides=(1, 1), padding=((1, 1), (1, 1)),
            dimension_numbers=('NCHW', 'OIHW', 'NCHW'), precision=P)
        return y + b[None, :, None, None]

    def bnrelu(x, name):
        g, bta, m, v = (params[name + '_g'], params[name + '_b'],
                        params[name + '_m'], params[name + '_v'])
        scale = (g / jnp.sqrt(v + _BN_EPS))[None, :, None, None]
        y = (x - m[None, :, None, None]) * scale + bta[None, :, None, None]
        return jnp.maximum(y, 0.0)

    x11 = conv1x1(X, params['conv11_w'], params['conv11_b'])
    x12 = conv1x1(bnrelu(x11, 'bn11'), params['conv12_w'], params['conv12_b'])
    x13 = conv1x1(bnrelu(jnp.concatenate([x11, x12], 1), 'bn12'),
                  params['conv13_w'], params['conv13_b'])
    x14 = conv1x1(bnrelu(jnp.concatenate([x11, x12, x13], 1), 'bn13'),
                  params['conv14_w'], params['conv14_b'])
    x1 = conv1x1(bnrelu(jnp.concatenate([x11, x12, x13, x14], 1), 'bn14'),
                 params['conv15_w'], params['conv15_b'])

    x21 = conv1x1(X, params['conv21_w'], params['conv21_b'])
    x22 = conv3x3(bnrelu(x21, 'bn21'), params['conv22_w'], params['conv22_b'])
    x23 = conv3x3(bnrelu(jnp.concatenate([x21, x22], 1), 'bn22'),
                  params['conv23_w'], params['conv23_b'])
    x24 = conv3x3(bnrelu(jnp.concatenate([x21, x22, x23], 1), 'bn23'),
                  params['conv24_w'], params['conv24_b'])
    x2 = jnp.concatenate([x21, x22, x23, x24], 1)

    p1 = jnp.mean(x1, axis=(2, 3))   # AvgPool2d((11,11)) on an 11x11 map
    p2 = jnp.mean(x2, axis=(2, 3))

    def head(p, w, b):
        return jnp.einsum('bc,oc->bo', p, w[:, :, 0, 0], precision=P) + b[None, :]

    o_spec = head(p1, params['fc_spec_w'], params['fc_spec_b'])
    o_spat = head(p2, params['fc_spat_w'], params['fc_spat_b'])
    hid = jnp.maximum(head(jnp.concatenate([p1, p2], 1),
                           params['fc1_w'], params['fc1_b']), 0.0)
    o_main = head(hid, params['fc2_w'], params['fc2_b'])
    return o_main, o_spec, o_spat


# ------------------------------------ main ----------------------------------- #

if __name__ == "__main__":
    B, band, classes = 2, 16, 9
    H = W = 11

    key = jax.random.PRNGKey(0)
    kp, kx = jax.random.split(key)

    conv_specs = [
        ('conv11', (24, band, 1, 1)), ('conv12', (24, 24, 1, 1)),
        ('conv13', (24, 48, 1, 1)), ('conv14', (24, 72, 1, 1)),
        ('conv15', (60, 96, 1, 1)),
        ('conv21', (24, band, 1, 1)), ('conv22', (12, 24, 3, 3)),
        ('conv23', (12, 36, 3, 3)), ('conv24', (12, 48, 3, 3)),
        ('fc_spec', (classes, 60, 1, 1)), ('fc_spat', (classes, 60, 1, 1)),
        ('fc1', (60, 120, 1, 1)), ('fc2', (classes, 60, 1, 1)),
    ]
    bn_specs = [('bn11', 24), ('bn12', 48), ('bn13', 72), ('bn14', 96),
                ('bn21', 24), ('bn22', 36), ('bn23', 48)]

    keys = jax.random.split(kp, 2 * len(conv_specs) + 4 * len(bn_specs))
    params = {}
    ki = 0
    for name, shape in conv_specs:
        fan_in = shape[1] * shape[2] * shape[3]
        params[name + '_w'] = (jax.random.normal(keys[ki], shape, jnp.float32)
                               / jnp.sqrt(float(fan_in))); ki += 1
        params[name + '_b'] = 0.1 * jax.random.normal(keys[ki], (shape[0],), jnp.float32); ki += 1
    for name, c in bn_specs:
        params[name + '_g'] = 1.0 + 0.1 * jax.random.normal(keys[ki], (c,), jnp.float32); ki += 1
        params[name + '_b'] = 0.1 * jax.random.normal(keys[ki], (c,), jnp.float32); ki += 1
        params[name + '_m'] = 0.1 * jax.random.normal(keys[ki], (c,), jnp.float32); ki += 1
        params[name + '_v'] = 1.0 + 0.2 * jnp.abs(jax.random.normal(keys[ki], (c,), jnp.float32)); ki += 1

    X = jax.random.normal(kx, (B, band, H, W), jnp.float32)

    fwd = jax.jit(dbda_forward)
    ref_fwd = jax.jit(reference_forward)

    outs = jax.block_until_ready(fwd(params, X))
    refs = jax.block_until_ready(ref_fwd(params, X))

    for name, o, r in zip(("output", "output_spec", "output_spat"), outs, refs):
        assert o.shape == (B, classes), (name, o.shape)
        if not bool(jnp.allclose(o, r, rtol=2e-2, atol=2e-2)):
            err = float(jnp.max(jnp.abs(o - r)))
            raise AssertionError(f"{name}: Pallas vs reference mismatch (max abs err = {err})")

    print("KERNEL_OK")
</pallas_src>

<mosaic_0001>
module attributes {stable_mosaic.version = 11 : i64} {
  func.func @kernel(%arg0: i32, %arg1: memref<176x16xf32, #tpu.memory_space<vmem>>, %arg2: memref<176x1xf32, #tpu.memory_space<vmem>>, %arg3: memref<1x176xf32, #tpu.memory_space<vmem>>, %arg4: memref<272x64xf32, #tpu.memory_space<vmem>>, %arg5: memref<112x108xf32, #tpu.memory_space<vmem>>, %arg6: memref<19x96xf32, #tpu.memory_space<vmem>>, %arg7: memref<120x78xf32, #tpu.memory_space<vmem>>, %arg8: memref<1x78xf32, #tpu.memory_space<vmem>>, %arg9: memref<60x9xf32, #tpu.memory_space<vmem>>, %arg10: memref<1x9xf32, #tpu.memory_space<vmem>>, %arg11: memref<1x1x27xf32, #tpu.memory_space<vmem>>, %arg12: memref<176x96xf32, #tpu.memory_space<vmem>>, %arg13: memref<176x60xf32, #tpu.memory_space<vmem>>, %arg14: memref<208x108xf32, #tpu.memory_space<vmem>>) attributes {dimension_semantics = [#tpu.dimension_semantics<parallel>], iteration_bounds = array<i64: 2>, scalar_prefetch = 0 : i64, scratch_operands = 3 : i64, tpu.core_type = #tpu.core_type<tc>, window_params = [{transform_indices = @transform_0, window_bounds = array<i64: 176, 16>}, {pipeline_mode = #tpu.pipeline_mode<synchronous>, transform_indices = @transform_1, window_bounds = array<i64: 176, 1>}, {pipeline_mode = #tpu.pipeline_mode<synchronous>, transform_indices = @transform_2, window_bounds = array<i64: 1, 176>}, {pipeline_mode = #tpu.pipeline_mode<synchronous>, transform_indices = @transform_3, window_bounds = array<i64: 272, 64>}, {pipeline_mode = #tpu.pipeline_mode<synchronous>, transform_indices = @transform_4, window_bounds = array<i64: 112, 108>}, {pipeline_mode = #tpu.pipeline_mode<synchronous>, transform_indices = @transform_5, window_bounds = array<i64: 19, 96>}, {pipeline_mode = #tpu.pipeline_mode<synchronous>, transform_indices = @transform_6, window_bounds = array<i64: 120, 78>}, {pipeline_mode = #tpu.pipeline_mode<synchronous>, transform_indices = @transform_7, window_bounds = array<i64: 1, 78>}, {pipeline_mode = #tpu.pipeline_mode<synchronous>, transform_indices = @transform_8, window_bounds = array<i64: 60, 9>}, {pipeline_mode = #tpu.pipeline_mode<synchronous>, transform_indices = @transform_9, window_bounds = array<i64: 1, 9>}, {transform_indices = @transform_10, window_bounds = array<i64: 1, 1, 27>}]} {
    %cst = arith.constant 0.000000e+00 : f32
    %0 = vector.broadcast %cst : f32 to vector<16x108xf32>
    %c0 = arith.constant 0 : index
    %c0_0 = arith.constant 0 : index
    %1 = vector.load %arg14[%c0, %c0_0] : memref<208x108xf32, #tpu.memory_space<vmem>>, vector<16x108xf32>
    tpu.vector_store %arg14[%c0, %c0_0], %0 {strides = array<i32>} : memref<208x108xf32, #tpu.memory_space<vmem>>, vector<16x108xf32>,
    %cst_1 = arith.constant 0.000000e+00 : f32
    %2 = vector.broadcast %cst_1 : f32 to vector<16x108xf32>
    %c192 = arith.constant 192 : index
    %c0_2 = arith.constant 0 : index
    %3 = vector.load %arg14[%c192, %c0_2] : memref<208x108xf32, #tpu.memory_space<vmem>>, vector<16x108xf32>
    tpu.vector_store %arg14[%c192, %c0_2], %2 {strides = array<i32>} : memref<208x108xf32, #tpu.memory_space<vmem>>, vector<16x108xf32>,
    %c0_3 = arith.constant 0 : index
    %c0_4 = arith.constant 0 : index
    %4 = vector.load %arg1[%c0_3, %c0_4] : memref<176x16xf32, #tpu.memory_space<vmem>>, vector<176x16xf32>
    %c0_5 = arith.constant 0 : index
    %c0_6 = arith.constant 0 : index
    %5 = vector.load %arg2[%c0_5, %c0_6] : memref<176x1xf32, #tpu.memory_space<vmem>>, vector<176x1xf32>
    %c0_7 = arith.constant 0 : index
    %c0_8 = arith.constant 0 : index
    %6 = vector.load %arg4[%c0_7, %c0_8] : memref<272x64xf32, #tpu.memory_space<vmem>>, vector<16x24xf32>
    %cst_9 = arith.constant dense<0.000000e+00> : vector<176x24xf32>
    %7 = tpu.matmul %4, %6, %cst_9 {dimension_numbers = #tpu.dot_dimension_numbers<[1], [0], [0], [1], [0, 0, 1, 1], [], []>} : vector<176x16xf32>, vector<16x24xf32>, vector<176x24xf32> -> vector<176x24xf32>
    %c0_10 = arith.constant 0 : index
    %c0_11 = arith.constant 0 : index
    %8 = vector.load %arg12[%c0_10, %c0_11] : memref<176x96xf32, #tpu.memory_space<vmem>>, vector<176x24xf32>
    tpu.vector_store %arg12[%c0_10, %c0_11], %7 {strides = array<i32>} : memref<176x96xf32, #tpu.memory_space<vmem>>, vector<176x24xf32>,
    %c0_12 = arith.constant 0 : index
    %c0_13 = arith.constant 0 : index
    %9 = vector.load %arg12[%c0_12, %c0_13] : memref<176x96xf32, #tpu.memory_space<vmem>>, vector<176x24xf32>
    %c0_14 = arith.constant 0 : index
    %c0_15 = arith.constant 0 : index
    %10 = vector.load %arg6[%c0_14, %c0_15] : memref<19x96xf32, #tpu.memory_space<vmem>>, vector<1x24xf32>
    %11 = vector.broadcast %10 : vector<1x24xf32> to vector<176x24xf32>
    %12 = arith.mulf %9, %11 : vector<176x24xf32>
    %c1 = arith.constant 1 : index
    %c0_16 = arith.constant 0 : index
    %13 = vector.load %arg6[%c1, %c0_16] : memref<19x96xf32, #tpu.memory_space<vmem>>, vector<1x24xf32>
    %14 = vector.broadcast %13 : vector<1x24xf32> to vector<176x24xf32>
    %15 = arith.addf %12, %14 : vector<176x24xf32>
    %cst_17 = arith.constant 0.000000e+00 : f32
    %16 = vector.broadcast %cst_17 : f32 to vector<176x24xf32>
    %17 = arith.maximumf %15, %16 : vector<176x24xf32>
    %c16 = arith.constant 16 : index
    %c0_18 = arith.constant 0 : index
    %18 = vector.load %arg4[%c16, %c0_18] : memref<272x64xf32, #tpu.memory_space<vmem>>, vector<24x24xf32>
    %cst_19 = arith.constant dense<0.000000e+00> : vector<176x24xf32>
    %19 = tpu.matmul %17, %18, %cst_19 {dimension_numbers = #tpu.dot_dimension_numbers<[1], [0], [0], [1], [0, 0, 1, 1], [], []>} : vector<176x24xf32>, vector<24x24xf32>, vector<176x24xf32> -> vector<176x24xf32>
    %c0_20 = arith.constant 0 : index
    %c24 = arith.constant 24 : index
    %20 = vector.load %arg12[%c0_20, %c24] : memref<176x96xf32, #tpu.memory_space<vmem>>, vector<176x24xf32>
    tpu.vector_store %arg12[%c0_20, %c24], %19 {strides = array<i32>} : memref<176x96xf32, #tpu.memory_space<vmem>>, vector<176x24xf32>,
    %c0_21 = arith.constant 0 : index
    %c0_22 = arith.constant 0 : index
    %21 = vector.load %arg12[%c0_21, %c0_22] : memref<176x96xf32, #tpu.memory_space<vmem>>, vector<176x48xf32>
    %c2 = arith.constant 2 : index
    %c0_23 = arith.constant 0 : index
    %22 = vector.load %arg6[%c2, %c0_23] : memref<19x96xf32, #tpu.memory_space<vmem>>, vector<1x48xf32>
    %23 = vector.broadcast %22 : vector<1x48xf32> to vector<176x48xf32>
    %24 = arith.mulf %21, %23 : vector<176x48xf32>
    %c3 = arith.constant 3 : index
    %c0_24 = arith.constant 0 : index
    %25 = vector.load %arg6[%c3, %c0_24] : memref<19x96xf32, #tpu.memory_space<vmem>>, vector<1x48xf32>
    %26 = vector.broadcast %25 : vector<1x48xf32> to vector<176x48xf32>
    %27 = arith.addf %24, %26 : vector<176x48xf32>
    %cst_25 = arith.constant 0.000000e+00 : f32
    %28 = vector.broadcast %cst_25 : f32 to vector<176x48xf32>
    %29 = arith.maximumf %27, %28 : vector<176x48xf32>
    %c40 = arith.constant 40 : index
    %c0_26 = arith.constant 0 : index
    %30 = vector.load %arg4[%c40, %c0_26] : memref<272x64xf32, #tpu.memory_space<vmem>>, vector<48x24xf32>
    %cst_27 = arith.constant dense<0.000000e+00> : vector<176x24xf32>
    %31 = tpu.matmul %29, %30, %cst_27 {dimension_numbers = #tpu.dot_dimension_numbers<[1], [0], [0], [1], [0, 0, 1, 1], [], []>} : vector<176x48xf32>, vector<48x24xf32>, vector<176x24xf32> -> vector<176x24xf32>
    %c0_28 = arith.constant 0 : index
    %c48 = arith.constant 48 : index
    %32 = vector.load %arg12[%c0_28, %c48] : memref<176x96xf32, #tpu.memory_space<vmem>>, vector<176x24xf32>
    tpu.vector_store %arg12[%c0_28, %c48], %31 {strides = array<i32>} : memref<176x96xf32, #tpu.memory_space<vmem>>, vector<176x24xf32>,
    %c0_29 = arith.constant 0 : index
    %c0_30 = arith.constant 0 : index
    %33 = vector.load %arg12[%c0_29, %c0_30] : memref<176x96xf32, #tpu.memory_space<vmem>>, vector<176x72xf32>
    %c4 = arith.constant 4 : index
    %c0_31 = arith.constant 0 : index
    %34 = vector.load %arg6[%c4, %c0_31] : memref<19x96xf32, #tpu.memory_space<vmem>>, vector<1x72xf32>
    %35 = vector.broadcast %34 : vector<1x72xf32> to vector<176x72xf32>
    %36 = arith.mulf %33, %35 : vector<176x72xf32>
    %c5 = arith.constant 5 : index
    %c0_32 = arith.constant 0 : index
    %37 = vector.load %arg6[%c5, %c0_32] : memref<19x96xf32, #tpu.memory_space<vmem>>, vector<1x72xf32>
    %38 = vector.broadcast %37 : vector<1x72xf32> to vector<176x72xf32>
    %39 = arith.addf %36, %38 : vector<176x72xf32>
    %cst_33 = arith.constant 0.000000e+00 : f32
    %40 = vector.broadcast %cst_33 : f32 to vector<176x72xf32>
    %41 = arith.maximumf %39, %40 : vector<176x72xf32>
    %c88 = arith.constant 88 : index
    %c0_34 = arith.constant 0 : index
    %42 = vector.load %arg4[%c88, %c0_34] : memref<272x64xf32, #tpu.memory_space<vmem>>, vector<72x24xf32>
    %cst_35 = arith.constant dense<0.000000e+00> : vector<176x24xf32>
    %43 = tpu.matmul %41, %42, %cst_35 {dimension_numbers = #tpu.dot_dimension_numbers<[1], [0], [0], [1], [0, 0, 1, 1], [], []>} : vector<176x72xf32>, vector<72x24xf32>, vector<176x24xf32> -> vector<176x24xf32>
    %c0_36 = arith.constant 0 : index
    %c72 = arith.constant 72 : index
    %44 = vector.load %arg12[%c0_36, %c72] : memref<176x96xf32, #tpu.memory_space<vmem>>, vector<176x24xf32>
    tpu.vector_store %arg12[%c0_36, %c72], %43 {strides = array<i32>} : memref<176x96xf32, #tpu.memory_space<vmem>>, vector<176x24xf32>,
    %c0_37 = arith.constant 0 : index
    %c0_38 = arith.constant 0 : index
    %45 = vector.load %arg12[%c0_37, %c0_38] : memref<176x96xf32, #tpu.memory_space<vmem>>, vector<176x96xf32>
    %c6 = arith.constant 6 : index
    %c0_39 = arith.constant 0 : index
    %46 = vector.load %arg6[%c6, %c0_39] : memref<19x96xf32, #tpu.memory_space<vmem>>, vector<1x96xf32>
    %47 = vector.broadcast %46 : vector<1x96xf32> to vector<176x96xf32>
    %48 = arith.mulf %45, %47 : vector<176x96xf32>
    %c7 = arith.constant 7 : index
    %c0_40 = arith.constant 0 : index
    %49 = vector.load %arg6[%c7, %c0_40] : memref<19x96xf32, #tpu.memory_space<vmem>>, vector<1x96xf32>
    %50 = vector.broadcast %49 : vector<1x96xf32> to vector<176x96xf32>
    %51 = arith.addf %48, %50 : vector<176x96xf32>
    %cst_41 = arith.constant 0.000000e+00 : f32
    %52 = vector.broadcast %cst_41 : f32 to vector<176x96xf32>
    %53 = arith.maximumf %51, %52 : vector<176x96xf32>
    %c160 = arith.constant 160 : index
    %c0_42 = arith.constant 0 : index
    %54 = vector.load %arg4[%c160, %c0_42] : memref<272x64xf32, #tpu.memory_space<vmem>>, vector<96x60xf32>
    %cst_43 = arith.constant dense<0.000000e+00> : vector<176x60xf32>
    %55 = tpu.matmul %53, %54, %cst_43 {dimension_numbers = #tpu.dot_dimension_numbers<[1], [0], [0], [1], [0, 0, 1, 1], [], []>} : vector<176x96xf32>, vector<96x60xf32>, vector<176x60xf32> -> vector<176x60xf32>
    %c8 = arith.constant 8 : index
    %c0_44 = arith.constant 0 : index
    %56 = vector.load %arg6[%c8, %c0_44] : memref<19x96xf32, #tpu.memory_space<vmem>>, vector<1x60xf32>
    %57 = vector.broadcast %56 : vector<1x60xf32> to vector<176x60xf32>
    %58 = arith.addf %55, %57 : vector<176x60xf32>
    %c256 = arith.constant 256 : index
    %c0_45 = arith.constant 0 : index
    %59 = vector.load %arg4[%c256, %c0_45] : memref<272x64xf32, #tpu.memory_space<vmem>>, vector<16x24xf32>
    %cst_46 = arith.constant dense<0.000000e+00> : vector<176x24xf32>
    %60 = tpu.matmul %4, %59, %cst_46 {dimension_numbers = #tpu.dot_dimension_numbers<[1], [0], [0], [1], [0, 0, 1, 1], [], []>} : vector<176x16xf32>, vector<16x24xf32>, vector<176x24xf32> -> vector<176x24xf32>
    %c11 = arith.constant 11 : index
    %c0_47 = arith.constant 0 : index
    %61 = vector.load %arg6[%c11, %c0_47] : memref<19x96xf32, #tpu.memory_space<vmem>>, vector<1x24xf32>
    %62 = vector.broadcast %61 : vector<1x24xf32> to vector<176x24xf32>
    %63 = arith.addf %60, %62 : vector<176x24xf32>
    %c0_48 = arith.constant 0 : index
    %c0_49 = arith.constant 0 : index
    %64 = vector.load %arg13[%c0_48, %c0_49] : memref<176x60xf32, #tpu.memory_space<vmem>>, vector<176x24xf32>
    tpu.vector_store %arg13[%c0_48, %c0_49], %63 {strides = array<i32>} : memref<176x60xf32, #tpu.memory_space<vmem>>, vector<176x24xf32>,
    %c0_50 = arith.constant 0 : index
    %c0_51 = arith.constant 0 : index
    %65 = vector.load %arg13[%c0_50, %c0_51] : memref<176x60xf32, #tpu.memory_space<vmem>>, vector<176x24xf32>
    %c9 = arith.constant 9 : index
    %c0_52 = arith.constant 0 : index
    %66 = vector.load %arg6[%c9, %c0_52] : memref<19x96xf32, #tpu.memory_space<vmem>>, vector<1x24xf32>
    %67 = vector.broadcast %66 : vector<1x24xf32> to vector<176x24xf32>
    %68 = arith.mulf %65, %67 : vector<176x24xf32>
    %c10 = arith.constant 10 : index
    %c0_53 = arith.constant 0 : index
    %69 = vector.load %arg6[%c10, %c0_53] : memref<19x96xf32, #tpu.memory_space<vmem>>, vector<1x24xf32>
    %70 = vector.broadcast %69 : vector<1x24xf32> to vector<176x24xf32>
    %71 = arith.addf %68, %70 : vector<176x24xf32>
    %cst_54 = arith.constant 0.000000e+00 : f32
    %72 = vector.broadcast %cst_54 : f32 to vector<176x24xf32>
    %73 = arith.maximumf %71, %72 : vector<176x24xf32>
    %74 = vector.broadcast %5 : vector<176x1xf32> to vector<176x24xf32>
    %75 = arith.mulf %73, %74 : vector<176x24xf32>
    %c0_55 = arith.constant 0 : index
    %c0_56 = arith.constant 0 : index
    %76 = vector.load %arg5[%c0_55, %c0_56] : memref<112x108xf32, #tpu.memory_space<vmem>>, vector<24x108xf32>
    %cst_57 = arith.constant dense<0.000000e+00> : vector<176x108xf32>
    %77 = tpu.matmul %75, %76, %cst_57 {dimension_numbers = #tpu.dot_dimension_numbers<[1], [0], [0], [1], [0, 0, 1, 1], [], []>} : vector<176x24xf32>, vector<24x108xf32>, vector<176x108xf32> -> vector<176x108xf32>
    %c16_58 = arith.constant 16 : index
    %c0_59 = arith.constant 0 : index
    %78 = vector.load %arg14[%c16_58, %c0_59] : memref<208x108xf32, #tpu.memory_space<vmem>>, vector<176x108xf32>
    tpu.vector_store %arg14[%c16_58, %c0_59], %77 {strides = array<i32>} : memref<208x108xf32, #tpu.memory_space<vmem>>, vector<176x108xf32>,
    %cst_60 = arith.constant 0.000000e+00 : f32
    %79 = vector.broadcast %cst_60 : f32 to vector<176x12xf32>
    %c14 = arith.constant 14 : index
    %c0_61 = arith.constant 0 : index
    %80 = vector.load %arg6[%c14, %c0_61] : memref<19x96xf32, #tpu.memory_space<vmem>>, vector<1x12xf32>
    %81 = vector.broadcast %80 : vector<1x12xf32> to vector<176x12xf32>
    %82 = arith.addf %79, %81 : vector<176x12xf32>
    %c2_62 = arith.constant 2 : index
    %c0_63 = arith.constant 0 : index
    %83 = vector.load %arg14[%c2_62, %c0_63] : memref<208x108xf32, #tpu.memory_space<vmem>>, vector<176x12xf32>
    %84 = arith.addf %82, %83 : vector<176x12xf32>
    %c3_64 = arith.constant 3 : index
    %c12 = arith.constant 12 : index
    %85 = vector.load %arg14[%c3_64, %c12] : memref<208x108xf32, #tpu.memory_space<vmem>>, vector<176x12xf32>
    %86 = arith.addf %84, %85 : vector<176x12xf32>
    %c4_65 = arith.constant 4 : index
    %c24_66 = arith.constant 24 : index
    %87 = vector.load %arg14[%c4_65, %c24_66] : memref<208x108xf32, #tpu.memory_space<vmem>>, vector<176x12xf32>
    %88 = arith.addf %86, %87 : vector<176x12xf32>
    %c15 = arith.constant 15 : index
    %c36 = arith.constant 36 : index
    %89 = vector.load %arg14[%c15, %c36] : memref<208x108xf32, #tpu.memory_space<vmem>>, vector<176x12xf32>
    %90 = arith.addf %88, %89 : vector<176x12xf32>
    %c16_67 = arith.constant 16 : index
    %c48_68 = arith.constant 48 : index
    %91 = vector.load %arg14[%c16_67, %c48_68] : memref<208x108xf32, #tpu.memory_space<vmem>>, vector<176x12xf32>
    %92 = arith.addf %90, %91 : vector<176x12xf32>
    %c17 = arith.constant 17 : index
    %c60 = arith.constant 60 : index
    %93 = vector.load %arg14[%c17, %c60] : memref<208x108xf32, #tpu.memory_space<vmem>>, vector<176x12xf32>
    %94 = arith.addf %92, %93 : vector<176x12xf32>
    %c28 = arith.constant 28 : index
    %c72_69 = arith.constant 72 : index
    %95 = vector.load %arg14[%c28, %c72_69] : memref<208x108xf32, #tpu.memory_space<vmem>>, vector<176x12xf32>
    %96 = arith.addf %94, %95 : vector<176x12xf32>
    %c29 = arith.constant 29 : index
    %c84 = arith.constant 84 : index
    %97 = vector.load %arg14[%c29, %c84] : memref<208x108xf32, #tpu.memory_space<vmem>>, vector<176x12xf32>
    %98 = arith.addf %96, %97 : vector<176x12xf32>
    %c30 = arith.constant 30 : index
    %c96 = arith.constant 96 : index
    %99 = vector.load %arg14[%c30, %c96] : memref<208x108xf32, #tpu.memory_space<vmem>>, vector<176x12xf32>
    %100 = arith.addf %98, %99 : vector<176x12xf32>
    %c0_70 = arith.constant 0 : index
    %c24_71 = arith.constant 24 : index
    %101 = vector.load %arg13[%c0_70, %c24_71] : memref<176x60xf32, #tpu.memory_space<vmem>>, vector<176x12xf32>
    tpu.vector_store %arg13[%c0_70, %c24_71], %100 {strides = array<i32>} : memref<176x60xf32, #tpu.memory_space<vmem>>, vector<176x12xf32>,
    %c0_72 = arith.constant 0 : index
    %c0_73 = arith.constant 0 : index
    %102 = vector.load %arg13[%c0_72, %c0_73] : memref<176x60xf32, #tpu.memory_space<vmem>>, vector<176x36xf32>
    %c12_74 = arith.constant 12 : index
    %c0_75 = arith.constant 0 : index
    %103 = vector.load %arg6[%c12_74, %c0_75] : memref<19x96xf32, #tpu.memory_space<vmem>>, vector<1x36xf32>
    %104 = vector.broadcast %103 : vector<1x36xf32> to vector<176x36xf32>
    %105 = arith.mulf %102, %104 : vector<176x36xf32>
    %c13 = arith.constant 13 : index
    %c0_76 = arith.constant 0 : index
    %106 = vector.load %arg6[%c13, %c0_76] : memref<19x96xf32, #tpu.memory_space<vmem>>, vector<1x36xf32>
    %107 = vector.broadcast %106 : vector<1x36xf32> to vector<176x36xf32>
    %108 = arith.addf %105, %107 : vector<176x36xf32>
    %cst_77 = arith.constant 0.000000e+00 : f32
    %109 = vector.broadcast %cst_77 : f32 to vector<176x36xf32>
    %110 = arith.maximumf %108, %109 : vector<176x36xf32>
    %111 = vector.broadcast %5 : vector<176x1xf32> to vector<176x36xf32>
    %112 = arith.mulf %110, %111 : vector<176x36xf32>
    %c24_78 = arith.constant 24 : index
    %c0_79 = arith.constant 0 : index
    %113 = vector.load %arg5[%c24_78, %c0_79] : memref<112x108xf32, #tpu.memory_space<vmem>>, vector<36x108xf32>
    %cst_80 = arith.constant dense<0.000000e+00> : vector<176x108xf32>
    %114 = tpu.matmul %112, %113, %cst_80 {dimension_numbers = #tpu.dot_dimension_numbers<[1], [0], [0], [1], [0, 0, 1, 1], [], []>} : vector<176x36xf32>, vector<36x108xf32>, vector<176x108xf32> -> vector<176x108xf32>
    %c16_81 = arith.constant 16 : index
    %c0_82 = arith.constant 0 : index
    %115 = vector.load %arg14[%c16_81, %c0_82] : memref<208x108xf32, #tpu.memory_space<vmem>>, vector<176x108xf32>
    tpu.vector_store %arg14[%c16_81, %c0_82], %114 {strides = array<i32>} : memref<208x108xf32, #tpu.memory_space<vmem>>, vector<176x108xf32>,
    %cst_83 = arith.constant 0.000000e+00 : f32
    %116 = vector.broadcast %cst_83 : f32 to vector<176x12xf32>
    %c17_84 = arith.constant 17 : index
    %c0_85 = arith.constant 0 : index
    %117 = vector.load %arg6[%c17_84, %c0_85] : memref<19x96xf32, #tpu.memory_space<vmem>>, vector<1x12xf32>
    %118 = vector.broadcast %117 : vector<1x12xf32> to vector<176x12xf32>
    %119 = arith.addf %116, %118 : vector<176x12xf32>
    %c2_86 = arith.constant 2 : index
    %c0_87 = arith.constant 0 : index
    %120 = vector.load %arg14[%c2_86, %c0_87] : memref<208x108xf32, #tpu.memory_space<vmem>>, vector<176x12xf32>
    %121 = arith.addf %119, %120 : vector<176x12xf32>
    %c3_88 = arith.constant 3 : index
    %c12_89 = arith.constant 12 : index
    %122 = vector.load %arg14[%c3_88, %c12_89] : memref<208x108xf32, #tpu.memory_space<vmem>>, vector<176x12xf32>
    %123 = arith.addf %121, %122 : vector<176x12xf32>
    %c4_90 = arith.constant 4 : index
    %c24_91 = arith.constant 24 : index
    %124 = vector.load %arg14[%c4_90, %c24_91] : memref<208x108xf32, #tpu.memory_space<vmem>>, vector<176x12xf32>
    %125 = arith.addf %123, %124 : vector<176x12xf32>
    %c15_92 = arith.constant 15 : index
    %c36_93 = arith.constant 36 : index
    %126 = vector.load %arg14[%c15_92, %c36_93] : memref<208x108xf32, #tpu.memory_space<vmem>>, vector<176x12xf32>
    %127 = arith.addf %125, %126 : vector<176x12xf32>
    %c16_94 = arith.constant 16 : index
    %c48_95 = arith.constant 48 : index
    %128 = vector.load %arg14[%c16_94, %c48_95] : memref<208x108xf32, #tpu.memory_space<vmem>>, vector<176x12xf32>
    %129 = arith.addf %127, %128 : vector<176x12xf32>
    %c17_96 = arith.constant 17 : index
    %c60_97 = arith.constant 60 : index
    %130 = vector.load %arg14[%c17_96, %c60_97] : memref<208x108xf32, #tpu.memory_space<vmem>>, vector<176x12xf32>
    %131 = arith.addf %129, %130 : vector<176x12xf32>
    %c28_98 = arith.constant 28 : index
    %c72_99 = arith.constant 72 : index
    %132 = vector.load %arg14[%c28_98, %c72_99] : memref<208x108xf32, #tpu.memory_space<vmem>>, vector<176x12xf32>
    %133 = arith.addf %131, %132 : vector<176x12xf32>
    %c29_100 = arith.constant 29 : index
    %c84_101 = arith.constant 84 : index
    %134 = vector.load %arg14[%c29_100, %c84_101] : memref<208x108xf32, #tpu.memory_space<vmem>>, vector<176x12xf32>
    %135 = arith.addf %133, %134 : vector<176x12xf32>
    %c30_102 = arith.constant 30 : index
    %c96_103 = arith.constant 96 : index
    %136 = vector.load %arg14[%c30_102, %c96_103] : memref<208x108xf32, #tpu.memory_space<vmem>>, vector<176x12xf32>
    %137 = arith.addf %135, %136 : vector<176x12xf32>
    %c0_104 = arith.constant 0 : index
    %c36_105 = arith.constant 36 : index
    %138 = vector.load %arg13[%c0_104, %c36_105] : memref<176x60xf32, #tpu.memory_space<vmem>>, vector<176x12xf32>
    tpu.vector_store %arg13[%c0_104, %c36_105], %137 {strides = array<i32>} : memref<176x60xf32, #tpu.memory_space<vmem>>, vector<176x12xf32>,
    %c0_106 = arith.constant 0 : index
    %c0_107 = arith.constant 0 : index
    %139 = vector.load %arg13[%c0_106, %c0_107] : memref<176x60xf32, #tpu.memory_space<vmem>>, vector<176x48xf32>
    %c15_108 = arith.constant 15 : index
    %c0_109 = arith.constant 0 : index
    %140 = vector.load %arg6[%c15_108, %c0_109] : memref<19x96xf32, #tpu.memory_space<vmem>>, vector<1x48xf32>
    %141 = vector.broadcast %140 : vector<1x48xf32> to vector<176x48xf32>
    %142 = arith.mulf %139, %141 : vector<176x48xf32>
    %c16_110 = arith.constant 16 : index
    %c0_111 = arith.constant 0 : index
    %143 = vector.load %arg6[%c16_110, %c0_111] : memref<19x96xf32, #tpu.memory_space<vmem>>, vector<1x48xf32>
    %144 = vector.broadcast %143 : vector<1x48xf32> to vector<176x48xf32>
    %145 = arith.addf %142, %144 : vector<176x48xf32>
    %cst_112 = arith.constant 0.000000e+00 : f32
    %146 = vector.broadcast %cst_112 : f32 to vector<176x48xf32>
    %147 = arith.maximumf %145, %146 : vector<176x48xf32>
    %148 = vector.broadcast %5 : vector<176x1xf32> to vector<176x48xf32>
    %149 = arith.mulf %147, %148 : vector<176x48xf32>
    %c64 = arith.constant 64 : index
    %c0_113 = arith.constant 0 : index
    %150 = vector.load %arg5[%c64, %c0_113] : memref<112x108xf32, #tpu.memory_space<vmem>>, vector<48x108xf32>
    %cst_114 = arith.constant dense<0.000000e+00> : vector<176x108xf32>
    %151 = tpu.matmul %149, %150, %cst_114 {dimension_numbers = #tpu.dot_dimension_numbers<[1], [0], [0], [1], [0, 0, 1, 1], [], []>} : vector<176x48xf32>, vector<48x108xf32>, vector<176x108xf32> -> vector<176x108xf32>
    %c16_115 = arith.constant 16 : index
    %c0_116 = arith.constant 0 : index
    %152 = vector.load %arg14[%c16_115, %c0_116] : memref<208x108xf32, #tpu.memory_space<vmem>>, vector<176x108xf32>
    tpu.vector_store %arg14[%c16_115, %c0_116], %151 {strides = array<i32>} : memref<208x108xf32, #tpu.memory_space<vmem>>, vector<176x108xf32>,
    %cst_117 = arith.constant 0.000000e+00 : f32
    %153 = vector.broadcast %cst_117 : f32 to vector<176x12xf32>
    %c18 = arith.constant 18 : index
    %c0_118 = arith.constant 0 : index
    %154 = vector.load %arg6[%c18, %c0_118] : memref<19x96xf32, #tpu.memory_space<vmem>>, vector<1x12xf32>
    %155 = vector.broadcast %154 : vector<1x12xf32> to vector<176x12xf32>
    %156 = arith.addf %153, %155 : vector<176x12xf32>
    %c2_119 = arith.constant 2 : index
    %c0_120 = arith.constant 0 : index
    %157 = vector.load %arg14[%c2_119, %c0_120] : memref<208x108xf32, #tpu.memory_space<vmem>>, vector<176x12xf32>
    %158 = arith.addf %156, %157 : vector<176x12xf32>
    %c3_121 = arith.constant 3 : index
    %c12_122 = arith.constant 12 : index
    %159 = vector.load %arg14[%c3_121, %c12_122] : memref<208x108xf32, #tpu.memory_space<vmem>>, vector<176x12xf32>
    %160 = arith.addf %158, %159 : vector<176x12xf32>
    %c4_123 = arith.constant 4 : index
    %c24_124 = arith.constant 24 : index
    %161 = vector.load %arg14[%c4_123, %c24_124] : memref<208x108xf32, #tpu.memory_space<vmem>>, vector<176x12xf32>
    %162 = arith.addf %160, %161 : vector<176x12xf32>
    %c15_125 = arith.constant 15 : index
    %c36_126 = arith.constant 36 : index
    %163 = vector.load %arg14[%c15_125, %c36_126] : memref<208x108xf32, #tpu.memory_space<vmem>>, vector<176x12xf32>
    %164 = arith.addf %162, %163 : vector<176x12xf32>
    %c16_127 = arith.constant 16 : index
    %c48_128 = arith.constant 48 : index
    %165 = vector.load %arg14[%c16_127, %c48_128] : memref<208x108xf32, #tpu.memory_space<vmem>>, vector<176x12xf32>
    %166 = arith.addf %164, %165 : vector<176x12xf32>
    %c17_129 = arith.constant 17 : index
    %c60_130 = arith.constant 60 : index
    %167 = vector.load %arg14[%c17_129, %c60_130] : memref<208x108xf32, #tpu.memory_space<vmem>>, vector<176x12xf32>
    %168 = arith.addf %166, %167 : vector<176x12xf32>
    %c28_131 = arith.constant 28 : index
    %c72_132 = arith.constant 72 : index
    %169 = vector.load %arg14[%c28_131, %c72_132] : memref<208x108xf32, #tpu.memory_space<vmem>>, vector<176x12xf32>
    %170 = arith.addf %168, %169 : vector<176x12xf32>
    %c29_133 = arith.constant 29 : index
    %c84_134 = arith.constant 84 : index
    %171 = vector.load %arg14[%c29_133, %c84_134] : memref<208x108xf32, #tpu.memory_space<vmem>>, vector<176x12xf32>
    %172 = arith.addf %170, %171 : vector<176x12xf32>
    %c30_135 = arith.constant 30 : index
    %c96_136 = arith.constant 96 : index
    %173 = vector.load %arg14[%c30_135, %c96_136] : memref<208x108xf32, #tpu.memory_space<vmem>>, vector<176x12xf32>
    %174 = arith.addf %172, %173 : vector<176x12xf32>
    %c0_137 = arith.constant 0 : index
    %c48_138 = arith.constant 48 : index
    %175 = vector.load %arg13[%c0_137, %c48_138] : memref<176x60xf32, #tpu.memory_space<vmem>>, vector<176x12xf32>
    tpu.vector_store %arg13[%c0_137, %c48_138], %174 {strides = array<i32>} : memref<176x60xf32, #tpu.memory_space<vmem>>, vector<176x12xf32>,
    %c0_139 = arith.constant 0 : index
    %c0_140 = arith.constant 0 : index
    %176 = vector.load %arg3[%c0_139, %c0_140] : memref<1x176xf32, #tpu.memory_space<vmem>>, vector<1x176xf32>
    %cst_141 = arith.constant dense<0.000000e+00> : vector<1x60xf32>
    %177 = tpu.matmul %176, %58, %cst_141 {dimension_numbers = #tpu.dot_dimension_numbers<[1], [0], [0], [1], [0, 0, 1, 1], [], []>} : vector<1x176xf32>, vector<176x60xf32>, vector<1x60xf32> -> vector<1x60xf32>
    %c0_142 = arith.constant 0 : index
    %c0_143 = arith.constant 0 : index
    %178 = vector.load %arg13[%c0_142, %c0_143] : memref<176x60xf32, #tpu.memory_space<vmem>>, vector<176x60xf32>
    %cst_144 = arith.constant dense<0.000000e+00> : vector<1x60xf32>
    %179 = tpu.matmul %176, %178, %cst_144 {dimension_numbers = #tpu.dot_dimension_numbers<[1], [0], [0], [1], [0, 0, 1, 1], [], []>} : vector<1x176xf32>, vector<176x60xf32>, vector<1x60xf32> -> vector<1x60xf32>
    %180 = tpu.concatenate %177, %179 in 1 : vector<1x60xf32>, vector<1x60xf32> -> vector<1x120xf32>
    %c0_145 = arith.constant 0 : index
    %c0_146 = arith.constant 0 : index
    %181 = vector.load %arg7[%c0_145, %c0_146] : memref<120x78xf32, #tpu.memory_space<vmem>>, vector<120x78xf32>
    %cst_147 = arith.constant dense<0.000000e+00> : vector<1x78xf32>
    %182 = tpu.matmul %180, %181, %cst_147 {dimension_numbers = #tpu.dot_dimension_numbers<[1], [0], [0], [1], [0, 0, 1, 1], [], []>} : vector<1x120xf32>, vector<120x78xf32>, vector<1x78xf32> -> vector<1x78xf32>
    %c0_148 = arith.constant 0 : index
    %c0_149 = arith.constant 0 : index
    %183 = vector.load %arg8[%c0_148, %c0_149] : memref<1x78xf32, #tpu.memory_space<vmem>>, vector<1x78xf32>
    %184 = arith.addf %182, %183 : vector<1x78xf32>
    %185 = vector.extract_strided_slice %184 {offsets = [0, 0], sizes = [1, 9], strides = [1, 1]} : vector<1x78xf32> to vector<1x9xf32>
    %186 = vector.extract_strided_slice %184 {offsets = [0, 9], sizes = [1, 9], strides = [1, 1]} : vector<1x78xf32> to vector<1x9xf32>
    %187 = vector.extract_strided_slice %184 {offsets = [0, 18], sizes = [1, 60], strides = [1, 1]} : vector<1x78xf32> to vector<1x60xf32>
    %cst_150 = arith.constant 0.000000e+00 : f32
    %188 = vector.broadcast %cst_150 : f32 to vector<1x60xf32>
    %189 = arith.maximumf %187, %188 : vector<1x60xf32>
    %c0_151 = arith.constant 0 : index
    %c0_152 = arith.constant 0 : index
    %190 = vector.load %arg9[%c0_151, %c0_152] : memref<60x9xf32, #tpu.memory_space<vmem>>, vector<60x9xf32>
    %cst_153 = arith.constant dense<0.000000e+00> : vector<1x9xf32>
    %191 = tpu.matmul %189, %190, %cst_153 {dimension_numbers = #tpu.dot_dimension_numbers<[1], [0], [0], [1], [0, 0, 1, 1], [], []>} : vector<1x60xf32>, vector<60x9xf32>, vector<1x9xf32> -> vector<1x9xf32>
    %c0_154 = arith.constant 0 : index
    %c0_155 = arith.constant 0 : index
    %192 = vector.load %arg10[%c0_154, %c0_155] : memref<1x9xf32, #tpu.memory_space<vmem>>, vector<1x9xf32>
    %193 = arith.addf %191, %192 : vector<1x9xf32>
    %194 = tpu.concatenate %193, %185, %186 in 1 : vector<1x9xf32>, vector<1x9xf32>, vector<1x9xf32> -> vector<1x27xf32>
    %195 = vector.shape_cast %194 : vector<1x27xf32> to vector<1x1x27xf32>
    %c0_156 = arith.constant 0 : index
    %c0_157 = arith.constant 0 : index
    %c0_158 = arith.constant 0 : index
    %196 = vector.load %arg11[%c0_156, %c0_157, %c0_158] : memref<1x1x27xf32, #tpu.memory_space<vmem>>, vector<1x1x27xf32>
    tpu.vector_store %arg11[%c0_156, %c0_157, %c0_158], %195 {strides = array<i32>} : memref<1x1x27xf32, #tpu.memory_space<vmem>>, vector<1x1x27xf32>,
    return
  }
  func.func @transform_0(%arg0: i32) -> (i32, i32) {
    %c0_i32 = arith.constant 0 : i32
    %c0_i32_0 = arith.constant 0 : i32
    return %arg0, %c0_i32 : i32, i32
  }
  func.func @transform_1(%arg0: i32) -> (i32, i32) {
    %c0_i32 = arith.constant 0 : i32
    %c0_i32_0 = arith.constant 0 : i32
    %c0_i32_1 = arith.constant 0 : i32
    return %c0_i32, %c0_i32_0 : i32, i32
  }
  func.func @transform_2(%arg0: i32) -> (i32, i32) {
    %c0_i32 = arith.constant 0 : i32
    %c0_i32_0 = arith.constant 0 : i32
    %c0_i32_1 = arith.constant 0 : i32
    return %c0_i32, %c0_i32_0 : i32, i32
  }
  func.func @transform_3(%arg0: i32) -> (i32, i32) {
    %c0_i32 = arith.constant 0 : i32
    %c0_i32_0 = arith.constant 0 : i32
    %c0_i32_1 = arith.constant 0 : i32
    return %c0_i32, %c0_i32_0 : i32, i32
  }
  func.func @transform_4(%arg0: i32) -> (i32, i32) {
    %c0_i32 = arith.constant 0 : i32
    %c0_i32_0 = arith.constant 0 : i32
    %c0_i32_1 = arith.constant 0 : i32
    return %c0_i32, %c0_i32_0 : i32, i32
  }
  func.func @transform_5(%arg0: i32) -> (i32, i32) {
    %c0_i32 = arith.constant 0 : i32
    %c0_i32_0 = arith.constant 0 : i32
    %c0_i32_1 = arith.constant 0 : i32
    return %c0_i32, %c0_i32_0 : i32, i32
  }
  func.func @transform_6(%arg0: i32) -> (i32, i32) {
    %c0_i32 = arith.constant 0 : i32
    %c0_i32_0 = arith.constant 0 : i32
    %c0_i32_1 = arith.constant 0 : i32
    return %c0_i32, %c0_i32_0 : i32, i32
  }
  func.func @transform_7(%arg0: i32) -> (i32, i32) {
    %c0_i32 = arith.constant 0 : i32
    %c0_i32_0 = arith.constant 0 : i32
    %c0_i32_1 = arith.constant 0 : i32
    return %c0_i32, %c0_i32_0 : i32, i32
  }
  func.func @transform_8(%arg0: i32) -> (i32, i32) {
    %c0_i32 = arith.constant 0 : i32
    %c0_i32_0 = arith.constant 0 : i32
    %c0_i32_1 = arith.constant 0 : i32
    return %c0_i32, %c0_i32_0 : i32, i32
  }
  func.func @transform_9(%arg0: i32) -> (i32, i32) {
    %c0_i32 = arith.constant 0 : i32
    %c0_i32_0 = arith.constant 0 : i32
    %c0_i32_1 = arith.constant 0 : i32
    return %c0_i32, %c0_i32_0 : i32, i32
  }
  func.func @transform_10(%arg0: i32) -> (i32, i32, i32) {
    %c0_i32 = arith.constant 0 : i32
    %c0_i32_0 = arith.constant 0 : i32
    %c0_i32_1 = arith.constant 0 : i32
    return %arg0, %c0_i32, %c0_i32_0 : i32, i32, i32
  }
}

</mosaic_0001>

<bundles_post_ra>
// kernel: dbda_forward.1
= control target key start
LH: loop header
LB: loop body
LE: loop exit
PB: predicated region body
PF: predicated region fallthrough
CT: control target
= control target key end

     0   :  { %s9108_s13 = smov 0   ;;  %s12518_s0 = inlined_call_operand.vmem [shape: f32[352,16], index: 0, kind: input, shape index: {}]   ;;  %s12519_s1 = inlined_call_operand.vmem [shape: f32[176,1], index: 1, kind: input, shape index: {}]   ;;  %s12520_s2 = inlined_call_operand.vmem [shape: f32[1,176], index: 2, kind: input, shape index: {}]   ;;  %s12521_s3 = inlined_call_operand.vmem [shape: f32[272,64], index: 3, kind: input, shape index: {}]   ;;  %s12522_s4 = inlined_call_operand.vmem [shape: f32[112,108], index: 4, kind: input, shape index: {}]   ;;  %s12523_s5 = inlined_call_operand.vmem [shape: f32[19,96], index: 5, kind: input, shape index: {}]   ;;  %s12524_s6 = inlined_call_operand.vmem [shape: f32[120,78], index: 6, kind: input, shape index: {}]   ;;  %s12525_s7 = inlined_call_operand.vmem [shape: f32[1,78], index: 7, kind: input, shape index: {}]   ;;  %s12526_s8 = inlined_call_operand.vmem [shape: f32[60,9], index: 8, kind: input, shape index: {}]   ;;  %s12527_s9 = inlined_call_operand.vmem [shape: f32[1,9], index: 9, kind: input, shape index: {}]   ;;  %s12528_s10 = inlined_call_operand.vmem [shape: f32[2,1,27], index: 10, kind: output, shape index: {}]  }
   0x1 LB: > { %s9114_s14 = sadd.s32 4294967295, %s9031_s13   ;;  %p7840_p0 = scmp.ge.s32.totalorder %s9031_s13, 1  ;;  %s9031_s13 = sphi %s9108_s13, %s20_s13  }
   0x2   : > { %p313_p1 = scmp.lt.s32.totalorder %s9031_s13, 3 }
   0x4   : > { %p314_p2 = pnand %p7840_p0, %p313_p1 }
   0x6   : > { %317 = sbr.rel (%p314_p2) target bundleno = 4398 (0x112e), region = 60 }
   0xd   : > { %v407_v0 = vld [vmem:[%s12521_s3] sm:$0xff]  ;;  %v408_v1 = vld [vmem:[%s12521_s3 + $0x8] sm:$0xff]  ;;  %s349_s19 = smul.u32 22, %s9114_s14  ;;  %vm409_vm0 = vcmask 130048   ;;  %v772_v25 = vld [vmem:[%s12521_s3 + $0x10] sm:$0xff]  ;;  %vm651_vm1 = vcmask 195584  }
   0xe   : > { %v8783_v2 = vpack.c.bf16 %v408_v1, %v407_v0  ;;  %v773_v26 = vld [vmem:[%s12521_s3 + $0x18] sm:$0xff]  ;;  %v774_v28 = vld [vmem:[%s12521_s3 + $0x20] sm:$0xff]  ;;  %s9033_s29 = smov 24   ;;  %vm1104_vm2 = vcmask 392384   ;;  %vm1231_vm3 = vcmask 392192   ;;  %s9034_s18 = smov 48  }
   0xf   : > { %p350_p3 = scmp.lt.s32.totalorder %s349_s19, 43  ;;  %v8787_v27 = vpack.c.bf16 %v773_v26, %v772_v25  ;;  %v9190_v33 = vld [vmem:[%s12523_s5] ss:$0 sm:$0xff]  ;;  %v9195_v35 = vld [vmem:[%s12523_s5 + $0x1] ss:$0 sm:$0xff]  ;;  %vm358_vm4 = vcmask 883712  }
  0x10   : > { %8784 = vmatprep.subr.bf16.mxu0 %v8783_v2  ;;  %vm1561_vm5 = vcmask 589184   ;;  %vm1691_vm6 = vcmask 588800   ;;  %s9037_s27 = smov 116   ;;  %s9038_s28 = smov 44   ;;  %vm2021_vm7 = vcmask 785984   ;;  %vm2159_vm8 = vcmask 785408  }
  0x11   : > { %8786 = vmatpush3.bf16.msra.mxu0 %v8783_v2  ;;  %s13106_s19 = smov (!%p350_p3, %s349_s19), 43  ;;  %8788 = vmatprep.subr.bf16.mxu1 %v8787_v27  ;;  %s9039_s30 = smov 104   ;;  %vm4472_vm9 = vcmask 1043456   ;;  %vm4257_vm10 = vcmask 294080   ;;  %vm4405_vm11 = vcmask 293888   ;;  %vm5829_vm12 = vcmask 392480  }
  0x12   : > { %s7841_s20 = sshll.u32 %s13106_s19, 3  ;;  %8790 = vmatpush3.bf16.msra.mxu1 %v8787_v27  ;;  %s9040_s11 = smov 32   ;;  %vm7397_vm13 = vcmask 490880   ;;  %vm9048_vm14 = vmmov 0   ;;  %vm7599_vm15 = vcmask 490496  }
  0x13   : > { %s9128_s23 = scalar_lea.vmem %s12518_s0, %s7841_s20  ;;  %8379 = vmatprep.subr.mxu1 %v774_v28  ;;  %s9041_s12 = smov 56  }
  0x14   : > { %v363_v3 = vld [vmem:[%s9128_s23] sm:$0xff]  ;;  %v364_v4 = vld [vmem:[%s9128_s23 + $0x8] sm:$0xff]  ;;  %v365_v5 = vld [vmem:[%s9128_s23 + $0x10] sm:$0xff]  ;;  %s9042_s17 = smov 72   ;;  %s9043_s26 = smov 80  }
  0x15   : > { %8342 = vmatprep.mubr.msk.f32.mxu0 %vm409_vm0, %v363_v3  ;;  %v366_v6 = vld [vmem:[%s9128_s23 + $0x18] sm:$0xff]  ;;  %v367_v7 = vld [vmem:[%s9128_s23 + $0x20] sm:$0xff]  ;;  %v368_v8 = vld [vmem:[%s9128_s23 + $0x28] sm:$0xff]  ;;  %s9044_s15 = smov 68   ;;  %s9045_s16 = smov 92  }
  0x16   : > { %8343 = vmatmul.mubr.msk.f32.vlgmr.msra.gmra.mrb[0].mxu0 %vm409_vm0, %v364_v4  ;;  %v369_v9 = vld [vmem:[%s9128_s23 + $0x30] sm:$0xff]  ;;  %v370_v10 = vld [vmem:[%s9128_s23 + $0x38] sm:$0xff]  ;;  %v371_v11 = vld [vmem:[%s9128_s23 + $0x40] sm:$0xff]  ;;  %8380 = vmatpush3.msra.mxu1 %v774_v28  ;;  %s9047_s22 = smov 36   ;;  %s9049_s25 = smov 60  }
  0x17   : > { %8345 = vmatprep.mubr.msk.f32.mxu0 %vm409_vm0, %v365_v5  ;;  %v372_v12 = vld [vmem:[%s9128_s23 + $0x48] sm:$0xff]  ;;  %v373_v13 = vld [vmem:[%s9128_s23 + $0x50] sm:$0xff]  ;;  %v374_v14 = vld [vmem:[%s9128_s23 + $0x58] sm:$0xff]  ;;  %p355_p4 = scmp.lt.s32.totalorder %s9114_s14, 1 }
  0x18   : > { %v375_v15 = vld [vmem:[%s9128_s23 + $0x60] sm:$0xff]  ;;  %v376_v16 = vld [vmem:[%s9128_s23 + $0x68] sm:$0xff]  ;;  %v377_v17 = vld [vmem:[%s9128_s23 + $0x70] sm:$0xff] }
  0x19   : > { %v378_v18 = vld [vmem:[%s9128_s23 + $0x78] sm:$0xff]  ;;  %v379_v19 = vld [vmem:[%s9128_s23 + $0x80] sm:$0xff]  ;;  %v380_v20 = vld [vmem:[%s9128_s23 + $0x88] sm:$0xff]  ;;  %s13108_s14 = smov (!%p355_p4, %s9114_s14), 1 }
  0x1a   : > { %8346 = vmatmul.mubr.msk.f32.gmra.mrb[2].mxu0 %vm409_vm0, %v366_v6  ;;  %v381_v21 = vld [vmem:[%s9128_s23 + $0x90] sm:$0xff]  ;;  %v382_v22 = vld [vmem:[%s9128_s23 + $0x98] sm:$0xff]  ;;  %v383_v23 = vld [vmem:[%s9128_s23 + $0xa0] sm:$0xff] }
  0x1b   : > { %8348 = vmatprep.mubr.msk.f32.mxu0 %vm409_vm0, %v367_v7  ;;  %v384_v24 = vld [vmem:[%s9128_s23 + $0xa8] sm:$0xff] }
  0x1e   : > { %8349 = vmatmul.mubr.msk.f32.gmra.mrb[4].mxu0 %vm409_vm0, %v368_v8 }
  0x1f   : > { %8351 = vmatprep.mubr.msk.f32.mxu0 %vm409_vm0, %v369_v9 }
  0x22   : > { %8352 = vmatmul.mubr.msk.f32.gmra.mrb[6].mxu0 %vm409_vm0, %v370_v10 }
  0x23   : > { %8354 = vmatprep.mubr.msk.f32.mxu0 %vm409_vm0, %v371_v11 }
  0x26   : > { %8355 = vmatmul.mubr.msk.f32.gmra.mrb[8].mxu0 %vm409_vm0, %v372_v12 }
  0x27   : > { %8357 = vmatprep.mubr.msk.f32.mxu0 %vm409_vm0, %v373_v13 }
  0x2a   : > { %8358 = vmatmul.mubr.msk.f32.gmra.mrb[10].mxu0 %vm409_vm0, %v374_v14 }
  0x2b   : > { %8360 = vmatprep.mubr.msk.f32.mxu0 %vm409_vm0, %v375_v15 }
  0x2e   : > { %8361 = vmatmul.mubr.msk.f32.gmra.mrb[12].mxu0 %vm409_vm0, %v376_v16 }
  0x2f   : > { %8363 = vmatprep.mubr.msk.f32.mxu0 %vm409_vm0, %v377_v17 }
  0x32   : > { %8364 = vmatmul.mubr.msk.f32.gmra.mrb[14].mxu0 %vm409_vm0, %v378_v18 }
  0x33   : > { %8366 = vmatprep.mubr.msk.f32.mxu0 %vm409_vm0, %v379_v19 }
  0x36   : > { %8367 = vmatmul.mubr.msk.f32.gmra.mrb[16].mxu0 %vm409_vm0, %v380_v20 }
  0x37   : > { %8369 = vmatprep.mubr.msk.f32.mxu0 %vm409_vm0, %v381_v21 }
  0x3a   : > { %8370 = vmatmul.mubr.msk.f32.gmra.mrb[18].mxu0 %vm409_vm0, %v382_v22 }
  0x3b   : > { %8372 = vmatprep.mubr.msk.f32.mxu0 %vm409_vm0, %v383_v23 }
  0x3e   : > { %8373 = vmatmul.mubr.msk.f32.gmra.mrb[20].mxu0 %vm409_vm0, %v384_v24 }
  0xe9   : > { %v8344_v29 = vpop.f32.mrb[0].mxu0 }
  0xea   : > { %653 = vst.msk [vmem:[#allocation2 + $0x8] sm:$0xff] %vm651_vm1, %v8344_v29  ;;  %v542_v30 = vpop.f32.mrb[1].mxu0 }
  0xeb   : > { %652 = vst.msk [vmem:[#allocation2] sm:$0xff] %vm651_vm1, %v542_v30 }
  0xed   : > { %v8347_v31 = vpop.f32.mrb[2].mxu0 }
  0xee   : > { %655 = vst.msk [vmem:[#allocation2 + $0x18] sm:$0xff] %vm651_vm1, %v8347_v31  ;;  %v552_v32 = vpop.f32.mrb[3].mxu0 }
  0xef   : > { %654 = vst.msk [vmem:[#allocation2 + $0x10] sm:$0xff] %vm651_vm1, %v552_v32 }
  0xf1   : > { %v8350_v34 = vpop.f32.mrb[4].mxu0  ;;  %v675_v36 = vld [vmem:[#allocation2 + $0x8] sm:$0xff] }
  0xf2   : > { %657 = vst.msk [vmem:[#allocation2 + $0x28] sm:$0xff] %vm651_vm1, %v8350_v34  ;;  %v562_v37 = vpop.f32.mrb[5].mxu0  ;;  %v674_v38 = vld [vmem:[#allocation2] sm:$0xff]  ;;  %v702_v39 = vmul.f32 %v9190_v33, %v675_v36 }
  0xf3   : > { %656 = vst.msk [vmem:[#allocation2 + $0x20] sm:$0xff] %vm651_vm1, %v562_v37  ;;  %v701_v40 = vmul.f32 %v9190_v33, %v674_v38 }
  0xf4   : > { %v729_v41 = vadd.f32 %v9195_v35, %v702_v39 }
  0xf5   : > { %v8353_v42 = vpop.f32.mrb[6].mxu0  ;;  %v728_v43 = vadd.f32 %v9195_v35, %v701_v40  ;;  %v677_v44 = vld [vmem:[#allocation2 + $0x18] sm:$0xff] }
  0xf6   : > { %659 = vst.msk [vmem:[#allocation2 + $0x38] sm:$0xff] %vm651_vm1, %v8353_v42  ;;  %v572_v45 = vpop.f32.mrb[7].mxu0  ;;  %v676_v46 = vld [vmem:[#allocation2 + $0x10] sm:$0xff]  ;;  %v704_v47 = vmul.f32 %v9190_v33, %v677_v44  ;;  %v751_v50 = vmax.f32 %v729_v41, 0.0 }
  0xf7   : > { %658 = vst.msk [vmem:[#allocation2 + $0x30] sm:$0xff] %vm651_vm1, %v572_v45  ;;  %v750_v48 = vmax.f32 %v728_v43, 0.0  ;;  %v703_v49 = vmul.f32 %v9190_v33, %v676_v46 }
  0xf8   : > { %v731_v51 = vadd.f32 %v9195_v35, %v704_v47 }
  0xf9   : > { %v8356_v52 = vpop.f32.mrb[8].mxu0  ;;  %8381 = vmatprep.mubr.msk.f32.mxu1 %vm651_vm1, %v750_v48  ;;  %v730_v53 = vadd.f32 %v9195_v35, %v703_v49  ;;  %v679_v54 = vld [vmem:[#allocation2 + $0x28] sm:$0xff] }
  0xfa   : > { %661 = vst.msk [vmem:[#allocation2 + $0x48] sm:$0xff] %vm651_vm1, %v8356_v52  ;;  %v582_v55 = vpop.f32.mrb[9].mxu0  ;;  %8382 = vmatmul.mubr.msk.f32.vlgmr.msra.gmra.mrb[0].mxu1 %vm651_vm1, %v751_v50  ;;  %v678_v56 = vld [vmem:[#allocation2 + $0x20] sm:$0xff]  ;;  %v706_v57 = vmul.f32 %v9190_v33, %v679_v54  ;;  %v753_v60 = vmax.f32 %v731_v51, 0.0 }
  0xfb   : > { %660 = vst.msk [vmem:[#allocation2 + $0x40] sm:$0xff] %vm651_vm1, %v582_v55  ;;  %v752_v58 = vmax.f32 %v730_v53, 0.0  ;;  %v705_v59 = vmul.f32 %v9190_v33, %v678_v56 }
  0xfc   : > { %v733_v61 = vadd.f32 %v9195_v35, %v706_v57 }
  0xfd   : > { %v8359_v62 = vpop.f32.mrb[10].mxu0  ;;  %8384 = vmatprep.mubr.msk.f32.mxu1 %vm651_vm1, %v752_v58  ;;  %v732_v63 = vadd.f32 %v9195_v35, %v705_v59  ;;  %v681_v0 = vld [vmem:[#allocation2 + $0x38] sm:$0xff] }
  0xfe   : > { %663 = vst.msk [vmem:[#allocation2 + $0x58] sm:$0xff] %vm651_vm1, %v8359_v62  ;;  %v592_v1 = vpop.f32.mrb[11].mxu0  ;;  %8385 = vmatmul.mubr.msk.f32.gmra.mrb[2].mxu1 %vm651_vm1, %v753_v60  ;;  %v755_v2 = vmax.f32 %v733_v61, 0.0  ;;  %v680_v3 = vld [vmem:[#allocation2 + $0x30] sm:$0xff]  ;;  %v708_v4 = vmul.f32 %v9190_v33, %v681_v0 }
  0xff   : > { %662 = vst.msk [vmem:[#allocation2 + $0x50] sm:$0xff] %vm651_vm1, %v592_v1  ;;  %v754_v5 = vmax.f32 %v732_v63, 0.0  ;;  %v707_v6 = vmul.f32 %v9190_v33, %v680_v3 }
 0x100   : > { %v735_v7 = vadd.f32 %v9195_v35, %v708_v4 }
 0x101   : > { %v8362_v8 = vpop.f32.mrb[12].mxu0  ;;  %8387 = vmatprep.mubr.msk.f32.mxu1 %vm651_vm1, %v754_v5  ;;  %v734_v9 = vadd.f32 %v9195_v35, %v707_v6  ;;  %v683_v10 = vld [vmem:[#allocation2 + $0x48] sm:$0xff] }
 0x102   : > { %665 = vst.msk [vmem:[#allocation2 + $0x68] sm:$0xff] %vm651_vm1, %v8362_v8  ;;  %v602_v11 = vpop.f32.mrb[13].mxu0  ;;  %8388 = vmatmul.mubr.msk.f32.gmra.mrb[4].mxu1 %vm651_vm1, %v755_v2  ;;  %v757_v12 = vmax.f32 %v735_v7, 0.0  ;;  %v682_v13 = vld [vmem:[#allocation2 + $0x40] sm:$0xff]  ;;  %v710_v14 = vmul.f32 %v9190_v33, %v683_v10 }
 0x103   : > { %664 = vst.msk [vmem:[#allocation2 + $0x60] sm:$0xff] %vm651_vm1, %v602_v11  ;;  %v756_v15 = vmax.f32 %v734_v9, 0.0  ;;  %v709_v16 = vmul.f32 %v9190_v33, %v682_v13 }
 0x104   : > { %v737_v17 = vadd.f32 %v9195_v35, %v710_v14 }
 0x105   : > { %v8365_v18 = vpop.f32.mrb[14].mxu0  ;;  %8390 = vmatprep.mubr.msk.f32.mxu1 %vm651_vm1, %v756_v15  ;;  %v736_v19 = vadd.f32 %v9195_v35, %v709_v16  ;;  %v685_v20 = vld [vmem:[#allocation2 + $0x58] sm:$0xff]  ;;  %v1225_v15 = vld [vmem:[%s12521_s3 + $0x28] sm:$0xff] }
 0x106   : > { %667 = vst.msk [vmem:[#allocation2 + $0x78] sm:$0xff] %vm651_vm1, %v8365_v18  ;;  %v612_v21 = vpop.f32.mrb[15].mxu0  ;;  %8391 = vmatmul.mubr.msk.f32.gmra.mrb[6].mxu1 %vm651_vm1, %v757_v12  ;;  %v759_v22 = vmax.f32 %v737_v17, 0.0  ;;  %v684_v23 = vld [vmem:[#allocation2 + $0x50] sm:$0xff]  ;;  %v712_v24 = vmul.f32 %v9190_v33, %v685_v20  ;;  %v1228_v17 = vld [vmem:[%s12521_s3 + $0x40] sm:$0xff] }
 0x107   : > { %666 = vst.msk [vmem:[#allocation2 + $0x70] sm:$0xff] %vm651_vm1, %v612_v21  ;;  %v758_v25 = vmax.f32 %v736_v19, 0.0  ;;  %v711_v26 = vmul.f32 %v9190_v33, %v684_v23  ;;  %v1229_v19 = vld [vmem:[%s12521_s3 + $0x48] sm:$0xff]  ;;  %v1230_v20 = vld [vmem:[%s12521_s3 + $0x50] sm:$0xff] }
 0x108   : > { %v739_v27 = vadd.f32 %v9195_v35, %v712_v24  ;;  %v8799_v21 = vpack.c.bf16 %v1230_v20, %v1229_v19 }
 0x109   : > { %v8368_v28 = vpop.f32.mrb[16].mxu0  ;;  %8393 = vmatprep.mubr.msk.f32.mxu1 %vm651_vm1, %v758_v25  ;;  %v738_v29 = vadd.f32 %v9195_v35, %v711_v26  ;;  %v687_v30 = vld [vmem:[#allocation2 + $0x68] sm:$0xff] }
 0x10a   : > { %669 = vst.msk [vmem:[#allocation2 + $0x88] sm:$0xff] %vm651_vm1, %v8368_v28  ;;  %v622_v31 = vpop.f32.mrb[17].mxu0  ;;  %8394 = vmatmul.mubr.msk.f32.gmra.mrb[8].mxu1 %vm651_vm1, %v759_v22  ;;  %v761_v32 = vmax.f32 %v739_v27, 0.0  ;;  %v686_v34 = vld [vmem:[#allocation2 + $0x60] sm:$0xff]  ;;  %v714_v36 = vmul.f32 %v9190_v33, %v687_v30 }
 0x10b   : > { %668 = vst.msk [vmem:[#allocation2 + $0x80] sm:$0xff] %vm651_vm1, %v622_v31  ;;  %v760_v37 = vmax.f32 %v738_v29, 0.0  ;;  %v713_v38 = vmul.f32 %v9190_v33, %v686_v34 }
 0x10c   : > { %v741_v39 = vadd.f32 %v9195_v35, %v714_v36 }
 0x10d   : > { %v8371_v40 = vpop.f32.mrb[18].mxu0  ;;  %8396 = vmatprep.mubr.msk.f32.mxu1 %vm651_vm1, %v760_v37  ;;  %v740_v41 = vadd.f32 %v9195_v35, %v713_v38  ;;  %v689_v42 = vld [vmem:[#allocation2 + $0x78] sm:$0xff] }
 0x10e   : > { %671 = vst.msk [vmem:[#allocation2 + $0x98] sm:$0xff] %vm651_vm1, %v8371_v40  ;;  %v632_v43 = vpop.f32.mrb[19].mxu0  ;;  %8397 = vmatmul.mubr.msk.f32.gmra.mrb[10].mxu1 %vm651_vm1, %v761_v32  ;;  %v763_v44 = vmax.f32 %v741_v39, 0.0  ;;  %v688_v45 = vld [vmem:[#allocation2 + $0x70] sm:$0xff]  ;;  %v716_v46 = vmul.f32 %v9190_v33, %v689_v42 }
 0x10f   : > { %670 = vst.msk [vmem:[#allocation2 + $0x90] sm:$0xff] %vm651_vm1, %v632_v43  ;;  %v762_v47 = vmax.f32 %v740_v41, 0.0  ;;  %v715_v48 = vmul.f32 %v9190_v33, %v688_v45 }
 0x110   : > { %v743_v49 = vadd.f32 %v9195_v35, %v716_v46 }
 0x111   : > { %v8374_v50 = vpop.f32.mrb[20].mxu0  ;;  %8399 = vmatprep.mubr.msk.f32.mxu1 %vm651_vm1, %v762_v47  ;;  %v742_v51 = vadd.f32 %v9195_v35, %v715_v48  ;;  %v691_v52 = vld [vmem:[#allocation2 + $0x88] sm:$0xff] }
 0x112   : > { %673 = vst.msk [vmem:[#allocation2 + $0xa8] sm:$0xff] %vm651_vm1, %v8374_v50  ;;  %v642_v53 = vpop.f32.mrb[21].mxu0  ;;  %8400 = vmatmul.mubr.msk.f32.gmra.mrb[12].mxu1 %vm651_vm1, %v763_v44  ;;  %v765_v54 = vmax.f32 %v743_v49, 0.0  ;;  %v690_v55 = vld [vmem:[#allocation2 + $0x80] sm:$0xff]  ;;  %v718_v56 = vmul.f32 %v9190_v33, %v691_v52 }
 0x113   : > { %672 = vst.msk [vmem:[#allocation2 + $0xa0] sm:$0xff] %vm651_vm1, %v642_v53  ;;  %v764_v57 = vmax.f32 %v742_v51, 0.0  ;;  %v717_v58 = vmul.f32 %v9190_v33, %v690_v55  ;;  %v9327_v49 = vld [vmem:[%s12523_s5 + $0x2] ss:$0 sm:$0xff]  ;;  %v9332_v53 = vld [vmem:[%s12523_s5 + $0x3] ss:$0 sm:$0xff] }
 0x114   : > { %v745_v59 = vadd.f32 %v9195_v35, %v718_v56 }
 0x115   : > { %8402 = vmatprep.mubr.msk.f32.mxu1 %vm651_vm1, %v764_v57  ;;  %v744_v60 = vadd.f32 %v9195_v35, %v717_v58  ;;  %v693_v61 = vld [vmem:[#allocation2 + $0x98] sm:$0xff] }
 0x116   : > { %8403 = vmatmul.mubr.msk.f32.gmra.mrb[14].mxu1 %vm651_vm1, %v765_v54  ;;  %v767_v62 = vmax.f32 %v745_v59, 0.0  ;;  %v692_v63 = vld [vmem:[#allocation2 + $0x90] sm:$0xff]  ;;  %v720_v0 = vmul.f32 %v9190_v33, %v693_v61 }
 0x117   : > { %v766_v1 = vmax.f32 %v744_v60, 0.0  ;;  %v719_v2 = vmul.f32 %v9190_v33, %v692_v63 }
 0x118   : > { %v747_v3 = vadd.f32 %v9195_v35, %v720_v0 }
 0x119   : > { %8405 = vmatprep.mubr.msk.f32.mxu1 %vm651_vm1, %v766_v1  ;;  %v746_v4 = vadd.f32 %v9195_v35, %v719_v2  ;;  %v695_v5 = vld [vmem:[#allocation2 + $0xa8] sm:$0xff] }
 0x11a   : > { %8406 = vmatmul.mubr.msk.f32.gmra.mrb[16].mxu1 %vm651_vm1, %v767_v62  ;;  %v769_v6 = vmax.f32 %v747_v3, 0.0  ;;  %v694_v7 = vld [vmem:[#allocation2 + $0xa0] sm:$0xff]  ;;  %v722_v8 = vmul.f32 %v9190_v33, %v695_v5 }
 0x11b   : > { %v768_v9 = vmax.f32 %v746_v4, 0.0  ;;  %v721_v10 = vmul.f32 %v9190_v33, %v694_v7  ;;  %v1226_v33 = vld [vmem:[%s12521_s3 + $0x30] sm:$0xff] }
 0x11c   : > { %v749_v11 = vadd.f32 %v9195_v35, %v722_v8  ;;  %v8791_v16 = vpack.c.bf16 %v1226_v33, %v1225_v15 }
 0x11d   : > { %8408 = vmatprep.mubr.msk.f32.mxu1 %vm651_vm1, %v768_v9  ;;  %v748_v12 = vadd.f32 %v9195_v35, %v721_v10  ;;  %v1227_v35 = vld [vmem:[%s12521_s3 + $0x38] sm:$0xff] }
 0x11e   : > { %8409 = vmatmul.mubr.msk.f32.gmra.mrb[18].mxu1 %vm651_vm1, %v769_v6  ;;  %v771_v13 = vmax.f32 %v749_v11, 0.0  ;;  %v8795_v18 = vpack.c.bf16 %v1228_v17, %v1227_v35  ;;  %8792 = vmatprep.subr.bf16.mxu0 %v8791_v16 }
 0x11f   : > { %v770_v14 = vmax.f32 %v748_v12, 0.0  ;;  %8794 = vmatpush3.bf16.msra.mxu0 %v8791_v16 }
 0x120   : > { %8796 = vmatprep.subr.bf16.mxu0 %v8795_v18 }
 0x121   : > { %8411 = vmatprep.mubr.msk.f32.mxu1 %vm651_vm1, %v770_v14 }
 0x122   : > { %8412 = vmatmul.mubr.msk.f32.gmra.mrb[20].mxu1 %vm651_vm1, %v771_v13 }
 0x123   : > { %8798 = vmatpush3.bf16.msra.mxu0 %v8795_v18 }
 0x124   : > { %8800 = vmatprep.subr.bf16.mxu0 %v8799_v21 }
 0x127   : > { %8802 = vmatpush3.bf16.msra.mxu0 %v8799_v21 }
 0x1cd   : > { %v8383_v22 = vpop.f32.mrb[0].mxu1 }
 0x1ce   : > { %v907_v23 = vpop.f32.mrb[1].mxu1 }
 0x1cf   : > { %1038 = vrot.lane.b32.xlu0 %v907_v23, %s9033_s29 }
 0x1d1   : > { %v8386_v24 = vpop.f32.mrb[2].mxu1 }
 0x1d2   : > { %v917_v25 = vpop.f32.mrb[3].mxu1 }
 0x1d3   : > { %1040 = vrot.lane.b32.xlu0 %v8383_v22, %s9033_s29  ;;  %1042 = vrot.lane.b32.xlu1 %v917_v25, %s9033_s29 }
 0x1d5   : > { %v8389_v26 = vpop.f32.mrb[4].mxu1 }
 0x1d6   : > { %v927_v27 = vpop.f32.mrb[5].mxu1 }
 0x1d7   : > { %1044 = vrot.lane.b32.xlu1 %v8386_v24, %s9033_s29  ;;  %1046 = vrot.lane.b32.xlu0 %v927_v27, %s9033_s29 }
 0x1d9   : > { %v8392_v28 = vpop.f32.mrb[6].mxu1 }
 0x1da   : > { %v937_v29 = vpop.f32.mrb[7].mxu1 }
 0x1db   : > { %1048 = vrot.lane.b32.xlu1 %v8389_v26, %s9033_s29  ;;  %1050 = vrot.lane.b32.xlu0 %v937_v29, %s9033_s29 }
 0x1dd   : > { %v8395_v30 = vpop.f32.mrb[8].mxu1 }
 0x1de   : > { %v947_v31 = vpop.f32.mrb[9].mxu1 }
 0x1df   : > { %1052 = vrot.lane.b32.xlu1 %v8392_v28, %s9033_s29  ;;  %1054 = vrot.lane.b32.xlu0 %v947_v31, %s9033_s29 }
 0x1e1   : > { %v8398_v32 = vpop.f32.mrb[10].mxu1 }
 0x1e2   : > { %v957_v34 = vpop.f32.mrb[11].mxu1 }
 0x1e3   : > { %1056 = vrot.lane.b32.xlu1 %v8395_v30, %s9033_s29  ;;  %1058 = vrot.lane.b32.xlu0 %v957_v34, %s9033_s29 }
 0x1e5   : > { %v8401_v36 = vpop.f32.mrb[12].mxu1 }
 0x1e6   : > { %v967_v37 = vpop.f32.mrb[13].mxu1 }
 0x1e7   : > { %1060 = vrot.lane.b32.xlu1 %v8398_v32, %s9033_s29  ;;  %1062 = vrot.lane.b32.xlu0 %v967_v37, %s9033_s29 }
 0x1e9   : > { %v8404_v38 = vpop.f32.mrb[14].mxu1 }
 0x1ea   : > { %v977_v39 = vpop.f32.mrb[15].mxu1 }
 0x1eb   : > { %1064 = vrot.lane.b32.xlu1 %v8401_v36, %s9033_s29  ;;  %1066 = vrot.lane.b32.xlu0 %v977_v39, %s9033_s29 }
 0x1ed   : > { %v8407_v40 = vpop.f32.mrb[16].mxu1 }
 0x1ee   : > { %v987_v41 = vpop.f32.mrb[17].mxu1 }
 0x1ef   : > { %1068 = vrot.lane.b32.xlu1 %v8404_v38, %s9033_s29  ;;  %1070 = vrot.lane.b32.xlu0 %v987_v41, %s9033_s29 }
 0x1f1   : > { %v8410_v42 = vpop.f32.mrb[18].mxu1 }
 0x1f2   : > { %v997_v43 = vpop.f32.mrb[19].mxu1 }
 0x1f3   : > { %1072 = vrot.lane.b32.xlu1 %v8407_v40, %s9033_s29  ;;  %1074 = vrot.lane.b32.xlu0 %v997_v43, %s9033_s29 }
 0x1f5   : > { %v8413_v44 = vpop.f32.mrb[20].mxu1 }
 0x1f6   : > { %v1007_v45 = vpop.f32.mrb[21].mxu1 }
 0x1f7   : > { %1076 = vrot.lane.b32.xlu1 %v8410_v42, %s9033_s29  ;;  %1078 = vrot.lane.b32.xlu0 %v1007_v45, %s9033_s29 }
 0x1fb   : > { %1080 = vrot.lane.b32.xlu1 %v8413_v44, %s9033_s29 }
 0x241   : > { %v1039_v46 = vpop.permute.xlu0 %1038 }
 0x242   : > { %1105 = vst.msk [vmem:[#allocation2] sm:$0xff] %vm1104_vm2, %v1039_v46 }
 0x245   : > { %v1041_v47 = vpop.permute.xlu0 %1040  ;;  %v1043_v48 = vpop.permute.xlu1 %1042 }
 0x246   : > { %1106 = vst.msk [vmem:[#allocation2 + $0x8] sm:$0xff] %vm1104_vm2, %v1041_v47  ;;  %1107 = vst.msk [vmem:[#allocation2 + $0x10] sm:$0xff] %vm1104_vm2, %v1043_v48 }
 0x249   : > { %v1045_v50 = vpop.permute.xlu1 %1044  ;;  %v1047_v51 = vpop.permute.xlu0 %1046  ;;  %v1127_v52 = vld [vmem:[#allocation2] sm:$0xff] }
 0x24a   : > { %1108 = vst.msk [vmem:[#allocation2 + $0x18] sm:$0xff] %vm1104_vm2, %v1045_v50  ;;  %1109 = vst.msk [vmem:[#allocation2 + $0x20] sm:$0xff] %vm1104_vm2, %v1047_v51  ;;  %v1154_v54 = vmul.f32 %v9327_v49, %v1127_v52 }
 0x24c   : > { %v1181_v55 = vadd.f32 %v9332_v53, %v1154_v54 }
 0x24d   : > { %v1049_v56 = vpop.permute.xlu1 %1048  ;;  %v1051_v57 = vpop.permute.xlu0 %1050  ;;  %v1128_v58 = vld [vmem:[#allocation2 + $0x8] sm:$0xff]  ;;  %v1129_v59 = vld [vmem:[#allocation2 + $0x10] sm:$0xff] }
 0x24e   : > { %1110 = vst.msk [vmem:[#allocation2 + $0x28] sm:$0xff] %vm1104_vm2, %v1049_v56  ;;  %1111 = vst.msk [vmem:[#allocation2 + $0x30] sm:$0xff] %vm1104_vm2, %v1051_v57  ;;  %v1203_v60 = vmax.f32 %v1181_v55, 0.0  ;;  %v1155_v61 = vmul.f32 %v9327_v49, %v1128_v58  ;;  %v1156_v62 = vmul.f32 %v9327_v49, %v1129_v59 }
 0x250   : > { %8426 = vmatprep.mubr.msk.f32.mxu0 %vm1231_vm3, %v1203_v60  ;;  %v1182_v63 = vadd.f32 %v9332_v53, %v1155_v61  ;;  %v1183_v0 = vadd.f32 %v9332_v53, %v1156_v62 }
 0x251   : > { %v1053_v1 = vpop.permute.xlu1 %1052  ;;  %v1055_v2 = vpop.permute.xlu0 %1054  ;;  %v1130_v3 = vld [vmem:[#allocation2 + $0x18] sm:$0xff]  ;;  %v1131_v4 = vld [vmem:[#allocation2 + $0x20] sm:$0xff] }
 0x252   : > { %1112 = vst.msk [vmem:[#allocation2 + $0x38] sm:$0xff] %vm1104_vm2, %v1053_v1  ;;  %1113 = vst.msk [vmem:[#allocation2 + $0x40] sm:$0xff] %vm1104_vm2, %v1055_v2  ;;  %v1204_v5 = vmax.f32 %v1182_v63, 0.0  ;;  %v1205_v6 = vmax.f32 %v1183_v0, 0.0  ;;  %v1157_v7 = vmul.f32 %v9327_v49, %v1130_v3  ;;  %v1158_v8 = vmul.f32 %v9327_v49, %v1131_v4 }
 0x254   : > { %8427 = vmatmul.mubr.msk.f32.vlgmr.msra.gmra.mrb[22].mxu0 %vm1231_vm3, %v1204_v5  ;;  %v1184_v9 = vadd.f32 %v9332_v53, %v1157_v7  ;;  %v1185_v10 = vadd.f32 %v9332_v53, %v1158_v8 }
 0x255   : > { %8429 = vmatprep.mubr.msk.f32.mxu0 %vm1231_vm3, %v1205_v6  ;;  %v1057_v11 = vpop.permute.xlu1 %1056  ;;  %v1059_v12 = vpop.permute.xlu0 %1058  ;;  %v1132_v13 = vld [vmem:[#allocation2 + $0x28] sm:$0xff]  ;;  %v1133_v14 = vld [vmem:[#allocation2 + $0x30] sm:$0xff] }
 0x256   : > { %1114 = vst.msk [vmem:[#allocation2 + $0x48] sm:$0xff] %vm1104_vm2, %v1057_v11  ;;  %1115 = vst.msk [vmem:[#allocation2 + $0x50] sm:$0xff] %vm1104_vm2, %v1059_v12  ;;  %v1206_v15 = vmax.f32 %v1184_v9, 0.0  ;;  %v1207_v33 = vmax.f32 %v1185_v10, 0.0  ;;  %v1159_v35 = vmul.f32 %v9327_v49, %v1132_v13  ;;  %v1160_v16 = vmul.f32 %v9327_v49, %v1133_v14 }
 0x258   : > { %8430 = vmatmul.mubr.msk.f32.gmra.mrb[24].mxu0 %vm1231_vm3, %v1206_v15  ;;  %v1186_v17 = vadd.f32 %v9332_v53, %v1159_v35  ;;  %v1187_v18 = vadd.f32 %v9332_v53, %v1160_v16 }
 0x259   : > { %8432 = vmatprep.mubr.msk.f32.mxu0 %vm1231_vm3, %v1207_v33  ;;  %v1061_v19 = vpop.permute.xlu1 %1060  ;;  %v1063_v20 = vpop.permute.xlu0 %1062  ;;  %v1134_v21 = vld [vmem:[#allocation2 + $0x38] sm:$0xff]  ;;  %v1135_v22 = vld [vmem:[#allocation2 + $0x40] sm:$0xff] }
 0x25a   : > { %1116 = vst.msk [vmem:[#allocation2 + $0x58] sm:$0xff] %vm1104_vm2, %v1061_v19  ;;  %1117 = vst.msk [vmem:[#allocation2 + $0x60] sm:$0xff] %vm1104_vm2, %v1063_v20  ;;  %v1208_v23 = vmax.f32 %v1186_v17, 0.0  ;;  %v1209_v24 = vmax.f32 %v1187_v18, 0.0  ;;  %v1161_v25 = vmul.f32 %v9327_v49, %v1134_v21  ;;  %v1162_v26 = vmul.f32 %v9327_v49, %v1135_v22 }
 0x25c   : > { %8433 = vmatmul.mubr.msk.f32.gmra.mrb[26].mxu0 %vm1231_vm3, %v1208_v23  ;;  %v1188_v27 = vadd.f32 %v9332_v53, %v1161_v25  ;;  %v1189_v28 = vadd.f32 %v9332_v53, %v1162_v26 }
 0x25d   : > { %8435 = vmatprep.mubr.msk.f32.mxu0 %vm1231_vm3, %v1209_v24  ;;  %v1065_v29 = vpop.permute.xlu1 %1064  ;;  %v1067_v30 = vpop.permute.xlu0 %1066  ;;  %v1136_v31 = vld [vmem:[#allocation2 + $0x48] sm:$0xff]  ;;  %v1137_v32 = vld [vmem:[#allocation2 + $0x50] sm:$0xff] }
 0x25e   : > { %1118 = vst.msk [vmem:[#allocation2 + $0x68] sm:$0xff] %vm1104_vm2, %v1065_v29  ;;  %1119 = vst.msk [vmem:[#allocation2 + $0x70] sm:$0xff] %vm1104_vm2, %v1067_v30  ;;  %v1210_v34 = vmax.f32 %v1188_v27, 0.0  ;;  %v1211_v36 = vmax.f32 %v1189_v28, 0.0  ;;  %v1163_v37 = vmul.f32 %v9327_v49, %v1136_v31  ;;  %v1164_v38 = vmul.f32 %v9327_v49, %v1137_v32  ;;  %v1682_v30 = vld [vmem:[%s12521_s3 + $0x58] sm:$0xff]  ;;  %v1683_v31 = vld [vmem:[%s12521_s3 + $0x60] sm:$0xff] }
 0x25f   : > { %v8803_v32 = vpack.c.bf16 %v1683_v31, %v1682_v30  ;;  %v404_v30 = vld [vmem:[%s12519_s1 + $0x98] sm:$0xff] }
 0x260   : > { %8436 = vmatmul.mubr.msk.f32.gmra.mrb[28].mxu0 %vm1231_vm3, %v1210_v34  ;;  %v1190_v39 = vadd.f32 %v9332_v53, %v1163_v37  ;;  %v1191_v40 = vadd.f32 %v9332_v53, %v1164_v38  ;;  %v1687_v37 = vld [vmem:[%s12521_s3 + $0x80] sm:$0xff] }
 0x261   : > { %8438 = vmatprep.mubr.msk.f32.mxu0 %vm1231_vm3, %v1211_v36  ;;  %v1069_v41 = vpop.permute.xlu1 %1068  ;;  %v1071_v42 = vpop.permute.xlu0 %1070  ;;  %v1138_v43 = vld [vmem:[#allocation2 + $0x58] sm:$0xff]  ;;  %v1139_v44 = vld [vmem:[#allocation2 + $0x60] sm:$0xff]  ;;  %8804 = vmatprep.subr.bf16.mxu1 %v8803_v32 }
 0x262   : > { %1120 = vst.msk [vmem:[#allocation2 + $0x78] sm:$0xff] %vm1104_vm2, %v1069_v41  ;;  %1121 = vst.msk [vmem:[#allocation2 + $0x80] sm:$0xff] %vm1104_vm2, %v1071_v42  ;;  %v1212_v45 = vmax.f32 %v1190_v39, 0.0  ;;  %v1213_v46 = vmax.f32 %v1191_v40, 0.0  ;;  %v1165_v47 = vmul.f32 %v9327_v49, %v1138_v43  ;;  %v1166_v48 = vmul.f32 %v9327_v49, %v1139_v44  ;;  %v1686_v36 = vld [vmem:[%s12521_s3 + $0x78] sm:$0xff]  ;;  %8806 = vmatpush3.bf16.msra.mxu1 %v8803_v32  ;;  %v1688_v39 = vld [vmem:[%s12521_s3 + $0x88] sm:$0xff] }
 0x263   : > { %v8811_v38 = vpack.c.bf16 %v1687_v37, %v1686_v36  ;;  %v1689_v40 = vld [vmem:[%s12521_s3 + $0x90] sm:$0xff]  ;;  %v1690_v42 = vld [vmem:[%s12521_s3 + $0x98] sm:$0xff] }
 0x264   : > { %8439 = vmatmul.mubr.msk.f32.gmra.mrb[30].mxu0 %vm1231_vm3, %v1212_v45  ;;  %v1192_v50 = vadd.f32 %v9332_v53, %v1165_v47  ;;  %v1193_v51 = vadd.f32 %v9332_v53, %v1166_v48  ;;  %v8815_v41 = vpack.c.bf16 %v1689_v40, %v1688_v39  ;;  %v405_v39 = vld [vmem:[%s12519_s1 + $0xa0] sm:$0xff]  ;;  %v406_v40 = vld [vmem:[%s12519_s1 + $0xa8] sm:$0xff] }
 0x265   : > { %8441 = vmatprep.mubr.msk.f32.mxu0 %vm1231_vm3, %v1213_v46  ;;  %v1073_v52 = vpop.permute.xlu1 %1072  ;;  %v1075_v54 = vpop.permute.xlu0 %1074  ;;  %v1140_v55 = vld [vmem:[#allocation2 + $0x68] sm:$0xff]  ;;  %v1141_v56 = vld [vmem:[#allocation2 + $0x70] sm:$0xff] }
 0x266   : > { %1122 = vst.msk [vmem:[#allocation2 + $0x88] sm:$0xff] %vm1104_vm2, %v1073_v52  ;;  %1123 = vst.msk [vmem:[#allocation2 + $0x90] sm:$0xff] %vm1104_vm2, %v1075_v54  ;;  %v1214_v57 = vmax.f32 %v1192_v50, 0.0  ;;  %v1215_v58 = vmax.f32 %v1193_v51, 0.0  ;;  %v1167_v59 = vmul.f32 %v9327_v49, %v1140_v55  ;;  %v1168_v60 = vmul.f32 %v9327_v49, %v1141_v56 }
 0x268   : > { %8442 = vmatmul.mubr.msk.f32.gmra.mrb[32].mxu0 %vm1231_vm3, %v1214_v57  ;;  %v1194_v61 = vadd.f32 %v9332_v53, %v1167_v59  ;;  %v1195_v62 = vadd.f32 %v9332_v53, %v1168_v60 }
 0x269   : > { %8444 = vmatprep.mubr.msk.f32.mxu0 %vm1231_vm3, %v1215_v58  ;;  %v1077_v63 = vpop.permute.xlu1 %1076  ;;  %v1079_v0 = vpop.permute.xlu0 %1078  ;;  %v1142_v1 = vld [vmem:[#allocation2 + $0x78] sm:$0xff]  ;;  %v1143_v2 = vld [vmem:[#allocation2 + $0x80] sm:$0xff] }
 0x26a   : > { %1124 = vst.msk [vmem:[#allocation2 + $0x98] sm:$0xff] %vm1104_vm2, %v1077_v63  ;;  %1125 = vst.msk [vmem:[#allocation2 + $0xa0] sm:$0xff] %vm1104_vm2, %v1079_v0  ;;  %v1216_v3 = vmax.f32 %v1194_v61, 0.0  ;;  %v1217_v4 = vmax.f32 %v1195_v62, 0.0  ;;  %v1169_v5 = vmul.f32 %v9327_v49, %v1142_v1  ;;  %v1170_v6 = vmul.f32 %v9327_v49, %v1143_v2 }
 0x26c   : > { %8445 = vmatmul.mubr.msk.f32.gmra.mrb[34].mxu0 %vm1231_vm3, %v1216_v3  ;;  %v1196_v7 = vadd.f32 %v9332_v53, %v1169_v5  ;;  %v1197_v8 = vadd.f32 %v9332_v53, %v1170_v6  ;;  %v2401_v3 = vld [vmem:[%s12521_s3 + $0x100] sm:$0xff]  ;;  %v9035_v6 = vmov 0  }
 0x26d   : > { %8447 = vmatprep.mubr.msk.f32.mxu0 %vm1231_vm3, %v1217_v4  ;;  %v1081_v9 = vpop.permute.xlu1 %1080  ;;  %v1144_v10 = vld [vmem:[#allocation2 + $0x88] sm:$0xff]  ;;  %v1145_v11 = vld [vmem:[#allocation2 + $0x90] sm:$0xff]  ;;  %9000 = vset.pattern.permute.xlu1 %v9035_v6 }
 0x26e   : > { %1126 = vst.msk [vmem:[#allocation2 + $0xa8] sm:$0xff] %vm1104_vm2, %v1081_v9  ;;  %v1218_v12 = vmax.f32 %v1196_v7, 0.0  ;;  %v1219_v13 = vmax.f32 %v1197_v8, 0.0  ;;  %v1171_v14 = vmul.f32 %v9327_v49, %v1144_v10  ;;  %v1172_v15 = vmul.f32 %v9327_v49, %v1145_v11  ;;  %v2402_v4 = vld [vmem:[%s12521_s3 + $0x108] sm:$0xff]  ;;  %8999 = vset.pattern.permute.xlu0 %v9035_v6  ;;  %v385_v8 = vld [vmem:[%s12519_s1] sm:$0xff]  ;;  %v387_v10 = vld [vmem:[%s12519_s1 + $0x10] sm:$0xff] }
 0x26f   : > { %v9474_v5 = vpack.c.bf16 %v2402_v4, %v2401_v3  ;;  %v386_v7 = vld [vmem:[%s12519_s1 + $0x8] sm:$0xff]  ;;  %v12529_v9 = vmov 0.0   ;;  %v388_v11 = vld [vmem:[%s12519_s1 + $0x18] sm:$0xff] }
 0x270   : > { %8448 = vmatmul.mubr.msk.f32.gmra.mrb[36].mxu0 %vm1231_vm3, %v1218_v12  ;;  %v1198_v33 = vadd.f32 %v9332_v53, %v1171_v14  ;;  %v1199_v35 = vadd.f32 %v9332_v53, %v1172_v15  ;;  %359 = vst.msk [vmem:[#allocation4] sm:$0xff] %vm358_vm4, %v12529_v9  ;;  %360 = vst.msk [vmem:[#allocation4 + $0x8] sm:$0xff] %vm358_vm4, %v12529_v9  ;;  %v389_v12 = vld [vmem:[%s12519_s1 + $0x20] sm:$0xff]  ;;  %v391_v14 = vld [vmem:[%s12519_s1 + $0x30] sm:$0xff] }
 0x271   : > { %8450 = vmatprep.mubr.msk.f32.mxu0 %vm1231_vm3, %v1219_v13  ;;  %v1146_v16 = vld [vmem:[#allocation2 + $0x98] sm:$0xff]  ;;  %v1147_v17 = vld [vmem:[#allocation2 + $0xa0] sm:$0xff]  ;;  %361 = vst.msk [vmem:[#allocation4 + $0xc0] sm:$0xff] %vm358_vm4, %v12529_v9  ;;  %362 = vst.msk [vmem:[#allocation4 + $0xc8] sm:$0xff] %vm358_vm4, %v12529_v9 }
 0x272   : > { %v1220_v18 = vmax.f32 %v1198_v33, 0.0  ;;  %v1221_v19 = vmax.f32 %v1199_v35, 0.0  ;;  %v1173_v20 = vmul.f32 %v9327_v49, %v1146_v16  ;;  %v1174_v21 = vmul.f32 %v9327_v49, %v1147_v17  ;;  %v390_v13 = vld [vmem:[%s12519_s1 + $0x28] sm:$0xff]  ;;  %v392_v15 = vld [vmem:[%s12519_s1 + $0x38] sm:$0xff]  ;;  %v393_v33 = vld [vmem:[%s12519_s1 + $0x40] sm:$0xff] }
 0x273   : > { %v394_v35 = vld [vmem:[%s12519_s1 + $0x48] sm:$0xff]  ;;  %v395_v16 = vld [vmem:[%s12519_s1 + $0x50] sm:$0xff]  ;;  %v396_v17 = vld [vmem:[%s12519_s1 + $0x58] sm:$0xff] }
 0x274   : > { %8451 = vmatmul.mubr.msk.f32.gmra.mrb[38].mxu0 %vm1231_vm3, %v1220_v18  ;;  %v1200_v22 = vadd.f32 %v9332_v53, %v1173_v20  ;;  %v1201_v23 = vadd.f32 %v9332_v53, %v1174_v21  ;;  %v397_v18 = vld [vmem:[%s12519_s1 + $0x60] sm:$0xff]  ;;  %v399_v20 = vld [vmem:[%s12519_s1 + $0x70] sm:$0xff]  ;;  %v400_v21 = vld [vmem:[%s12519_s1 + $0x78] sm:$0xff] }
 0x275   : > { %8453 = vmatprep.mubr.msk.f32.mxu0 %vm1231_vm3, %v1221_v19  ;;  %v1148_v24 = vld [vmem:[#allocation2 + $0xa8] sm:$0xff] }
 0x276   : > { %v1222_v25 = vmax.f32 %v1200_v22, 0.0  ;;  %v1223_v26 = vmax.f32 %v1201_v23, 0.0  ;;  %v1175_v27 = vmul.f32 %v9327_v49, %v1148_v24  ;;  %v1684_v49 = vld [vmem:[%s12521_s3 + $0x68] sm:$0xff]  ;;  %v401_v24 = vld [vmem:[%s12519_s1 + $0x80] sm:$0xff] }
 0x277   : > { %v398_v19 = vld [vmem:[%s12519_s1 + $0x68] sm:$0xff] }
 0x278   : > { %8454 = vmatmul.mubr.msk.f32.gmra.mrb[40].mxu0 %vm1231_vm3, %v1222_v25  ;;  %v1202_v28 = vadd.f32 %v9332_v53, %v1175_v27  ;;  %v1685_v53 = vld [vmem:[%s12521_s3 + $0x70] sm:$0xff]  ;;  %v402_v25 = vld [vmem:[%s12519_s1 + $0x88] sm:$0xff] }
 0x279   : > { %8456 = vmatprep.mubr.msk.f32.mxu0 %vm1231_vm3, %v1223_v26  ;;  %v8807_v34 = vpack.c.bf16 %v1685_v53, %v1684_v49  ;;  %v9557_v49 = vld [vmem:[%s12523_s5 + $0x5] ss:$0 sm:$0xff] }
 0x27a   : > { %v1224_v29 = vmax.f32 %v1202_v28, 0.0  ;;  %v9546_v28 = vld [vmem:[%s12523_s5 + $0x4] ss:$0 sm:$0xff] }
 0x27b   : > { %8808 = vmatprep.subr.bf16.mxu1 %v8807_v34 }
 0x27c   : > { %8457 = vmatmul.mubr.msk.f32.gmra.mrb[42].mxu0 %vm1231_vm3, %v1224_v29  ;;  %8810 = vmatpush3.bf16.msra.mxu1 %v8807_v34  ;;  %v403_v29 = vld [vmem:[%s12519_s1 + $0x90] sm:$0xff] }
 0x27d   : > { %8812 = vmatprep.subr.bf16.mxu1 %v8811_v38 }
 0x280   : > { %8814 = vmatpush3.bf16.msra.mxu1 %v8811_v38 }
 0x281   : > { %8816 = vmatprep.subr.bf16.mxu1 %v8815_v41 }
 0x284   : > { %8818 = vmatpush3.bf16.msra.mxu1 %v8815_v41 }
 0x285   : > { %8475 = vmatprep.subr.mxu1 %v1690_v42 }
 0x288   : > { %8476 = vmatpush3.msra.mxu1 %v1690_v42 }
 0x289   : > { %8844 = vmatprep.subr.bf16.mxu1 %v9474_v5 }
 0x327   : > { %v8428_v43 = vpop.f32.mrb[22].mxu0 }
 0x328   : > { %v1364_v44 = vpop.f32.mrb[23].mxu0  ;;  %1497 = vrot.lane.b32.xlu1 %v8428_v43, %s9034_s18 }
 0x329   : > { %1495 = vrot.lane.b32.xlu0 %v1364_v44, %s9034_s18 }
 0x32b   : > { %v8431_v45 = vpop.f32.mrb[24].mxu0 }
 0x32c   : > { %v1374_v46 = vpop.f32.mrb[25].mxu0  ;;  %1501 = vrot.lane.b32.xlu1 %v8431_v45, %s9034_s18 }
 0x32d   : > { %1499 = vrot.lane.b32.xlu0 %v1374_v46, %s9034_s18 }
 0x32f   : > { %v8434_v47 = vpop.f32.mrb[26].mxu0 }
 0x330   : > { %v1384_v48 = vpop.f32.mrb[27].mxu0  ;;  %1505 = vrot.lane.b32.xlu1 %v8434_v47, %s9034_s18 }
 0x331   : > { %1503 = vrot.lane.b32.xlu0 %v1384_v48, %s9034_s18 }
 0x333   : > { %v8437_v50 = vpop.f32.mrb[28].mxu0 }
 0x334   : > { %v1394_v51 = vpop.f32.mrb[29].mxu0  ;;  %1509 = vrot.lane.b32.xlu1 %v8437_v50, %s9034_s18 }
 0x335   : > { %1507 = vrot.lane.b32.xlu0 %v1394_v51, %s9034_s18 }
 0x337   : > { %v8440_v52 = vpop.f32.mrb[30].mxu0 }
 0x338   : > { %v1404_v54 = vpop.f32.mrb[31].mxu0  ;;  %1513 = vrot.lane.b32.xlu1 %v8440_v52, %s9034_s18  ;;  %v9576_v52 = vld [vmem:[#allocation4 + $0x3] sm:$0xff] }
 0x339   : > { %1511 = vrot.lane.b32.xlu0 %v1404_v54, %s9034_s18 }
 0x33b   : > { %v8443_v55 = vpop.f32.mrb[32].mxu0 }
 0x33c   : > { %v1414_v56 = vpop.f32.mrb[33].mxu0  ;;  %1517 = vrot.lane.b32.xlu1 %v8443_v55, %s9034_s18 }
 0x33d   : > { %1515 = vrot.lane.b32.xlu0 %v1414_v56, %s9034_s18 }
 0x33f   : > { %v8446_v57 = vpop.f32.mrb[34].mxu0 }
 0x340   : > { %v1424_v58 = vpop.f32.mrb[35].mxu0  ;;  %1521 = vrot.lane.b32.xlu1 %v8446_v57, %s9034_s18  ;;  %v9580_v57 = vld [vmem:[#allocation4 + $0xc5] sm:$0xff] }
 0x341   : > { %1519 = vrot.lane.b32.xlu0 %v1424_v58, %s9034_s18 }
 0x343   : > { %v8449_v59 = vpop.f32.mrb[36].mxu0 }
 0x344   : > { %v1434_v60 = vpop.f32.mrb[37].mxu0  ;;  %1525 = vrot.lane.b32.xlu1 %v8449_v59, %s9034_s18 }
 0x345   : > { %1523 = vrot.lane.b32.xlu0 %v1434_v60, %s9034_s18 }
 0x347   : > { %v8452_v61 = vpop.f32.mrb[38].mxu0 }
 0x348   : > { %v1444_v62 = vpop.f32.mrb[39].mxu0  ;;  %1529 = vrot.lane.b32.xlu1 %v8452_v61, %s9034_s18 }
 0x349   : > { %1527 = vrot.lane.b32.xlu0 %v1444_v62, %s9034_s18 }
 0x34b   : > { %v8455_v63 = vpop.f32.mrb[40].mxu0 }
 0x34c   : > { %v1454_v0 = vpop.f32.mrb[41].mxu0  ;;  %1533 = vrot.lane.b32.xlu1 %v8455_v63, %s9034_s18 }
 0x34d   : > { %1531 = vrot.lane.b32.xlu0 %v1454_v0, %s9034_s18 }
 0x34f   : > { %v8458_v1 = vpop.f32.mrb[42].mxu0 }
 0x350   : > { %1537 = vrot.lane.b32.xlu1 %v8458_v1, %s9034_s18  ;;  %v1464_v2 = vpop.f32.mrb[43].mxu0  ;;  %v9591_v1 = vld [vmem:[#allocation4 + $0x4] sm:$0xff] }
 0x351   : > { %1535 = vrot.lane.b32.xlu0 %v1464_v2, %s9034_s18 }
 0x354   : > { %2710 = vperm.xlu1 %9000, %v386_v7  }
 0x355   : > { %2705 = vperm.xlu0 %8999, %v385_v8  }
 0x358   : > { %2715 = vperm.xlu1 %9000, %v387_v10  }
 0x359   : > { %2720 = vperm.xlu0 %8999, %v388_v11  }
 0x35c   : > { %2725 = vperm.xlu1 %9000, %v389_v12  }
 0x35d   : > { %2730 = vperm.xlu0 %8999, %v390_v13  }
 0x360   : > { %2735 = vperm.xlu1 %9000, %v391_v14   ;;  %v9605_v14 = vld [vmem:[#allocation4 + $0xc4] sm:$0xff] }
 0x361   : > { %2740 = vperm.xlu0 %8999, %v392_v15  }
 0x364   : > { %2745 = vperm.xlu1 %9000, %v393_v33  }
 0x365   : > { %2750 = vperm.xlu0 %8999, %v394_v35  }
 0x368   : > { %2755 = vperm.xlu1 %9000, %v395_v16  }
 0x369   : > { %2760 = vperm.xlu0 %8999, %v396_v17  }
 0x36c   : > { %2765 = vperm.xlu1 %9000, %v397_v18  }
 0x36d   : > { %2770 = vperm.xlu0 %8999, %v398_v19  }
 0x370   : > { %2775 = vperm.xlu1 %9000, %v399_v20  }
 0x371   : > { %2780 = vperm.xlu0 %8999, %v400_v21  }
 0x374   : > { %2785 = vperm.xlu1 %9000, %v401_v24  }
 0x375   : > { %2790 = vperm.xlu0 %8999, %v402_v25  }
 0x378   : > { %2795 = vperm.xlu1 %9000, %v403_v29  }
 0x379   : > { %2800 = vperm.xlu0 %8999, %v404_v30  }
 0x37c   : > { %2805 = vperm.xlu1 %9000, %v405_v39  }
 0x37d   : > { %2810 = vperm.xlu0 %8999, %v406_v40  }
 0x380   : > { %3195 = vrot.lane.b32.xlu1 %v9576_v52, %s9037_s27 }
 0x381   : > { %3991 = vrot.lane.b32.xlu0 %v9580_v57, %s9038_s28 }
 0x384   : > { %3327 = vrot.lane.b32.xlu1 %v9591_v1, %s9039_s30 }
 0x388   : > { %3859 = vrot.lane.b32.xlu1 %v9605_v14, %s9041_s12 }
 0x38c   : > { %4767 = vrot.lane.b32.xlu1 %v9576_v52, %s9037_s27 }
 0x390   : > { %4899 = vrot.lane.b32.xlu1 %v9591_v1, %s9039_s30 }
 0x394   : > { %5431 = vrot.lane.b32.xlu1 %v9605_v14, %s9041_s12 }
 0x398   : > { %6335 = vrot.lane.b32.xlu1 %v9576_v52, %s9037_s27 }
 0x39a   : > { %v1498_v22 = vpop.permute.xlu1 %1497 }
 0x39b   : > { %1563 = vst.msk [vmem:[#allocation2 + $0x8] sm:$0xff] %vm1561_vm5, %v1498_v22  ;;  %v1496_v23 = vpop.permute.xlu0 %1495 }
 0x39c   : > { %1562 = vst.msk [vmem:[#allocation2] sm:$0xff] %vm1561_vm5, %v1496_v23  ;;  %6467 = vrot.lane.b32.xlu1 %v9591_v1, %s9039_s30 }
 0x39e   : > { %v1502_v26 = vpop.permute.xlu1 %1501 }
 0x39f   : > { %1565 = vst.msk [vmem:[#allocation2 + $0x18] sm:$0xff] %vm1561_vm5, %v1502_v26  ;;  %v1500_v27 = vpop.permute.xlu0 %1499 }
 0x3a0   : > { %1564 = vst.msk [vmem:[#allocation2 + $0x10] sm:$0xff] %vm1561_vm5, %v1500_v27 }
 0x3a2   : > { %v1506_v31 = vpop.permute.xlu1 %1505  ;;  %v1585_v32 = vld [vmem:[#allocation2 + $0x8] sm:$0xff] }
 0x3a3   : > { %1567 = vst.msk [vmem:[#allocation2 + $0x28] sm:$0xff] %vm1561_vm5, %v1506_v31  ;;  %v1504_v53 = vpop.permute.xlu0 %1503  ;;  %v1584_v34 = vld [vmem:[#allocation2] sm:$0xff]  ;;  %v1612_v36 = vmul.f32 %v9546_v28, %v1585_v32 }
 0x3a4   : > { %1566 = vst.msk [vmem:[#allocation2 + $0x20] sm:$0xff] %vm1561_vm5, %v1504_v53  ;;  %v1611_v37 = vmul.f32 %v9546_v28, %v1584_v34 }
 0x3a5   : > { %v1639_v38 = vadd.f32 %v9557_v49, %v1612_v36 }
 0x3a6   : > { %v1510_v41 = vpop.permute.xlu1 %1509  ;;  %v1638_v42 = vadd.f32 %v9557_v49, %v1611_v37  ;;  %v1587_v43 = vld [vmem:[#allocation2 + $0x18] sm:$0xff] }
 0x3a7   : > { %1569 = vst.msk [vmem:[#allocation2 + $0x38] sm:$0xff] %vm1561_vm5, %v1510_v41  ;;  %v1508_v44 = vpop.permute.xlu0 %1507  ;;  %v1586_v45 = vld [vmem:[#allocation2 + $0x10] sm:$0xff]  ;;  %v1614_v46 = vmul.f32 %v9546_v28, %v1587_v43  ;;  %v1661_v50 = vmax.f32 %v1639_v38, 0.0 }
 0x3a8   : > { %1568 = vst.msk [vmem:[#allocation2 + $0x30] sm:$0xff] %vm1561_vm5, %v1508_v44  ;;  %v1660_v47 = vmax.f32 %v1638_v42, 0.0  ;;  %v1613_v48 = vmul.f32 %v9546_v28, %v1586_v45 }
 0x3a9   : > { %v1641_v51 = vadd.f32 %v9557_v49, %v1614_v46 }
 0x3aa   : > { %v1514_v54 = vpop.permute.xlu1 %1513  ;;  %8477 = vmatprep.mubr.msk.f32.mxu1 %vm1691_vm6, %v1660_v47  ;;  %v1640_v55 = vadd.f32 %v9557_v49, %v1613_v48  ;;  %v1589_v56 = vld [vmem:[#allocation2 + $0x28] sm:$0xff] }
 0x3ab   : > { %1571 = vst.msk [vmem:[#allocation2 + $0x48] sm:$0xff] %vm1561_vm5, %v1514_v54  ;;  %8478 = vmatmul.mubr.msk.f32.vlgmr.msra.gmra.mrb[22].mxu1 %vm1691_vm6, %v1661_v50  ;;  %v1512_v58 = vpop.permute.xlu0 %1511  ;;  %v1588_v59 = vld [vmem:[#allocation2 + $0x20] sm:$0xff]  ;;  %v1616_v60 = vmul.f32 %v9546_v28, %v1589_v56  ;;  %v1663_v63 = vmax.f32 %v1641_v51, 0.0 }
 0x3ac   : > { %1570 = vst.msk [vmem:[#allocation2 + $0x40] sm:$0xff] %vm1561_vm5, %v1512_v58  ;;  %v1662_v61 = vmax.f32 %v1640_v55, 0.0  ;;  %v1615_v62 = vmul.f32 %v9546_v28, %v1588_v59  ;;  %8846 = vmatpush3.bf16.msra.mxu1 %v9474_v5  ;;  %v4058_v5 = vld [vmem:[#allocation4 + $0xc6] sm:$0xff] }
 0x3ad   : > { %v1643_v0 = vadd.f32 %v9557_v49, %v1616_v60  ;;  %4123 = vrot.lane.b32.xlu0 %v4058_v5, %s9040_s11 }
 0x3ae   : > { %v1518_v2 = vpop.permute.xlu1 %1517  ;;  %8480 = vmatprep.mubr.msk.f32.mxu1 %vm1691_vm6, %v1662_v61  ;;  %v1642_v3 = vadd.f32 %v9557_v49, %v1615_v62  ;;  %v1591_v4 = vld [vmem:[#allocation2 + $0x38] sm:$0xff] }
 0x3af   : > { %1573 = vst.msk [vmem:[#allocation2 + $0x58] sm:$0xff] %vm1561_vm5, %v1518_v2  ;;  %8481 = vmatmul.mubr.msk.f32.gmra.mrb[24].mxu1 %vm1691_vm6, %v1663_v63  ;;  %v1516_v6 = vpop.permute.xlu0 %1515  ;;  %v1590_v7 = vld [vmem:[#allocation2 + $0x30] sm:$0xff]  ;;  %v1618_v8 = vmul.f32 %v9546_v28, %v1591_v4  ;;  %v1665_v12 = vmax.f32 %v1643_v0, 0.0 }
 0x3b0   : > { %1572 = vst.msk [vmem:[#allocation2 + $0x50] sm:$0xff] %vm1561_vm5, %v1516_v6  ;;  %v1664_v10 = vmax.f32 %v1642_v3, 0.0  ;;  %v1617_v11 = vmul.f32 %v9546_v28, %v1590_v7 }
 0x3b1   : > { %v1645_v13 = vadd.f32 %v9557_v49, %v1618_v8  ;;  %5563 = vrot.lane.b32.xlu0 %v9580_v57, %s9038_s28 }
 0x3b2   : > { %v1522_v15 = vpop.permute.xlu1 %1521  ;;  %8483 = vmatprep.mubr.msk.f32.mxu1 %vm1691_vm6, %v1664_v10  ;;  %v1644_v33 = vadd.f32 %v9557_v49, %v1617_v11  ;;  %v1593_v35 = vld [vmem:[#allocation2 + $0x48] sm:$0xff] }
 0x3b3   : > { %1575 = vst.msk [vmem:[#allocation2 + $0x68] sm:$0xff] %vm1561_vm5, %v1522_v15  ;;  %8484 = vmatmul.mubr.msk.f32.gmra.mrb[26].mxu1 %vm1691_vm6, %v1665_v12  ;;  %v1520_v16 = vpop.permute.xlu0 %1519  ;;  %v1592_v17 = vld [vmem:[#allocation2 + $0x40] sm:$0xff]  ;;  %v1620_v18 = vmul.f32 %v9546_v28, %v1593_v35  ;;  %v1667_v21 = vmax.f32 %v1645_v13, 0.0 }
 0x3b4   : > { %1574 = vst.msk [vmem:[#allocation2 + $0x60] sm:$0xff] %vm1561_vm5, %v1520_v16  ;;  %v1666_v19 = vmax.f32 %v1644_v33, 0.0  ;;  %v1619_v20 = vmul.f32 %v9546_v28, %v1592_v17 }
 0x3b5   : > { %v1647_v22 = vadd.f32 %v9557_v49, %v1620_v18  ;;  %5695 = vrot.lane.b32.xlu0 %v4058_v5, %s9040_s11 }
 0x3b6   : > { %v1526_v23 = vpop.permute.xlu1 %1525  ;;  %8486 = vmatprep.mubr.msk.f32.mxu1 %vm1691_vm6, %v1666_v19  ;;  %v1646_v24 = vadd.f32 %v9557_v49, %v1619_v20  ;;  %v1595_v25 = vld [vmem:[#allocation2 + $0x58] sm:$0xff] }
 0x3b7   : > { %1577 = vst.msk [vmem:[#allocation2 + $0x78] sm:$0xff] %vm1561_vm5, %v1526_v23  ;;  %8487 = vmatmul.mubr.msk.f32.gmra.mrb[28].mxu1 %vm1691_vm6, %v1667_v21  ;;  %v1524_v26 = vpop.permute.xlu0 %1523  ;;  %v1594_v27 = vld [vmem:[#allocation2 + $0x50] sm:$0xff]  ;;  %v1622_v29 = vmul.f32 %v9546_v28, %v1595_v25  ;;  %v1669_v32 = vmax.f32 %v1647_v22, 0.0  ;;  %v9002_v21 = vld [vmem:[%s9128_s23 + $0x8] sm:$0xff]  ;;  %v9004_v22 = vld [vmem:[%s9128_s23 + $0x18] sm:$0xff] }
 0x3b8   : > { %1576 = vst.msk [vmem:[#allocation2 + $0x70] sm:$0xff] %vm1561_vm5, %v1524_v26  ;;  %v1668_v30 = vmax.f32 %v1646_v24, 0.0  ;;  %v1621_v31 = vmul.f32 %v9546_v28, %v1594_v27  ;;  %v9005_v23 = vld [vmem:[%s9128_s23 + $0x20] sm:$0xff]  ;;  %v9006_v24 = vld [vmem:[%s9128_s23 + $0x28] sm:$0xff]  ;;  %v9007_v25 = vld [vmem:[%s9128_s23 + $0x30] sm:$0xff] }
 0x3b9   : > { %v1649_v53 = vadd.f32 %v9557_v49, %v1622_v29  ;;  %6999 = vrot.lane.b32.xlu0 %v9605_v14, %s9041_s12  ;;  %v9008_v26 = vld [vmem:[%s9128_s23 + $0x38] sm:$0xff]  ;;  %v9009_v27 = vld [vmem:[%s9128_s23 + $0x40] sm:$0xff]  ;;  %v9010_v29 = vld [vmem:[%s9128_s23 + $0x48] sm:$0xff] }
 0x3ba   : > { %v1530_v34 = vpop.permute.xlu1 %1529  ;;  %8489 = vmatprep.mubr.msk.f32.mxu1 %vm1691_vm6, %v1668_v30  ;;  %v1648_v36 = vadd.f32 %v9557_v49, %v1621_v31  ;;  %v1597_v37 = vld [vmem:[#allocation2 + $0x68] sm:$0xff]  ;;  %v9011_v30 = vld [vmem:[%s9128_s23 + $0x50] sm:$0xff]  ;;  %v9012_v31 = vld [vmem:[%s9128_s23 + $0x58] sm:$0xff] }
 0x3bb   : > { %1579 = vst.msk [vmem:[#allocation2 + $0x88] sm:$0xff] %vm1561_vm5, %v1530_v34  ;;  %8490 = vmatmul.mubr.msk.f32.gmra.mrb[30].mxu1 %vm1691_vm6, %v1669_v32  ;;  %v1528_v38 = vpop.permute.xlu0 %1527  ;;  %v1596_v39 = vld [vmem:[#allocation2 + $0x60] sm:$0xff]  ;;  %v1624_v40 = vmul.f32 %v9546_v28, %v1597_v37  ;;  %v1671_v43 = vmax.f32 %v1649_v53, 0.0  ;;  %v9014_v53 = vld [vmem:[%s9128_s23 + $0x68] sm:$0xff]  ;;  %v9015_v34 = vld [vmem:[%s9128_s23 + $0x70] sm:$0xff] }
 0x3bc   : > { %1578 = vst.msk [vmem:[#allocation2 + $0x80] sm:$0xff] %vm1561_vm5, %v1528_v38  ;;  %v1670_v41 = vmax.f32 %v1648_v36, 0.0  ;;  %v1623_v42 = vmul.f32 %v9546_v28, %v1596_v39  ;;  %v9013_v32 = vld [vmem:[%s9128_s23 + $0x60] sm:$0xff]  ;;  %v9016_v36 = vld [vmem:[%s9128_s23 + $0x78] sm:$0xff]  ;;  %v9018_v38 = vld [vmem:[%s9128_s23 + $0x88] sm:$0xff] }
 0x3bd   : > { %v1651_v44 = vadd.f32 %v9557_v49, %v1624_v40  ;;  %7131 = vrot.lane.b32.xlu0 %v9580_v57, %s9038_s28  ;;  %v9017_v37 = vld [vmem:[%s9128_s23 + $0x80] sm:$0xff]  ;;  %v9019_v39 = vld [vmem:[%s9128_s23 + $0x90] sm:$0xff]  ;;  %v9020_v40 = vld [vmem:[%s9128_s23 + $0x98] sm:$0xff] }
 0x3be   : > { %v1534_v45 = vpop.permute.xlu1 %1533  ;;  %8492 = vmatprep.mubr.msk.f32.mxu1 %vm1691_vm6, %v1670_v41  ;;  %v1650_v46 = vadd.f32 %v9557_v49, %v1623_v42  ;;  %v1599_v47 = vld [vmem:[#allocation2 + $0x78] sm:$0xff]  ;;  %v9021_v41 = vld [vmem:[%s9128_s23 + $0xa0] sm:$0xff]  ;;  %v9022_v42 = vld [vmem:[%s9128_s23 + $0xa8] sm:$0xff] }
 0x3bf   : > { %1581 = vst.msk [vmem:[#allocation2 + $0x98] sm:$0xff] %vm1561_vm5, %v1534_v45  ;;  %8493 = vmatmul.mubr.msk.f32.gmra.mrb[32].mxu1 %vm1691_vm6, %v1671_v43  ;;  %v1532_v48 = vpop.permute.xlu0 %1531  ;;  %v1598_v50 = vld [vmem:[#allocation2 + $0x70] sm:$0xff]  ;;  %v1626_v51 = vmul.f32 %v9546_v28, %v1599_v47  ;;  %v1673_v56 = vmax.f32 %v1651_v44, 0.0  ;;  %v2142_v43 = vld [vmem:[%s12521_s3 + $0xa0] sm:$0xff]  ;;  %v2143_v44 = vld [vmem:[%s12521_s3 + $0xa8] sm:$0xff] }
 0x3c0   : > { %1580 = vst.msk [vmem:[#allocation2 + $0x90] sm:$0xff] %vm1561_vm5, %v1532_v48  ;;  %v1672_v54 = vmax.f32 %v1650_v46, 0.0  ;;  %v1625_v55 = vmul.f32 %v9546_v28, %v1598_v50  ;;  %v8819_v45 = vpack.c.bf16 %v2143_v44, %v2142_v43  ;;  %v2144_v46 = vld [vmem:[%s12521_s3 + $0xb0] sm:$0xff]  ;;  %v2145_v47 = vld [vmem:[%s12521_s3 + $0xb8] sm:$0xff]  ;;  %v2146_v50 = vld [vmem:[%s12521_s3 + $0xc0] sm:$0xff] }
 0x3c1   : > { %v1653_v58 = vadd.f32 %v9557_v49, %v1626_v51  ;;  %v8823_v48 = vpack.c.bf16 %v2145_v47, %v2144_v46  ;;  %v2147_v51 = vld [vmem:[%s12521_s3 + $0xc8] sm:$0xff] }
 0x3c2   : > { %v1538_v59 = vpop.permute.xlu1 %1537  ;;  %8495 = vmatprep.mubr.msk.f32.mxu1 %vm1691_vm6, %v1672_v54  ;;  %v1652_v60 = vadd.f32 %v9557_v49, %v1625_v55  ;;  %v1601_v61 = vld [vmem:[#allocation2 + $0x88] sm:$0xff]  ;;  %8820 = vmatprep.subr.bf16.mxu0 %v8819_v45  ;;  %v8827_v54 = vpack.c.bf16 %v2147_v51, %v2146_v50  ;;  %v2148_v55 = vld [vmem:[%s12521_s3 + $0xd0] sm:$0xff] }
 0x3c3   : > { %1583 = vst.msk [vmem:[#allocation2 + $0xa8] sm:$0xff] %vm1561_vm5, %v1538_v59  ;;  %8496 = vmatmul.mubr.msk.f32.gmra.mrb[34].mxu1 %vm1691_vm6, %v1673_v56  ;;  %v1536_v62 = vpop.permute.xlu0 %1535  ;;  %v1600_v63 = vld [vmem:[#allocation2 + $0x80] sm:$0xff]  ;;  %v1628_v0 = vmul.f32 %v9546_v28, %v1601_v61  ;;  %v1675_v57 = vmax.f32 %v1653_v58, 0.0  ;;  %8822 = vmatpush3.bf16.msra.mxu0 %v8819_v45  ;;  %v2149_v56 = vld [vmem:[%s12521_s3 + $0xd8] sm:$0xff] }
 0x3c4   : > { %1582 = vst.msk [vmem:[#allocation2 + $0xa0] sm:$0xff] %vm1561_vm5, %v1536_v62  ;;  %v1674_v2 = vmax.f32 %v1652_v60, 0.0  ;;  %v1627_v3 = vmul.f32 %v9546_v28, %v1600_v63  ;;  %8824 = vmatprep.subr.bf16.mxu0 %v8823_v48  ;;  %v8831_v58 = vpack.c.bf16 %v2149_v56, %v2148_v55  ;;  %v2150_v59 = vld [vmem:[%s12521_s3 + $0xe0] sm:$0xff]  ;;  %v2151_v60 = vld [vmem:[%s12521_s3 + $0xe8] sm:$0xff]  ;;  %v2152_v62 = vld [vmem:[%s12521_s3 + $0xf0] sm:$0xff]  ;;  %vm7787_vm5 = vcmask 212992  }
 0x3c5   : > { %v1655_v4 = vadd.f32 %v9557_v49, %v1628_v0  ;;  %v8835_v61 = vpack.c.bf16 %v2151_v60, %v2150_v59  ;;  %v2153_v63 = vld [vmem:[%s12521_s3 + $0xf8] sm:$0xff] }
 0x3c6   : > { %8498 = vmatprep.mubr.msk.f32.mxu1 %vm1691_vm6, %v1674_v2  ;;  %v1654_v5 = vadd.f32 %v9557_v49, %v1627_v3  ;;  %v1603_v6 = vld [vmem:[#allocation2 + $0x98] sm:$0xff]  ;;  %v8839_v0 = vpack.c.bf16 %v2153_v63, %v2152_v62 }
 0x3c7   : > { %8499 = vmatmul.mubr.msk.f32.gmra.mrb[36].mxu1 %vm1691_vm6, %v1675_v57  ;;  %v1602_v7 = vld [vmem:[#allocation2 + $0x90] sm:$0xff]  ;;  %v1630_v8 = vmul.f32 %v9546_v28, %v1603_v6  ;;  %v1677_v52 = vmax.f32 %v1655_v4, 0.0  ;;  %8826 = vmatpush3.bf16.msra.mxu0 %v8823_v48  ;;  %v2836_v6 = vld [vmem:[%s12522_s4 + $0x8] sm:$0xff] }
 0x3c8   : > { %v1676_v10 = vmax.f32 %v1654_v5, 0.0  ;;  %v1629_v11 = vmul.f32 %v9546_v28, %v1602_v7  ;;  %8828 = vmatprep.subr.bf16.mxu0 %v8827_v54  ;;  %v2835_v5 = vld [vmem:[%s12522_s4] sm:$0xff] }
 0x3c9   : > { %v1657_v12 = vadd.f32 %v9557_v49, %v1630_v8  ;;  %v9775_v8 = vpack.c.bf16 %v2836_v6, %v2835_v5 }
 0x3ca   : > { %8501 = vmatprep.mubr.msk.f32.mxu1 %vm1691_vm6, %v1676_v10  ;;  %v1656_v13 = vadd.f32 %v9557_v49, %v1629_v11  ;;  %v1605_v14 = vld [vmem:[#allocation2 + $0xa8] sm:$0xff] }
 0x3cb   : > { %8502 = vmatmul.mubr.msk.f32.gmra.mrb[38].mxu1 %vm1691_vm6, %v1677_v52  ;;  %v1604_v15 = vld [vmem:[#allocation2 + $0xa0] sm:$0xff]  ;;  %v1632_v33 = vmul.f32 %v9546_v28, %v1605_v14  ;;  %v1679_v1 = vmax.f32 %v1657_v12, 0.0  ;;  %8830 = vmatpush3.bf16.msra.mxu0 %v8827_v54 }
 0x3cc   : > { %v1678_v35 = vmax.f32 %v1656_v13, 0.0  ;;  %v1631_v16 = vmul.f32 %v9546_v28, %v1604_v15  ;;  %v9001_v28 = vld [vmem:[%s9128_s23] sm:$0xff]  ;;  %8832 = vmatprep.subr.bf16.mxu0 %v8831_v58 }
 0x3cd   : > { %v1659_v17 = vadd.f32 %v9557_v49, %v1632_v33 }
 0x3ce   : > { %8504 = vmatprep.mubr.msk.f32.mxu1 %vm1691_vm6, %v1678_v35  ;;  %v1658_v18 = vadd.f32 %v9557_v49, %v1631_v16  ;;  %v9003_v49 = vld [vmem:[%s9128_s23 + $0x10] sm:$0xff] }
 0x3cf   : > { %8505 = vmatmul.mubr.msk.f32.gmra.mrb[40].mxu1 %vm1691_vm6, %v1679_v1  ;;  %v1681_v20 = vmax.f32 %v1659_v17, 0.0  ;;  %8834 = vmatpush3.bf16.msra.mxu0 %v8831_v58 }
 0x3d0   : > { %v1680_v19 = vmax.f32 %v1658_v18, 0.0  ;;  %8836 = vmatprep.subr.bf16.mxu0 %v8835_v61 }
 0x3d2   : > { %8507 = vmatprep.mubr.msk.f32.mxu1 %vm1691_vm6, %v1680_v19 }
 0x3d3   : > { %8508 = vmatmul.mubr.msk.f32.gmra.mrb[42].mxu1 %vm1691_vm6, %v1681_v20  ;;  %8838 = vmatpush3.bf16.msra.mxu0 %v8835_v61  ;;  %v9766_v57 = vpop.permute.xlu1 %2710 }
 0x3d4   : > { %8571 = vmatprep.mubr.msk.f32.mxu1 %vm409_vm0, %v9001_v28  ;;  %8840 = vmatprep.subr.bf16.mxu0 %v8839_v0  ;;  %12599 = vst [vmem:[#allocation5_spill] sm:$0xff] %v9766_v57  ;;  %v9787_v15 = vpop.permute.xlu0 %2705 }
 0x3d5   : > { %12602 = vst [vmem:[#allocation8_spill] sm:$0xff] %v9787_v15 }
 0x3d7   : > { %8572 = vmatmul.mubr.msk.f32.vlgmr.msra.gmra.mrb[44].mxu1 %vm409_vm0, %v9002_v21  ;;  %8842 = vmatpush3.bf16.msra.mxu0 %v8839_v0  ;;  %v9779_v11 = vpop.permute.xlu1 %2715 }
 0x3d8   : > { %8574 = vmatprep.mubr.msk.f32.mxu1 %vm409_vm0, %v9003_v49  ;;  %8848 = vmatprep.subr.bf16.mxu0 %v9775_v8  ;;  %12600 = vst [vmem:[#allocation6_spill] sm:$0xff] %v9779_v11  ;;  %v9794_v18 = vpop.permute.xlu0 %2720 }
 0x3d9   : > { %12604 = vst [vmem:[#allocation10_spill] sm:$0xff] %v9794_v18 }
 0x3db   : > { %8575 = vmatmul.mubr.msk.f32.gmra.mrb[46].mxu1 %vm409_vm0, %v9004_v22  ;;  %v9785_v14 = vpop.permute.xlu1 %2725 }
 0x3dc   : > { %8577 = vmatprep.mubr.msk.f32.mxu1 %vm409_vm0, %v9005_v23  ;;  %12601 = vst [vmem:[#allocation7_spill] sm:$0xff] %v9785_v14  ;;  %v9801_v21 = vpop.permute.xlu0 %2730 }
 0x3dd   : > { %12606 = vst [vmem:[#allocation12_spill] sm:$0xff] %v9801_v21 }
 0x3df   : > { %8578 = vmatmul.mubr.msk.f32.gmra.mrb[48].mxu1 %vm409_vm0, %v9006_v24  ;;  %v9791_v1 = vpop.permute.xlu1 %2735 }
 0x3e0   : > { %8580 = vmatprep.mubr.msk.f32.mxu1 %vm409_vm0, %v9007_v25  ;;  %12603 = vst [vmem:[#allocation9_spill] sm:$0xff] %v9791_v1 }
 0x3e3   : > { %8581 = vmatmul.mubr.msk.f32.gmra.mrb[50].mxu1 %vm409_vm0, %v9008_v26  ;;  %v9799_v28 = vpop.permute.xlu1 %2745  ;;  %v9808_v26 = vpop.permute.xlu0 %2740 }
 0x3e4   : > { %8583 = vmatprep.mubr.msk.f32.mxu1 %vm409_vm0, %v9009_v27  ;;  %12605 = vst [vmem:[#allocation11_spill] sm:$0xff] %v9799_v28  ;;  %12608 = vst [vmem:[#allocation14_spill] sm:$0xff] %v9808_v26 }
 0x3e7   : > { %8584 = vmatmul.mubr.msk.f32.gmra.mrb[52].mxu1 %vm409_vm0, %v9010_v29  ;;  %v9805_v24 = vpop.permute.xlu1 %2755 }
 0x3e8   : > { %8586 = vmatprep.mubr.msk.f32.mxu1 %vm409_vm0, %v9011_v30  ;;  %12607 = vst [vmem:[#allocation13_spill] sm:$0xff] %v9805_v24 }
 0x3eb   : > { %8587 = vmatmul.mubr.msk.f32.gmra.mrb[54].mxu1 %vm409_vm0, %v9012_v31  ;;  %v9813_v30 = vpop.permute.xlu1 %2765  ;;  %v9815_v31 = vpop.permute.xlu0 %2750 }
 0x3ec   : > { %8589 = vmatprep.mubr.msk.f32.mxu1 %vm409_vm0, %v9013_v32  ;;  %12609 = vst [vmem:[#allocation15_spill] sm:$0xff] %v9813_v30  ;;  %12610 = vst [vmem:[#allocation16_spill] sm:$0xff] %v9815_v31 }
 0x3ef   : > { %8590 = vmatmul.mubr.msk.f32.gmra.mrb[56].mxu1 %vm409_vm0, %v9014_v53 }
 0x3f0   : > { %8592 = vmatprep.mubr.msk.f32.mxu1 %vm409_vm0, %v9015_v34  ;;  %v9822_v34 = vld [vmem:[%s12523_s5 + $0xb] ss:$0 sm:$0xff] }
 0x3f3   : > { %8593 = vmatmul.mubr.msk.f32.gmra.mrb[58].mxu1 %vm409_vm0, %v9016_v36 }
 0x3f4   : > { %8595 = vmatprep.mubr.msk.f32.mxu1 %vm409_vm0, %v9017_v37  ;;  %v9824_v37 = vpop.permute.xlu1 %2775 }
 0x3f5   : > { %12611 = vst [vmem:[#allocation17_spill] sm:$0xff] %v9824_v37 }
 0x3f7   : > { %8596 = vmatmul.mubr.msk.f32.gmra.mrb[60].mxu1 %vm409_vm0, %v9018_v38 }
 0x3f8   : > { %8598 = vmatprep.mubr.msk.f32.mxu1 %vm409_vm0, %v9019_v39  ;;  %v9834_v46 = vpop.permute.xlu1 %2785 }
 0x3f9   : > { %12613 = vst [vmem:[#allocation19_spill] sm:$0xff] %v9834_v46 }
 0x3fb   : > { %8599 = vmatmul.mubr.msk.f32.gmra.mrb[62].mxu1 %vm409_vm0, %v9020_v40  ;;  %v9827_v40 = vpop.permute.xlu0 %2760 }
 0x3fc   : > { %8601 = vmatprep.mubr.msk.f32.mxu1 %vm409_vm0, %v9021_v41  ;;  %12612 = vst [vmem:[#allocation18_spill] sm:$0xff] %v9827_v40  ;;  %v9844_v56 = vpop.permute.xlu1 %2795 }
 0x3fd   : > { %12615 = vst [vmem:[#allocation21_spill] sm:$0xff] %v9844_v56 }
 0x3ff   : > { %8602 = vmatmul.mubr.msk.f32.gmra.mrb[64].mxu1 %vm409_vm0, %v9022_v42  ;;  %v9837_v47 = vpop.permute.xlu0 %2770  ;;  %vm7617_vm0 = vcmask 982016  }
 0x400   : > { %12614 = vst [vmem:[#allocation20_spill] sm:$0xff] %v9837_v47 }
 0x403   : > { %v9847_v60 = vpop.permute.xlu0 %2780 }
 0x404   : > { %12616 = vst [vmem:[#allocation22_spill] sm:$0xff] %v9847_v60 }
 0x47e   : > { %v8479_v2 = vpop.f32.mrb[22].mxu1 }
 0x47f   : > { %1957 = vrot.lane.b32.xlu1 %v8479_v2, %s9042_s17  ;;  %v1824_v3 = vpop.f32.mrb[23].mxu1 }
 0x480   : > { %1955 = vrot.lane.b32.xlu0 %v1824_v3, %s9042_s17  ;;  %v9854_v3 = vpop.permute.xlu1 %2805 }
 0x481   : > { %12617 = vst [vmem:[#allocation23_spill] sm:$0xff] %v9854_v3 }
 0x482   : > { %v8482_v4 = vpop.f32.mrb[24].mxu1 }
 0x483   : > { %1961 = vrot.lane.b32.xlu1 %v8482_v4, %s9042_s17  ;;  %v1834_v7 = vpop.f32.mrb[25].mxu1  ;;  %v9857_v4 = vpop.permute.xlu0 %2790 }
 0x484   : > { %1959 = vrot.lane.b32.xlu0 %v1834_v7, %s9042_s17  ;;  %12618 = vst [vmem:[#allocation24_spill] sm:$0xff] %v9857_v4 }
 0x486   : > { %v8485_v10 = vpop.f32.mrb[26].mxu1 }
 0x487   : > { %1965 = vrot.lane.b32.xlu1 %v8485_v10, %s9042_s17  ;;  %v1844_v52 = vpop.f32.mrb[27].mxu1 }
 0x488   : > { %1963 = vrot.lane.b32.xlu0 %v1844_v52, %s9042_s17  ;;  %v9863_v52 = vpop.permute.xlu1 %3195 }
 0x48a   : > { %v8488_v12 = vpop.f32.mrb[28].mxu1 }
 0x48b   : > { %1969 = vrot.lane.b32.xlu1 %v8488_v12, %s9042_s17  ;;  %v1854_v13 = vpop.f32.mrb[29].mxu1 }
 0x48c   : > { %1967 = vrot.lane.b32.xlu0 %v1854_v13, %s9042_s17 }
 0x48e   : > { %v8491_v33 = vpop.f32.mrb[30].mxu1 }
 0x48f   : > { %1973 = vrot.lane.b32.xlu1 %v8491_v33, %s9042_s17  ;;  %v1864_v35 = vpop.f32.mrb[31].mxu1 }
 0x490   : > { %1971 = vrot.lane.b32.xlu0 %v1864_v35, %s9042_s17  ;;  %v9867_v35 = vpop.permute.xlu0 %2800 }
 0x491   : > { %12619 = vst [vmem:[#allocation25_spill] sm:$0xff] %v9867_v35 }
 0x492   : > { %v8494_v16 = vpop.f32.mrb[32].mxu1 }
 0x493   : > { %1977 = vrot.lane.b32.xlu1 %v8494_v16, %s9042_s17  ;;  %v1874_v17 = vpop.f32.mrb[33].mxu1 }
 0x494   : > { %1975 = vrot.lane.b32.xlu0 %v1874_v17, %s9042_s17 }
 0x496   : > { %v8497_v19 = vpop.f32.mrb[34].mxu1 }
 0x497   : > { %1981 = vrot.lane.b32.xlu1 %v8497_v19, %s9042_s17  ;;  %v1884_v20 = vpop.f32.mrb[35].mxu1 }
 0x498   : > { %1979 = vrot.lane.b32.xlu0 %v1884_v20, %s9042_s17 }
 0x49a   : > { %v8500_v49 = vpop.f32.mrb[36].mxu1 }
 0x49b   : > { %1985 = vrot.lane.b32.xlu1 %v8500_v49, %s9042_s17  ;;  %v1894_v22 = vpop.f32.mrb[37].mxu1  ;;  %v9873_v49 = vpop.permute.xlu1 %3327 }
 0x49c   : > { %1983 = vrot.lane.b32.xlu0 %v1894_v22, %s9042_s17 }
 0x49e   : > { %v8503_v23 = vpop.f32.mrb[38].mxu1 }
 0x49f   : > { %1989 = vrot.lane.b32.xlu1 %v8503_v23, %s9042_s17  ;;  %v1904_v25 = vpop.f32.mrb[39].mxu1  ;;  %v9877_v23 = vpop.permute.xlu0 %2810 }
 0x4a0   : > { %1987 = vrot.lane.b32.xlu0 %v1904_v25, %s9042_s17  ;;  %12620 = vst [vmem:[#allocation26_spill] sm:$0xff] %v9877_v23 }
 0x4a2   : > { %v8506_v27 = vpop.f32.mrb[40].mxu1 }
 0x4a3   : > { %1993 = vrot.lane.b32.xlu1 %v8506_v27, %s9042_s17  ;;  %v1914_v29 = vpop.f32.mrb[41].mxu1 }
 0x4a4   : > { %1991 = vrot.lane.b32.xlu0 %v1914_v29, %s9042_s17 }
 0x4a6   : > { %v8509_v32 = vpop.f32.mrb[42].mxu1 }
 0x4a7   : > { %1997 = vrot.lane.b32.xlu1 %v8509_v32, %s9042_s17  ;;  %v1924_v53 = vpop.f32.mrb[43].mxu1 }
 0x4a8   : > { %1995 = vrot.lane.b32.xlu0 %v1924_v53, %s9042_s17  ;;  %v9883_v53 = vpop.permute.xlu1 %3859  ;;  %s9052_s17 = smov 110  }
 0x4a9   : > { %12621 = vst [vmem:[#allocation27_spill] sm:$0xff] %v9883_v53 }
 0x4aa   : > { %v8573_v36 = vpop.f32.mrb[44].mxu1 }
 0x4ab   : > { %v2480_v38 = vadd.f32 %v8573_v36, %v9822_v34  ;;  %v2474_v39 = vpop.f32.mrb[45].mxu1 }
 0x4ac   : > { %v2475_v41 = vadd.f32 %v9822_v34, %v2474_v39 }
 0x4ad   : > { %2584 = vst.msk [vmem:[#allocation3 + $0x8] sm:$0xff] %vm651_vm1, %v2480_v38  ;;  %v9886_v38 = vpop.permute.xlu0 %3991 }
 0x4ae   : > { %2583 = vst.msk [vmem:[#allocation3] sm:$0xff] %vm651_vm1, %v2475_v41  ;;  %v8576_v42 = vpop.f32.mrb[46].mxu1  ;;  %12622 = vst [vmem:[#allocation28_spill] sm:$0xff] %v9886_v38 }
 0x4af   : > { %v2490_v43 = vadd.f32 %v8576_v42, %v9822_v34  ;;  %v2484_v44 = vpop.f32.mrb[47].mxu1 }
 0x4b0   : > { %v2485_v45 = vadd.f32 %v9822_v34, %v2484_v44 }
 0x4b1   : > { %2586 = vst.msk [vmem:[#allocation3 + $0x18] sm:$0xff] %vm651_vm1, %v2490_v43 }
 0x4b2   : > { %2585 = vst.msk [vmem:[#allocation3 + $0x10] sm:$0xff] %vm651_vm1, %v2485_v45  ;;  %v8579_v48 = vpop.f32.mrb[48].mxu1 }
 0x4b3   : > { %v2500_v50 = vadd.f32 %v8579_v48, %v9822_v34  ;;  %v2494_v51 = vpop.f32.mrb[49].mxu1  ;;  %v9893_v48 = vpop.permute.xlu1 %4767 }
 0x4b4   : > { %v2495_v54 = vadd.f32 %v9822_v34, %v2494_v51  ;;  %12623 = vst [vmem:[#allocation29_spill] sm:$0xff] %v9893_v48  ;;  %v9896_v51 = vpop.permute.xlu0 %4123 }
 0x4b5   : > { %2588 = vst.msk [vmem:[#allocation3 + $0x28] sm:$0xff] %vm651_vm1, %v2500_v50  ;;  %12624 = vst [vmem:[#allocation30_spill] sm:$0xff] %v9896_v51 }
 0x4b6   : > { %2587 = vst.msk [vmem:[#allocation3 + $0x20] sm:$0xff] %vm651_vm1, %v2495_v54  ;;  %v8582_v55 = vpop.f32.mrb[50].mxu1 }
 0x4b7   : > { %v2510_v58 = vadd.f32 %v8582_v55, %v9822_v34  ;;  %v2504_v59 = vpop.f32.mrb[51].mxu1  ;;  %v9900_v54 = vpop.permute.xlu1 %4899 }
 0x4b8   : > { %v2505_v61 = vadd.f32 %v9822_v34, %v2504_v59  ;;  %12625 = vst [vmem:[#allocation31_spill] sm:$0xff] %v9900_v54  ;;  %v9902_v55 = vpop.permute.xlu0 %5563 }
 0x4b9   : > { %2590 = vst.msk [vmem:[#allocation3 + $0x38] sm:$0xff] %vm651_vm1, %v2510_v58  ;;  %12626 = vst [vmem:[#allocation32_spill] sm:$0xff] %v9902_v55 }
 0x4ba   : > { %2589 = vst.msk [vmem:[#allocation3 + $0x30] sm:$0xff] %vm651_vm1, %v2505_v61  ;;  %v8585_v62 = vpop.f32.mrb[52].mxu1 }
 0x4bb   : > { %v2520_v63 = vadd.f32 %v8585_v62, %v9822_v34  ;;  %v2514_v0 = vpop.f32.mrb[53].mxu1  ;;  %v9904_v58 = vpop.permute.xlu1 %5431 }
 0x4bc   : > { %v2515_v2 = vadd.f32 %v9822_v34, %v2514_v0  ;;  %12627 = vst [vmem:[#allocation33_spill] sm:$0xff] %v9904_v58  ;;  %v9906_v59 = vpop.permute.xlu0 %5695 }
 0x4bd   : > { %2592 = vst.msk [vmem:[#allocation3 + $0x48] sm:$0xff] %vm651_vm1, %v2520_v63  ;;  %12628 = vst [vmem:[#allocation34_spill] sm:$0xff] %v9906_v59 }
 0x4be   : > { %2591 = vst.msk [vmem:[#allocation3 + $0x40] sm:$0xff] %vm651_vm1, %v2515_v2  ;;  %v8588_v5 = vpop.f32.mrb[54].mxu1 }
 0x4bf   : > { %v2530_v6 = vadd.f32 %v8588_v5, %v9822_v34  ;;  %v2524_v7 = vpop.f32.mrb[55].mxu1  ;;  %v9908_v61 = vpop.permute.xlu1 %6335 }
 0x4c0   : > { %v2525_v10 = vadd.f32 %v9822_v34, %v2524_v7  ;;  %12629 = vst [vmem:[#allocation35_spill] sm:$0xff] %v9908_v61  ;;  %v9910_v62 = vpop.permute.xlu0 %6999  ;;  %v9923_v7 = vld [vmem:[%s12523_s5 + $0x6] ss:$0 sm:$0xff] }
 0x4c1   : > { %2594 = vst.msk [vmem:[#allocation3 + $0x58] sm:$0xff] %vm651_vm1, %v2530_v6  ;;  %12630 = vst [vmem:[#allocation36_spill] sm:$0xff] %v9910_v62 }
 0x4c2   : > { %2593 = vst.msk [vmem:[#allocation3 + $0x50] sm:$0xff] %vm651_vm1, %v2525_v10  ;;  %v8591_v12 = vpop.f32.mrb[56].mxu1 }
 0x4c3   : > { %v2540_v13 = vadd.f32 %v8591_v12, %v9822_v34  ;;  %v2534_v33 = vpop.f32.mrb[57].mxu1  ;;  %v9912_v63 = vpop.permute.xlu1 %6467  ;;  %v9928_v12 = vld [vmem:[%s12523_s5 + $0x7] ss:$0 sm:$0xff] }
 0x4c4   : > { %v2535_v16 = vadd.f32 %v9822_v34, %v2534_v33  ;;  %12631 = vst [vmem:[#allocation37_spill] sm:$0xff] %v9912_v63 }
 0x4c5   : > { %2596 = vst.msk [vmem:[#allocation3 + $0x68] sm:$0xff] %vm651_vm1, %v2540_v13 }
 0x4c6   : > { %2595 = vst.msk [vmem:[#allocation3 + $0x60] sm:$0xff] %vm651_vm1, %v2535_v16  ;;  %v8594_v17 = vpop.f32.mrb[58].mxu1 }
 0x4c7   : > { %v2550_v19 = vadd.f32 %v8594_v17, %v9822_v34  ;;  %v2544_v20 = vpop.f32.mrb[59].mxu1 }
 0x4c8   : > { %v2545_v22 = vadd.f32 %v9822_v34, %v2544_v20 }
 0x4c9   : > { %2598 = vst.msk [vmem:[#allocation3 + $0x78] sm:$0xff] %vm651_vm1, %v2550_v19 }
 0x4ca   : > { %2597 = vst.msk [vmem:[#allocation3 + $0x70] sm:$0xff] %vm651_vm1, %v2545_v22  ;;  %v8597_v25 = vpop.f32.mrb[60].mxu1 }
 0x4cb   : > { %v2560_v27 = vadd.f32 %v8597_v25, %v9822_v34  ;;  %v2554_v29 = vpop.f32.mrb[61].mxu1 }
 0x4cc   : > { %v2555_v32 = vadd.f32 %v9822_v34, %v2554_v29 }
 0x4cd   : > { %2600 = vst.msk [vmem:[#allocation3 + $0x88] sm:$0xff] %vm651_vm1, %v2560_v27 }
 0x4ce   : > { %2599 = vst.msk [vmem:[#allocation3 + $0x80] sm:$0xff] %vm651_vm1, %v2555_v32  ;;  %v8600_v36 = vpop.f32.mrb[62].mxu1 }
 0x4cf   : > { %v2570_v39 = vadd.f32 %v8600_v36, %v9822_v34  ;;  %v2564_v41 = vpop.f32.mrb[63].mxu1 }
 0x4d0   : > { %v2565_v42 = vadd.f32 %v9822_v34, %v2564_v41 }
 0x4d1   : > { %2602 = vst.msk [vmem:[#allocation3 + $0x98] sm:$0xff] %vm651_vm1, %v2570_v39 }
 0x4d2   : > { %2601 = vst.msk [vmem:[#allocation3 + $0x90] sm:$0xff] %vm651_vm1, %v2565_v42  ;;  %v8603_v43 = vpop.f32.mrb[64].mxu1 }
 0x4d3   : > { %v2580_v44 = vadd.f32 %v8603_v43, %v9822_v34  ;;  %v2574_v45 = vpop.f32.mrb[65].mxu1 }
 0x4d4   : > { %v2575_v50 = vadd.f32 %v9822_v34, %v2574_v45  ;;  %v9914_v34 = vpop.permute.xlu0 %7131 }
 0x4d5   : > { %2604 = vst.msk [vmem:[#allocation3 + $0xa8] sm:$0xff] %vm651_vm1, %v2580_v44  ;;  %12632 = vst [vmem:[#allocation38_spill] sm:$0xff] %v9914_v34 }
 0x4d6   : > { %2603 = vst.msk [vmem:[#allocation3 + $0xa0] sm:$0xff] %vm651_vm1, %v2575_v50 }
 0x4f1   : > { %v1958_v0 = vpop.permute.xlu1 %1957 }
 0x4f2   : > { %2023 = vst.msk [vmem:[#allocation2 + $0x8] sm:$0xff] %vm2021_vm7, %v1958_v0  ;;  %v1956_v2 = vpop.permute.xlu0 %1955  ;;  %v2837_v0 = vld [vmem:[%s12522_s4 + $0x10] sm:$0xff] }
 0x4f3   : > { %2022 = vst.msk [vmem:[#allocation2] sm:$0xff] %vm2021_vm7, %v1956_v2 }
 0x4f5   : > { %v1962_v5 = vpop.permute.xlu1 %1961 }
 0x4f6   : > { %2025 = vst.msk [vmem:[#allocation2 + $0x18] sm:$0xff] %vm2021_vm7, %v1962_v5  ;;  %v1960_v6 = vpop.permute.xlu0 %1959 }
 0x4f7   : > { %2024 = vst.msk [vmem:[#allocation2 + $0x10] sm:$0xff] %vm2021_vm7, %v1960_v6 }
 0x4f9   : > { %v1966_v10 = vpop.permute.xlu1 %1965  ;;  %v2045_v13 = vld [vmem:[#allocation2 + $0x8] sm:$0xff] }
 0x4fa   : > { %2027 = vst.msk [vmem:[#allocation2 + $0x28] sm:$0xff] %vm2021_vm7, %v1966_v10  ;;  %v1964_v33 = vpop.permute.xlu0 %1963  ;;  %v2044_v16 = vld [vmem:[#allocation2] sm:$0xff]  ;;  %v2072_v17 = vmul.f32 %v9923_v7, %v2045_v13 }
 0x4fb   : > { %2026 = vst.msk [vmem:[#allocation2 + $0x20] sm:$0xff] %vm2021_vm7, %v1964_v33  ;;  %v2071_v19 = vmul.f32 %v9923_v7, %v2044_v16 }
 0x4fc   : > { %v2099_v20 = vadd.f32 %v9928_v12, %v2072_v17 }
 0x4fd   : > { %v1970_v22 = vpop.permute.xlu1 %1969  ;;  %v2098_v25 = vadd.f32 %v9928_v12, %v2071_v19  ;;  %v2047_v27 = vld [vmem:[#allocation2 + $0x18] sm:$0xff] }
 0x4fe   : > { %2029 = vst.msk [vmem:[#allocation2 + $0x38] sm:$0xff] %vm2021_vm7, %v1970_v22  ;;  %v1968_v29 = vpop.permute.xlu0 %1967  ;;  %v2046_v32 = vld [vmem:[#allocation2 + $0x10] sm:$0xff]  ;;  %v2074_v36 = vmul.f32 %v9923_v7, %v2047_v27  ;;  %v2121_v42 = vmax.f32 %v2099_v20, 0.0 }
 0x4ff   : > { %2028 = vst.msk [vmem:[#allocation2 + $0x30] sm:$0xff] %vm2021_vm7, %v1968_v29  ;;  %v2120_v39 = vmax.f32 %v2098_v25, 0.0  ;;  %v2073_v41 = vmul.f32 %v9923_v7, %v2046_v32 }
 0x500   : > { %v2101_v43 = vadd.f32 %v9928_v12, %v2074_v36 }
 0x501   : > { %v1974_v44 = vpop.permute.xlu1 %1973  ;;  %8534 = vmatprep.mubr.msk.f32.mxu0 %vm2159_vm8, %v2120_v39  ;;  %v2100_v45 = vadd.f32 %v9928_v12, %v2073_v41  ;;  %v2049_v50 = vld [vmem:[#allocation2 + $0x28] sm:$0xff] }
 0x502   : > { %2031 = vst.msk [vmem:[#allocation2 + $0x48] sm:$0xff] %vm2021_vm7, %v1974_v44  ;;  %8535 = vmatmul.mubr.msk.f32.vlgmr.msra.gmra.mrb[44].mxu0 %vm2159_vm8, %v2121_v42  ;;  %v1972_v2 = vpop.permute.xlu0 %1971  ;;  %v2048_v5 = vld [vmem:[#allocation2 + $0x20] sm:$0xff]  ;;  %v2076_v6 = vmul.f32 %v9923_v7, %v2049_v50  ;;  %v2123_v33 = vmax.f32 %v2101_v43, 0.0 }
 0x503   : > { %2030 = vst.msk [vmem:[#allocation2 + $0x40] sm:$0xff] %vm2021_vm7, %v1972_v2  ;;  %8850 = vmatpush3.bf16.msra.mxu0 %v9775_v8  ;;  %v2122_v10 = vmax.f32 %v2100_v45, 0.0  ;;  %v2075_v13 = vmul.f32 %v9923_v7, %v2048_v5 }
 0x504   : > { %v2103_v16 = vadd.f32 %v9928_v12, %v2076_v6  ;;  %8608 = vmatprep.subr.mxu0 %v2837_v0 }
 0x505   : > { %v1978_v17 = vpop.permute.xlu1 %1977  ;;  %8537 = vmatprep.mubr.msk.f32.mxu0 %vm2159_vm8, %v2122_v10  ;;  %v2102_v19 = vadd.f32 %v9928_v12, %v2075_v13  ;;  %v2051_v20 = vld [vmem:[#allocation2 + $0x38] sm:$0xff] }
 0x506   : > { %2033 = vst.msk [vmem:[#allocation2 + $0x58] sm:$0xff] %vm2021_vm7, %v1978_v17  ;;  %8538 = vmatmul.mubr.msk.f32.gmra.mrb[46].mxu0 %vm2159_vm8, %v2123_v33  ;;  %v1976_v22 = vpop.permute.xlu0 %1975  ;;  %v2050_v25 = vld [vmem:[#allocation2 + $0x30] sm:$0xff]  ;;  %v2078_v8 = vmul.f32 %v9923_v7, %v2051_v20  ;;  %v2125_v32 = vmax.f32 %v2103_v16, 0.0 }
 0x507   : > { %2032 = vst.msk [vmem:[#allocation2 + $0x50] sm:$0xff] %vm2021_vm7, %v1976_v22  ;;  %v2124_v27 = vmax.f32 %v2102_v19, 0.0  ;;  %v2077_v29 = vmul.f32 %v9923_v7, %v2050_v25  ;;  %8609 = vmatpush3.msra.mxu0 %v2837_v0 }
 0x508   : > { %v2105_v36 = vadd.f32 %v9928_v12, %v2078_v8 }
 0x509   : > { %v1982_v39 = vpop.permute.xlu1 %1981  ;;  %8540 = vmatprep.mubr.msk.f32.mxu0 %vm2159_vm8, %v2124_v27  ;;  %v2104_v41 = vadd.f32 %v9928_v12, %v2077_v29  ;;  %v2053_v42 = vld [vmem:[#allocation2 + $0x48] sm:$0xff] }
 0x50a   : > { %2035 = vst.msk [vmem:[#allocation2 + $0x68] sm:$0xff] %vm2021_vm7, %v1982_v39  ;;  %8541 = vmatmul.mubr.msk.f32.gmra.mrb[48].mxu0 %vm2159_vm8, %v2125_v32  ;;  %v1980_v43 = vpop.permute.xlu0 %1979  ;;  %v2052_v44 = vld [vmem:[#allocation2 + $0x40] sm:$0xff]  ;;  %v2080_v45 = vmul.f32 %v9923_v7, %v2053_v42  ;;  %v2127_v2 = vmax.f32 %v2105_v36, 0.0 }
 0x50b   : > { %2034 = vst.msk [vmem:[#allocation2 + $0x60] sm:$0xff] %vm2021_vm7, %v1980_v43  ;;  %v2126_v50 = vmax.f32 %v2104_v41, 0.0  ;;  %v2079_v0 = vmul.f32 %v9923_v7, %v2052_v44 }
 0x50c   : > { %v2107_v5 = vadd.f32 %v9928_v12, %v2080_v45 }
 0x50d   : > { %v1986_v6 = vpop.permute.xlu1 %1985  ;;  %8543 = vmatprep.mubr.msk.f32.mxu0 %vm2159_vm8, %v2126_v50  ;;  %v2106_v10 = vadd.f32 %v9928_v12, %v2079_v0  ;;  %v2055_v13 = vld [vmem:[#allocation2 + $0x58] sm:$0xff] }
 0x50e   : > { %2037 = vst.msk [vmem:[#allocation2 + $0x78] sm:$0xff] %vm2021_vm7, %v1986_v6  ;;  %8544 = vmatmul.mubr.msk.f32.gmra.mrb[50].mxu0 %vm2159_vm8, %v2127_v2  ;;  %v1984_v33 = vpop.permute.xlu0 %1983  ;;  %v2054_v16 = vld [vmem:[#allocation2 + $0x50] sm:$0xff]  ;;  %v2082_v17 = vmul.f32 %v9923_v7, %v2055_v13  ;;  %v2129_v22 = vmax.f32 %v2107_v5, 0.0 }
 0x50f   : > { %2036 = vst.msk [vmem:[#allocation2 + $0x70] sm:$0xff] %vm2021_vm7, %v1984_v33  ;;  %v2128_v19 = vmax.f32 %v2106_v10, 0.0  ;;  %v2081_v20 = vmul.f32 %v9923_v7, %v2054_v16 }
 0x510   : > { %v2109_v25 = vadd.f32 %v9928_v12, %v2082_v17 }
 0x511   : > { %v1990_v8 = vpop.permute.xlu1 %1989  ;;  %8546 = vmatprep.mubr.msk.f32.mxu0 %vm2159_vm8, %v2128_v19  ;;  %v2108_v27 = vadd.f32 %v9928_v12, %v2081_v20  ;;  %v2057_v29 = vld [vmem:[#allocation2 + $0x68] sm:$0xff] }
 0x512   : > { %2039 = vst.msk [vmem:[#allocation2 + $0x88] sm:$0xff] %vm2021_vm7, %v1990_v8  ;;  %8547 = vmatmul.mubr.msk.f32.gmra.mrb[52].mxu0 %vm2159_vm8, %v2129_v22  ;;  %v1988_v32 = vpop.permute.xlu0 %1987  ;;  %v2056_v36 = vld [vmem:[#allocation2 + $0x60] sm:$0xff]  ;;  %v2084_v39 = vmul.f32 %v9923_v7, %v2057_v29  ;;  %v2131_v43 = vmax.f32 %v2109_v25, 0.0  ;;  %v10001_v29 = vld [vmem:[%s12523_s5 + $0x9] ss:$0 sm:$0xff] }
 0x513   : > { %2038 = vst.msk [vmem:[#allocation2 + $0x80] sm:$0xff] %vm2021_vm7, %v1988_v32  ;;  %v2130_v41 = vmax.f32 %v2108_v27, 0.0  ;;  %v2083_v42 = vmul.f32 %v9923_v7, %v2056_v36  ;;  %v2605_v27 = vld [vmem:[#allocation3] sm:$0xff] }
 0x514   : > { %v2111_v44 = vadd.f32 %v9928_v12, %v2084_v39 }
 0x515   : > { %v1994_v45 = vpop.permute.xlu1 %1993  ;;  %8549 = vmatprep.mubr.msk.f32.mxu0 %vm2159_vm8, %v2130_v41  ;;  %v2110_v50 = vadd.f32 %v9928_v12, %v2083_v42  ;;  %v2059_v0 = vld [vmem:[#allocation2 + $0x78] sm:$0xff] }
 0x516   : > { %2041 = vst.msk [vmem:[#allocation2 + $0x98] sm:$0xff] %vm2021_vm7, %v1994_v45  ;;  %8550 = vmatmul.mubr.msk.f32.gmra.mrb[54].mxu0 %vm2159_vm8, %v2131_v43  ;;  %v1992_v2 = vpop.permute.xlu0 %1991  ;;  %v2058_v5 = vld [vmem:[#allocation2 + $0x70] sm:$0xff]  ;;  %v2086_v6 = vmul.f32 %v9923_v7, %v2059_v0  ;;  %v2133_v33 = vmax.f32 %v2111_v44, 0.0  ;;  %v2632_v44 = vmul.f32 %v10001_v29, %v2605_v27  ;;  %v2606_v45 = vld [vmem:[#allocation3 + $0x8] sm:$0xff] }
 0x517   : > { %2040 = vst.msk [vmem:[#allocation2 + $0x90] sm:$0xff] %vm2021_vm7, %v1992_v2  ;;  %v2132_v10 = vmax.f32 %v2110_v50, 0.0  ;;  %v2085_v13 = vmul.f32 %v9923_v7, %v2058_v5  ;;  %v10014_v2 = vld [vmem:[%s12523_s5 + $0xa] ss:$0 sm:$0xff]  ;;  %v2607_v5 = vld [vmem:[#allocation3 + $0x10] sm:$0xff] }
 0x518   : > { %v2113_v16 = vadd.f32 %v9928_v12, %v2086_v6 }
 0x519   : > { %v1998_v17 = vpop.permute.xlu1 %1997  ;;  %8552 = vmatprep.mubr.msk.f32.mxu0 %vm2159_vm8, %v2132_v10  ;;  %v2112_v19 = vadd.f32 %v9928_v12, %v2085_v13  ;;  %v2061_v20 = vld [vmem:[#allocation2 + $0x88] sm:$0xff] }
 0x51a   : > { %2043 = vst.msk [vmem:[#allocation2 + $0xa8] sm:$0xff] %vm2021_vm7, %v1998_v17  ;;  %8553 = vmatmul.mubr.msk.f32.gmra.mrb[56].mxu0 %vm2159_vm8, %v2133_v33  ;;  %v1996_v22 = vpop.permute.xlu0 %1995  ;;  %v2060_v25 = vld [vmem:[#allocation2 + $0x80] sm:$0xff]  ;;  %v2088_v8 = vmul.f32 %v9923_v7, %v2061_v20  ;;  %v2135_v39 = vmax.f32 %v2113_v16, 0.0  ;;  %v2633_v16 = vmul.f32 %v10001_v29, %v2606_v45  ;;  %v2659_v20 = vadd.f32 %v10014_v2, %v2632_v44 }
 0x51b   : > { %2042 = vst.msk [vmem:[#allocation2 + $0xa0] sm:$0xff] %vm2021_vm7, %v1996_v22  ;;  %v2134_v32 = vmax.f32 %v2112_v19, 0.0  ;;  %v2087_v36 = vmul.f32 %v9923_v7, %v2060_v25  ;;  %v2634_v22 = vmul.f32 %v10001_v29, %v2607_v5  ;;  %v2608_v25 = vld [vmem:[#allocation3 + $0x18] sm:$0xff] }
 0x51c   : > { %v2115_v41 = vadd.f32 %v9928_v12, %v2088_v8  ;;  %v2635_v45 = vmul.f32 %v10001_v29, %v2608_v25  ;;  %v2612_v25 = vld [vmem:[#allocation3 + $0x38] sm:$0xff] }
 0x51d   : > { %8555 = vmatprep.mubr.msk.f32.mxu0 %vm2159_vm8, %v2134_v32  ;;  %v2114_v42 = vadd.f32 %v9928_v12, %v2087_v36  ;;  %v2063_v43 = vld [vmem:[#allocation2 + $0x98] sm:$0xff]  ;;  %v2609_v32 = vld [vmem:[#allocation3 + $0x20] sm:$0xff] }
 0x51e   : > { %8556 = vmatmul.mubr.msk.f32.gmra.mrb[58].mxu0 %vm2159_vm8, %v2135_v39  ;;  %v2062_v50 = vld [vmem:[#allocation2 + $0x90] sm:$0xff]  ;;  %v2090_v0 = vmul.f32 %v9923_v7, %v2063_v43  ;;  %v2137_v13 = vmax.f32 %v2115_v41, 0.0  ;;  %v2660_v43 = vadd.f32 %v10014_v2, %v2633_v16  ;;  %v2636_v5 = vmul.f32 %v10001_v29, %v2609_v32 }
 0x51f   : > { %v2136_v6 = vmax.f32 %v2114_v42, 0.0  ;;  %v2089_v10 = vmul.f32 %v9923_v7, %v2062_v50  ;;  %v2681_v50 = vmax.f32 %v2659_v20, 0.0  ;;  %v2662_v16 = vadd.f32 %v10014_v2, %v2635_v45 }
 0x520   : > { %v2117_v33 = vadd.f32 %v9928_v12, %v2090_v0  ;;  %v2661_v0 = vadd.f32 %v10014_v2, %v2634_v22  ;;  %v2663_v20 = vadd.f32 %v10014_v2, %v2636_v5 }
 0x521   : > { %8558 = vmatprep.mubr.msk.f32.mxu0 %vm2159_vm8, %v2136_v6  ;;  %v2116_v17 = vadd.f32 %v9928_v12, %v2089_v10  ;;  %v2065_v19 = vld [vmem:[#allocation2 + $0xa8] sm:$0xff]  ;;  %v2610_v6 = vld [vmem:[#allocation3 + $0x28] sm:$0xff]  ;;  %v2684_v32 = vmax.f32 %v2662_v16, 0.0 }
 0x522   : > { %8559 = vmatmul.mubr.msk.f32.gmra.mrb[60].mxu0 %vm2159_vm8, %v2137_v13  ;;  %v2064_v8 = vld [vmem:[#allocation2 + $0xa0] sm:$0xff]  ;;  %v2092_v27 = vmul.f32 %v9923_v7, %v2065_v19  ;;  %v2139_v41 = vmax.f32 %v2117_v33, 0.0  ;;  %v2682_v33 = vmax.f32 %v2660_v43, 0.0  ;;  %v2683_v19 = vmax.f32 %v2661_v0, 0.0 }
 0x523   : > { %v2138_v36 = vmax.f32 %v2116_v17, 0.0  ;;  %v2091_v39 = vmul.f32 %v9923_v7, %v2064_v8  ;;  %v2611_v7 = vld [vmem:[#allocation3 + $0x30] sm:$0xff]  ;;  %v2637_v17 = vmul.f32 %v10001_v29, %v2610_v6  ;;  %v2613_v8 = vld [vmem:[#allocation3 + $0x40] sm:$0xff]  ;;  %v2816_v0 = vmul.f32 %v9794_v18, %v2684_v32 }
 0x524   : > { %v2119_v42 = vadd.f32 %v9928_v12, %v2092_v27  ;;  %v2638_v22 = vmul.f32 %v10001_v29, %v2611_v7  ;;  %v2814_v27 = vmul.f32 %v9766_v57, %v2682_v33  ;;  %v2640_v45 = vmul.f32 %v10001_v29, %v2613_v8 }
 0x525   : > { %8561 = vmatprep.mubr.msk.f32.mxu0 %vm2159_vm8, %v2138_v36  ;;  %v2118_v44 = vadd.f32 %v9928_v12, %v2091_v39  ;;  %v2813_v12 = vmul.f32 %v9787_v15, %v2681_v50  ;;  %v2664_v36 = vadd.f32 %v10014_v2, %v2637_v17  ;;  %v2639_v39 = vmul.f32 %v10001_v29, %v2612_v25  ;;  %v2615_v50 = vld [vmem:[#allocation3 + $0x50] sm:$0xff]  ;;  %v2616_v17 = vld [vmem:[#allocation3 + $0x58] sm:$0xff] }
 0x526   : > { %8562 = vmatmul.mubr.msk.f32.gmra.mrb[62].mxu0 %vm2159_vm8, %v2139_v41  ;;  %v2141_v13 = vmax.f32 %v2119_v42, 0.0  ;;  %v2815_v41 = vmul.f32 %v9779_v11, %v2683_v19  ;;  %v2685_v42 = vmax.f32 %v2663_v20, 0.0  ;;  %v2665_v43 = vadd.f32 %v10014_v2, %v2638_v22 }
 0x527   : > { %v2140_v10 = vmax.f32 %v2118_v44, 0.0  ;;  %v2614_v44 = vld [vmem:[#allocation3 + $0x48] sm:$0xff]  ;;  %v2686_v5 = vmax.f32 %v2664_v36, 0.0  ;;  %v2666_v6 = vadd.f32 %v10014_v2, %v2639_v39  ;;  %v2667_v33 = vadd.f32 %v10014_v2, %v2640_v45 }
 0x528   : > { %v2641_v7 = vmul.f32 %v10001_v29, %v2614_v44  ;;  %v2642_v16 = vmul.f32 %v10001_v29, %v2615_v50  ;;  %v2643_v25 = vmul.f32 %v10001_v29, %v2616_v17  ;;  %v2618_v39 = vld [vmem:[#allocation3 + $0x68] sm:$0xff] }
 0x529   : > { %8564 = vmatprep.mubr.msk.f32.mxu0 %vm2159_vm8, %v2140_v10  ;;  %v2817_v10 = vmul.f32 %v9785_v14, %v2685_v42  ;;  %v2818_v19 = vmul.f32 %v9801_v21, %v2686_v5  ;;  %v2688_v20 = vmax.f32 %v2666_v6, 0.0  ;;  %v2645_v44 = vmul.f32 %v10001_v29, %v2618_v39 }
 0x52a   : > { %8565 = vmatmul.mubr.msk.f32.gmra.mrb[64].mxu0 %vm2159_vm8, %v2141_v13  ;;  %v2687_v13 = vmax.f32 %v2665_v43, 0.0  ;;  %v2668_v22 = vadd.f32 %v10014_v2, %v2641_v7  ;;  %v2669_v32 = vadd.f32 %v10014_v2, %v2642_v16  ;;  %v2670_v45 = vadd.f32 %v10014_v2, %v2643_v25  ;;  %v2620_v7 = vld [vmem:[#allocation3 + $0x78] sm:$0xff]  ;;  %v2622_v25 = vld [vmem:[#allocation3 + $0x88] sm:$0xff] }
 0x52b   : > { %8610 = vmatprep.mubr.msk.f32.mxu0 %vm651_vm1, %v2813_v12  ;;  %v2617_v12 = vld [vmem:[#allocation3 + $0x60] sm:$0xff]  ;;  %v2820_v42 = vmul.f32 %v9808_v26, %v2688_v20  ;;  %v2672_v16 = vadd.f32 %v10014_v2, %v2645_v44  ;;  %v2647_v17 = vmul.f32 %v10001_v29, %v2620_v7  ;;  %v2649_v39 = vmul.f32 %v10001_v29, %v2622_v25  ;;  %v2624_v44 = vld [vmem:[#allocation3 + $0x98] sm:$0xff] }
 0x52c   : > { %v2819_v8 = vmul.f32 %v9791_v1, %v2687_v13  ;;  %v2644_v36 = vmul.f32 %v10001_v29, %v2617_v12  ;;  %v2690_v43 = vmax.f32 %v2668_v22, 0.0  ;;  %v2651_v7 = vmul.f32 %v10001_v29, %v2624_v44 }
 0x52e   : > { %8611 = vmatmul.mubr.msk.f32.vlgmr.msra.gmra.mrb[66].mxu0 %vm651_vm1, %v2814_v27  ;;  %v2689_v27 = vmax.f32 %v2667_v33, 0.0  ;;  %v2671_v5 = vadd.f32 %v10014_v2, %v2644_v36  ;;  %v2822_v13 = vmul.f32 %v9815_v31, %v2690_v43  ;;  %v2692_v33 = vmax.f32 %v2670_v45, 0.0 }
 0x52f   : > { %8613 = vmatprep.mubr.msk.f32.mxu0 %vm651_vm1, %v2815_v41  ;;  %v2619_v41 = vld [vmem:[#allocation3 + $0x70] sm:$0xff]  ;;  %v2674_v36 = vadd.f32 %v10014_v2, %v2647_v17  ;;  %v2626_v17 = vld [vmem:[#allocation3 + $0xa8] sm:$0xff] }
 0x530   : > { %v2821_v50 = vmul.f32 %v9799_v28, %v2689_v27  ;;  %v2646_v6 = vmul.f32 %v10001_v29, %v2619_v41  ;;  %v2824_v27 = vmul.f32 %v9827_v40, %v2692_v33 }
 0x532   : > { %8614 = vmatmul.mubr.msk.f32.gmra.mrb[68].mxu0 %vm651_vm1, %v2816_v0  ;;  %v2691_v0 = vmax.f32 %v2669_v32, 0.0  ;;  %v2673_v20 = vadd.f32 %v10014_v2, %v2646_v6  ;;  %v2694_v32 = vmax.f32 %v2672_v16, 0.0  ;;  %v2676_v6 = vadd.f32 %v10014_v2, %v2649_v39 }
 0x533   : > { %8616 = vmatprep.mubr.msk.f32.mxu0 %vm651_vm1, %v2817_v10  ;;  %v2621_v10 = vld [vmem:[#allocation3 + $0x80] sm:$0xff] }
 0x534   : > { %v2823_v12 = vmul.f32 %v9805_v24, %v2691_v0  ;;  %v2648_v22 = vmul.f32 %v10001_v29, %v2621_v10  ;;  %v2826_v0 = vmul.f32 %v9837_v47, %v2694_v32 }
 0x536   : > { %8617 = vmatmul.mubr.msk.f32.gmra.mrb[70].mxu0 %vm651_vm1, %v2818_v19  ;;  %v2693_v19 = vmax.f32 %v2671_v5, 0.0  ;;  %v2675_v43 = vadd.f32 %v10014_v2, %v2648_v22  ;;  %v2696_v5 = vmax.f32 %v2674_v36, 0.0  ;;  %v2653_v22 = vmul.f32 %v10001_v29, %v2626_v17 }
 0x537   : > { %8619 = vmatprep.mubr.msk.f32.mxu0 %vm651_vm1, %v2819_v8  ;;  %v2623_v8 = vld [vmem:[#allocation3 + $0x90] sm:$0xff] }
 0x538   : > { %v2825_v41 = vmul.f32 %v9813_v30, %v2693_v19  ;;  %v2650_v45 = vmul.f32 %v10001_v29, %v2623_v8  ;;  %v2698_v19 = vmax.f32 %v2676_v6, 0.0  ;;  %v2680_v39 = vadd.f32 %v10014_v2, %v2653_v22 }
 0x53a   : > { %8620 = vmatmul.mubr.msk.f32.gmra.mrb[72].mxu0 %vm651_vm1, %v2820_v42  ;;  %v2695_v42 = vmax.f32 %v2673_v20, 0.0  ;;  %v2677_v33 = vadd.f32 %v10014_v2, %v2650_v45  ;;  %v2678_v20 = vadd.f32 %v10014_v2, %v2651_v7  ;;  %v2830_v32 = vmul.f32 %v9857_v4, %v2698_v19 }
 0x53b   : > { %8622 = vmatprep.mubr.msk.f32.mxu0 %vm651_vm1, %v2821_v50  ;;  %v2625_v50 = vld [vmem:[#allocation3 + $0xa0] sm:$0xff] }
 0x53c   : > { %v2827_v10 = vmul.f32 %v9824_v37, %v2695_v42  ;;  %v2652_v16 = vmul.f32 %v10001_v29, %v2625_v50  ;;  %v2699_v8 = vmax.f32 %v2677_v33, 0.0  ;;  %v2700_v36 = vmax.f32 %v2678_v20, 0.0 }
 0x53e   : > { %8623 = vmatmul.mubr.msk.f32.gmra.mrb[74].mxu0 %vm651_vm1, %v2822_v13  ;;  %v2697_v13 = vmax.f32 %v2675_v43, 0.0  ;;  %v2832_v29 = vmul.f32 %v9867_v35, %v2700_v36  ;;  %v2702_v43 = vmax.f32 %v2680_v39, 0.0 }
 0x53f   : > { %8625 = vmatprep.mubr.msk.f32.mxu0 %vm651_vm1, %v2823_v12  ;;  %v2828_v12 = vmul.f32 %v9847_v60, %v2696_v5 }
 0x540   : > { %v2829_v25 = vmul.f32 %v9834_v46, %v2697_v13  ;;  %v2834_v44 = vmul.f32 %v9877_v23, %v2702_v43 }
 0x542   : > { %8626 = vmatmul.mubr.msk.f32.gmra.mrb[76].mxu0 %vm651_vm1, %v2824_v27  ;;  %v2679_v27 = vadd.f32 %v10014_v2, %v2652_v16  ;;  %v7938_v2 = vld [vmem:[%s12523_s5 + $0x8] ss:$0 sm:$0xff] }
 0x543   : > { %8628 = vmatprep.mubr.msk.f32.mxu0 %vm651_vm1, %v2825_v41  ;;  %v2831_v41 = vmul.f32 %v9844_v56, %v2699_v8 }
 0x544   : > { %v2701_v42 = vmax.f32 %v2679_v27, 0.0 }
 0x546   : > { %8629 = vmatmul.mubr.msk.f32.gmra.mrb[78].mxu0 %vm651_vm1, %v2826_v0  ;;  %v2833_v45 = vmul.f32 %v9854_v3, %v2701_v42 }
 0x547   : > { %8631 = vmatprep.mubr.msk.f32.mxu0 %vm651_vm1, %v2827_v10 }
 0x54a   : > { %8632 = vmatmul.mubr.msk.f32.gmra.mrb[80].mxu0 %vm651_vm1, %v2828_v12 }
 0x54b   : > { %8634 = vmatprep.mubr.msk.f32.mxu0 %vm651_vm1, %v2829_v25 }
 0x54e   : > { %8635 = vmatmul.mubr.msk.f32.gmra.mrb[82].mxu0 %vm651_vm1, %v2830_v32 }
 0x54f   : > { %8637 = vmatprep.mubr.msk.f32.mxu0 %vm651_vm1, %v2831_v41 }
 0x552   : > { %8638 = vmatmul.mubr.msk.f32.gmra.mrb[84].mxu0 %vm651_vm1, %v2832_v29 }
 0x553   : > { %8640 = vmatprep.mubr.msk.f32.mxu0 %vm651_vm1, %v2833_v45 }
 0x556   : > { %8641 = vmatmul.mubr.msk.f32.gmra.mrb[86].mxu0 %vm651_vm1, %v2834_v44  ;;  %vm9050_vm1 = vmmov 1  }
 0x557   : > { %vm8969_vm2 = vmpackc.low %vm4472_vm9, %vm9050_vm1 }
 0x5d5   : > { %v8536_v50 = vpop.f32.mrb[44].mxu0 }
 0x5d6   : > { %v10119_v0 = vadd.f32 %v8536_v50, %v7938_v2  ;;  %v2292_v5 = vpop.f32.mrb[45].mxu0 }
 0x5d7   : > { %v10121_v6 = vadd.f32 %v7938_v2, %v2292_v5 }
 0x5d8   : > { %12633 = vst [vmem:[#allocation39_spill] sm:$0xff] %v10119_v0 }
 0x5d9   : > { %12634 = vst [vmem:[#allocation40_spill] sm:$0xff] %v10121_v6  ;;  %v8539_v10 = vpop.f32.mrb[46].mxu0 }
 0x5da   : > { %v10125_v13 = vadd.f32 %v8539_v10, %v7938_v2  ;;  %v2302_v33 = vpop.f32.mrb[47].mxu0 }
 0x5db   : > { %v10127_v16 = vadd.f32 %v7938_v2, %v2302_v33 }
 0x5dc   : > { %12635 = vst [vmem:[#allocation41_spill] sm:$0xff] %v10125_v13 }
 0x5dd   : > { %12636 = vst [vmem:[#allocation42_spill] sm:$0xff] %v10127_v16  ;;  %v8542_v12 = vpop.f32.mrb[48].mxu0 }
 0x5de   : > { %v10131_v19 = vadd.f32 %v8542_v12, %v7938_v2  ;;  %v2312_v20 = vpop.f32.mrb[49].mxu0 }
 0x5df   : > { %v10133_v22 = vadd.f32 %v7938_v2, %v2312_v20 }
 0x5e0   : > { %12637 = vst [vmem:[#allocation43_spill] sm:$0xff] %v10131_v19 }
 0x5e1   : > { %12638 = vst [vmem:[#allocation44_spill] sm:$0xff] %v10133_v22  ;;  %v8545_v8 = vpop.f32.mrb[50].mxu0 }
 0x5e2   : > { %v10137_v27 = vadd.f32 %v8545_v8, %v7938_v2  ;;  %v2322_v32 = vpop.f32.mrb[51].mxu0 }
 0x5e3   : > { %v10139_v36 = vadd.f32 %v7938_v2, %v2322_v32 }
 0x5e4   : > { %12639 = vst [vmem:[#allocation45_spill] sm:$0xff] %v10137_v27 }
 0x5e5   : > { %12640 = vst [vmem:[#allocation46_spill] sm:$0xff] %v10139_v36  ;;  %v8548_v41 = vpop.f32.mrb[52].mxu0 }
 0x5e6   : > { %v10143_v42 = vadd.f32 %v8548_v41, %v7938_v2  ;;  %v2332_v29 = vpop.f32.mrb[53].mxu0 }
 0x5e7   : > { %v10145_v43 = vadd.f32 %v7938_v2, %v2332_v29 }
 0x5e8   : > { %12641 = vst [vmem:[#allocation47_spill] sm:$0xff] %v10143_v42 }
 0x5e9   : > { %12642 = vst [vmem:[#allocation48_spill] sm:$0xff] %v10145_v43  ;;  %v8551_v44 = vpop.f32.mrb[54].mxu0 }
 0x5ea   : > { %v10149_v50 = vadd.f32 %v8551_v44, %v7938_v2  ;;  %v2342_v5 = vpop.f32.mrb[55].mxu0 }
 0x5eb   : > { %v10151_v10 = vadd.f32 %v7938_v2, %v2342_v5 }
 0x5ec   : > { %12643 = vst [vmem:[#allocation49_spill] sm:$0xff] %v10149_v50 }
 0x5ed   : > { %12644 = vst [vmem:[#allocation50_spill] sm:$0xff] %v10151_v10  ;;  %v8554_v12 = vpop.f32.mrb[56].mxu0 }
 0x5ee   : > { %v10155_v20 = vadd.f32 %v8554_v12, %v7938_v2  ;;  %v2352_v8 = vpop.f32.mrb[57].mxu0 }
 0x5ef   : > { %v10157_v32 = vadd.f32 %v7938_v2, %v2352_v8 }
 0x5f0   : > { %12645 = vst [vmem:[#allocation51_spill] sm:$0xff] %v10155_v20 }
 0x5f1   : > { %12646 = vst [vmem:[#allocation52_spill] sm:$0xff] %v10157_v32  ;;  %v8557_v29 = vpop.f32.mrb[58].mxu0 }
 0x5f2   : > { %v10161_v9 = vadd.f32 %v8557_v29, %v7938_v2  ;;  %v2362_v44 = vpop.f32.mrb[59].mxu0 }
 0x5f3   : > { %v10163_v45 = vadd.f32 %v7938_v2, %v2362_v44 }
 0x5f4   : > { %12647 = vst [vmem:[#allocation53_spill] sm:$0xff] %v10161_v9 }
 0x5f5   : > { %12648 = vst [vmem:[#allocation54_spill] sm:$0xff] %v10163_v45  ;;  %v8560_v39 = vpop.f32.mrb[60].mxu0 }
 0x5f6   : > { %v10167_v33 = vadd.f32 %v8560_v39, %v7938_v2  ;;  %v2372_v12 = vpop.f32.mrb[61].mxu0 }
 0x5f7   : > { %v10169_v25 = vadd.f32 %v7938_v2, %v2372_v12 }
 0x5f8   : > { %12649 = vst [vmem:[#allocation55_spill] sm:$0xff] %v10167_v33 }
 0x5f9   : > { %12650 = vst [vmem:[#allocation56_spill] sm:$0xff] %v10169_v25  ;;  %v8563_v17 = vpop.f32.mrb[62].mxu0 }
 0x5fa   : > { %v10173_v41 = vadd.f32 %v8563_v17, %v7938_v2  ;;  %v2382_v29 = vpop.f32.mrb[63].mxu0 }
 0x5fb   : > { %v10175_v7 = vadd.f32 %v7938_v2, %v2382_v29 }
 0x5fc   : > { %12651 = vst [vmem:[#allocation57_spill] sm:$0xff] %v10173_v41 }
 0x5fd   : > { %12652 = vst [vmem:[#allocation58_spill] sm:$0xff] %v10175_v7  ;;  %v8566_v34 = vpop.f32.mrb[64].mxu0 }
 0x5fe   : > { %v10179_v5 = vadd.f32 %v8566_v34, %v7938_v2  ;;  %v2392_v39 = vpop.f32.mrb[65].mxu0 }
 0x5ff   : > { %v10181_v62 = vadd.f32 %v7938_v2, %v2392_v39 }
 0x600   : > { %12653 = vst [vmem:[#allocation59_spill] sm:$0xff] %v10179_v5 }
 0x601   : > { %12654 = vst [vmem:[#allocation60_spill] sm:$0xff] %v10181_v62  ;;  %v8612_v63 = vpop.f32.mrb[66].mxu0 }
 0x602   : > { %3080 = vst.msk [vmem:[#allocation4 + $0x18] sm:$0xff] %vm358_vm4, %v8612_v63  ;;  %v2970_v17 = vpop.f32.mrb[67].mxu0 }
 0x603   : > { %3079 = vst.msk [vmem:[#allocation4 + $0x10] sm:$0xff] %vm358_vm4, %v2970_v17 }
 0x605   : > { %v8615_v29 = vpop.f32.mrb[68].mxu0 }
 0x606   : > { %3082 = vst.msk [vmem:[#allocation4 + $0x28] sm:$0xff] %vm358_vm4, %v8615_v29  ;;  %v2980_v8 = vpop.f32.mrb[69].mxu0 }
 0x607   : > { %3081 = vst.msk [vmem:[#allocation4 + $0x20] sm:$0xff] %vm358_vm4, %v2980_v8 }
 0x609   : > { %v8618_v34 = vpop.f32.mrb[70].mxu0  ;;  %v3548_v44 = vld [vmem:[#allocation4 + $0x18] sm:$0xff] }
 0x60a   : > { %3084 = vst.msk [vmem:[#allocation4 + $0x38] sm:$0xff] %vm358_vm4, %v8618_v34  ;;  %3593 = vrot.lane.b32.xlu0 %v3548_v44, %s9043_s26  ;;  %v2990_v2 = vpop.f32.mrb[71].mxu0  ;;  %v3153_v39 = vld [vmem:[#allocation4 + $0x13] sm:$0xff]  ;;  %v3152_v17 = vld [vmem:[#allocation4 + $0xb] sm:$0xff] }
 0x60b   : > { %3083 = vst.msk [vmem:[#allocation4 + $0x30] sm:$0xff] %vm358_vm4, %v2990_v2  ;;  %3199 = vrot.lane.b32.xlu1 %v3153_v39, %s9037_s27  ;;  %v3285_v29 = vld [vmem:[#allocation4 + $0x14] sm:$0xff]  ;;  %v3284_v44 = vld [vmem:[#allocation4 + $0xc] sm:$0xff] }
 0x60c   : > { %v3679_v39 = vld [vmem:[#allocation4 + $0x11] sm:$0xff] }
 0x60d   : > { %v8621_v63 = vpop.f32.mrb[72].mxu0 }
 0x60e   : > { %3086 = vst.msk [vmem:[#allocation4 + $0x48] sm:$0xff] %vm358_vm4, %v8621_v63  ;;  %3197 = vrot.lane.b32.xlu0 %v3152_v17, %s9037_s27  ;;  %v3000_v8 = vpop.f32.mrb[73].mxu0  ;;  %v3415_v17 = vld [vmem:[#allocation4 + $0xf] sm:$0xff]  ;;  %v3418_v12 = vld [vmem:[#allocation4 + $0x27] sm:$0xff] }
 0x60f   : > { %3085 = vst.msk [vmem:[#allocation4 + $0x40] sm:$0xff] %vm358_vm4, %v3000_v8  ;;  %3331 = vrot.lane.b32.xlu1 %v3285_v29, %s9039_s30  ;;  %v3550_v29 = vld [vmem:[#allocation4 + $0x28] sm:$0xff] }
 0x611   : > { %v8624_v34 = vpop.f32.mrb[74].mxu0 }
 0x612   : > { %3088 = vst.msk [vmem:[#allocation4 + $0x58] sm:$0xff] %vm358_vm4, %v8624_v34  ;;  %3329 = vrot.lane.b32.xlu0 %v3284_v44, %s9039_s30  ;;  %v3010_v2 = vpop.f32.mrb[75].mxu0  ;;  %v3416_v44 = vld [vmem:[#allocation4 + $0x17] sm:$0xff] }
 0x613   : > { %3087 = vst.msk [vmem:[#allocation4 + $0x50] sm:$0xff] %vm358_vm4, %v3010_v2  ;;  %3723 = vrot.lane.b32.xlu1 %v3679_v39, %s9044_s15  ;;  %v3154_v39 = vld [vmem:[#allocation4 + $0x1b] sm:$0xff] }
 0x615   : > { %v8627_v63 = vpop.f32.mrb[76].mxu0 }
 0x616   : > { %3090 = vst.msk [vmem:[#allocation4 + $0x68] sm:$0xff] %vm358_vm4, %v8627_v63  ;;  %3459 = vrot.lane.b32.xlu0 %v3415_v17, %s9045_s16  ;;  %v3020_v8 = vpop.f32.mrb[77].mxu0  ;;  %v3547_v17 = vld [vmem:[#allocation4 + $0x10] sm:$0xff]  ;;  %v4042_v59 = vld [vmem:[#allocation4 + $0x46] sm:$0xff] }
 0x617   : > { %3089 = vst.msk [vmem:[#allocation4 + $0x60] sm:$0xff] %vm358_vm4, %v3020_v8  ;;  %3597 = vrot.lane.b32.xlu1 %v3550_v29, %s9043_s26  ;;  %v3286_v29 = vld [vmem:[#allocation4 + $0x1c] sm:$0xff] }
 0x619   : > { %v8630_v34 = vpop.f32.mrb[78].mxu0  ;;  %v3556_v58 = vld [vmem:[#allocation4 + $0x58] sm:$0xff] }
 0x61a   : > { %3092 = vst.msk [vmem:[#allocation4 + $0x78] sm:$0xff] %vm358_vm4, %v8630_v34  ;;  %3461 = vrot.lane.b32.xlu0 %v3416_v44, %s9045_s16  ;;  %v3030_v2 = vpop.f32.mrb[79].mxu0  ;;  %v3417_v44 = vld [vmem:[#allocation4 + $0x1f] sm:$0xff]  ;;  %v3687_v54 = vld [vmem:[#allocation4 + $0x51] sm:$0xff] }
 0x61b   : > { %3091 = vst.msk [vmem:[#allocation4 + $0x70] sm:$0xff] %vm358_vm4, %v3030_v2  ;;  %3201 = vrot.lane.b32.xlu1 %v3154_v39, %s9037_s27  ;;  %v3155_v39 = vld [vmem:[#allocation4 + $0x23] sm:$0xff]  ;;  %v3423_v48 = vld [vmem:[#allocation4 + $0x4f] sm:$0xff]  ;;  %v3424_v3 = vld [vmem:[#allocation4 + $0x57] sm:$0xff] }
 0x61c   : > { %v3555_v56 = vld [vmem:[#allocation4 + $0x50] sm:$0xff] }
 0x61d   : > { %v8633_v63 = vpop.f32.mrb[80].mxu0  ;;  %v3911_v46 = vld [vmem:[#allocation4 + $0x4d] sm:$0xff]  ;;  %v3912_v62 = vld [vmem:[#allocation4 + $0x55] sm:$0xff] }
 0x61e   : > { %3094 = vst.msk [vmem:[#allocation4 + $0x88] sm:$0xff] %vm358_vm4, %v8633_v63  ;;  %3591 = vrot.lane.b32.xlu0 %v3547_v17, %s9043_s26  ;;  %v3040_v8 = vpop.f32.mrb[81].mxu0  ;;  %v3680_v17 = vld [vmem:[#allocation4 + $0x19] sm:$0xff]  ;;  %v4043_v7 = vld [vmem:[#allocation4 + $0x4e] sm:$0xff]  ;;  %v3689_v45 = vld [vmem:[#allocation4 + $0x61] sm:$0xff] }
 0x61f   : > { %3093 = vst.msk [vmem:[#allocation4 + $0x80] sm:$0xff] %vm358_vm4, %v3040_v8  ;;  %3333 = vrot.lane.b32.xlu1 %v3286_v29, %s9039_s30  ;;  %v4044_v41 = vld [vmem:[#allocation4 + $0x56] sm:$0xff]  ;;  %v3558_v33 = vld [vmem:[#allocation4 + $0x68] sm:$0xff]  ;;  %v3425_v9 = vld [vmem:[#allocation4 + $0x5f] sm:$0xff] }
 0x620   : > { %v3426_v20 = vld [vmem:[#allocation4 + $0x67] sm:$0xff]  ;;  %v3913_v30 = vld [vmem:[#allocation4 + $0x5d] sm:$0xff] }
 0x621   : > { %v8636_v34 = vpop.f32.mrb[82].mxu0  ;;  %v3557_v10 = vld [vmem:[#allocation4 + $0x60] sm:$0xff]  ;;  %v3560_v28 = vld [vmem:[#allocation4 + $0x78] sm:$0xff] }
 0x622   : > { %3096 = vst.msk [vmem:[#allocation4 + $0x98] sm:$0xff] %vm358_vm4, %v8636_v34  ;;  %3463 = vrot.lane.b32.xlu0 %v3417_v44, %s9045_s16  ;;  %v3050_v2 = vpop.f32.mrb[83].mxu0  ;;  %v3549_v44 = vld [vmem:[#allocation4 + $0x20] sm:$0xff]  ;;  %v3691_v26 = vld [vmem:[#allocation4 + $0x71] sm:$0xff] }
 0x623   : > { %3095 = vst.msk [vmem:[#allocation4 + $0x90] sm:$0xff] %vm358_vm4, %v3050_v2  ;;  %3203 = vrot.lane.b32.xlu1 %v3155_v39, %s9037_s27  ;;  %v3287_v39 = vld [vmem:[#allocation4 + $0x24] sm:$0xff]  ;;  %v3427_v22 = vld [vmem:[#allocation4 + $0x6f] sm:$0xff]  ;;  %v3428_v1 = vld [vmem:[#allocation4 + $0x77] sm:$0xff] }
 0x624   : > { %v3914_v42 = vld [vmem:[#allocation4 + $0x65] sm:$0xff]  ;;  %v3559_v16 = vld [vmem:[#allocation4 + $0x70] sm:$0xff] }
 0x625   : > { %v8639_v63 = vpop.f32.mrb[84].mxu0  ;;  %v4045_v31 = vld [vmem:[#allocation4 + $0x5e] sm:$0xff]  ;;  %v4046_v36 = vld [vmem:[#allocation4 + $0x66] sm:$0xff]  ;;  %v3916_v0 = vld [vmem:[#allocation4 + $0x75] sm:$0xff] }
 0x626   : > { %3098 = vst.msk [vmem:[#allocation4 + $0xa8] sm:$0xff] %vm358_vm4, %v8639_v63  ;;  %3725 = vrot.lane.b32.xlu0 %v3680_v17, %s9044_s15  ;;  %v3060_v8 = vpop.f32.mrb[85].mxu0  ;;  %v3905_v63 = vld [vmem:[#allocation4 + $0x1d] sm:$0xff]  ;;  %v3906_v17 = vld [vmem:[#allocation4 + $0x25] sm:$0xff]  ;;  %v3915_v14 = vld [vmem:[#allocation4 + $0x6d] sm:$0xff] }
 0x627   : > { %3097 = vst.msk [vmem:[#allocation4 + $0xa0] sm:$0xff] %vm358_vm4, %v3060_v8  ;;  %3465 = vrot.lane.b32.xlu1 %v3418_v12, %s9045_s16  ;;  %v3681_v12 = vld [vmem:[#allocation4 + $0x21] sm:$0xff]  ;;  %v3157_v8 = vld [vmem:[#allocation4 + $0x33] sm:$0xff] }
 0x628   : > { %v4047_v57 = vld [vmem:[#allocation4 + $0x6e] sm:$0xff]  ;;  %v4048_v15 = vld [vmem:[#allocation4 + $0x76] sm:$0xff]  ;;  %v3693_v53 = vld [vmem:[#allocation4 + $0x81] sm:$0xff] }
 0x629   : > { %v8642_v34 = vpop.f32.mrb[86].mxu0  ;;  %v3562_v38 = vld [vmem:[#allocation4 + $0x88] sm:$0xff] }
 0x62a   : > { %3100 = vst.msk [vmem:[#allocation4 + $0xb8] sm:$0xff] %vm358_vm4, %v8642_v34  ;;  %3595 = vrot.lane.b32.xlu0 %v3549_v44, %s9043_s26  ;;  %v3070_v2 = vpop.f32.mrb[87].mxu0  ;;  %v4037_v34 = vld [vmem:[#allocation4 + $0x1e] sm:$0xff]  ;;  %v3682_v44 = vld [vmem:[#allocation4 + $0x29] sm:$0xff] }
 0x62b   : > { %3099 = vst.msk [vmem:[#allocation4 + $0xb0] sm:$0xff] %vm358_vm4, %v3070_v2  ;;  %3335 = vrot.lane.b32.xlu1 %v3287_v39, %s9039_s30  ;;  %v4038_v2 = vld [vmem:[#allocation4 + $0x26] sm:$0xff] }
 0x62e   : > { %3819 = vrot.lane.b32.xlu0 %v3287_v39, %s9041_s12  ;;  %v3552_v39 = vld [vmem:[#allocation4 + $0x38] sm:$0xff] }
 0x62f   : > { %3817 = vrot.lane.b32.xlu1 %v3286_v29, %s9041_s12  ;;  %v3289_v29 = vld [vmem:[#allocation4 + $0x34] sm:$0xff] }
 0x632   : > { %3949 = vrot.lane.b32.xlu0 %v3905_v63, %s9038_s28  ;;  %v3288_v63 = vld [vmem:[#allocation4 + $0x2c] sm:$0xff] }
 0x633   : > { %3727 = vrot.lane.b32.xlu1 %v3681_v12, %s9044_s15  ;;  %v3156_v12 = vld [vmem:[#allocation4 + $0x2b] sm:$0xff] }
 0x636   : > { %3951 = vrot.lane.b32.xlu0 %v3906_v17, %s9038_s28  ;;  %v3683_v17 = vld [vmem:[#allocation4 + $0x31] sm:$0xff] }
 0x637   : > { %3207 = vrot.lane.b32.xlu1 %v3157_v8, %s9037_s27  ;;  %v3419_v8 = vld [vmem:[#allocation4 + $0x2f] sm:$0xff] }
 0x63a   : > { %4081 = vrot.lane.b32.xlu0 %v4037_v34, %s9040_s11  ;;  %v3158_v34 = vld [vmem:[#allocation4 + $0x3b] sm:$0xff] }
 0x63b   : > { %3729 = vrot.lane.b32.xlu1 %v3682_v44, %s9044_s15  ;;  %v3420_v44 = vld [vmem:[#allocation4 + $0x37] sm:$0xff] }
 0x63e   : > { %4083 = vrot.lane.b32.xlu0 %v4038_v2, %s9040_s11  ;;  %v3290_v2 = vld [vmem:[#allocation4 + $0x3c] sm:$0xff] }
 0x63f   : > { %3339 = vrot.lane.b32.xlu1 %v3289_v29, %s9039_s30 }
 0x642   : > { %3601 = vrot.lane.b32.xlu0 %v3552_v39, %s9043_s26  ;;  %v3551_v39 = vld [vmem:[#allocation4 + $0x30] sm:$0xff] }
 0x643   : > { %3821 = vrot.lane.b32.xlu1 %v3288_v63, %s9041_s12 }
 0x646   : > { %3205 = vrot.lane.b32.xlu0 %v3156_v12, %s9037_s27  ;;  %v3684_v12 = vld [vmem:[#allocation4 + $0x39] sm:$0xff] }
 0x647   : > { %3823 = vrot.lane.b32.xlu1 %v3289_v29, %s9041_s12  ;;  %v3159_v29 = vld [vmem:[#allocation4 + $0x43] sm:$0xff] }
 0x64a   : > { %3337 = vrot.lane.b32.xlu0 %v3288_v63, %s9039_s30  ;;  %v3907_v63 = vld [vmem:[#allocation4 + $0x2d] sm:$0xff] }
 0x64b   : > { %3731 = vrot.lane.b32.xlu1 %v3683_v17, %s9044_s15  ;;  %v3908_v17 = vld [vmem:[#allocation4 + $0x35] sm:$0xff] }
 0x64e   : > { %3467 = vrot.lane.b32.xlu0 %v3419_v8, %s9045_s16  ;;  %v3291_v8 = vld [vmem:[#allocation4 + $0x44] sm:$0xff] }
 0x64f   : > { %3209 = vrot.lane.b32.xlu1 %v3158_v34, %s9037_s27  ;;  %v4039_v34 = vld [vmem:[#allocation4 + $0x2e] sm:$0xff] }
 0x652   : > { %3469 = vrot.lane.b32.xlu0 %v3420_v44, %s9045_s16  ;;  %v4040_v44 = vld [vmem:[#allocation4 + $0x36] sm:$0xff] }
 0x653   : > { %3341 = vrot.lane.b32.xlu1 %v3290_v2, %s9039_s30 }
 0x656   : > { %3599 = vrot.lane.b32.xlu0 %v3551_v39, %s9043_s26  ;;  %v3554_v39 = vld [vmem:[#allocation4 + $0x48] sm:$0xff] }
 0x657   : > { %3211 = vrot.lane.b32.xlu1 %v3159_v29, %s9037_s27  ;;  %v3685_v29 = vld [vmem:[#allocation4 + $0x41] sm:$0xff] }
 0x65a   : > { %3953 = vrot.lane.b32.xlu0 %v3907_v63, %s9038_s28  ;;  %v3421_v63 = vld [vmem:[#allocation4 + $0x3f] sm:$0xff] }
 0x65b   : > { %3733 = vrot.lane.b32.xlu1 %v3684_v12, %s9044_s15  ;;  %v3160_v12 = vld [vmem:[#allocation4 + $0x4b] sm:$0xff] }
 0x65e   : > { %3955 = vrot.lane.b32.xlu0 %v3908_v17, %s9038_s28  ;;  %v3422_v17 = vld [vmem:[#allocation4 + $0x47] sm:$0xff] }
 0x65f   : > { %3343 = vrot.lane.b32.xlu1 %v3291_v8, %s9039_s30 }
 0x662   : > { %4085 = vrot.lane.b32.xlu0 %v4039_v34, %s9040_s11  ;;  %v3553_v34 = vld [vmem:[#allocation4 + $0x40] sm:$0xff] }
 0x663   : > { %3825 = vrot.lane.b32.xlu1 %v3290_v2, %s9041_s12  ;;  %v3292_v2 = vld [vmem:[#allocation4 + $0x4c] sm:$0xff] }
 0x666   : > { %4087 = vrot.lane.b32.xlu0 %v4040_v44, %s9040_s11  ;;  %v3909_v44 = vld [vmem:[#allocation4 + $0x3d] sm:$0xff] }
 0x667   : > { %3827 = vrot.lane.b32.xlu1 %v3291_v8, %s9041_s12  ;;  %v3161_v8 = vld [vmem:[#allocation4 + $0x53] sm:$0xff] }
 0x66a   : > { %3605 = vrot.lane.b32.xlu0 %v3554_v39, %s9043_s26  ;;  %v3686_v39 = vld [vmem:[#allocation4 + $0x49] sm:$0xff] }
 0x66b   : > { %3735 = vrot.lane.b32.xlu1 %v3685_v29, %s9044_s15 }
 0x66e   : > { %3471 = vrot.lane.b32.xlu0 %v3421_v63, %s9045_s16 }
 0x66f   : > { %3213 = vrot.lane.b32.xlu1 %v3160_v12, %s9037_s27  ;;  %v3910_v12 = vld [vmem:[#allocation4 + $0x45] sm:$0xff] }
 0x672   : > { %3473 = vrot.lane.b32.xlu0 %v3422_v17, %s9045_s16  ;;  %v3293_v17 = vld [vmem:[#allocation4 + $0x54] sm:$0xff] }
 0x673   : > { %3345 = vrot.lane.b32.xlu1 %v3292_v2, %s9039_s30 }
 0x676   : > { %3603 = vrot.lane.b32.xlu0 %v3553_v34, %s9043_s26 }
 0x677   : > { %3215 = vrot.lane.b32.xlu1 %v3161_v8, %s9037_s27  ;;  %v4041_v8 = vld [vmem:[#allocation4 + $0x3e] sm:$0xff] }
 0x67a   : > { %3957 = vrot.lane.b32.xlu0 %v3909_v44, %s9038_s28 }
 0x67b   : > { %3737 = vrot.lane.b32.xlu1 %v3686_v39, %s9044_s15 }
 0x67c   : > { %v10265_v29 = vpop.permute.xlu0 %3593 }
 0x67d   : > { %v10267_v63 = vpop.permute.xlu1 %3199 }
 0x67e   : > { %3959 = vrot.lane.b32.xlu0 %v3910_v12, %s9038_s28 }
 0x67f   : > { %3347 = vrot.lane.b32.xlu1 %v3293_v17, %s9039_s30 }
 0x680   : > { %v10271_v34 = vpop.permute.xlu0 %3197 }
 0x681   : > { %v10273_v61 = vpop.permute.xlu1 %3331 }
 0x682   : > { %4089 = vrot.lane.b32.xlu0 %v4041_v8, %s9040_s11 }
 0x683   : > { %3829 = vrot.lane.b32.xlu1 %v3292_v2, %s9041_s12 }
 0x684   : > { %v10277_v44 = vpop.permute.xlu0 %3329 }
 0x685   : > { %v10279_v39 = vpop.permute.xlu1 %3723 }
 0x686   : > { %4091 = vrot.lane.b32.xlu0 %v4042_v59, %s9040_s11  ;;  %v3162_v59 = vld [vmem:[#allocation4 + $0x5b] sm:$0xff] }
 0x687   : > { %3831 = vrot.lane.b32.xlu1 %v3293_v17, %s9041_s12 }
 0x688   : > { %v10283_v12 = vpop.permute.xlu0 %3459 }
 0x689   : > { %v10285_v55 = vpop.permute.xlu1 %3597 }
 0x68a   : > { %3609 = vrot.lane.b32.xlu0 %v3556_v58, %s9043_s26  ;;  %v3294_v58 = vld [vmem:[#allocation4 + $0x5c] sm:$0xff] }
 0x68b   : > { %3739 = vrot.lane.b32.xlu1 %v3687_v54, %s9044_s15 }
 0x68c   : > { %v10289_v2 = vpop.permute.xlu0 %3461 }
 0x68d   : > { %v10291_v8 = vpop.permute.xlu1 %3201 }
 0x68e   : > { %3475 = vrot.lane.b32.xlu0 %v3423_v48, %s9045_s16  ;;  %v3163_v48 = vld [vmem:[#allocation4 + $0x63] sm:$0xff] }
 0x68f   : > { %3217 = vrot.lane.b32.xlu1 %v3162_v59, %s9037_s27 }
 0x690   : > { %v10295_v17 = vpop.permute.xlu0 %3591 }
 0x691   : > { %v10297_v23 = vpop.permute.xlu1 %3333 }
 0x692   : > { %3477 = vrot.lane.b32.xlu0 %v3424_v3, %s9045_s16  ;;  %v3688_v3 = vld [vmem:[#allocation4 + $0x59] sm:$0xff] }
 0x693   : > { %3349 = vrot.lane.b32.xlu1 %v3294_v58, %s9039_s30 }
 0x694   : > { %v10301_v54 = vpop.permute.xlu0 %3463 }
 0x695   : > { %v10303_v35 = vpop.permute.xlu1 %3203 }
 0x696   : > { %3607 = vrot.lane.b32.xlu0 %v3555_v56, %s9043_s26  ;;  %v3295_v56 = vld [vmem:[#allocation4 + $0x64] sm:$0xff] }
 0x697   : > { %3219 = vrot.lane.b32.xlu1 %v3163_v48, %s9037_s27 }
 0x698   : > { %v10307_v59 = vpop.permute.xlu0 %3725 }
 0x699   : > { %v10309_v4 = vpop.permute.xlu1 %3465 }
 0x69a   : > { %3961 = vrot.lane.b32.xlu0 %v3911_v46, %s9038_s28 }
 0x69b   : > { %3741 = vrot.lane.b32.xlu1 %v3688_v3, %s9044_s15 }
 0x69c   : > { %v10313_v60 = vpop.permute.xlu0 %3595 }
 0x69d   : > { %v10315_v37 = vpop.permute.xlu1 %3335 }
 0x69e   : > { %3963 = vrot.lane.b32.xlu0 %v3912_v62, %s9038_s28 }
 0x69f   : > { %3351 = vrot.lane.b32.xlu1 %v3295_v56, %s9039_s30 }
 0x6a0   : > { %v10319_v48 = vpop.permute.xlu0 %3819 }
 0x6a1   : > { %v10321_v5 = vpop.permute.xlu1 %3817 }
 0x6a2   : > { %4093 = vrot.lane.b32.xlu0 %v4043_v7, %s9040_s11 }
 0x6a3   : > { %3833 = vrot.lane.b32.xlu1 %v3294_v58, %s9041_s12 }
 0x6a4   : > { %v10325_v46 = vpop.permute.xlu0 %3949 }
 0x6a5   : > { %v10327_v3 = vpop.permute.xlu1 %3727 }
 0x6a6   : > { %4095 = vrot.lane.b32.xlu0 %v4044_v41, %s9040_s11  ;;  %v3164_v41 = vld [vmem:[#allocation4 + $0x6b] sm:$0xff] }
 0x6a7   : > { %3835 = vrot.lane.b32.xlu1 %v3295_v56, %s9041_s12 }
 0x6a8   : > { %v10331_v62 = vpop.permute.xlu0 %3951 }
 0x6a9   : > { %v10333_v25 = vpop.permute.xlu1 %3207 }
 0x6aa   : > { %3613 = vrot.lane.b32.xlu0 %v3558_v33, %s9043_s26  ;;  %v3296_v33 = vld [vmem:[#allocation4 + $0x6c] sm:$0xff] }
 0x6ab   : > { %3743 = vrot.lane.b32.xlu1 %v3689_v45, %s9044_s15 }
 0x6ac   : > { %v10337_v7 = vpop.permute.xlu0 %4081 }
 0x6ad   : > { %v10339_v58 = vpop.permute.xlu1 %3729 }
 0x6ae   : > { %3479 = vrot.lane.b32.xlu0 %v3425_v9, %s9045_s16  ;;  %v3165_v9 = vld [vmem:[#allocation4 + $0x73] sm:$0xff] }
 0x6af   : > { %3221 = vrot.lane.b32.xlu1 %v3164_v41, %s9037_s27 }
 0x6b0   : > { %v10343_v56 = vpop.permute.xlu0 %4083 }
 0x6b1   : > { %v10345_v32 = vpop.permute.xlu1 %3339 }
 0x6b2   : > { %3481 = vrot.lane.b32.xlu0 %v3426_v20, %s9045_s16  ;;  %v3690_v20 = vld [vmem:[#allocation4 + $0x69] sm:$0xff] }
 0x6b3   : > { %3353 = vrot.lane.b32.xlu1 %v3296_v33, %s9039_s30 }
 0x6b4   : > { %v10349_v45 = vpop.permute.xlu0 %3601 }
 0x6b5   : > { %v10351_v47 = vpop.permute.xlu1 %3821 }
 0x6b6   : > { %3611 = vrot.lane.b32.xlu0 %v3557_v10, %s9043_s26  ;;  %v3297_v10 = vld [vmem:[#allocation4 + $0x74] sm:$0xff] }
 0x6b7   : > { %3223 = vrot.lane.b32.xlu1 %v3165_v9, %s9037_s27 }
 0x6b8   : > { %v10355_v41 = vpop.permute.xlu0 %3205 }
 0x6b9   : > { %v10357_v50 = vpop.permute.xlu1 %3823 }
 0x6ba   : > { %3965 = vrot.lane.b32.xlu0 %v3913_v30, %s9038_s28 }
 0x6bb   : > { %3745 = vrot.lane.b32.xlu1 %v3690_v20, %s9044_s15 }
 0x6bc   : > { %v10361_v40 = vpop.permute.xlu0 %3337 }
 0x6bd   : > { %v10363_v43 = vpop.permute.xlu1 %3731 }
 0x6be   : > { %3967 = vrot.lane.b32.xlu0 %v3914_v42, %s9038_s28 }
 0x6bf   : > { %3355 = vrot.lane.b32.xlu1 %v3297_v10, %s9039_s30 }
 0x6c0   : > { %v10367_v9 = vpop.permute.xlu0 %3467 }
 0x6c1   : > { %v10369_v24 = vpop.permute.xlu1 %3209 }
 0x6c2   : > { %4097 = vrot.lane.b32.xlu0 %v4045_v31, %s9040_s11 }
 0x6c3   : > { %3837 = vrot.lane.b32.xlu1 %v3296_v33, %s9041_s12 }
 0x6c4   : > { %v10373_v30 = vpop.permute.xlu0 %3469 }
 0x6c5   : > { %v10375_v20 = vpop.permute.xlu1 %3341 }
 0x6c6   : > { %4099 = vrot.lane.b32.xlu0 %v4046_v36, %s9040_s11  ;;  %v3166_v36 = vld [vmem:[#allocation4 + $0x7b] sm:$0xff] }
 0x6c7   : > { %3839 = vrot.lane.b32.xlu1 %v3297_v10, %s9041_s12 }
 0x6c8   : > { %v10379_v42 = vpop.permute.xlu0 %3599 }
 0x6c9   : > { %v10381_v27 = vpop.permute.xlu1 %3211 }
 0x6ca   : > { %3617 = vrot.lane.b32.xlu0 %v3560_v28, %s9043_s26  ;;  %v3298_v28 = vld [vmem:[#allocation4 + $0x7c] sm:$0xff] }
 0x6cb   : > { %3747 = vrot.lane.b32.xlu1 %v3691_v26, %s9044_s15 }
 0x6cc   : > { %v10385_v31 = vpop.permute.xlu0 %3953 }
 0x6cd   : > { %v10387_v33 = vpop.permute.xlu1 %3733 }
 0x6ce   : > { %3483 = vrot.lane.b32.xlu0 %v3427_v22, %s9045_s16  ;;  %v3167_v22 = vld [vmem:[#allocation4 + $0x83] sm:$0xff] }
 0x6cf   : > { %3225 = vrot.lane.b32.xlu1 %v3166_v36, %s9037_s27 }
 0x6d0   : > { %v10391_v10 = vpop.permute.xlu0 %3955 }
 0x6d1   : > { %v10393_v19 = vpop.permute.xlu1 %3343 }
 0x6d2   : > { %3485 = vrot.lane.b32.xlu0 %v3428_v1, %s9045_s16  ;;  %v3692_v1 = vld [vmem:[#allocation4 + $0x79] sm:$0xff] }
 0x6d3   : > { %3357 = vrot.lane.b32.xlu1 %v3298_v28, %s9039_s30 }
 0x6d4   : > { %v10397_v26 = vpop.permute.xlu0 %4085 }
 0x6d5   : > { %12655 = vst [vmem:[#allocation61_spill] sm:$0xff] %v10397_v26  ;;  %v10399_v21 = vpop.permute.xlu1 %3825 }
 0x6d6   : > { %12656 = vst [vmem:[#allocation62_spill] sm:$0xff] %v10399_v21  ;;  %3615 = vrot.lane.b32.xlu0 %v3559_v16, %s9043_s26  ;;  %v3299_v16 = vld [vmem:[#allocation4 + $0x84] sm:$0xff] }
 0x6d7   : > { %3227 = vrot.lane.b32.xlu1 %v3167_v22, %s9037_s27 }
 0x6d8   : > { %v10403_v36 = vpop.permute.xlu0 %4087 }
 0x6d9   : > { %12657 = vst [vmem:[#allocation63_spill] sm:$0xff] %v10403_v36  ;;  %v10405_v13 = vpop.permute.xlu1 %3827  ;;  %v3564_v36 = vld [vmem:[#allocation4 + $0x98] sm:$0xff] }
 0x6da   : > { %12658 = vst [vmem:[#allocation64_spill] sm:$0xff] %v10405_v13  ;;  %3969 = vrot.lane.b32.xlu0 %v3915_v14, %s9038_s28 }
 0x6db   : > { %3749 = vrot.lane.b32.xlu1 %v3692_v1, %s9044_s15 }
 0x6dc   : > { %v10409_v18 = vpop.permute.xlu0 %3605 }
 0x6dd   : > { %12659 = vst [vmem:[#allocation65_spill] sm:$0xff] %v10409_v18  ;;  %v10411_v6 = vpop.permute.xlu1 %3735  ;;  %v3429_v18 = vld [vmem:[#allocation4 + $0x7f] sm:$0xff] }
 0x6de   : > { %12660 = vst [vmem:[#allocation66_spill] sm:$0xff] %v10411_v6  ;;  %3971 = vrot.lane.b32.xlu0 %v3916_v0, %s9038_s28  ;;  %v3430_v6 = vld [vmem:[#allocation4 + $0x87] sm:$0xff] }
 0x6df   : > { %3359 = vrot.lane.b32.xlu1 %v3299_v16, %s9039_s30 }
 0x6e0   : > { %v10415_v22 = vpop.permute.xlu0 %3471 }
 0x6e1   : > { %v10417_v11 = vpop.permute.xlu1 %3213 }
 0x6e2   : > { %4101 = vrot.lane.b32.xlu0 %v4047_v57, %s9040_s11 }
 0x6e3   : > { %3841 = vrot.lane.b32.xlu1 %v3298_v28, %s9041_s12 }
 0x6e4   : > { %v10421_v14 = vpop.permute.xlu0 %3473 }
 0x6e5   : > { %v10423_v1 = vpop.permute.xlu1 %3345 }
 0x6e6   : > { %12661 = vst [vmem:[#allocation67_spill] sm:$0xff] %v10423_v1  ;;  %4103 = vrot.lane.b32.xlu0 %v4048_v15, %s9040_s11  ;;  %v3168_v15 = vld [vmem:[#allocation4 + $0x8b] sm:$0xff] }
 0x6e7   : > { %3843 = vrot.lane.b32.xlu1 %v3299_v16, %s9041_s12 }
 0x6e8   : > { %v10427_v0 = vpop.permute.xlu0 %3603 }
 0x6e9   : > { %v10429_v51 = vpop.permute.xlu1 %3215 }
 0x6ea   : > { %12662 = vst [vmem:[#allocation68_spill] sm:$0xff] %v10429_v51  ;;  %3621 = vrot.lane.b32.xlu0 %v3562_v38, %s9043_s26  ;;  %v3300_v38 = vld [vmem:[#allocation4 + $0x8c] sm:$0xff] }
 0x6eb   : > { %3751 = vrot.lane.b32.xlu1 %v3693_v53, %s9044_s15  ;;  %v3435_v51 = vld [vmem:[#allocation4 + $0xaf] sm:$0xff] }
 0x6ec   : > { %v10433_v57 = vpop.permute.xlu0 %3957 }
 0x6ed   : > { %12663 = vst [vmem:[#allocation69_spill] sm:$0xff] %v10433_v57  ;;  %v10435_v28 = vpop.permute.xlu1 %3737 }
 0x6ee   : > { %12664 = vst [vmem:[#allocation70_spill] sm:$0xff] %v10435_v28  ;;  %3487 = vrot.lane.b32.xlu0 %v3429_v18, %s9045_s16  ;;  %v3561_v28 = vld [vmem:[#allocation4 + $0x80] sm:$0xff]  ;;  %v3169_v18 = vld [vmem:[#allocation4 + $0x93] sm:$0xff] }
 0x6ef   : > { %3229 = vrot.lane.b32.xlu1 %v3168_v15, %s9037_s27 }
 0x6f0   : > { %v10439_v16 = vpop.permute.xlu0 %3959 }
 0x6f1   : > { %12665 = vst [vmem:[#allocation71_spill] sm:$0xff] %v10439_v16  ;;  %v10441_v13 = vpop.permute.xlu1 %3347 }
 0x6f2   : > { %12666 = vst [vmem:[#allocation72_spill] sm:$0xff] %v10441_v13  ;;  %3489 = vrot.lane.b32.xlu0 %v3430_v6, %s9045_s16  ;;  %v3917_v13 = vld [vmem:[#allocation4 + $0x7d] sm:$0xff]  ;;  %v3694_v6 = vld [vmem:[#allocation4 + $0x89] sm:$0xff] }
 0x6f3   : > { %3361 = vrot.lane.b32.xlu1 %v3300_v38, %s9039_s30 }
 0x6f4   : > { %v10445_v53 = vpop.permute.xlu0 %4089 }
 0x6f5   : > { %12667 = vst [vmem:[#allocation73_spill] sm:$0xff] %v10445_v53  ;;  %v10447_v57 = vpop.permute.xlu1 %3829 }
 0x6f6   : > { %12668 = vst [vmem:[#allocation74_spill] sm:$0xff] %v10447_v57  ;;  %3619 = vrot.lane.b32.xlu0 %v3561_v28, %s9043_s26  ;;  %v3918_v57 = vld [vmem:[#allocation4 + $0x85] sm:$0xff]  ;;  %v3301_v28 = vld [vmem:[#allocation4 + $0x94] sm:$0xff] }
 0x6f7   : > { %3231 = vrot.lane.b32.xlu1 %v3169_v18, %s9037_s27 }
 0x6f8   : > { %v10451_v15 = vpop.permute.xlu0 %4091 }
 0x6f9   : > { %12669 = vst [vmem:[#allocation75_spill] sm:$0xff] %v10451_v15  ;;  %v10453_v16 = vpop.permute.xlu1 %3831 }
 0x6fa   : > { %12670 = vst [vmem:[#allocation76_spill] sm:$0xff] %v10453_v16  ;;  %3973 = vrot.lane.b32.xlu0 %v3917_v13, %s9038_s28  ;;  %v4049_v16 = vld [vmem:[#allocation4 + $0x7e] sm:$0xff] }
 0x6fb   : > { %3753 = vrot.lane.b32.xlu1 %v3694_v6, %s9044_s15 }
 0x6fc   : > { %v10457_v1 = vpop.permute.xlu0 %3609 }
 0x6fd   : > { %12671 = vst [vmem:[#allocation77_spill] sm:$0xff] %v10457_v1  ;;  %v10459_v53 = vpop.permute.xlu1 %3739  ;;  %v4050_v1 = vld [vmem:[#allocation4 + $0x86] sm:$0xff] }
 0x6fe   : > { %12672 = vst [vmem:[#allocation78_spill] sm:$0xff] %v10459_v53  ;;  %3975 = vrot.lane.b32.xlu0 %v3918_v57, %s9038_s28 }
 0x6ff   : > { %3363 = vrot.lane.b32.xlu1 %v3301_v28, %s9039_s30 }
 0x700   : > { %v10463_v18 = vpop.permute.xlu0 %3475 }
 0x701   : > { %12673 = vst [vmem:[#allocation79_spill] sm:$0xff] %v10463_v18  ;;  %v10465_v15 = vpop.permute.xlu1 %3217 }
 0x702   : > { %12674 = vst [vmem:[#allocation80_spill] sm:$0xff] %v10465_v15  ;;  %4105 = vrot.lane.b32.xlu0 %v4049_v16, %s9040_s11  ;;  %v3695_v15 = vld [vmem:[#allocation4 + $0x91] sm:$0xff] }
 0x703   : > { %3845 = vrot.lane.b32.xlu1 %v3300_v38, %s9041_s12 }
 0x704   : > { %v10469_v13 = vpop.permute.xlu0 %3477 }
 0x705   : > { %12675 = vst [vmem:[#allocation81_spill] sm:$0xff] %v10469_v13  ;;  %v10471_v6 = vpop.permute.xlu1 %3349 }
 0x706   : > { %12676 = vst [vmem:[#allocation82_spill] sm:$0xff] %v10471_v6  ;;  %4107 = vrot.lane.b32.xlu0 %v4050_v1, %s9040_s11  ;;  %v3431_v6 = vld [vmem:[#allocation4 + $0x8f] sm:$0xff]  ;;  %v3170_v1 = vld [vmem:[#allocation4 + $0x9b] sm:$0xff] }
 0x707   : > { %3847 = vrot.lane.b32.xlu1 %v3301_v28, %s9041_s12 }
 0x708   : > { %v10475_v57 = vpop.permute.xlu0 %3607 }
 0x709   : > { %12677 = vst [vmem:[#allocation83_spill] sm:$0xff] %v10475_v57  ;;  %v10477_v53 = vpop.permute.xlu1 %3219 }
 0x70a   : > { %12678 = vst [vmem:[#allocation84_spill] sm:$0xff] %v10477_v53  ;;  %3625 = vrot.lane.b32.xlu0 %v3564_v36, %s9043_s26  ;;  %v3432_v53 = vld [vmem:[#allocation4 + $0x97] sm:$0xff] }
 0x70b   : > { %3755 = vrot.lane.b32.xlu1 %v3695_v15, %s9044_s15  ;;  %v3302_v36 = vld [vmem:[#allocation4 + $0x9c] sm:$0xff] }
 0x70c   : > { %v10481_v16 = vpop.permute.xlu0 %3961 }
 0x70d   : > { %12679 = vst [vmem:[#allocation85_spill] sm:$0xff] %v10481_v16  ;;  %v10483_v38 = vpop.permute.xlu1 %3741 }
 0x70e   : > { %12680 = vst [vmem:[#allocation86_spill] sm:$0xff] %v10483_v38  ;;  %3491 = vrot.lane.b32.xlu0 %v3431_v6, %s9045_s16  ;;  %v3563_v38 = vld [vmem:[#allocation4 + $0x90] sm:$0xff]  ;;  %v3171_v6 = vld [vmem:[#allocation4 + $0xa3] sm:$0xff] }
 0x70f   : > { %3233 = vrot.lane.b32.xlu1 %v3170_v1, %s9037_s27 }
 0x710   : > { %v10487_v28 = vpop.permute.xlu0 %3963 }
 0x711   : > { %12681 = vst [vmem:[#allocation87_spill] sm:$0xff] %v10487_v28  ;;  %v10489_v13 = vpop.permute.xlu1 %3351 }
 0x712   : > { %12682 = vst [vmem:[#allocation88_spill] sm:$0xff] %v10489_v13  ;;  %3493 = vrot.lane.b32.xlu0 %v3432_v53, %s9045_s16  ;;  %v3919_v13 = vld [vmem:[#allocation4 + $0x8d] sm:$0xff]  ;;  %v3696_v53 = vld [vmem:[#allocation4 + $0x99] sm:$0xff] }
 0x713   : > { %3365 = vrot.lane.b32.xlu1 %v3302_v36, %s9039_s30 }
 0x714   : > { %v10493_v15 = vpop.permute.xlu0 %4093 }
 0x715   : > { %12683 = vst [vmem:[#allocation89_spill] sm:$0xff] %v10493_v15  ;;  %v10495_v16 = vpop.permute.xlu1 %3833 }
 0x716   : > { %12684 = vst [vmem:[#allocation90_spill] sm:$0xff] %v10495_v16  ;;  %3623 = vrot.lane.b32.xlu0 %v3563_v38, %s9043_s26  ;;  %v3920_v16 = vld [vmem:[#allocation4 + $0x95] sm:$0xff]  ;;  %v3303_v38 = vld [vmem:[#allocation4 + $0xa4] sm:$0xff] }
 0x717   : > { %3235 = vrot.lane.b32.xlu1 %v3171_v6, %s9037_s27 }
 0x718   : > { %v10499_v1 = vpop.permute.xlu0 %4095 }
 0x719   : > { %12685 = vst [vmem:[#allocation91_spill] sm:$0xff] %v10499_v1  ;;  %v10501_v28 = vpop.permute.xlu1 %3835 }
 0x71a   : > { %12686 = vst [vmem:[#allocation92_spill] sm:$0xff] %v10501_v28  ;;  %3977 = vrot.lane.b32.xlu0 %v3919_v13, %s9038_s28  ;;  %v4051_v28 = vld [vmem:[#allocation4 + $0x8e] sm:$0xff] }
 0x71b   : > { %3757 = vrot.lane.b32.xlu1 %v3696_v53, %s9044_s15 }
 0x71c   : > { %v10505_v57 = vpop.permute.xlu0 %3613 }
 0x71d   : > { %12687 = vst [vmem:[#allocation93_spill] sm:$0xff] %v10505_v57  ;;  %v10507_v15 = vpop.permute.xlu1 %3743  ;;  %v4052_v57 = vld [vmem:[#allocation4 + $0x96] sm:$0xff] }
 0x71e   : > { %12688 = vst [vmem:[#allocation94_spill] sm:$0xff] %v10507_v15  ;;  %3979 = vrot.lane.b32.xlu0 %v3920_v16, %s9038_s28 }
 0x71f   : > { %3367 = vrot.lane.b32.xlu1 %v3303_v38, %s9039_s30 }
 0x720   : > { %v10511_v6 = vpop.permute.xlu0 %3479 }
 0x721   : > { %12689 = vst [vmem:[#allocation95_spill] sm:$0xff] %v10511_v6  ;;  %v10513_v1 = vpop.permute.xlu1 %3221  ;;  %v3566_v6 = vld [vmem:[#allocation4 + $0xa8] sm:$0xff] }
 0x722   : > { %12690 = vst [vmem:[#allocation96_spill] sm:$0xff] %v10513_v1  ;;  %4109 = vrot.lane.b32.xlu0 %v4051_v28, %s9040_s11  ;;  %v3921_v1 = vld [vmem:[#allocation4 + $0x9d] sm:$0xff] }
 0x723   : > { %3849 = vrot.lane.b32.xlu1 %v3302_v36, %s9041_s12 }
 0x724   : > { %v10517_v13 = vpop.permute.xlu0 %3481 }
 0x725   : > { %12691 = vst [vmem:[#allocation97_spill] sm:$0xff] %v10517_v13  ;;  %v10519_v53 = vpop.permute.xlu1 %3353 }
 0x726   : > { %12692 = vst [vmem:[#allocation98_spill] sm:$0xff] %v10519_v53  ;;  %4111 = vrot.lane.b32.xlu0 %v4052_v57, %s9040_s11  ;;  %v3433_v53 = vld [vmem:[#allocation4 + $0x9f] sm:$0xff] }
 0x727   : > { %3851 = vrot.lane.b32.xlu1 %v3303_v38, %s9041_s12  ;;  %v4053_v57 = vld [vmem:[#allocation4 + $0x9e] sm:$0xff] }
 0x728   : > { %v10523_v16 = vpop.permute.xlu0 %3611 }
 0x729   : > { %12693 = vst [vmem:[#allocation99_spill] sm:$0xff] %v10523_v16  ;;  %v10525_v15 = vpop.permute.xlu1 %3223  ;;  %v4057_v16 = vld [vmem:[#allocation4 + $0xbe] sm:$0xff] }
 0x72a   : > { %12694 = vst [vmem:[#allocation100_spill] sm:$0xff] %v10525_v15  ;;  %3629 = vrot.lane.b32.xlu0 %v3566_v6, %s9043_s26  ;;  %v3434_v15 = vld [vmem:[#allocation4 + $0xa7] sm:$0xff]  ;;  %v3700_v6 = vld [vmem:[#allocation4 + $0xb9] sm:$0xff] }
 0x72b   : > { %3981 = vrot.lane.b32.xlu1 %v3921_v1, %s9038_s28 }
 0x72c   : > { %v10529_v28 = vpop.permute.xlu0 %3965 }
 0x72d   : > { %12695 = vst [vmem:[#allocation101_spill] sm:$0xff] %v10529_v28  ;;  %v10531_v36 = vpop.permute.xlu1 %3745 }
 0x72e   : > { %12696 = vst [vmem:[#allocation102_spill] sm:$0xff] %v10531_v36  ;;  %3495 = vrot.lane.b32.xlu0 %v3433_v53, %s9045_s16  ;;  %v3565_v36 = vld [vmem:[#allocation4 + $0xa0] sm:$0xff] }
 0x72f   : > { %4113 = vrot.lane.b32.xlu1 %v4053_v57, %s9040_s11  ;;  %v3812_v53 = vld [vmem:[#allocation4 + $0xbc] sm:$0xff] }
 0x730   : > { %v10535_v38 = vpop.permute.xlu0 %3967 }
 0x731   : > { %12697 = vst [vmem:[#allocation103_spill] sm:$0xff] %v10535_v38  ;;  %v10537_v13 = vpop.permute.xlu1 %3355  ;;  %v3697_v38 = vld [vmem:[#allocation4 + $0xa1] sm:$0xff] }
 0x732   : > { %12698 = vst [vmem:[#allocation104_spill] sm:$0xff] %v10537_v13  ;;  %3497 = vrot.lane.b32.xlu0 %v3434_v15, %s9045_s16  ;;  %v4400_v13 = vld [vmem:[%s12522_s4 + $0x18] sm:$0xff]  ;;  %v4401_v15 = vld [vmem:[%s12522_s4 + $0x20] sm:$0xff] }
 0x733   : > { %3765 = vrot.lane.b32.xlu1 %v3700_v6, %s9044_s15 }
 0x734   : > { %v10541_v1 = vpop.permute.xlu0 %4097 }
 0x735   : > { %12699 = vst [vmem:[#allocation105_spill] sm:$0xff] %v10541_v1  ;;  %v10543_v28 = vpop.permute.xlu1 %3837  ;;  %v3922_v1 = vld [vmem:[#allocation4 + $0xa5] sm:$0xff] }
 0x736   : > { %12700 = vst [vmem:[#allocation106_spill] sm:$0xff] %v10543_v28  ;;  %3627 = vrot.lane.b32.xlu0 %v3565_v36, %s9043_s26  ;;  %v8851_v28 = vpack.c.bf16 %v4401_v15, %v4400_v13  ;;  %v3925_v36 = vld [vmem:[#allocation4 + $0xbd] sm:$0xff]  ;;  %v10572_v15 = vld [vmem:[%s12523_s5 + $0xe] ss:$0 sm:$0xff] }
 0x737   : > { %3857 = vrot.lane.b32.xlu1 %v3812_v53, %s9041_s12 }
 0x738   : > { %v10547_v57 = vpop.permute.xlu0 %4099  ;;  %8852 = vmatprep.subr.bf16.mxu1 %v8851_v28 }
 0x739   : > { %12701 = vst [vmem:[#allocation107_spill] sm:$0xff] %v10547_v57  ;;  %v10555_v6 = vpop.permute.xlu1 %3839  ;;  %8854 = vmatpush3.bf16.msra.mxu1 %v8851_v28  ;;  %v3172_v28 = vld [vmem:[#allocation4 + $0xab] sm:$0xff] }
 0x73a   : > { %12702 = vst [vmem:[#allocation108_spill] sm:$0xff] %v10555_v6  ;;  %3759 = vrot.lane.b32.xlu0 %v3697_v38, %s9044_s15  ;;  %v4054_v38 = vld [vmem:[#allocation4 + $0xa6] sm:$0xff] }
 0x73b   : > { %3989 = vrot.lane.b32.xlu1 %v3925_v36, %s9038_s28  ;;  %v3107_v36 = vld [vmem:[#allocation4 + $0x2] sm:$0xff] }
 0x73c   : > { %v10559_v53 = vpop.permute.xlu0 %3617 }
 0x73d   : > { %12703 = vst [vmem:[#allocation109_spill] sm:$0xff] %v10559_v53  ;;  %v10561_v57 = vpop.permute.xlu1 %3747 }
 0x73e   : > { %12704 = vst [vmem:[#allocation110_spill] sm:$0xff] %v10561_v57  ;;  %3983 = vrot.lane.b32.xlu0 %v3922_v1, %s9038_s28  ;;  %v3568_v57 = vld [vmem:[#allocation4 + $0xb8] sm:$0xff] }
 0x73f   : > { %4121 = vrot.lane.b32.xlu1 %v4057_v16, %s9040_s11  ;;  %v3129_v16 = vadd.f32 %v10572_v15, %v3107_v36 }
 0x740   : > { %v10565_v6 = vpop.permute.xlu0 %3483 }
 0x741   : > { %12705 = vst [vmem:[#allocation111_spill] sm:$0xff] %v10565_v6  ;;  %v10567_v13 = vpop.permute.xlu1 %3225  ;;  %v4402_v6 = vld [vmem:[%s12522_s4 + $0x28] sm:$0xff]  ;;  %v3261_v36 = vadd.f32 %v9863_v52, %v3129_v16  ;;  %v3109_v52 = vld [vmem:[#allocation4 + $0x12] sm:$0xff] }
 0x742   : > { %12706 = vst [vmem:[#allocation112_spill] sm:$0xff] %v10567_v13  ;;  %4115 = vrot.lane.b32.xlu0 %v4054_v38, %s9040_s11  ;;  %v3304_v13 = vld [vmem:[#allocation4 + $0xac] sm:$0xff] }
 0x743   : > { %3237 = vrot.lane.b32.xlu1 %v3172_v28, %s9037_s27  ;;  %v4403_v38 = vld [vmem:[%s12522_s4 + $0x30] sm:$0xff] }
 0x744   : > { %v10576_v1 = vpop.permute.xlu0 %3485  ;;  %v8855_v28 = vpack.c.bf16 %v4403_v38, %v4402_v6  ;;  %v3393_v6 = vadd.f32 %v9873_v49, %v3261_v36  ;;  %v3110_v38 = vld [vmem:[#allocation4 + $0x1a] sm:$0xff]  ;;  %v3131_v49 = vadd.f32 %v10572_v15, %v3109_v52 }
 0x745   : > { %12707 = vst [vmem:[#allocation113_spill] sm:$0xff] %v10576_v1  ;;  %v10579_v53 = vpop.permute.xlu1 %3357 }
 0x746   : > { %12708 = vst [vmem:[#allocation114_spill] sm:$0xff] %v10579_v53  ;;  %3633 = vrot.lane.b32.xlu0 %v3568_v57, %s9043_s26  ;;  %v3108_v53 = vld [vmem:[#allocation4 + $0xa] sm:$0xff]  ;;  %v3436_v57 = vld [vmem:[#allocation4 + $0xb7] sm:$0xff]  ;;  %8856 = vmatprep.subr.bf16.mxu1 %v8855_v28 }
 0x747   : > { %3369 = vrot.lane.b32.xlu1 %v3304_v13, %s9039_s30  ;;  %8858 = vmatpush3.bf16.msra.mxu1 %v8855_v28  ;;  %v3130_v21 = vadd.f32 %v10572_v15, %v3108_v53  ;;  %v3132_v53 = vadd.f32 %v10572_v15, %v3110_v38  ;;  %v3111_v28 = vld [vmem:[#allocation4 + $0x22] sm:$0xff]  ;;  %v3263_v38 = vadd.f32 %v10267_v63, %v3131_v49 }
 0x748   : > { %v10589_v1 = vpop.permute.xlu0 %3615 }
 0x749   : > { %12709 = vst [vmem:[#allocation115_spill] sm:$0xff] %v10589_v1  ;;  %v10592_v18 = vpop.permute.xlu1 %3227  ;;  %v3262_v16 = vadd.f32 %v10271_v34, %v3130_v21  ;;  %v3112_v21 = vld [vmem:[#allocation4 + $0x2a] sm:$0xff] }
 0x74a   : > { %12710 = vst [vmem:[#allocation116_spill] sm:$0xff] %v10592_v18  ;;  %3501 = vrot.lane.b32.xlu0 %v3436_v57, %s9045_s16  ;;  %v3698_v18 = vld [vmem:[#allocation4 + $0xa9] sm:$0xff]  ;;  %v3525_v57 = vadd.f32 %v10283_v12, %v3393_v6  ;;  %v3114_v6 = vld [vmem:[#allocation4 + $0x3a] sm:$0xff] }
 0x74b   : > { %3499 = vrot.lane.b32.xlu1 %v3435_v51, %s9045_s16  ;;  %v3394_v51 = vadd.f32 %v10277_v44, %v3262_v16  ;;  %v3567_v44 = vld [vmem:[#allocation4 + $0xb0] sm:$0xff]  ;;  %v3133_v16 = vadd.f32 %v10572_v15, %v3111_v28  ;;  %v3136_v63 = vadd.f32 %v10572_v15, %v3114_v6 }
 0x74c   : > { %v10597_v26 = vpop.permute.xlu0 %3969  ;;  %v3657_v36 = vadd.f32 %v10295_v17, %v3525_v57  ;;  %v3134_v57 = vadd.f32 %v10572_v15, %v3112_v21  ;;  %v3116_v28 = vld [vmem:[#allocation4 + $0x4a] sm:$0xff] }
 0x74d   : > { %12711 = vst [vmem:[#allocation117_spill] sm:$0xff] %v10597_v26  ;;  %v10600_v1 = vpop.permute.xlu1 %3749  ;;  %v3526_v12 = vadd.f32 %v10289_v2, %v3394_v51  ;;  %v3395_v2 = vadd.f32 %v10273_v61, %v3263_v38  ;;  %v3811_v61 = vld [vmem:[#allocation4 + $0xb4] sm:$0xff] }
 0x74e   : > { %12712 = vst [vmem:[#allocation118_spill] sm:$0xff] %v10600_v1  ;;  %3853 = vrot.lane.b32.xlu0 %v3304_v13, %s9041_s12  ;;  %v3113_v1 = vld [vmem:[#allocation4 + $0x32] sm:$0xff]  ;;  %v3789_v51 = vadd.f32 %v10279_v39, %v3657_v36  ;;  %v3266_v21 = vadd.f32 %v10355_v41, %v3134_v57 }
 0x74f   : > { %3761 = vrot.lane.b32.xlu1 %v3698_v18, %s9044_s15  ;;  %v3923_v13 = vld [vmem:[#allocation4 + $0xad] sm:$0xff]  ;;  %v3264_v18 = vadd.f32 %v10291_v8, %v3132_v53  ;;  %v3135_v52 = vadd.f32 %v10572_v15, %v3113_v1  ;;  %v3265_v8 = vadd.f32 %v10303_v35, %v3133_v16  ;;  %v3115_v53 = vld [vmem:[#allocation4 + $0x42] sm:$0xff]  ;;  %v4404_v35 = vld [vmem:[%s12522_s4 + $0x38] sm:$0xf]  ;;  %v3527_v39 = vadd.f32 %v10301_v54, %v3395_v2 }
 0x750   : > { %v10608_v26 = vpop.permute.xlu0 %3971  ;;  %v3883_v6 = vadd.f32 %v10321_v5, %v3789_v51  ;;  %8651 = vmatprep.subr.msk.mxu1 %vm4472_vm9, %v4404_v35  ;;  %v3398_v41 = vadd.f32 %v10361_v40, %v3266_v21  ;;  %v4055_v40 = vld [vmem:[#allocation4 + $0xae] sm:$0xff] }
 0x751   : > { %v10612_v34 = vpop.permute.xlu1 %3359  ;;  %v3396_v17 = vadd.f32 %v10297_v23, %v3264_v18  ;;  %v3658_v23 = vadd.f32 %v10265_v29, %v3526_v12  ;;  %v3117_v18 = vld [vmem:[#allocation4 + $0x52] sm:$0xff]  ;;  %v3397_v36 = vadd.f32 %v10315_v37, %v3265_v8  ;;  %v3118_v29 = vld [vmem:[#allocation4 + $0x5a] sm:$0xff]  ;;  %v3137_v12 = vadd.f32 %v10572_v15, %v3115_v53  ;;  %8652 = vmatpush3.msk.msra.mxu1 %vm4472_vm9, %v4404_v35  ;;  %v12716_v35 = vld [vmem:[#allocation68_spill] sm:$0xff] }
 0x752   : > { %12713 = vst [vmem:[#allocation119_spill] sm:$0xff] %v10612_v34  ;;  %3985 = vrot.lane.b32.xlu0 %v3923_v13, %s9038_s28  ;;  %v3924_v13 = vld [vmem:[#allocation4 + $0xb5] sm:$0xff]  ;;  %v3659_v5 = vadd.f32 %v10313_v60, %v3527_v39  ;;  %v3139_v16 = vadd.f32 %v10572_v15, %v3117_v18  ;;  %v3530_v2 = vadd.f32 %v10373_v30, %v3398_v41  ;;  %v12717_v39 = vld [vmem:[#allocation79_spill] sm:$0xff] }
 0x753   : > { %3631 = vrot.lane.b32.xlu1 %v3567_v44, %s9043_s26  ;;  %v3528_v1 = vadd.f32 %v10309_v4, %v3396_v17  ;;  %v3267_v4 = vadd.f32 %v10333_v25, %v3135_v52  ;;  %v3138_v44 = vadd.f32 %v10572_v15, %v3116_v28  ;;  %v3790_v37 = vadd.f32 %v10307_v59, %v3658_v23  ;;  %v3119_v17 = vld [vmem:[#allocation4 + $0x62] sm:$0xff]  ;;  %v3699_v59 = vld [vmem:[#allocation4 + $0xb1] sm:$0xff] }
 0x754   : > { %v10623_v34 = vpop.permute.xlu0 %4101  ;;  %v3529_v54 = vadd.f32 %v10367_v9, %v3397_v36  ;;  %v3140_v8 = vadd.f32 %v10572_v15, %v3118_v29  ;;  %v4015_v9 = vadd.f32 %v10325_v46, %v3883_v6  ;;  %v3791_v51 = vadd.f32 %v10327_v3, %v3659_v5  ;;  %v12714_v18 = vld [vmem:[#allocation61_spill] sm:$0xff]  ;;  %v12718_v6 = vld [vmem:[#allocation63_spill] sm:$0xff] }
 0x755   : > { %v10629_v49 = vpop.permute.xlu1 %3841  ;;  %v3660_v52 = vadd.f32 %v10285_v55, %v3528_v1  ;;  %v3399_v57 = vadd.f32 %v10345_v32, %v3267_v4  ;;  %v3884_v60 = vadd.f32 %v10319_v48, %v3790_v37  ;;  %v3268_v32 = vadd.f32 %v10369_v24, %v3136_v63  ;;  %v4056_v1 = vld [vmem:[#allocation4 + $0xb6] sm:$0xff]  ;;  %v12719_v29 = vld [vmem:[#allocation67_spill] sm:$0xff] }
 0x756   : > { %3987 = vrot.lane.b32.xlu0 %v3924_v13, %s9038_s28  ;;  %v3661_v53 = vadd.f32 %v10379_v42, %v3529_v54  ;;  %v3141_v28 = vadd.f32 %v10572_v15, %v3119_v17  ;;  %v4147_v46 = vadd.f32 %v10337_v7, %v4015_v9  ;;  %v3885_v3 = vadd.f32 %v10351_v47, %v3791_v51  ;;  %v12720_v4 = vld [vmem:[#allocation66_spill] sm:$0xff]  ;;  %v12723_v37 = vld [vmem:[#allocation83_spill] sm:$0xff]  ;;  %v3120_v54 = vld [vmem:[#allocation4 + $0x6a] sm:$0xff] }
 0x757   : > { %3855 = vrot.lane.b32.xlu1 %v3811_v61, %s9041_s12  ;;  %v3792_v55 = vadd.f32 %v10339_v58, %v3660_v52  ;;  %v3531_v30 = vadd.f32 %v10415_v22, %v3399_v57  ;;  %v4016_v48 = vadd.f32 %v10331_v62, %v3884_v60  ;;  %v3269_v42 = vadd.f32 %v10381_v27, %v3137_v12  ;;  %v12715_v61 = vld [vmem:[#allocation62_spill] sm:$0xff]  ;;  %v12722_v12 = vld [vmem:[#allocation72_spill] sm:$0xff]  ;;  %v12725_v52 = vld [vmem:[#allocation65_spill] sm:$0xff] }
 0x758   : > { %v10647_v38 = vpop.permute.xlu0 %4103  ;;  %v3400_v24 = vadd.f32 %v10375_v20, %v3268_v32  ;;  %v3662_v22 = vadd.f32 %v10349_v45, %v3530_v2  ;;  %v4017_v7 = vadd.f32 %v10385_v31, %v3885_v3  ;;  %v3793_v27 = vadd.f32 %v10363_v43, %v3661_v53  ;;  %v12724_v17 = vld [vmem:[#allocation64_spill] sm:$0xff]  ;;  %v12727_v60 = vld [vmem:[#allocation81_spill] sm:$0xff]  ;;  %v12729_v32 = vld [vmem:[#allocation74_spill] sm:$0xff] }
 0x759   : > { %v10654_v25 = vpop.permute.xlu1 %3843  ;;  %v3886_v58 = vadd.f32 %v10357_v50, %v3792_v55  ;;  %v3663_v63 = vadd.f32 %v10427_v0, %v3531_v30  ;;  %v4148_v62 = vadd.f32 %v10343_v56, %v4016_v48  ;;  %v3401_v47 = vadd.f32 %v10393_v19, %v3269_v42  ;;  %v12726_v2 = vld [vmem:[#allocation80_spill] sm:$0xff]  ;;  %v12728_v53 = vld [vmem:[#allocation73_spill] sm:$0xff]  ;;  %v12731_v3 = vld [vmem:[#allocation95_spill] sm:$0xff] }
 0x75a   : > { %4117 = vrot.lane.b32.xlu0 %v4055_v40, %s9040_s11  ;;  %v3794_v50 = vadd.f32 %v10387_v33, %v3662_v22  ;;  %v3270_v45 = vadd.f32 %v10417_v11, %v3138_v44  ;;  %v3532_v0 = vadd.f32 %v10421_v14, %v3400_v24  ;;  %v4149_v56 = vadd.f32 %v12714_v18, %v4017_v7  ;;  %v12721_v14 = vld [vmem:[#allocation69_spill] sm:$0xff]  ;;  %v12730_v48 = vld [vmem:[#allocation84_spill] sm:$0xff]  ;;  %v12733_v22 = vld [vmem:[#allocation71_spill] sm:$0xff] }
 0x75b   : > { %3763 = vrot.lane.b32.xlu1 %v3699_v59, %s9044_s15  ;;  %v4018_v20 = vadd.f32 %v10391_v10, %v3886_v58  ;;  %v3887_v31 = vadd.f32 %v12715_v61, %v3793_v27  ;;  %v3271_v19 = vadd.f32 %v12716_v35, %v3139_v16  ;;  %v3533_v43 = vadd.f32 %v12717_v39, %v3401_v47  ;;  %v12732_v58 = vld [vmem:[#allocation70_spill] sm:$0xff]  ;;  %v12735_v47 = vld [vmem:[#allocation85_spill] sm:$0xff] }
 0x75c   : > { %v10670_v13 = vpop.permute.xlu0 %3621  ;;  %v3402_v10 = vadd.f32 %v12719_v29, %v3270_v45  ;;  %v3795_v11 = vadd.f32 %v12720_v4, %v3663_v63  ;;  %v12597_v16 = vmov 0.0|0.0   ;;  %v3888_v40 = vadd.f32 %v12724_v17, %v3794_v50  ;;  %v12736_v50 = vld [vmem:[#allocation88_spill] sm:$0xff]  ;;  %v12737_v45 = vld [vmem:[#allocation78_spill] sm:$0xff]  ;;  %v12748_v17 = vld [vmem:[#allocation87_spill] sm:$0xff] }
 0x75d   : > { %v10676_v23 = vpop.permute.xlu1 %3751  ;;  %v4150_v33 = vadd.f32 %v12718_v6, %v4018_v20  ;;  %v4019_v41 = vadd.f32 %v12721_v14, %v3887_v31  ;;  %v3403_v44 = vadd.f32 %v12722_v12, %v3271_v19  ;;  %v3665_v5 = vadd.f32 %v12723_v37, %v3533_v43  ;;  %8871 = vmatprep.subr.bf16.mxu1 %v12597_v16  ;;  %v12740_v31 = vld [vmem:[#allocation76_spill] sm:$0xff]  ;;  %v12741_v19 = vld [vmem:[#allocation77_spill] sm:$0xff]  ;;  %v12744_v4 = vld [vmem:[#allocation90_spill] sm:$0xff] }
 0x75e   : > { %4119 = vrot.lane.b32.xlu0 %v4056_v1, %s9040_s11  ;;  %v3664_v57 = vadd.f32 %v12725_v52, %v3532_v0  ;;  %v3272_v59 = vadd.f32 %v12726_v2, %v3140_v8  ;;  %v3534_v9 = vadd.f32 %v12727_v60, %v3402_v10  ;;  %v3889_v30 = vadd.f32 %v12729_v32, %v3795_v11  ;;  %v12738_v0 = vld [vmem:[#allocation99_spill] sm:$0xff]  ;;  %v12742_v43 = vld [vmem:[#allocation97_spill] sm:$0xff]  ;;  %v12745_v14 = vld [vmem:[#allocation96_spill] sm:$0xff] }
 0x75f   : > { %4191 = vrot.lane.b32.xlu1 %v4147_v46, %s9033_s29  ;;  %v4151_v55 = vadd.f32 %v12728_v53, %v4019_v41  ;;  %v3273_v46 = vadd.f32 %v12730_v48, %v3141_v28  ;;  %v3535_v42 = vadd.f32 %v12731_v3, %v3403_v44  ;;  %v4020_v63 = vadd.f32 %v12733_v22, %v3888_v40  ;;  %v12746_v12 = vld [vmem:[#allocation111_spill] sm:$0xff]  ;;  %v12749_v52 = vld [vmem:[#allocation98_spill] sm:$0xff]  ;;  %v12750_v2 = vld [vmem:[#allocation101_spill] sm:$0xff] }
 0x760   : > { %v10692_v21 = vpop.permute.xlu0 %3487  ;;  %v3796_v24 = vadd.f32 %v12732_v58, %v3664_v57  ;;  %v3142_v7 = vadd.f32 %v10572_v15, %v3120_v54  ;;  %v4021_v27 = vadd.f32 %v12735_v47, %v3889_v30  ;;  %v3797_v28 = vadd.f32 %v12737_v45, %v3665_v5  ;;  %v12747_v5 = vld [vmem:[#allocation86_spill] sm:$0xff]  ;;  %v12752_v53 = vld [vmem:[#allocation115_spill] sm:$0xff]  ;;  %v12754_v48 = vld [vmem:[#allocation92_spill] sm:$0xff] }
 0x761   : > { %v10698_v36 = vpop.permute.xlu1 %3229  ;;  %v3405_v20 = vadd.f32 %v12736_v50, %v3273_v46  ;;  %v3667_v18 = vadd.f32 %v12738_v0, %v3535_v42  ;;  %v3666_v39 = vadd.f32 %v12741_v19, %v3534_v9  ;;  %v12751_v60 = vld [vmem:[#allocation94_spill] sm:$0xff]  ;;  %v12753_v32 = vld [vmem:[#allocation91_spill] sm:$0xff]  ;;  %v12755_v3 = vld [vmem:[#allocation93_spill] sm:$0xff] }
 0x762   : > { %4193 = vrot.lane.b32.xlu0 %v4148_v62, %s9033_s29  ;;  %v12734_v62 = vld [vmem:[#allocation82_spill] sm:$0xff]  ;;  %v3890_v35 = vadd.f32 %v12740_v31, %v3796_v24  ;;  %v3891_v11 = vadd.f32 %v12744_v4, %v3797_v28  ;;  %v3274_v41 = vadd.f32 %v12745_v14, %v3142_v7  ;;  %v12756_v24 = vld [vmem:[#allocation105_spill] sm:$0xff] }
 0x763   : > { %4195 = vrot.lane.b32.xlu1 %v4149_v56, %s9033_s29  ;;  %v3404_v8 = vadd.f32 %v12734_v62, %v3272_v59  ;;  %v12739_v56 = vld [vmem:[#allocation75_spill] sm:$0xff]  ;;  %v3537_v44 = vadd.f32 %v12746_v12, %v3405_v20  ;;  %v3798_v54 = vadd.f32 %v12747_v5, %v3666_v39  ;;  %v3799_v9 = vadd.f32 %v12751_v60, %v3667_v18  ;;  %v12761_v28 = vld [vmem:[#allocation117_spill] sm:$0xff]  ;;  %v12762_v18 = vld [vmem:[#allocation110_spill] sm:$0xff] }
 0x764   : > { %v10713_v51 = vpop.permute.xlu0 %3489  ;;  %v4152_v61 = vadd.f32 %v12739_v56, %v4020_v63  ;;  %v4022_v40 = vadd.f32 %v12748_v17, %v3890_v35  ;;  %v3406_v57 = vadd.f32 %v12749_v52, %v3274_v41  ;;  %v4023_v59 = vadd.f32 %v12750_v2, %v3891_v11  ;;  %v12757_v63 = vld [vmem:[#allocation106_spill] sm:$0xff]  ;;  %v12760_v20 = vld [vmem:[#allocation103_spill] sm:$0xff]  ;;  %v12764_v35 = vld [vmem:[#allocation108_spill] sm:$0xff] }
 0x765   : > { %v10719_v1 = vpop.permute.xlu1 %3361  ;;  %v3536_v6 = vadd.f32 %v12742_v43, %v3404_v8  ;;  %v3892_v46 = vadd.f32 %v12754_v48, %v3798_v54  ;;  %v3893_v62 = vadd.f32 %v12757_v63, %v3799_v9  ;;  %v12758_v8 = vld [vmem:[#allocation113_spill] sm:$0xff]  ;;  %v12766_v14 = vld [vmem:[#allocation118_spill] sm:$0xff]  ;;  %v12768_v48 = vld [vmem:[#allocation104_spill] sm:$0xff] }
 0x766   : > { %4197 = vrot.lane.b32.xlu0 %v4150_v33, %s9033_s29  ;;  %v12743_v33 = vld [vmem:[#allocation89_spill] sm:$0xff]  ;;  %v4154_v30 = vadd.f32 %v12753_v32, %v4022_v40  ;;  %v4155_v22 = vadd.f32 %v12756_v24, %v4023_v59  ;;  %v3538_v7 = vadd.f32 %v12758_v8, %v3406_v57  ;;  %v3122_v9 = vld [vmem:[#allocation4 + $0x7a] sm:$0xff] }
 0x767   : > { %4199 = vrot.lane.b32.xlu1 %v4151_v55, %s9033_s29  ;;  %v4153_v10 = vadd.f32 %v12743_v33, %v4021_v27  ;;  %v3669_v55 = vadd.f32 %v12752_v53, %v3537_v44  ;;  %v3668_v42 = vadd.f32 %v12755_v3, %v3536_v6  ;;  %v12759_v27 = vld [vmem:[#allocation102_spill] sm:$0xff]  ;;  %v4024_v45 = vadd.f32 %v12760_v20, %v3892_v46  ;;  %v12765_v43 = vld [vmem:[#allocation109_spill] sm:$0xff] }
 0x768   : > { %v10735_v29 = vpop.permute.xlu0 %3619  ;;  %v4025_v0 = vadd.f32 %v12761_v28, %v3893_v62  ;;  %v3670_v6 = vadd.f32 %v12765_v43, %v3538_v7  ;;  %v3121_v59 = vld [vmem:[#allocation4 + $0x72] sm:$0xff]  ;;  %v3144_v3 = vadd.f32 %v10572_v15, %v3122_v9 }
 0x769   : > { %v10741_v37 = vpop.permute.xlu1 %3231  ;;  %v3800_v50 = vadd.f32 %v12759_v27, %v3668_v42  ;;  %v3801_v56 = vadd.f32 %v12762_v18, %v3669_v55  ;;  %v12767_v55 = vld [vmem:[#allocation100_spill] sm:$0xff]  ;;  %v12770_v62 = vld [vmem:[#allocation114_spill] sm:$0xff] }
 0x76a   : > { %4201 = vrot.lane.b32.xlu0 %v4152_v61, %s9033_s29  ;;  %v12763_v61 = vld [vmem:[#allocation107_spill] sm:$0xff]  ;;  %v4157_v33 = vadd.f32 %v10623_v34, %v4025_v0  ;;  %v3802_v41 = vadd.f32 %v12766_v14, %v3670_v6 }
 0x76b   : > { %4203 = vrot.lane.b32.xlu1 %v4153_v10, %s9033_s29  ;;  %v4156_v31 = vadd.f32 %v12763_v61, %v4024_v45  ;;  %v3894_v19 = vadd.f32 %v12764_v35, %v3800_v50  ;;  %v3895_v10 = vadd.f32 %v10629_v49, %v3801_v56  ;;  %v3123_v50 = vld [vmem:[#allocation4 + $0x82] sm:$0xff] }
 0x76c   : > { %v3974_v58 = vpop.permute.xlu0 %3973  ;;  %v3896_v54 = vadd.f32 %v10654_v25, %v3802_v41  ;;  %v3143_v25 = vadd.f32 %v10572_v15, %v3121_v59  ;;  %v3145_v0 = vadd.f32 %v10572_v15, %v3123_v50 }
 0x76d   : > { %v3754_v47 = vpop.permute.xlu1 %3753  ;;  %v4026_v11 = vadd.f32 %v10608_v26, %v3894_v19  ;;  %v4027_v12 = vadd.f32 %v3974_v58, %v3895_v10  ;;  %v12769_v58 = vld [vmem:[#allocation112_spill] sm:$0xff] }
 0x76e   : > { %4205 = vrot.lane.b32.xlu0 %v4154_v30, %s9033_s29  ;;  %v3275_v32 = vadd.f32 %v12767_v55, %v3143_v25  ;;  %v3276_v24 = vadd.f32 %v12769_v58, %v3144_v3 }
 0x76f   : > { %4207 = vrot.lane.b32.xlu1 %v4155_v22, %s9033_s29  ;;  %v4158_v44 = vadd.f32 %v10647_v38, %v4026_v11 }
 0x770   : > { %v3976_v39 = vpop.permute.xlu0 %3975  ;;  %v3407_v46 = vadd.f32 %v12768_v48, %v3275_v32  ;;  %v3408_v8 = vadd.f32 %v12770_v62, %v3276_v24 }
 0x771   : > { %v10768_v4 = vpop.permute.xlu1 %3363  ;;  %v4028_v49 = vadd.f32 %v3976_v39, %v3896_v54 }
 0x772   : > { %4209 = vrot.lane.b32.xlu0 %v4156_v31, %s9033_s29  ;;  %v3539_v22 = vadd.f32 %v10692_v21, %v3407_v46  ;;  %v3540_v20 = vadd.f32 %v10713_v51, %v3408_v8  ;;  %v12771_v31 = vld [vmem:[#allocation116_spill] sm:$0xff] }
 0x773   : > { %4211 = vrot.lane.b32.xlu1 %v4157_v33, %s9033_s29  ;;  %v3277_v35 = vadd.f32 %v12771_v31, %v3145_v0 }
 0x774   : > { %v4106_v5 = vpop.permute.xlu0 %4105  ;;  %v3671_v7 = vadd.f32 %v10735_v29, %v3539_v22  ;;  %v3672_v56 = vadd.f32 %v10670_v13, %v3540_v20  ;;  %v12772_v29 = vld [vmem:[#allocation119_spill] sm:$0xff]  ;;  %v3125_v20 = vld [vmem:[#allocation4 + $0x92] sm:$0xff] }
 0x775   : > { %v4159_v17 = vadd.f32 %v4106_v5, %v4027_v12  ;;  %v3846_v34 = vpop.permute.xlu1 %3845  ;;  %v3409_v43 = vadd.f32 %v12772_v29, %v3277_v35 }
 0x776   : > { %4213 = vrot.lane.b32.xlu0 %v4158_v44, %s9033_s29  ;;  %v3803_v28 = vadd.f32 %v10676_v23, %v3671_v7  ;;  %v3804_v19 = vadd.f32 %v3754_v47, %v3672_v56 }
 0x777   : > { %4215 = vrot.lane.b32.xlu1 %v4159_v17, %s9033_s29  ;;  %v3124_v17 = vld [vmem:[#allocation4 + $0x8a] sm:$0xff] }
 0x778   : > { %v4108_v26 = vpop.permute.xlu0 %4107  ;;  %v3897_v61 = vadd.f32 %v3846_v34, %v3803_v28 }
 0x779   : > { %v4160_v40 = vadd.f32 %v4108_v26, %v4028_v49  ;;  %v3848_v52 = vpop.permute.xlu1 %3847 }
 0x77a   : > { %v3898_v33 = vadd.f32 %v3848_v52, %v3804_v19  ;;  %v3146_v52 = vadd.f32 %v10572_v15, %v3124_v17 }
 0x77b   : > { %4217 = vrot.lane.b32.xlu0 %v4160_v40, %s9033_s29 }
 0x77c   : > { %v10779_v57 = vpop.permute.xlu0 %3625 }
 0x77d   : > { %v3756_v2 = vpop.permute.xlu1 %3755 }
 0x780   : > { %v3492_v38 = vpop.permute.xlu0 %3491 }
 0x781   : > { %v10781_v60 = vpop.permute.xlu1 %3233  ;;  %v3541_v11 = vadd.f32 %v3492_v38, %v3409_v43  ;;  %v3278_v38 = vadd.f32 %v10698_v36, %v3146_v52  ;;  %v3127_v43 = vld [vmem:[#allocation4 + $0xa2] sm:$0xff] }
 0x782   : > { %v12773_v52 = vld [vmem:[#allocation27_spill] sm:$0xff] }
 0x783   : > { %v3410_v9 = vadd.f32 %v10719_v1, %v3278_v38 }
 0x784   : > { %v3494_v53 = vpop.permute.xlu0 %3493 }
 0x785   : > { %v10785_v30 = vpop.permute.xlu1 %3365 }
 0x788   : > { %v3624_v42 = vpop.permute.xlu0 %3623 }
 0x789   : > { %v10791_v63 = vpop.permute.xlu1 %3235  ;;  %v3673_v14 = vadd.f32 %v3624_v42, %v3541_v11  ;;  %v3149_v11 = vadd.f32 %v10572_v15, %v3127_v43 }
 0x78b   : > { %v3805_v44 = vadd.f32 %v3756_v2, %v3673_v14  ;;  %v3542_v2 = vadd.f32 %v3494_v53, %v3410_v9 }
 0x78c   : > { %v3978_v27 = vpop.permute.xlu0 %3977 }
 0x78d   : > { %v3758_v45 = vpop.permute.xlu1 %3757  ;;  %v4029_v39 = vadd.f32 %v3978_v27, %v3897_v61  ;;  %v3674_v46 = vadd.f32 %v10779_v57, %v3542_v2  ;;  %v3128_v27 = vld [vmem:[#allocation4 + $0xaa] sm:$0xff]  ;;  %v3126_v57 = vld [vmem:[#allocation4 + $0x9a] sm:$0xff] }
 0x78e   : > { %v3150_v53 = vadd.f32 %v10572_v15, %v3128_v27  ;;  %v10846_v27 = vld [vmem:[%s12523_s5 + $0xd] ss:$0 sm:$0xff] }
 0x78f   : > { %v3806_v42 = vadd.f32 %v3758_v45, %v3674_v46  ;;  %v3147_v45 = vadd.f32 %v10572_v15, %v3125_v20 }
 0x790   : > { %v3980_v18 = vpop.permute.xlu0 %3979 }
 0x791   : > { %v10799_v21 = vpop.permute.xlu1 %3367  ;;  %v4030_v23 = vadd.f32 %v3980_v18, %v3898_v33  ;;  %v3148_v18 = vadd.f32 %v10572_v15, %v3126_v57  ;;  %v3279_v31 = vadd.f32 %v10741_v37, %v3147_v45  ;;  %v3281_v37 = vadd.f32 %v10791_v63, %v3149_v11  ;;  %v12777_v11 = vld [vmem:[#allocation5_spill] sm:$0xff] }
 0x793   : > { %v3280_v35 = vadd.f32 %v10781_v60, %v3148_v18 }
 0x794   : > { %v4110_v6 = vpop.permute.xlu0 %4109 }
 0x795   : > { %v4161_v51 = vadd.f32 %v4110_v6, %v4029_v39  ;;  %v3850_v10 = vpop.permute.xlu1 %3849  ;;  %v3411_v39 = vadd.f32 %v10768_v4, %v3279_v31  ;;  %v3412_v29 = vadd.f32 %v10785_v30, %v3280_v35  ;;  %v12776_v31 = vld [vmem:[#allocation8_spill] sm:$0xff] }
 0x796   : > { %v3899_v54 = vadd.f32 %v3850_v10, %v3805_v44  ;;  %v3413_v44 = vadd.f32 %v10799_v21, %v3281_v37 }
 0x797   : > { %4219 = vrot.lane.b32.xlu1 %v4161_v51, %s9033_s29 }
 0x798   : > { %v4112_v41 = vpop.permute.xlu0 %4111 }
 0x799   : > { %v4162_v13 = vadd.f32 %v4112_v41, %v4030_v23  ;;  %v3852_v12 = vpop.permute.xlu1 %3851 }
 0x79a   : > { %v3900_v24 = vadd.f32 %v3852_v12, %v3806_v42 }
 0x79b   : > { %4221 = vrot.lane.b32.xlu0 %v4162_v13, %s9033_s29 }
 0x79c   : > { %v3630_v5 = vpop.permute.xlu0 %3629 }
 0x79d   : > { %v3982_v47 = vpop.permute.xlu1 %3981 }
 0x79e   : > { %v4031_v34 = vadd.f32 %v3982_v47, %v3899_v54 }
 0x7a0   : > { %v3496_v49 = vpop.permute.xlu0 %3495 }
 0x7a1   : > { %v4114_v26 = vpop.permute.xlu1 %4113  ;;  %v3543_v51 = vadd.f32 %v3496_v49, %v3411_v39 }
 0x7a2   : > { %v4163_v40 = vadd.f32 %v4114_v26, %v4031_v34 }
 0x7a4   : > { %v3498_v59 = vpop.permute.xlu0 %3497  ;;  %4223 = vrot.lane.b32.xlu1 %v4163_v40, %s9033_s29 }
 0x7a5   : > { %v3766_v25 = vpop.permute.xlu1 %3765  ;;  %v3544_v10 = vadd.f32 %v3498_v59, %v3412_v29 }
 0x7a7   : > { %v3676_v60 = vadd.f32 %v3630_v5, %v3544_v10 }
 0x7a8   : > { %v3628_v55 = vpop.permute.xlu0 %3627 }
 0x7a9   : > { %v3858_v32 = vpop.permute.xlu1 %3857  ;;  %v3675_v14 = vadd.f32 %v3628_v55, %v3543_v51 }
 0x7ac   : > { %v3760_v48 = vpop.permute.xlu0 %3759 }
 0x7ad   : > { %v10810_v3 = vpop.permute.xlu1 %3989  ;;  %v3807_v12 = vadd.f32 %v3760_v48, %v3675_v14  ;;  %v12774_v48 = vld [vmem:[#allocation28_spill] sm:$0xff] }
 0x7b0   : > { %v3984_v58 = vpop.permute.xlu0 %3983 }
 0x7b1   : > { %v10812_v22 = vpop.permute.xlu1 %4121  ;;  %v4032_v62 = vadd.f32 %v3984_v58, %v3900_v24 }
 0x7b4   : > { %v4116_v8 = vpop.permute.xlu0 %4115 }
 0x7b5   : > { %v4164_v7 = vadd.f32 %v4116_v8, %v4032_v62  ;;  %v3238_v36 = vpop.permute.xlu1 %3237  ;;  %v12775_v8 = vld [vmem:[#allocation30_spill] sm:$0xff] }
 0x7b6   : > { %v3282_v28 = vadd.f32 %v3238_v36, %v3150_v53 }
 0x7b7   : > { %4225 = vrot.lane.b32.xlu0 %v4164_v7, %s9033_s29 }
 0x7b8   : > { %v3634_v1 = vpop.permute.xlu0 %3633 }
 0x7b9   : > { %v3370_v50 = vpop.permute.xlu1 %3369 }
 0x7ba   : > { %v3414_v56 = vadd.f32 %v3370_v50, %v3282_v28 }
 0x7bc   : > { %v3502_v0 = vpop.permute.xlu0 %3501 }
 0x7bd   : > { %v3500_v61 = vpop.permute.xlu1 %3499  ;;  %v3546_v6 = vadd.f32 %v3502_v0, %v3414_v56 }
 0x7be   : > { %v3545_v34 = vadd.f32 %v3500_v61, %v3413_v44 }
 0x7bf   : > { %v3678_v41 = vadd.f32 %v3634_v1, %v3546_v6 }
 0x7c0   : > { %v3854_v19 = vpop.permute.xlu0 %3853 }
 0x7c1   : > { %v3762_v33 = vpop.permute.xlu1 %3761  ;;  %v3810_v47 = vadd.f32 %v3766_v25, %v3678_v41  ;;  %v3901_v30 = vadd.f32 %v3854_v19, %v3807_v12 }
 0x7c2   : > { %v3808_v54 = vadd.f32 %v3762_v33, %v3676_v60 }
 0x7c3   : > { %v3904_v59 = vadd.f32 %v12773_v52, %v3810_v47 }
 0x7c4   : > { %v3986_v23 = vpop.permute.xlu0 %3985 }
 0x7c5   : > { %v3632_v13 = vpop.permute.xlu1 %3631  ;;  %v4033_v49 = vadd.f32 %v3986_v23, %v3901_v30  ;;  %v4036_v46 = vadd.f32 %v12774_v48, %v3904_v59  ;;  %v12784_v48 = vld [vmem:[#allocation41_spill] sm:$0xff] }
 0x7c6   : > { %v3677_v40 = vadd.f32 %v3632_v13, %v3545_v34  ;;  %v12778_v13 = vld [vmem:[#allocation6_spill] sm:$0xff] }
 0x7c7   : > { %v4168_v7 = vadd.f32 %v12775_v8, %v4036_v46  ;;  %v12785_v46 = vld [vmem:[#allocation42_spill] sm:$0xff] }
 0x7c8   : > { %v3988_v4 = vpop.permute.xlu0 %3987 }
 0x7c9   : > { %v3856_v17 = vpop.permute.xlu1 %3855 }
 0x7ca   : > { %v3902_v26 = vadd.f32 %v3856_v17, %v3808_v54  ;;  %v12779_v54 = vld [vmem:[#allocation39_spill] sm:$0xff]  ;;  %v12780_v17 = vld [vmem:[#allocation40_spill] sm:$0xff] }
 0x7cb   : > { %v12781_v34 = vpack.c.bf16 %v12779_v54, %v12780_v17 }
 0x7cc   : > { %v4118_v15 = vpop.permute.xlu0 %4117  ;;  %v4034_v63 = vadd.f32 %v3988_v4, %v3902_v26 }
 0x7cd   : > { %v4165_v38 = vadd.f32 %v4118_v15, %v4033_v49  ;;  %v3764_v9 = vpop.permute.xlu1 %3763 }
 0x7ce   : > { %v3809_v55 = vadd.f32 %v3764_v9, %v3677_v40  ;;  %v12782_v40 = vld [vmem:[#allocation10_spill] sm:$0xff] }
 0x7cf   : > { %4227 = vrot.lane.b32.xlu1 %v4165_v38, %s9033_s29  ;;  %v12783_v38 = vld [vmem:[#allocation7_spill] sm:$0xff] }
 0x7d0   : > { %v3903_v21 = vadd.f32 %v3858_v32, %v3809_v55  ;;  %v4120_v5 = vpop.permute.xlu0 %4119  ;;  %v10840_v32 = vld [vmem:[%s12523_s5 + $0xc] ss:$0 sm:$0xff] }
 0x7d1   : > { %v4166_v25 = vadd.f32 %v4120_v5, %v4034_v63  ;;  %v4192_v2 = vpop.permute.xlu1 %4191 }
 0x7d2   : > { %v4035_v42 = vadd.f32 %v10810_v3, %v3903_v21  ;;  %4258 = vst.msk [vmem:[#allocation3] sm:$0xff] %vm4257_vm10, %v4192_v2 }
 0x7d3   : > { %4229 = vrot.lane.b32.xlu0 %v4166_v25, %s9033_s29 }
 0x7d4   : > { %v4194_v58 = vpop.permute.xlu0 %4193  ;;  %v4167_v24 = vadd.f32 %v10812_v22, %v4035_v42  ;;  %v12786_v42 = vpack.c.bf16 %v12784_v48, %v12785_v46 }
 0x7d5   : > { %4259 = vst.msk [vmem:[#allocation3 + $0x8] sm:$0xff] %vm4257_vm10, %v4194_v58  ;;  %v4196_v62 = vpop.permute.xlu1 %4195 }
 0x7d6   : > { %4260 = vst.msk [vmem:[#allocation3 + $0x10] sm:$0xff] %vm4257_vm10, %v4196_v62  ;;  %4231 = vrot.lane.b32.xlu1 %v4167_v24, %s9033_s29  ;;  %v12787_v62 = vld [vmem:[#allocation12_spill] sm:$0xff] }
 0x7d7   : > { %4233 = vrot.lane.b32.xlu0 %v4168_v7, %s9033_s29  ;;  %s9051_s29 = smov 9  }
 0x7d8   : > { %v4198_v3 = vpop.permute.xlu0 %4197 }
 0x7d9   : > { %4261 = vst.msk [vmem:[#allocation3 + $0x18] sm:$0xff] %vm4257_vm10, %v4198_v3  ;;  %v4200_v22 = vpop.permute.xlu1 %4199  ;;  %v4280_v36 = vld [vmem:[#allocation3] sm:$0xff] }
 0x7da   : > { %4262 = vst.msk [vmem:[#allocation3 + $0x20] sm:$0xff] %vm4257_vm10, %v4200_v22  ;;  %v4307_v1 = vmul.f32 %v10840_v32, %v4280_v36  ;;  %v12788_v3 = vld [vmem:[#allocation9_spill] sm:$0xff] }
 0x7dc   : > { %v4202_v53 = vpop.permute.xlu0 %4201  ;;  %v4334_v50 = vadd.f32 %v10846_v27, %v4307_v1  ;;  %v4281_v20 = vld [vmem:[#allocation3 + $0x8] sm:$0xff] }
 0x7dd   : > { %4263 = vst.msk [vmem:[#allocation3 + $0x28] sm:$0xff] %vm4257_vm10, %v4202_v53  ;;  %v4204_v57 = vpop.permute.xlu1 %4203  ;;  %v4308_v28 = vmul.f32 %v10840_v32, %v4281_v20  ;;  %v4282_v0 = vld [vmem:[#allocation3 + $0x10] sm:$0xff] }
 0x7de   : > { %4264 = vst.msk [vmem:[#allocation3 + $0x30] sm:$0xff] %vm4257_vm10, %v4204_v57  ;;  %v4356_v45 = vmax.f32 %v4334_v50, 0.0  ;;  %v4309_v18 = vmul.f32 %v10840_v32, %v4282_v0  ;;  %v12790_v0 = vld [vmem:[#allocation44_spill] sm:$0xff] }
 0x7df   : > { %v4335_v56 = vadd.f32 %v10846_v27, %v4308_v28  ;;  %v12789_v28 = vld [vmem:[#allocation43_spill] sm:$0xff] }
 0x7e0   : > { %v4206_v61 = vpop.permute.xlu0 %4205  ;;  %v4378_v35 = vmul.f32 %v4356_v45, %v12776_v31  ;;  %v4336_v19 = vadd.f32 %v10846_v27, %v4309_v18  ;;  %v4283_v39 = vld [vmem:[#allocation3 + $0x18] sm:$0xff]  ;;  %v12791_v45 = vpack.c.bf16 %v12789_v28, %v12790_v0  ;;  %v12817_v28 = vld [vmem:[#allocation57_spill] sm:$0xff]  ;;  %v12818_v0 = vld [vmem:[#allocation58_spill] sm:$0xff] }
 0x7e1   : > { %4265 = vst.msk [vmem:[#allocation3 + $0x38] sm:$0xff] %vm4257_vm10, %v4206_v61  ;;  %v4208_v29 = vpop.permute.xlu1 %4207  ;;  %v4357_v43 = vmax.f32 %v4335_v56, 0.0  ;;  %v4310_v6 = vmul.f32 %v10840_v32, %v4283_v39  ;;  %v4284_v33 = vld [vmem:[#allocation3 + $0x20] sm:$0xff]  ;;  %v12792_v61 = vld [vmem:[#allocation14_spill] sm:$0xff]  ;;  %v12793_v39 = vld [vmem:[#allocation11_spill] sm:$0xff] }
 0x7e2   : > { %4266 = vst.msk [vmem:[#allocation3 + $0x40] sm:$0xff] %vm4257_vm10, %v4208_v29  ;;  %8653 = vmatprep.mubr.msk.f32.mxu1 %vm4405_vm11, %v4378_v35  ;;  %v4358_v51 = vmax.f32 %v4336_v19, 0.0  ;;  %v4311_v10 = vmul.f32 %v10840_v32, %v4284_v33 }
 0x7e3   : > { %v4379_v23 = vmul.f32 %v4357_v43, %v12777_v11  ;;  %v4337_v14 = vadd.f32 %v10846_v27, %v4310_v6 }
 0x7e4   : > { %v4210_v41 = vpop.permute.xlu0 %4209  ;;  %v4380_v37 = vmul.f32 %v4358_v51, %v12778_v13  ;;  %v4338_v12 = vadd.f32 %v10846_v27, %v4311_v10  ;;  %v4285_v60 = vld [vmem:[#allocation3 + $0x28] sm:$0xff] }
 0x7e5   : > { %4267 = vst.msk [vmem:[#allocation3 + $0x48] sm:$0xff] %vm4257_vm10, %v4210_v41  ;;  %8654 = vmatmul.mubr.msk.f32.vlgmr.msra.gmra.mrb[66].mxu1 %vm4405_vm11, %v4379_v23  ;;  %v4212_v44 = vpop.permute.xlu1 %4211  ;;  %v4359_v4 = vmax.f32 %v4337_v14, 0.0  ;;  %v4312_v47 = vmul.f32 %v10840_v32, %v4285_v60  ;;  %v4286_v30 = vld [vmem:[#allocation3 + $0x30] sm:$0xff]  ;;  %v12794_v23 = vld [vmem:[#allocation45_spill] sm:$0xff]  ;;  %v12795_v14 = vld [vmem:[#allocation46_spill] sm:$0xff] }
 0x7e6   : > { %8873 = vmatpush1.bf16.msra.mxu1 %v12781_v34  ;;  %4268 = vst.msk [vmem:[#allocation3 + $0x50] sm:$0xff] %vm4257_vm10, %v4212_v44  ;;  %8656 = vmatprep.mubr.msk.f32.mxu1 %vm4405_vm11, %v4380_v37  ;;  %v4360_v49 = vmax.f32 %v4338_v12, 0.0  ;;  %v4313_v26 = vmul.f32 %v10840_v32, %v4286_v30  ;;  %v12796_v41 = vpack.c.bf16 %v12794_v23, %v12795_v14  ;;  %v12797_v60 = vld [vmem:[#allocation16_spill] sm:$0xff]  ;;  %v12823_v14 = vld [vmem:[#allocation17_spill] sm:$0xff] }
 0x7e7   : > { %8874 = vmatprep.subr.bf16.mxu1 %v12597_v16  ;;  %v4381_v15 = vmul.f32 %v4359_v4, %v12782_v40  ;;  %v4339_v52 = vadd.f32 %v10846_v27, %v4312_v47  ;;  %v12798_v47 = vld [vmem:[#allocation13_spill] sm:$0xff] }
 0x7e8   : > { %v4214_v59 = vpop.permute.xlu0 %4213  ;;  %v4382_v9 = vmul.f32 %v4360_v49, %v12783_v38  ;;  %v4340_v55 = vadd.f32 %v10846_v27, %v4313_v26  ;;  %v4287_v63 = vld [vmem:[#allocation3 + $0x38] sm:$0xff]  ;;  %v12799_v49 = vld [vmem:[#allocation47_spill] sm:$0xff] }
 0x7e9   : > { %4269 = vst.msk [vmem:[#allocation3 + $0x58] sm:$0xff] %vm4257_vm10, %v4214_v59  ;;  %8657 = vmatmul.mubr.msk.f32.gmra.mrb[68].mxu1 %vm4405_vm11, %v4381_v15  ;;  %v4216_v21 = vpop.permute.xlu1 %4215  ;;  %v4361_v5 = vmax.f32 %v4339_v52, 0.0  ;;  %v4314_v25 = vmul.f32 %v10840_v32, %v4287_v63  ;;  %v4288_v2 = vld [vmem:[#allocation3 + $0x40] sm:$0xff]  ;;  %v12800_v26 = vld [vmem:[#allocation48_spill] sm:$0xff]  ;;  %v12803_v63 = vld [vmem:[#allocation15_spill] sm:$0xff] }
 0x7ea   : > { %8876 = vmatpush1.bf16.msra.mxu1 %v12786_v42  ;;  %4270 = vst.msk [vmem:[#allocation3 + $0x60] sm:$0xff] %vm4257_vm10, %v4216_v21  ;;  %8659 = vmatprep.mubr.msk.f32.mxu1 %vm4405_vm11, %v4382_v9  ;;  %v4362_v58 = vmax.f32 %v4340_v55, 0.0  ;;  %v4315_v24 = vmul.f32 %v10840_v32, %v4288_v2  ;;  %v12801_v15 = vpack.c.bf16 %v12799_v49, %v12800_v26  ;;  %v12802_v9 = vld [vmem:[#allocation18_spill] sm:$0xff]  ;;  %v12807_v42 = vld [vmem:[#allocation20_spill] sm:$0xff]  ;;  %v12825_v49 = vld [vmem:[#allocation19_spill] sm:$0xff] }
 0x7eb   : > { %8877 = vmatprep.subr.bf16.mxu1 %v12597_v16  ;;  %v4383_v8 = vmul.f32 %v4361_v5, %v12787_v62  ;;  %v4341_v7 = vadd.f32 %v10846_v27, %v4314_v25  ;;  %v12804_v25 = vld [vmem:[#allocation49_spill] sm:$0xff]  ;;  %v12805_v2 = vld [vmem:[#allocation50_spill] sm:$0xff] }
 0x7ec   : > { %v4384_v22 = vmul.f32 %v4362_v58, %v12788_v3  ;;  %v4342_v36 = vadd.f32 %v10846_v27, %v4315_v24  ;;  %v4289_v1 = vld [vmem:[#allocation3 + $0x48] sm:$0xff]  ;;  %v12806_v48 = vpack.c.bf16 %v12804_v25, %v12805_v2  ;;  %v12808_v24 = vld [vmem:[#allocation51_spill] sm:$0xff] }
 0x7ed   : > { %v4218_v53 = vpop.permute.xlu0 %4217  ;;  %8660 = vmatmul.mubr.msk.f32.gmra.mrb[70].mxu1 %vm4405_vm11, %v4383_v8  ;;  %v4363_v50 = vmax.f32 %v4341_v7, 0.0  ;;  %v4316_v20 = vmul.f32 %v10840_v32, %v4289_v1  ;;  %v4290_v57 = vld [vmem:[#allocation3 + $0x50] sm:$0xff]  ;;  %v12809_v8 = vld [vmem:[#allocation52_spill] sm:$0xff] }
 0x7ee   : > { %4271 = vst.msk [vmem:[#allocation3 + $0x68] sm:$0xff] %vm4257_vm10, %v4218_v53  ;;  %8879 = vmatpush1.bf16.msra.mxu1 %v12791_v45  ;;  %8662 = vmatprep.mubr.msk.f32.mxu1 %vm4405_vm11, %v4384_v22  ;;  %v4364_v18 = vmax.f32 %v4342_v36, 0.0  ;;  %v4317_v56 = vmul.f32 %v10840_v32, %v4290_v57  ;;  %v12810_v7 = vpack.c.bf16 %v12808_v24, %v12809_v8  ;;  %v12811_v22 = vld [vmem:[#allocation53_spill] sm:$0xff]  ;;  %v12812_v36 = vld [vmem:[#allocation54_spill] sm:$0xff]  ;;  %v12814_v53 = vld [vmem:[#allocation55_spill] sm:$0xff] }
 0x7ef   : > { %8880 = vmatprep.subr.bf16.mxu1 %v12597_v16  ;;  %v4385_v35 = vmul.f32 %v4363_v50, %v12792_v61  ;;  %v4343_v19 = vadd.f32 %v10846_v27, %v4316_v20  ;;  %v12813_v1 = vpack.c.bf16 %v12811_v22, %v12812_v36  ;;  %v12815_v50 = vld [vmem:[#allocation56_spill] sm:$0xff]  ;;  %v12819_v45 = vpack.c.bf16 %v12817_v28, %v12818_v0 }
 0x7f0   : > { %v4386_v29 = vmul.f32 %v4364_v18, %v12793_v39  ;;  %v4344_v43 = vadd.f32 %v10846_v27, %v4317_v56  ;;  %v4291_v6 = vld [vmem:[#allocation3 + $0x58] sm:$0xff]  ;;  %v12816_v20 = vpack.c.bf16 %v12814_v53, %v12815_v50  ;;  %v12820_v56 = vld [vmem:[#allocation59_spill] sm:$0xff]  ;;  %v12827_v53 = vld [vmem:[#allocation21_spill] sm:$0xff] }
 0x7f1   : > { %8663 = vmatmul.mubr.msk.f32.gmra.mrb[72].mxu1 %vm4405_vm11, %v4385_v35  ;;  %v4365_v33 = vmax.f32 %v4343_v19, 0.0  ;;  %v4318_v51 = vmul.f32 %v10840_v32, %v4291_v6  ;;  %v4292_v10 = vld [vmem:[#allocation3 + $0x60] sm:$0xff]  ;;  %v12821_v35 = vld [vmem:[#allocation60_spill] sm:$0xff] }
 0x7f2   : > { %8882 = vmatpush1.bf16.msra.mxu1 %v12796_v41  ;;  %8665 = vmatprep.mubr.msk.f32.mxu1 %vm4405_vm11, %v4386_v29  ;;  %v4366_v37 = vmax.f32 %v4344_v43, 0.0  ;;  %v4319_v12 = vmul.f32 %v10840_v32, %v4292_v10  ;;  %v12822_v19 = vpack.c.bf16 %v12820_v56, %v12821_v35  ;;  %v12828_v35 = vld [vmem:[#allocation25_spill] sm:$0xff] }
 0x7f3   : > { %8883 = vmatprep.subr.bf16.mxu1 %v12597_v16  ;;  %v4387_v44 = vmul.f32 %v4365_v33, %v12797_v60  ;;  %v4345_v4 = vadd.f32 %v10846_v27, %v4318_v51 }
 0x7f4   : > { %v4388_v30 = vmul.f32 %v4366_v37, %v12798_v47  ;;  %v4346_v54 = vadd.f32 %v10846_v27, %v4319_v12 }
 0x7f5   : > { %8666 = vmatmul.mubr.msk.f32.gmra.mrb[74].mxu1 %vm4405_vm11, %v4387_v44  ;;  %v4367_v17 = vmax.f32 %v4345_v4, 0.0  ;;  %v4293_v34 = vld [vmem:[#allocation3 + $0x68] sm:$0xff] }
 0x7f6   : > { %8885 = vmatpush1.bf16.msra.mxu1 %v12801_v15  ;;  %8668 = vmatprep.mubr.msk.f32.mxu1 %vm4405_vm11, %v4388_v30  ;;  %v4368_v52 = vmax.f32 %v4346_v54, 0.0  ;;  %v4320_v59 = vmul.f32 %v10840_v32, %v4293_v34  ;;  %v12824_v44 = vld [vmem:[#allocation22_spill] sm:$0xff] }
 0x7f7   : > { %8886 = vmatprep.subr.bf16.mxu1 %v12597_v16  ;;  %v4389_v55 = vmul.f32 %v4367_v17, %v12802_v9 }
 0x7f8   : > { %v4390_v21 = vmul.f32 %v4368_v52, %v12803_v63  ;;  %v4347_v5 = vadd.f32 %v10846_v27, %v4320_v59 }
 0x7f9   : > { %8669 = vmatmul.mubr.msk.f32.gmra.mrb[76].mxu1 %vm4405_vm11, %v4389_v55 }
 0x7fa   : > { %8888 = vmatpush1.bf16.msra.mxu1 %v12806_v48  ;;  %8671 = vmatprep.mubr.msk.f32.mxu1 %vm4405_vm11, %v4390_v21  ;;  %v4369_v46 = vmax.f32 %v4347_v5, 0.0  ;;  %v12826_v5 = vld [vmem:[#allocation24_spill] sm:$0xff] }
 0x7fb   : > { %8889 = vmatprep.subr.bf16.mxu1 %v12597_v16 }
 0x7fc   : > { %v4391_v58 = vmul.f32 %v4369_v46, %v12807_v42 }
 0x7fe   : > { %8891 = vmatpush1.bf16.msra.mxu1 %v12810_v7 }
 0x7ff   : > { %8672 = vmatmul.mubr.msk.f32.gmra.mrb[78].mxu1 %vm4405_vm11, %v4391_v58  ;;  %8892 = vmatprep.subr.bf16.mxu1 %v12597_v16 }
 0x802   : > { %8894 = vmatpush1.bf16.msra.mxu1 %v12813_v1 }
 0x803   : > { %8895 = vmatprep.subr.bf16.mxu1 %v12597_v16 }
 0x806   : > { %8897 = vmatpush1.bf16.msra.mxu1 %v12816_v20 }
 0x807   : > { %8898 = vmatprep.subr.bf16.mxu1 %v12597_v16 }
 0x809   : > { %v4220_v57 = vpop.permute.xlu1 %4219 }
 0x80a   : > { %8900 = vmatpush1.bf16.msra.mxu1 %v12819_v45  ;;  %4272 = vst.msk [vmem:[#allocation3 + $0x70] sm:$0xff] %vm4257_vm10, %v4220_v57 }
 0x80b   : > { %8901 = vmatprep.subr.bf16.mxu1 %v12597_v16 }
 0x80d   : > { %v4222_v18 = vpop.permute.xlu0 %4221 }
 0x80e   : > { %4273 = vst.msk [vmem:[#allocation3 + $0x78] sm:$0xff] %vm4257_vm10, %v4222_v18  ;;  %8903 = vmatpush1.bf16.msra.mxu1 %v12822_v19 }
 0x80f   : > { %8937 = vmatprep.subr.bf16.mxu1 %v12597_v16 }
 0x811   : > { %v4294_v29 = vld [vmem:[#allocation3 + $0x70] sm:$0xff] }
 0x812   : > { %v4321_v43 = vmul.f32 %v10840_v32, %v4294_v29 }
 0x814   : > { %v4348_v6 = vadd.f32 %v10846_v27, %v4321_v43 }
 0x815   : > { %v4295_v33 = vld [vmem:[#allocation3 + $0x78] sm:$0xff] }
 0x816   : > { %v4224_v51 = vpop.permute.xlu1 %4223  ;;  %v4370_v10 = vmax.f32 %v4348_v6, 0.0  ;;  %v4322_v23 = vmul.f32 %v10840_v32, %v4295_v33  ;;  %v12829_v33 = vld [vmem:[#allocation23_spill] sm:$0xff] }
 0x817   : > { %4274 = vst.msk [vmem:[#allocation3 + $0x80] sm:$0xff] %vm4257_vm10, %v4224_v51 }
 0x818   : > { %v4392_v41 = vmul.f32 %v4370_v10, %v12823_v14  ;;  %v4349_v37 = vadd.f32 %v10846_v27, %v4322_v23  ;;  %v12830_v10 = vld [vmem:[#allocation26_spill] sm:$0xff] }
 0x81a   : > { %8674 = vmatprep.mubr.msk.f32.mxu1 %vm4405_vm11, %v4392_v41  ;;  %v4371_v12 = vmax.f32 %v4349_v37, 0.0 }
 0x81c   : > { %v4393_v4 = vmul.f32 %v4371_v12, %v12824_v44 }
 0x81e   : > { %8675 = vmatmul.mubr.msk.f32.gmra.mrb[80].mxu1 %vm4405_vm11, %v4393_v4  ;;  %v4296_v30 = vld [vmem:[#allocation3 + $0x80] sm:$0xff] }
 0x81f   : > { %v4323_v54 = vmul.f32 %v10840_v32, %v4296_v30 }
 0x821   : > { %v4350_v17 = vadd.f32 %v10846_v27, %v4323_v54 }
 0x823   : > { %v4372_v34 = vmax.f32 %v4350_v17, 0.0 }
 0x825   : > { %v4394_v26 = vmul.f32 %v4372_v34, %v12825_v49 }
 0x827   : > { %8677 = vmatprep.mubr.msk.f32.mxu1 %vm4405_vm11, %v4394_v26 }
 0x829   : > { %v4226_v15 = vpop.permute.xlu0 %4225 }
 0x82a   : > { %4275 = vst.msk [vmem:[#allocation3 + $0x88] sm:$0xff] %vm4257_vm10, %v4226_v15 }
 0x831   : > { %v4297_v52 = vld [vmem:[#allocation3 + $0x88] sm:$0xff] }
 0x832   : > { %v4324_v59 = vmul.f32 %v10840_v32, %v4297_v52 }
 0x834   : > { %v4351_v55 = vadd.f32 %v10846_v27, %v4324_v59 }
 0x836   : > { %v4373_v21 = vmax.f32 %v4351_v55, 0.0 }
 0x838   : > { %v4395_v25 = vmul.f32 %v4373_v21, %v12826_v5 }
 0x83a   : > { %8678 = vmatmul.mubr.msk.f32.gmra.mrb[82].mxu1 %vm4405_vm11, %v4395_v25 }
 0x841   : > { %v4228_v2 = vpop.permute.xlu1 %4227 }
 0x842   : > { %4276 = vst.msk [vmem:[#allocation3 + $0x90] sm:$0xff] %vm4257_vm10, %v4228_v2 }
 0x845   : > { %v4230_v48 = vpop.permute.xlu0 %4229 }
 0x846   : > { %4277 = vst.msk [vmem:[#allocation3 + $0x98] sm:$0xff] %vm4257_vm10, %v4230_v48 }
 0x848   : > { %v4232_v46 = vpop.permute.xlu1 %4231 }
 0x849   : > { %4278 = vst.msk [vmem:[#allocation3 + $0xa0] sm:$0xff] %vm4257_vm10, %v4232_v46  ;;  %v4234_v58 = vpop.permute.xlu0 %4233  ;;  %v4298_v24 = vld [vmem:[#allocation3 + $0x90] sm:$0xff] }
 0x84a   : > { %4279 = vst.msk [vmem:[#allocation3 + $0xa8] sm:$0xff] %vm4257_vm10, %v4234_v58  ;;  %v4325_v8 = vmul.f32 %v10840_v32, %v4298_v24 }
 0x84c   : > { %v4352_v7 = vadd.f32 %v10846_v27, %v4325_v8 }
 0x84d   : > { %v4299_v22 = vld [vmem:[#allocation3 + $0x98] sm:$0xff] }
 0x84e   : > { %v4374_v36 = vmax.f32 %v4352_v7, 0.0  ;;  %v4326_v1 = vmul.f32 %v10840_v32, %v4299_v22 }
 0x850   : > { %v4396_v50 = vmul.f32 %v4374_v36, %v12827_v53  ;;  %v4353_v20 = vadd.f32 %v10846_v27, %v4326_v1  ;;  %v4300_v57 = vld [vmem:[#allocation3 + $0xa0] sm:$0xff] }
 0x851   : > { %v4327_v28 = vmul.f32 %v10840_v32, %v4300_v57  ;;  %v4301_v0 = vld [vmem:[#allocation3 + $0xa8] sm:$0xff] }
 0x852   : > { %8680 = vmatprep.mubr.msk.f32.mxu1 %vm4405_vm11, %v4396_v50  ;;  %v4375_v45 = vmax.f32 %v4353_v20, 0.0  ;;  %v4328_v18 = vmul.f32 %v10840_v32, %v4301_v0 }
 0x853   : > { %v4354_v56 = vadd.f32 %v10846_v27, %v4327_v28 }
 0x854   : > { %v4397_v19 = vmul.f32 %v4375_v45, %v12828_v35  ;;  %v4355_v29 = vadd.f32 %v10846_v27, %v4328_v18 }
 0x855   : > { %v4376_v43 = vmax.f32 %v4354_v56, 0.0 }
 0x856   : > { %8681 = vmatmul.mubr.msk.f32.gmra.mrb[84].mxu1 %vm4405_vm11, %v4397_v19  ;;  %v4377_v6 = vmax.f32 %v4355_v29, 0.0 }
 0x857   : > { %v4398_v51 = vmul.f32 %v4376_v43, %v12829_v33 }
 0x858   : > { %v4399_v23 = vmul.f32 %v4377_v6, %v12830_v10 }
 0x859   : > { %8683 = vmatprep.mubr.msk.f32.mxu1 %vm4405_vm11, %v4398_v51 }
 0x85a   : > { %8684 = vmatmul.mubr.msk.f32.gmra.mrb[86].mxu1 %vm4405_vm11, %v4399_v23 }
 0x8b8   : > { %v8655_v41 = vpop.f32.mrb[66].mxu1 }
 0x8b9   : > { %4652 = vst.msk [vmem:[#allocation4 + $0x18] sm:$0xff] %vm358_vm4, %v8655_v41  ;;  %v4542_v32 = vpop.f32.mrb[67].mxu1 }
 0x8ba   : > { %4651 = vst.msk [vmem:[#allocation4 + $0x10] sm:$0xff] %vm358_vm4, %v4542_v32 }
 0x8bc   : > { %v8658_v37 = vpop.f32.mrb[68].mxu1 }
 0x8bd   : > { %4654 = vst.msk [vmem:[#allocation4 + $0x28] sm:$0xff] %vm358_vm4, %v8658_v37  ;;  %v4552_v27 = vpop.f32.mrb[69].mxu1 }
 0x8be   : > { %4653 = vst.msk [vmem:[#allocation4 + $0x20] sm:$0xff] %vm358_vm4, %v4552_v27 }
 0x8c0   : > { %v8661_v12 = vpop.f32.mrb[70].mxu1  ;;  %v5120_v4 = vld [vmem:[#allocation4 + $0x18] sm:$0xff] }
 0x8c1   : > { %4656 = vst.msk [vmem:[#allocation4 + $0x38] sm:$0xff] %vm358_vm4, %v8661_v12  ;;  %v4562_v30 = vpop.f32.mrb[71].mxu1  ;;  %5165 = vrot.lane.b32.xlu0 %v5120_v4, %s9043_s26  ;;  %v4725_v54 = vld [vmem:[#allocation4 + $0x13] sm:$0xff]  ;;  %v4724_v34 = vld [vmem:[#allocation4 + $0xb] sm:$0xff] }
 0x8c2   : > { %4655 = vst.msk [vmem:[#allocation4 + $0x30] sm:$0xff] %vm358_vm4, %v4562_v30  ;;  %4771 = vrot.lane.b32.xlu1 %v4725_v54, %s9037_s27  ;;  %v4857_v15 = vld [vmem:[#allocation4 + $0x14] sm:$0xff]  ;;  %v4856_v59 = vld [vmem:[#allocation4 + $0xc] sm:$0xff] }
 0x8c3   : > { %v5251_v21 = vld [vmem:[#allocation4 + $0x11] sm:$0xff] }
 0x8c4   : > { %v8664_v17 = vpop.f32.mrb[72].mxu1  ;;  %v4987_v2 = vld [vmem:[#allocation4 + $0xf] sm:$0xff]  ;;  %v4988_v58 = vld [vmem:[#allocation4 + $0x17] sm:$0xff] }
 0x8c5   : > { %4658 = vst.msk [vmem:[#allocation4 + $0x48] sm:$0xff] %vm358_vm4, %v8664_v17  ;;  %v4572_v26 = vpop.f32.mrb[73].mxu1  ;;  %4769 = vrot.lane.b32.xlu0 %v4724_v34, %s9037_s27  ;;  %v5122_v46 = vld [vmem:[#allocation4 + $0x28] sm:$0xff]  ;;  %v4726_v24 = vld [vmem:[#allocation4 + $0x1b] sm:$0xff]  ;;  %v5119_v22 = vld [vmem:[#allocation4 + $0x10] sm:$0xff] }
 0x8c6   : > { %4657 = vst.msk [vmem:[#allocation4 + $0x40] sm:$0xff] %vm358_vm4, %v4572_v26  ;;  %4903 = vrot.lane.b32.xlu1 %v4857_v15, %s9039_s30  ;;  %v4858_v36 = vld [vmem:[#allocation4 + $0x1c] sm:$0xff]  ;;  %v4990_v57 = vld [vmem:[#allocation4 + $0x27] sm:$0xff] }
 0x8c7   : > { %v4989_v1 = vld [vmem:[#allocation4 + $0x1f] sm:$0xff] }
 0x8c8   : > { %v8667_v52 = vpop.f32.mrb[74].mxu1  ;;  %v4727_v50 = vld [vmem:[#allocation4 + $0x23] sm:$0xff]  ;;  %v5252_v20 = vld [vmem:[#allocation4 + $0x19] sm:$0xff] }
 0x8c9   : > { %4660 = vst.msk [vmem:[#allocation4 + $0x58] sm:$0xff] %vm358_vm4, %v8667_v52  ;;  %v4582_v55 = vpop.f32.mrb[75].mxu1  ;;  %4901 = vrot.lane.b32.xlu0 %v4856_v59, %s9039_s30  ;;  %v5121_v28 = vld [vmem:[#allocation4 + $0x20] sm:$0xff]  ;;  %v4729_v19 = vld [vmem:[#allocation4 + $0x33] sm:$0xff]  ;;  %v5254_v6 = vld [vmem:[#allocation4 + $0x29] sm:$0xff] }
 0x8ca   : > { %4659 = vst.msk [vmem:[#allocation4 + $0x50] sm:$0xff] %vm358_vm4, %v4582_v55  ;;  %5295 = vrot.lane.b32.xlu1 %v5251_v21, %s9044_s15  ;;  %v4859_v0 = vld [vmem:[#allocation4 + $0x24] sm:$0xff]  ;;  %v4861_v41 = vld [vmem:[#allocation4 + $0x34] sm:$0xff]  ;;  %v4860_v37 = vld [vmem:[#allocation4 + $0x2c] sm:$0xff] }
 0x8cb   : > { %v5477_v45 = vld [vmem:[#allocation4 + $0x1d] sm:$0xff]  ;;  %v5478_v56 = vld [vmem:[#allocation4 + $0x25] sm:$0xff]  ;;  %v5255_v12 = vld [vmem:[#allocation4 + $0x31] sm:$0xff] }
 0x8cc   : > { %v8670_v25 = vpop.f32.mrb[76].mxu1  ;;  %v5253_v18 = vld [vmem:[#allocation4 + $0x21] sm:$0xff]  ;;  %v5124_v32 = vld [vmem:[#allocation4 + $0x38] sm:$0xff]  ;;  %v4728_v27 = vld [vmem:[#allocation4 + $0x2b] sm:$0xff] }
 0x8cd   : > { %4662 = vst.msk [vmem:[#allocation4 + $0x68] sm:$0xff] %vm358_vm4, %v8670_v25  ;;  %v4592_v48 = vpop.f32.mrb[77].mxu1  ;;  %5031 = vrot.lane.b32.xlu0 %v4987_v2, %s9045_s16  ;;  %v5609_v29 = vld [vmem:[#allocation4 + $0x1e] sm:$0xff]  ;;  %v5610_v23 = vld [vmem:[#allocation4 + $0x26] sm:$0xff]  ;;  %v4991_v4 = vld [vmem:[#allocation4 + $0x2f] sm:$0xff] }
 0x8ce   : > { %4661 = vst.msk [vmem:[#allocation4 + $0x60] sm:$0xff] %vm358_vm4, %v4592_v48  ;;  %5169 = vrot.lane.b32.xlu1 %v5122_v46, %s9043_s26  ;;  %v4730_v30 = vld [vmem:[#allocation4 + $0x3b] sm:$0xff]  ;;  %v5123_v34 = vld [vmem:[#allocation4 + $0x30] sm:$0xff]  ;;  %v4731_v15 = vld [vmem:[#allocation4 + $0x43] sm:$0xff] }
 0x8cf   : > { %v4992_v54 = vld [vmem:[#allocation4 + $0x37] sm:$0xff]  ;;  %v5479_v59 = vld [vmem:[#allocation4 + $0x2d] sm:$0xff]  ;;  %v4863_v25 = vld [vmem:[#allocation4 + $0x44] sm:$0xff] }
 0x8d0   : > { %v4862_v17 = vld [vmem:[#allocation4 + $0x3c] sm:$0xff]  ;;  %v5611_v2 = vld [vmem:[#allocation4 + $0x2e] sm:$0xff] }
 0x8d1   : > { %5033 = vrot.lane.b32.xlu0 %v4988_v58, %s9045_s16  ;;  %v5256_v55 = vld [vmem:[#allocation4 + $0x39] sm:$0xff]  ;;  %v5126_v46 = vld [vmem:[#allocation4 + $0x48] sm:$0xff] }
 0x8d2   : > { %v8673_v8 = vpop.f32.mrb[78].mxu1  ;;  %4773 = vrot.lane.b32.xlu1 %v4726_v24, %s9037_s27  ;;  %v5480_v21 = vld [vmem:[#allocation4 + $0x35] sm:$0xff]  ;;  %v5257_v58 = vld [vmem:[#allocation4 + $0x41] sm:$0xff] }
 0x8d3   : > { %4664 = vst.msk [vmem:[#allocation4 + $0x78] sm:$0xff] %vm358_vm4, %v8673_v8  ;;  %v4602_v7 = vpop.f32.mrb[79].mxu1  ;;  %v5612_v48 = vld [vmem:[#allocation4 + $0x36] sm:$0xff]  ;;  %v4993_v24 = vld [vmem:[#allocation4 + $0x3f] sm:$0xff]  ;;  %v4732_v8 = vld [vmem:[#allocation4 + $0x4b] sm:$0xff] }
 0x8d4   : > { %4663 = vst.msk [vmem:[#allocation4 + $0x70] sm:$0xff] %vm358_vm4, %v4602_v7  ;;  %v4994_v7 = vld [vmem:[#allocation4 + $0x47] sm:$0xff] }
 0x8d5   : > { %5163 = vrot.lane.b32.xlu0 %v5119_v22, %s9043_s26  ;;  %v5617_v16 = vld [vmem:[#allocation4 + $0x5e] sm:$0xff]  ;;  %v5618_v10 = vld [vmem:[#allocation4 + $0x66] sm:$0xff] }
 0x8d6   : > { %4905 = vrot.lane.b32.xlu1 %v4858_v36, %s9039_s30 }
 0x8d9   : > { %5035 = vrot.lane.b32.xlu0 %v4989_v1, %s9045_s16 }
 0x8da   : > { %4775 = vrot.lane.b32.xlu1 %v4727_v50, %s9037_s27  ;;  %v5125_v50 = vld [vmem:[#allocation4 + $0x40] sm:$0xff]  ;;  %v5132_v35 = vld [vmem:[#allocation4 + $0x78] sm:$0xff] }
 0x8db   : > { %v5263_v53 = vld [vmem:[#allocation4 + $0x71] sm:$0xff] }
 0x8dc   : > { %v4999_v5 = vld [vmem:[#allocation4 + $0x6f] sm:$0xff]  ;;  %v5000_v44 = vld [vmem:[#allocation4 + $0x77] sm:$0xff] }
 0x8dd   : > { %5297 = vrot.lane.b32.xlu0 %v5252_v20, %s9044_s15  ;;  %v5131_v42 = vld [vmem:[#allocation4 + $0x70] sm:$0xff] }
 0x8de   : > { %5037 = vrot.lane.b32.xlu1 %v4990_v57, %s9045_s16  ;;  %v4733_v57 = vld [vmem:[#allocation4 + $0x53] sm:$0xff] }
 0x8df   : > { %v5487_v9 = vld [vmem:[#allocation4 + $0x6d] sm:$0xff]  ;;  %v5488_v39 = vld [vmem:[#allocation4 + $0x75] sm:$0xff] }
 0x8e0   : > { %v5619_v3 = vld [vmem:[#allocation4 + $0x6e] sm:$0xff]  ;;  %v5620_v62 = vld [vmem:[#allocation4 + $0x76] sm:$0xff] }
 0x8e1   : > { %5167 = vrot.lane.b32.xlu0 %v5121_v28, %s9043_s26 }
 0x8e2   : > { %4907 = vrot.lane.b32.xlu1 %v4859_v0, %s9039_s30 }
 0x8e5   : > { %5391 = vrot.lane.b32.xlu0 %v4859_v0, %s9041_s12  ;;  %v5481_v0 = vld [vmem:[#allocation4 + $0x3d] sm:$0xff] }
 0x8e6   : > { %5389 = vrot.lane.b32.xlu1 %v4858_v36, %s9041_s12  ;;  %v4864_v36 = vld [vmem:[#allocation4 + $0x4c] sm:$0xff] }
 0x8e9   : > { %5521 = vrot.lane.b32.xlu0 %v5477_v45, %s9038_s28  ;;  %v5258_v45 = vld [vmem:[#allocation4 + $0x49] sm:$0xff] }
 0x8ea   : > { %5299 = vrot.lane.b32.xlu1 %v5253_v18, %s9044_s15 }
 0x8ed   : > { %5523 = vrot.lane.b32.xlu0 %v5478_v56, %s9038_s28 }
 0x8ee   : > { %4779 = vrot.lane.b32.xlu1 %v4729_v19, %s9037_s27  ;;  %v5482_v19 = vld [vmem:[#allocation4 + $0x45] sm:$0xff] }
 0x8f1   : > { %v8676_v43 = vpop.f32.mrb[80].mxu1  ;;  %5653 = vrot.lane.b32.xlu0 %v5609_v29, %s9040_s11  ;;  %v4865_v29 = vld [vmem:[#allocation4 + $0x54] sm:$0xff] }
 0x8f2   : > { %4666 = vst.msk [vmem:[#allocation4 + $0x88] sm:$0xff] %vm358_vm4, %v8676_v43  ;;  %5301 = vrot.lane.b32.xlu1 %v5254_v6, %s9044_s15  ;;  %v4612_v51 = vpop.f32.mrb[81].mxu1 }
 0x8f3   : > { %4665 = vst.msk [vmem:[#allocation4 + $0x80] sm:$0xff] %vm358_vm4, %v4612_v51  ;;  %v5613_v51 = vld [vmem:[#allocation4 + $0x3e] sm:$0xff] }
 0x8f5   : > { %5655 = vrot.lane.b32.xlu0 %v5610_v23, %s9040_s11 }
 0x8f6   : > { %4911 = vrot.lane.b32.xlu1 %v4861_v41, %s9039_s30 }
 0x8f9   : > { %5173 = vrot.lane.b32.xlu0 %v5124_v32, %s9043_s26  ;;  %v5614_v32 = vld [vmem:[#allocation4 + $0x46] sm:$0xff] }
 0x8fa   : > { %5393 = vrot.lane.b32.xlu1 %v4860_v37, %s9041_s12  ;;  %v5134_v40 = vld [vmem:[#allocation4 + $0x88] sm:$0xff]  ;;  %v5001_v11 = vld [vmem:[#allocation4 + $0x7f] sm:$0xff] }
 0x8fb   : > { %v5265_v13 = vld [vmem:[#allocation4 + $0x81] sm:$0xff] }
 0x8fd   : > { %4777 = vrot.lane.b32.xlu0 %v4728_v27, %s9037_s27 }
 0x8fe   : > { %5395 = vrot.lane.b32.xlu1 %v4861_v41, %s9041_s12 }
 0x901   : > { %4909 = vrot.lane.b32.xlu0 %v4860_v37, %s9039_s30 }
 0x902   : > { %5303 = vrot.lane.b32.xlu1 %v5255_v12, %s9044_s15  ;;  %v5128_v12 = vld [vmem:[#allocation4 + $0x58] sm:$0xff] }
 0x905   : > { %5039 = vrot.lane.b32.xlu0 %v4991_v4, %s9045_s16  ;;  %v5259_v4 = vld [vmem:[#allocation4 + $0x51] sm:$0xff] }
 0x906   : > { %4781 = vrot.lane.b32.xlu1 %v4730_v30, %s9037_s27 }
 0x909   : > { %5041 = vrot.lane.b32.xlu0 %v4992_v54, %s9045_s16 }
 0x90a   : > { %4913 = vrot.lane.b32.xlu1 %v4862_v17, %s9039_s30 }
 0x90d   : > { %v8679_v26 = vpop.f32.mrb[82].mxu1  ;;  %5171 = vrot.lane.b32.xlu0 %v5123_v34, %s9043_s26  ;;  %v4734_v34 = vld [vmem:[#allocation4 + $0x5b] sm:$0xff] }
 0x90e   : > { %4668 = vst.msk [vmem:[#allocation4 + $0x98] sm:$0xff] %vm358_vm4, %v8679_v26  ;;  %4783 = vrot.lane.b32.xlu1 %v4731_v15, %s9037_s27  ;;  %v4622_v52 = vpop.f32.mrb[83].mxu1 }
 0x90f   : > { %4667 = vst.msk [vmem:[#allocation4 + $0x90] sm:$0xff] %vm358_vm4, %v4622_v52  ;;  %v4996_v52 = vld [vmem:[#allocation4 + $0x57] sm:$0xff] }
 0x911   : > { %5525 = vrot.lane.b32.xlu0 %v5479_v59, %s9038_s28  ;;  %v4866_v59 = vld [vmem:[#allocation4 + $0x5c] sm:$0xff] }
 0x912   : > { %5305 = vrot.lane.b32.xlu1 %v5256_v55, %s9044_s15 }
 0x915   : > { %5527 = vrot.lane.b32.xlu0 %v5480_v21, %s9038_s28 }
 0x916   : > { %4915 = vrot.lane.b32.xlu1 %v4863_v25, %s9039_s30 }
 0x919   : > { %5657 = vrot.lane.b32.xlu0 %v5611_v2, %s9040_s11  ;;  %v4735_v2 = vld [vmem:[#allocation4 + $0x63] sm:$0xff] }
 0x91a   : > { %5397 = vrot.lane.b32.xlu1 %v4862_v17, %s9041_s12  ;;  %v4995_v17 = vld [vmem:[#allocation4 + $0x4f] sm:$0xff] }
 0x91d   : > { %5659 = vrot.lane.b32.xlu0 %v5612_v48, %s9040_s11 }
 0x91e   : > { %5399 = vrot.lane.b32.xlu1 %v4863_v25, %s9041_s12  ;;  %v5127_v25 = vld [vmem:[#allocation4 + $0x50] sm:$0xff] }
 0x921   : > { %5177 = vrot.lane.b32.xlu0 %v5126_v46, %s9043_s26 }
 0x922   : > { %5307 = vrot.lane.b32.xlu1 %v5257_v58, %s9044_s15  ;;  %v5483_v58 = vld [vmem:[#allocation4 + $0x4d] sm:$0xff] }
 0x925   : > { %5043 = vrot.lane.b32.xlu0 %v4993_v24, %s9045_s16  ;;  %v5260_v24 = vld [vmem:[#allocation4 + $0x59] sm:$0xff] }
 0x926   : > { %4785 = vrot.lane.b32.xlu1 %v4732_v8, %s9037_s27 }
 0x929   : > { %v8682_v22 = vpop.f32.mrb[84].mxu1  ;;  %5045 = vrot.lane.b32.xlu0 %v4994_v7, %s9045_s16 }
 0x92a   : > { %4670 = vst.msk [vmem:[#allocation4 + $0xa8] sm:$0xff] %vm358_vm4, %v8682_v22  ;;  %4917 = vrot.lane.b32.xlu1 %v4864_v36, %s9039_s30  ;;  %v4632_v1 = vpop.f32.mrb[85].mxu1  ;;  %v5484_v22 = vld [vmem:[#allocation4 + $0x55] sm:$0xff] }
 0x92b   : > { %4669 = vst.msk [vmem:[#allocation4 + $0xa0] sm:$0xff] %vm358_vm4, %v4632_v1 }
 0x92d   : > { %5175 = vrot.lane.b32.xlu0 %v5125_v50, %s9043_s26  ;;  %v8685_v20 = vpop.f32.mrb[86].mxu1 }
 0x92e   : > { %4672 = vst.msk [vmem:[#allocation4 + $0xb8] sm:$0xff] %vm358_vm4, %v8685_v20  ;;  %4787 = vrot.lane.b32.xlu1 %v4733_v57, %s9037_s27  ;;  %v4642_v28 = vpop.f32.mrb[87].mxu1  ;;  %v5615_v20 = vld [vmem:[#allocation4 + $0x4e] sm:$0xff] }
 0x92f   : > { %4671 = vst.msk [vmem:[#allocation4 + $0xb0] sm:$0xff] %vm358_vm4, %v4642_v28 }
 0x931   : > { %5529 = vrot.lane.b32.xlu0 %v5481_v0, %s9038_s28  ;;  %v5616_v0 = vld [vmem:[#allocation4 + $0x56] sm:$0xff] }
 0x932   : > { %5309 = vrot.lane.b32.xlu1 %v5258_v45, %s9044_s15 }
 0x933   : > { %v11078_v18 = vpop.permute.xlu0 %5165 }
 0x934   : > { %v11080_v56 = vpop.permute.xlu1 %4771 }
 0x935   : > { %5531 = vrot.lane.b32.xlu0 %v5482_v19, %s9038_s28 }
 0x936   : > { %4919 = vrot.lane.b32.xlu1 %v4865_v29, %s9039_s30 }
 0x937   : > { %v11084_v43 = vpop.permute.xlu0 %4769 }
 0x938   : > { %v11086_v6 = vpop.permute.xlu1 %4903 }
 0x939   : > { %5661 = vrot.lane.b32.xlu0 %v5613_v51, %s9040_s11  ;;  %v5261_v51 = vld [vmem:[#allocation4 + $0x61] sm:$0xff] }
 0x93a   : > { %5401 = vrot.lane.b32.xlu1 %v4864_v36, %s9041_s12  ;;  %v4867_v36 = vld [vmem:[#allocation4 + $0x64] sm:$0xff] }
 0x93b   : > { %v11090_v23 = vpop.permute.xlu0 %4901 }
 0x93c   : > { %v11092_v41 = vpop.permute.xlu1 %5295 }
 0x93d   : > { %5663 = vrot.lane.b32.xlu0 %v5614_v32, %s9040_s11 }
 0x93e   : > { %5403 = vrot.lane.b32.xlu1 %v4865_v29, %s9041_s12  ;;  %v5130_v29 = vld [vmem:[#allocation4 + $0x68] sm:$0xff] }
 0x93f   : > { %v11096_v37 = vpop.permute.xlu0 %5031 }
 0x940   : > { %v11098_v27 = vpop.permute.xlu1 %5169 }
 0x941   : > { %5181 = vrot.lane.b32.xlu0 %v5128_v12, %s9043_s26 }
 0x942   : > { %5311 = vrot.lane.b32.xlu1 %v5259_v4, %s9044_s15  ;;  %v4997_v4 = vld [vmem:[#allocation4 + $0x5f] sm:$0xff] }
 0x943   : > { %v11102_v30 = vpop.permute.xlu0 %5033 }
 0x944   : > { %v11104_v54 = vpop.permute.xlu1 %4773 }
 0x945   : > { %5047 = vrot.lane.b32.xlu0 %v4995_v17, %s9045_s16  ;;  %v4736_v17 = vld [vmem:[#allocation4 + $0x6b] sm:$0xff] }
 0x946   : > { %4789 = vrot.lane.b32.xlu1 %v4734_v34, %s9037_s27 }
 0x947   : > { %v11108_v26 = vpop.permute.xlu0 %5163 }
 0x948   : > { %v11110_v15 = vpop.permute.xlu1 %4905 }
 0x949   : > { %5049 = vrot.lane.b32.xlu0 %v4996_v52, %s9045_s16 }
 0x94a   : > { %4921 = vrot.lane.b32.xlu1 %v4866_v59, %s9039_s30 }
 0x94b   : > { %v11114_v55 = vpop.permute.xlu0 %5035 }
 0x94c   : > { %v11116_v21 = vpop.permute.xlu1 %4775 }
 0x94d   : > { %5179 = vrot.lane.b32.xlu0 %v5127_v25, %s9043_s26  ;;  %v4868_v25 = vld [vmem:[#allocation4 + $0x6c] sm:$0xff] }
 0x94e   : > { %4791 = vrot.lane.b32.xlu1 %v4735_v2, %s9037_s27 }
 0x94f   : > { %v11120_v48 = vpop.permute.xlu0 %5297 }
 0x950   : > { %v11122_v46 = vpop.permute.xlu1 %5037 }
 0x951   : > { %5533 = vrot.lane.b32.xlu0 %v5483_v58, %s9038_s28 }
 0x952   : > { %5313 = vrot.lane.b32.xlu1 %v5260_v24, %s9044_s15  ;;  %v5129_v24 = vld [vmem:[#allocation4 + $0x60] sm:$0xff] }
 0x953   : > { %v11126_v8 = vpop.permute.xlu0 %5167 }
 0x954   : > { %v11128_v7 = vpop.permute.xlu1 %4907 }
 0x955   : > { %5535 = vrot.lane.b32.xlu0 %v5484_v22, %s9038_s28  ;;  %v4737_v22 = vld [vmem:[#allocation4 + $0x73] sm:$0xff] }
 0x956   : > { %4923 = vrot.lane.b32.xlu1 %v4867_v36, %s9039_s30 }
 0x957   : > { %v11132_v1 = vpop.permute.xlu0 %5391 }
 0x958   : > { %v11134_v50 = vpop.permute.xlu1 %5389 }
 0x959   : > { %5665 = vrot.lane.b32.xlu0 %v5615_v20, %s9040_s11 }
 0x95a   : > { %5405 = vrot.lane.b32.xlu1 %v4866_v59, %s9041_s12  ;;  %v4998_v59 = vld [vmem:[#allocation4 + $0x67] sm:$0xff] }
 0x95b   : > { %v11138_v57 = vpop.permute.xlu0 %5521 }
 0x95c   : > { %v11140_v28 = vpop.permute.xlu1 %5299 }
 0x95d   : > { %5667 = vrot.lane.b32.xlu0 %v5616_v0, %s9040_s11  ;;  %v5485_v0 = vld [vmem:[#allocation4 + $0x5d] sm:$0xff] }
 0x95e   : > { %5407 = vrot.lane.b32.xlu1 %v4867_v36, %s9041_s12 }
 0x95f   : > { %v11144_v45 = vpop.permute.xlu0 %5523 }
 0x960   : > { %v11146_v19 = vpop.permute.xlu1 %4779 }
 0x961   : > { %5185 = vrot.lane.b32.xlu0 %v5130_v29, %s9043_s26  ;;  %v5262_v29 = vld [vmem:[#allocation4 + $0x69] sm:$0xff] }
 0x962   : > { %5315 = vrot.lane.b32.xlu1 %v5261_v51, %s9044_s15 }
 0x963   : > { %v11150_v32 = vpop.permute.xlu0 %5653 }
 0x964   : > { %v11152_v12 = vpop.permute.xlu1 %5301 }
 0x965   : > { %5051 = vrot.lane.b32.xlu0 %v4997_v4, %s9045_s16 }
 0x966   : > { %4793 = vrot.lane.b32.xlu1 %v4736_v17, %s9037_s27  ;;  %v5486_v17 = vld [vmem:[#allocation4 + $0x65] sm:$0xff] }
 0x967   : > { %v11156_v34 = vpop.permute.xlu0 %5655 }
 0x968   : > { %v11158_v52 = vpop.permute.xlu1 %4911 }
 0x969   : > { %5053 = vrot.lane.b32.xlu0 %v4998_v59, %s9045_s16  ;;  %v4869_v59 = vld [vmem:[#allocation4 + $0x74] sm:$0xff] }
 0x96a   : > { %4925 = vrot.lane.b32.xlu1 %v4868_v25, %s9039_s30 }
 0x96b   : > { %v11162_v2 = vpop.permute.xlu0 %5173 }
 0x96c   : > { %v11164_v58 = vpop.permute.xlu1 %5393 }
 0x96d   : > { %5183 = vrot.lane.b32.xlu0 %v5129_v24, %s9043_s26 }
 0x96e   : > { %4795 = vrot.lane.b32.xlu1 %v4737_v22, %s9037_s27 }
 0x96f   : > { %v11168_v36 = vpop.permute.xlu0 %4777 }
 0x970   : > { %v11170_v20 = vpop.permute.xlu1 %5395 }
 0x971   : > { %5537 = vrot.lane.b32.xlu0 %v5485_v0, %s9038_s28 }
 0x972   : > { %5317 = vrot.lane.b32.xlu1 %v5262_v29, %s9044_s15 }
 0x973   : > { %v11174_v51 = vpop.permute.xlu0 %4909 }
 0x974   : > { %v11176_v4 = vpop.permute.xlu1 %5303 }
 0x975   : > { %5539 = vrot.lane.b32.xlu0 %v5486_v17, %s9038_s28 }
 0x976   : > { %4927 = vrot.lane.b32.xlu1 %v4869_v59, %s9039_s30 }
 0x977   : > { %v11180_v24 = vpop.permute.xlu0 %5039 }
 0x978   : > { %v11182_v22 = vpop.permute.xlu1 %4781 }
 0x979   : > { %5669 = vrot.lane.b32.xlu0 %v5617_v16, %s9040_s11 }
 0x97a   : > { %5409 = vrot.lane.b32.xlu1 %v4868_v25, %s9041_s12 }
 0x97b   : > { %v11186_v0 = vpop.permute.xlu0 %5041 }
 0x97c   : > { %v11188_v29 = vpop.permute.xlu1 %4913 }
 0x97d   : > { %5671 = vrot.lane.b32.xlu0 %v5618_v10, %s9040_s11  ;;  %v4738_v10 = vld [vmem:[#allocation4 + $0x7b] sm:$0xff] }
 0x97e   : > { %5411 = vrot.lane.b32.xlu1 %v4869_v59, %s9041_s12 }
 0x97f   : > { %v11192_v17 = vpop.permute.xlu0 %5171 }
 0x980   : > { %v11194_v33 = vpop.permute.xlu1 %4783 }
 0x981   : > { %5189 = vrot.lane.b32.xlu0 %v5132_v35, %s9043_s26  ;;  %v4870_v35 = vld [vmem:[#allocation4 + $0x7c] sm:$0xff] }
 0x982   : > { %5319 = vrot.lane.b32.xlu1 %v5263_v53, %s9044_s15 }
 0x983   : > { %v11198_v16 = vpop.permute.xlu0 %5525 }
 0x984   : > { %v11200_v25 = vpop.permute.xlu1 %5305 }
 0x985   : > { %12831 = vst [vmem:[#allocation61_spill] sm:$0xff] %v11200_v25  ;;  %5055 = vrot.lane.b32.xlu0 %v4999_v5, %s9045_s16  ;;  %v4739_v5 = vld [vmem:[#allocation4 + $0x83] sm:$0xff]  ;;  %v5007_v25 = vld [vmem:[#allocation4 + $0xaf] sm:$0xff] }
 0x986   : > { %4797 = vrot.lane.b32.xlu1 %v4738_v10, %s9037_s27 }
 0x987   : > { %v11204_v59 = vpop.permute.xlu0 %5527 }
 0x988   : > { %v11206_v49 = vpop.permute.xlu1 %4915 }
 0x989   : > { %5057 = vrot.lane.b32.xlu0 %v5000_v44, %s9045_s16  ;;  %v5264_v44 = vld [vmem:[#allocation4 + $0x79] sm:$0xff] }
 0x98a   : > { %4929 = vrot.lane.b32.xlu1 %v4870_v35, %s9039_s30 }
 0x98b   : > { %v11210_v53 = vpop.permute.xlu0 %5657 }
 0x98c   : > { %v11212_v14 = vpop.permute.xlu1 %5397 }
 0x98d   : > { %12832 = vst [vmem:[#allocation62_spill] sm:$0xff] %v11212_v14  ;;  %5187 = vrot.lane.b32.xlu0 %v5131_v42, %s9043_s26  ;;  %v4871_v42 = vld [vmem:[#allocation4 + $0x84] sm:$0xff] }
 0x98e   : > { %4799 = vrot.lane.b32.xlu1 %v4739_v5, %s9037_s27 }
 0x98f   : > { %v11216_v10 = vpop.permute.xlu0 %5659 }
 0x990   : > { %12833 = vst [vmem:[#allocation68_spill] sm:$0xff] %v11216_v10  ;;  %v11218_v63 = vpop.permute.xlu1 %5399 }
 0x991   : > { %12834 = vst [vmem:[#allocation79_spill] sm:$0xff] %v11218_v63  ;;  %5541 = vrot.lane.b32.xlu0 %v5487_v9, %s9038_s28 }
 0x992   : > { %5321 = vrot.lane.b32.xlu1 %v5264_v44, %s9044_s15 }
 0x993   : > { %v11222_v47 = vpop.permute.xlu0 %5177 }
 0x994   : > { %12835 = vst [vmem:[#allocation63_spill] sm:$0xff] %v11222_v47  ;;  %v11224_v60 = vpop.permute.xlu1 %5307  ;;  %v5002_v47 = vld [vmem:[#allocation4 + $0x87] sm:$0xff] }
 0x995   : > { %12836 = vst [vmem:[#allocation67_spill] sm:$0xff] %v11224_v60  ;;  %5543 = vrot.lane.b32.xlu0 %v5488_v39, %s9038_s28  ;;  %v5489_v60 = vld [vmem:[#allocation4 + $0x7d] sm:$0xff] }
 0x996   : > { %4931 = vrot.lane.b32.xlu1 %v4871_v42, %s9039_s30 }
 0x997   : > { %v11228_v5 = vpop.permute.xlu0 %5043 }
 0x998   : > { %v11230_v61 = vpop.permute.xlu1 %4785 }
 0x999   : > { %5673 = vrot.lane.b32.xlu0 %v5619_v3, %s9040_s11 }
 0x99a   : > { %5413 = vrot.lane.b32.xlu1 %v4870_v35, %s9041_s12 }
 0x99b   : > { %v11234_v9 = vpop.permute.xlu0 %5045 }
 0x99c   : > { %v11236_v44 = vpop.permute.xlu1 %4917 }
 0x99d   : > { %12837 = vst [vmem:[#allocation66_spill] sm:$0xff] %v11236_v44  ;;  %5675 = vrot.lane.b32.xlu0 %v5620_v62, %s9040_s11  ;;  %v4740_v62 = vld [vmem:[#allocation4 + $0x8b] sm:$0xff] }
 0x99e   : > { %5415 = vrot.lane.b32.xlu1 %v4871_v42, %s9041_s12 }
 0x99f   : > { %v11240_v39 = vpop.permute.xlu0 %5175 }
 0x9a0   : > { %v11242_v38 = vpop.permute.xlu1 %4787 }
 0x9a1   : > { %12838 = vst [vmem:[#allocation69_spill] sm:$0xff] %v11242_v38  ;;  %5193 = vrot.lane.b32.xlu0 %v5134_v40, %s9043_s26  ;;  %v4872_v40 = vld [vmem:[#allocation4 + $0x8c] sm:$0xff] }
 0x9a2   : > { %5323 = vrot.lane.b32.xlu1 %v5265_v13, %s9044_s15 }
 0x9a3   : > { %v11246_v3 = vpop.permute.xlu0 %5529 }
 0x9a4   : > { %12839 = vst [vmem:[#allocation72_spill] sm:$0xff] %v11246_v3  ;;  %v11248_v35 = vpop.permute.xlu1 %5309  ;;  %v5136_v3 = vld [vmem:[#allocation4 + $0x98] sm:$0xff] }
 0x9a5   : > { %12840 = vst [vmem:[#allocation83_spill] sm:$0xff] %v11248_v35  ;;  %5059 = vrot.lane.b32.xlu0 %v5001_v11, %s9045_s16  ;;  %v5133_v35 = vld [vmem:[#allocation4 + $0x80] sm:$0xff]  ;;  %v4741_v11 = vld [vmem:[#allocation4 + $0x93] sm:$0xff] }
 0x9a6   : > { %4801 = vrot.lane.b32.xlu1 %v4740_v62, %s9037_s27 }
 0x9a7   : > { %v11252_v42 = vpop.permute.xlu0 %5531 }
 0x9a8   : > { %12841 = vst [vmem:[#allocation64_spill] sm:$0xff] %v11252_v42  ;;  %v11254_v31 = vpop.permute.xlu1 %4919 }
 0x9a9   : > { %12842 = vst [vmem:[#allocation65_spill] sm:$0xff] %v11254_v31  ;;  %5061 = vrot.lane.b32.xlu0 %v5002_v47, %s9045_s16  ;;  %v5266_v47 = vld [vmem:[#allocation4 + $0x89] sm:$0xff] }
 0x9aa   : > { %4933 = vrot.lane.b32.xlu1 %v4872_v40, %s9039_s30 }
 0x9ab   : > { %v11258_v13 = vpop.permute.xlu0 %5661 }
 0x9ac   : > { %12843 = vst [vmem:[#allocation80_spill] sm:$0xff] %v11258_v13  ;;  %v11260_v63 = vpop.permute.xlu1 %5401 }
 0x9ad   : > { %12844 = vst [vmem:[#allocation81_spill] sm:$0xff] %v11260_v63  ;;  %5191 = vrot.lane.b32.xlu0 %v5133_v35, %s9043_s26  ;;  %v5490_v63 = vld [vmem:[#allocation4 + $0x85] sm:$0xff]  ;;  %v4873_v35 = vld [vmem:[#allocation4 + $0x94] sm:$0xff] }
 0x9ae   : > { %4803 = vrot.lane.b32.xlu1 %v4741_v11, %s9037_s27 }
 0x9af   : > { %v11264_v62 = vpop.permute.xlu0 %5663 }
 0x9b0   : > { %12845 = vst [vmem:[#allocation73_spill] sm:$0xff] %v11264_v62  ;;  %v11266_v42 = vpop.permute.xlu1 %5403 }
 0x9b1   : > { %12846 = vst [vmem:[#allocation74_spill] sm:$0xff] %v11266_v42  ;;  %5545 = vrot.lane.b32.xlu0 %v5489_v60, %s9038_s28  ;;  %v5621_v42 = vld [vmem:[#allocation4 + $0x7e] sm:$0xff] }
 0x9b2   : > { %5325 = vrot.lane.b32.xlu1 %v5266_v47, %s9044_s15 }
 0x9b3   : > { %v11270_v31 = vpop.permute.xlu0 %5181 }
 0x9b4   : > { %12847 = vst [vmem:[#allocation84_spill] sm:$0xff] %v11270_v31  ;;  %v11272_v13 = vpop.permute.xlu1 %5311  ;;  %v5622_v31 = vld [vmem:[#allocation4 + $0x86] sm:$0xff] }
 0x9b5   : > { %12848 = vst [vmem:[#allocation95_spill] sm:$0xff] %v11272_v13  ;;  %5547 = vrot.lane.b32.xlu0 %v5490_v63, %s9038_s28 }
 0x9b6   : > { %4935 = vrot.lane.b32.xlu1 %v4873_v35, %s9039_s30 }
 0x9b7   : > { %v11276_v11 = vpop.permute.xlu0 %5047 }
 0x9b8   : > { %12849 = vst [vmem:[#allocation70_spill] sm:$0xff] %v11276_v11  ;;  %v11278_v62 = vpop.permute.xlu1 %4789  ;;  %v12888_v11 = vld [vmem:[#allocation31_spill] sm:$0xff] }
 0x9b9   : > { %12850 = vst [vmem:[#allocation71_spill] sm:$0xff] %v11278_v62  ;;  %5677 = vrot.lane.b32.xlu0 %v5621_v42, %s9040_s11  ;;  %v5267_v62 = vld [vmem:[#allocation4 + $0x91] sm:$0xff] }
 0x9ba   : > { %5417 = vrot.lane.b32.xlu1 %v4872_v40, %s9041_s12 }
 0x9bb   : > { %v11282_v60 = vpop.permute.xlu0 %5049 }
 0x9bc   : > { %12851 = vst [vmem:[#allocation82_spill] sm:$0xff] %v11282_v60  ;;  %v11284_v47 = vpop.permute.xlu1 %4921 }
 0x9bd   : > { %12852 = vst [vmem:[#allocation85_spill] sm:$0xff] %v11284_v47  ;;  %5679 = vrot.lane.b32.xlu0 %v5622_v31, %s9040_s11  ;;  %v5003_v47 = vld [vmem:[#allocation4 + $0x8f] sm:$0xff]  ;;  %v4742_v31 = vld [vmem:[#allocation4 + $0x9b] sm:$0xff] }
 0x9be   : > { %5419 = vrot.lane.b32.xlu1 %v4873_v35, %s9041_s12 }
 0x9bf   : > { %v11288_v63 = vpop.permute.xlu0 %5179 }
 0x9c0   : > { %12853 = vst [vmem:[#allocation88_spill] sm:$0xff] %v11288_v63  ;;  %v11290_v13 = vpop.permute.xlu1 %4791 }
 0x9c1   : > { %12854 = vst [vmem:[#allocation78_spill] sm:$0xff] %v11290_v13  ;;  %5197 = vrot.lane.b32.xlu0 %v5136_v3, %s9043_s26  ;;  %v5004_v13 = vld [vmem:[#allocation4 + $0x97] sm:$0xff] }
 0x9c2   : > { %5327 = vrot.lane.b32.xlu1 %v5267_v62, %s9044_s15  ;;  %v4874_v3 = vld [vmem:[#allocation4 + $0x9c] sm:$0xff] }
 0x9c3   : > { %v11294_v42 = vpop.permute.xlu0 %5533 }
 0x9c4   : > { %12855 = vst [vmem:[#allocation99_spill] sm:$0xff] %v11294_v42  ;;  %v11296_v40 = vpop.permute.xlu1 %5313 }
 0x9c5   : > { %12856 = vst [vmem:[#allocation75_spill] sm:$0xff] %v11296_v40  ;;  %5063 = vrot.lane.b32.xlu0 %v5003_v47, %s9045_s16  ;;  %v5135_v40 = vld [vmem:[#allocation4 + $0x90] sm:$0xff]  ;;  %v4743_v47 = vld [vmem:[#allocation4 + $0xa3] sm:$0xff] }
 0x9c6   : > { %4805 = vrot.lane.b32.xlu1 %v4742_v31, %s9037_s27 }
 0x9c7   : > { %v11300_v35 = vpop.permute.xlu0 %5535 }
 0x9c8   : > { %12857 = vst [vmem:[#allocation76_spill] sm:$0xff] %v11300_v35  ;;  %v11302_v60 = vpop.permute.xlu1 %4923 }
 0x9c9   : > { %12858 = vst [vmem:[#allocation77_spill] sm:$0xff] %v11302_v60  ;;  %5065 = vrot.lane.b32.xlu0 %v5004_v13, %s9045_s16  ;;  %v5491_v60 = vld [vmem:[#allocation4 + $0x8d] sm:$0xff]  ;;  %v5268_v13 = vld [vmem:[#allocation4 + $0x99] sm:$0xff] }
 0x9ca   : > { %4937 = vrot.lane.b32.xlu1 %v4874_v3, %s9039_s30 }
 0x9cb   : > { %v11306_v62 = vpop.permute.xlu0 %5665 }
 0x9cc   : > { %12859 = vst [vmem:[#allocation97_spill] sm:$0xff] %v11306_v62  ;;  %v11308_v42 = vpop.permute.xlu1 %5405 }
 0x9cd   : > { %12860 = vst [vmem:[#allocation89_spill] sm:$0xff] %v11308_v42  ;;  %5195 = vrot.lane.b32.xlu0 %v5135_v40, %s9043_s26  ;;  %v5492_v42 = vld [vmem:[#allocation4 + $0x95] sm:$0xff]  ;;  %v4875_v40 = vld [vmem:[#allocation4 + $0xa4] sm:$0xff] }
 0x9ce   : > { %4807 = vrot.lane.b32.xlu1 %v4743_v47, %s9037_s27 }
 0x9cf   : > { %v11312_v31 = vpop.permute.xlu0 %5667 }
 0x9d0   : > { %12861 = vst [vmem:[#allocation90_spill] sm:$0xff] %v11312_v31  ;;  %v11314_v35 = vpop.permute.xlu1 %5407 }
 0x9d1   : > { %12862 = vst [vmem:[#allocation96_spill] sm:$0xff] %v11314_v35  ;;  %5549 = vrot.lane.b32.xlu0 %v5491_v60, %s9038_s28  ;;  %v5623_v35 = vld [vmem:[#allocation4 + $0x8e] sm:$0xff] }
 0x9d2   : > { %5329 = vrot.lane.b32.xlu1 %v5268_v13, %s9044_s15 }
 0x9d3   : > { %v11318_v63 = vpop.permute.xlu0 %5185 }
 0x9d4   : > { %12863 = vst [vmem:[#allocation111_spill] sm:$0xff] %v11318_v63  ;;  %v11320_v62 = vpop.permute.xlu1 %5315  ;;  %v5624_v63 = vld [vmem:[#allocation4 + $0x96] sm:$0xff] }
 0x9d5   : > { %12864 = vst [vmem:[#allocation86_spill] sm:$0xff] %v11320_v62  ;;  %5551 = vrot.lane.b32.xlu0 %v5492_v42, %s9038_s28 }
 0x9d6   : > { %4939 = vrot.lane.b32.xlu1 %v4875_v40, %s9039_s30 }
 0x9d7   : > { %v11324_v47 = vpop.permute.xlu0 %5051 }
 0x9d8   : > { %12865 = vst [vmem:[#allocation87_spill] sm:$0xff] %v11324_v47  ;;  %v11326_v31 = vpop.permute.xlu1 %4793  ;;  %v5138_v47 = vld [vmem:[#allocation4 + $0xa8] sm:$0xff] }
 0x9d9   : > { %12866 = vst [vmem:[#allocation98_spill] sm:$0xff] %v11326_v31  ;;  %5681 = vrot.lane.b32.xlu0 %v5623_v35, %s9040_s11  ;;  %v5493_v31 = vld [vmem:[#allocation4 + $0x9d] sm:$0xff] }
 0x9da   : > { %5421 = vrot.lane.b32.xlu1 %v4874_v3, %s9041_s12 }
 0x9db   : > { %v11330_v60 = vpop.permute.xlu0 %5053 }
 0x9dc   : > { %12867 = vst [vmem:[#allocation101_spill] sm:$0xff] %v11330_v60  ;;  %v11332_v13 = vpop.permute.xlu1 %4925 }
 0x9dd   : > { %12868 = vst [vmem:[#allocation94_spill] sm:$0xff] %v11332_v13  ;;  %5683 = vrot.lane.b32.xlu0 %v5624_v63, %s9040_s11  ;;  %v5005_v13 = vld [vmem:[#allocation4 + $0x9f] sm:$0xff] }
 0x9de   : > { %5423 = vrot.lane.b32.xlu1 %v4875_v40, %s9041_s12  ;;  %v5625_v63 = vld [vmem:[#allocation4 + $0x9e] sm:$0xff] }
 0x9df   : > { %v11336_v42 = vpop.permute.xlu0 %5183 }
 0x9e0   : > { %12869 = vst [vmem:[#allocation115_spill] sm:$0xff] %v11336_v42  ;;  %v11338_v62 = vpop.permute.xlu1 %4795  ;;  %v5629_v42 = vld [vmem:[#allocation4 + $0xbe] sm:$0xff] }
 0x9e1   : > { %12870 = vst [vmem:[#allocation91_spill] sm:$0xff] %v11338_v62  ;;  %5201 = vrot.lane.b32.xlu0 %v5138_v47, %s9043_s26  ;;  %v5006_v62 = vld [vmem:[#allocation4 + $0xa7] sm:$0xff]  ;;  %v5272_v47 = vld [vmem:[#allocation4 + $0xb9] sm:$0xff] }
 0x9e2   : > { %5553 = vrot.lane.b32.xlu1 %v5493_v31, %s9038_s28 }
 0x9e3   : > { %v11342_v35 = vpop.permute.xlu0 %5537 }
 0x9e4   : > { %12871 = vst [vmem:[#allocation92_spill] sm:$0xff] %v11342_v35  ;;  %v11344_v3 = vpop.permute.xlu1 %5317 }
 0x9e5   : > { %12872 = vst [vmem:[#allocation93_spill] sm:$0xff] %v11344_v3  ;;  %5067 = vrot.lane.b32.xlu0 %v5005_v13, %s9045_s16  ;;  %v5137_v3 = vld [vmem:[#allocation4 + $0xa0] sm:$0xff] }
 0x9e6   : > { %5685 = vrot.lane.b32.xlu1 %v5625_v63, %s9040_s11  ;;  %v5384_v13 = vld [vmem:[#allocation4 + $0xbc] sm:$0xff] }
 0x9e7   : > { %v11348_v40 = vpop.permute.xlu0 %5539 }
 0x9e8   : > { %12873 = vst [vmem:[#allocation105_spill] sm:$0xff] %v11348_v40  ;;  %v11350_v60 = vpop.permute.xlu1 %4927  ;;  %v5269_v40 = vld [vmem:[#allocation4 + $0xa1] sm:$0xff] }
 0x9e9   : > { %12874 = vst [vmem:[#allocation106_spill] sm:$0xff] %v11350_v60  ;;  %5069 = vrot.lane.b32.xlu0 %v5006_v62, %s9045_s16  ;;  %v5972_v60 = vld [vmem:[%s12522_s4 + $0x40] sm:$0xff]  ;;  %v5973_v62 = vld [vmem:[%s12522_s4 + $0x48] sm:$0xff] }
 0x9ea   : > { %5337 = vrot.lane.b32.xlu1 %v5272_v47, %s9044_s15 }
 0x9eb   : > { %v11354_v31 = vpop.permute.xlu0 %5669 }
 0x9ec   : > { %12875 = vst [vmem:[#allocation113_spill] sm:$0xff] %v11354_v31  ;;  %v11356_v35 = vpop.permute.xlu1 %5409  ;;  %v5494_v31 = vld [vmem:[#allocation4 + $0xa5] sm:$0xff] }
 0x9ed   : > { %12876 = vst [vmem:[#allocation102_spill] sm:$0xff] %v11356_v35  ;;  %5199 = vrot.lane.b32.xlu0 %v5137_v3, %s9043_s26  ;;  %v8859_v35 = vpack.c.bf16 %v5973_v62, %v5972_v60  ;;  %v5497_v3 = vld [vmem:[#allocation4 + $0xbd] sm:$0xff]  ;;  %v11383_v60 = vld [vmem:[%s12523_s5 + $0x11] ss:$0 sm:$0xff]  ;;  %v5626_v62 = vld [vmem:[#allocation4 + $0xa6] sm:$0xff] }
 0x9ee   : > { %5429 = vrot.lane.b32.xlu1 %v5384_v13, %s9041_s12 }
 0x9ef   : > { %v11360_v63 = vpop.permute.xlu0 %5671  ;;  %8860 = vmatprep.subr.bf16.mxu0 %v8859_v35 }
 0x9f0   : > { %12877 = vst [vmem:[#allocation103_spill] sm:$0xff] %v11360_v63  ;;  %v11368_v47 = vpop.permute.xlu1 %5411  ;;  %8862 = vmatpush3.bf16.msra.mxu0 %v8859_v35  ;;  %v4744_v35 = vld [vmem:[#allocation4 + $0xab] sm:$0xff] }
 0x9f1   : > { %12878 = vst [vmem:[#allocation117_spill] sm:$0xff] %v11368_v47  ;;  %5331 = vrot.lane.b32.xlu0 %v5269_v40, %s9044_s15 }
 0x9f2   : > { %5561 = vrot.lane.b32.xlu1 %v5497_v3, %s9038_s28  ;;  %v9023_v3 = vld [vmem:[#allocation4 + $0x2] sm:$0xff] }
 0x9f3   : > { %v11372_v13 = vpop.permute.xlu0 %5189 }
 0x9f4   : > { %12879 = vst [vmem:[#allocation110_spill] sm:$0xff] %v11372_v13  ;;  %v11374_v63 = vpop.permute.xlu1 %5319 }
 0x9f5   : > { %12880 = vst [vmem:[#allocation107_spill] sm:$0xff] %v11374_v63  ;;  %5555 = vrot.lane.b32.xlu0 %v5494_v31, %s9038_s28  ;;  %v4701_v31 = vadd.f32 %v9023_v3, %v11383_v60  ;;  %v5140_v63 = vld [vmem:[#allocation4 + $0xb8] sm:$0xff]  ;;  %v12885_v3 = vld [vmem:[#allocation29_spill] sm:$0xff] }
 0x9f6   : > { %5693 = vrot.lane.b32.xlu1 %v5629_v42, %s9040_s11 }
 0x9f7   : > { %v11378_v47 = vpop.permute.xlu0 %5055  ;;  %v4833_v44 = vadd.f32 %v12885_v3, %v4701_v31  ;;  %v4681_v3 = vld [vmem:[#allocation4 + $0x12] sm:$0xff] }
 0x9f8   : > { %12881 = vst [vmem:[#allocation108_spill] sm:$0xff] %v11378_v47  ;;  %v11385_v40 = vpop.permute.xlu1 %4797  ;;  %v4876_v47 = vld [vmem:[#allocation4 + $0xac] sm:$0xff] }
 0x9f9   : > { %12882 = vst [vmem:[#allocation109_spill] sm:$0xff] %v11385_v40  ;;  %5687 = vrot.lane.b32.xlu0 %v5626_v62, %s9040_s11  ;;  %v5974_v40 = vld [vmem:[%s12522_s4 + $0x50] sm:$0xff]  ;;  %v5975_v62 = vld [vmem:[%s12522_s4 + $0x58] sm:$0xff]  ;;  %v4965_v38 = vadd.f32 %v12888_v11, %v4833_v44  ;;  %v4683_v11 = vld [vmem:[#allocation4 + $0x22] sm:$0xff] }
 0x9fa   : > { %4809 = vrot.lane.b32.xlu1 %v4744_v35, %s9037_s27  ;;  %v8863_v35 = vpack.c.bf16 %v5975_v62, %v5974_v40  ;;  %v4682_v40 = vld [vmem:[#allocation4 + $0x1a] sm:$0xff] }
 0x9fb   : > { %v11390_v13 = vpop.permute.xlu0 %5057 }
 0x9fc   : > { %12883 = vst [vmem:[#allocation118_spill] sm:$0xff] %v11390_v13  ;;  %v11392_v42 = vpop.permute.xlu1 %4929  ;;  %8864 = vmatprep.subr.bf16.mxu0 %v8863_v35 }
 0x9fd   : > { %12884 = vst [vmem:[#allocation100_spill] sm:$0xff] %v11392_v42  ;;  %5205 = vrot.lane.b32.xlu0 %v5140_v63, %s9043_s26  ;;  %v4680_v42 = vld [vmem:[#allocation4 + $0xa] sm:$0xff]  ;;  %v5008_v63 = vld [vmem:[#allocation4 + $0xb7] sm:$0xff]  ;;  %8866 = vmatpush3.bf16.msra.mxu0 %v8863_v35  ;;  %v4704_v35 = vadd.f32 %v11383_v60, %v4682_v40 }
 0x9fe   : > { %4941 = vrot.lane.b32.xlu1 %v4876_v47, %s9039_s30  ;;  %v4702_v14 = vadd.f32 %v11383_v60, %v4680_v42  ;;  %v5139_v40 = vld [vmem:[#allocation4 + $0xb0] sm:$0xff] }
 0x9ff   : > { %v11403_v13 = vpop.permute.xlu0 %5187 }
 0xa00   : > { %12886 = vst [vmem:[#allocation104_spill] sm:$0xff] %v11403_v13  ;;  %v11405_v10 = vpop.permute.xlu1 %4799  ;;  %v5097_v13 = vadd.f32 %v11096_v37, %v4965_v38  ;;  %v5495_v38 = vld [vmem:[#allocation4 + $0xad] sm:$0xff] }
 0xa01   : > { %12887 = vst [vmem:[#allocation112_spill] sm:$0xff] %v11405_v10  ;;  %5073 = vrot.lane.b32.xlu0 %v5008_v63, %s9045_s16  ;;  %v4834_v10 = vadd.f32 %v11084_v43, %v4702_v14  ;;  %v5270_v63 = vld [vmem:[#allocation4 + $0xa9] sm:$0xff]  ;;  %v4836_v14 = vadd.f32 %v11104_v54, %v4704_v35 }
 0xa02   : > { %5071 = vrot.lane.b32.xlu1 %v5007_v25, %s9045_s16  ;;  %v5229_v44 = vadd.f32 %v11108_v26, %v5097_v13  ;;  %v4684_v13 = vld [vmem:[#allocation4 + $0x2a] sm:$0xff] }
 0xa03   : > { %v11411_v62 = vpop.permute.xlu0 %5541  ;;  %v4966_v25 = vadd.f32 %v11090_v23, %v4834_v10  ;;  %v4968_v26 = vadd.f32 %v11110_v15, %v4836_v14  ;;  %v4705_v10 = vadd.f32 %v11383_v60, %v4683_v11  ;;  %v4688_v15 = vld [vmem:[#allocation4 + $0x4a] sm:$0xff]  ;;  %v5496_v14 = vld [vmem:[#allocation4 + $0xb5] sm:$0xff] }
 0xa04   : > { %v11413_v31 = vpop.permute.xlu1 %5321  ;;  %v5361_v54 = vadd.f32 %v11092_v41, %v5229_v44  ;;  %v4706_v44 = vadd.f32 %v11383_v60, %v4684_v13 }
 0xa05   : > { %12889 = vst [vmem:[#allocation114_spill] sm:$0xff] %v11413_v31  ;;  %5425 = vrot.lane.b32.xlu0 %v4876_v47, %s9041_s12  ;;  %v4703_v31 = vadd.f32 %v11383_v60, %v4681_v3  ;;  %v5098_v37 = vadd.f32 %v11102_v30, %v4966_v25  ;;  %v4685_v47 = vld [vmem:[#allocation4 + $0x32] sm:$0xff]  ;;  %v4687_v3 = vld [vmem:[#allocation4 + $0x42] sm:$0xff]  ;;  %v4837_v25 = vadd.f32 %v11116_v21, %v4705_v10 }
 0xa06   : > { %5333 = vrot.lane.b32.xlu1 %v5270_v63, %s9044_s15  ;;  %v4686_v63 = vld [vmem:[#allocation4 + $0x3a] sm:$0xff]  ;;  %v5455_v41 = vadd.f32 %v11134_v50, %v5361_v54  ;;  %v4709_v50 = vadd.f32 %v11383_v60, %v4687_v3  ;;  %v4710_v10 = vadd.f32 %v11383_v60, %v4688_v15 }
 0xa07   : > { %v11422_v42 = vpop.permute.xlu0 %5543  ;;  %v4835_v23 = vadd.f32 %v11080_v56, %v4703_v31  ;;  %v4707_v56 = vadd.f32 %v11383_v60, %v4685_v47  ;;  %v4689_v31 = vld [vmem:[#allocation4 + $0x52] sm:$0xff]  ;;  %v5976_v21 = vld [vmem:[%s12522_s4 + $0x60] sm:$0xff] }
 0xa08   : > { %v11426_v43 = vpop.permute.xlu1 %4931  ;;  %v4711_v13 = vadd.f32 %v11383_v60, %v4689_v31  ;;  %v5271_v31 = vld [vmem:[#allocation4 + $0xb1] sm:$0xff] }
 0xa09   : > { %12890 = vst [vmem:[#allocation116_spill] sm:$0xff] %v11426_v43  ;;  %5557 = vrot.lane.b32.xlu0 %v5495_v38, %s9038_s28  ;;  %v4967_v30 = vadd.f32 %v11086_v6, %v4835_v23  ;;  %v5100_v38 = vadd.f32 %v11122_v46, %v4968_v26  ;;  %v4708_v43 = vadd.f32 %v11383_v60, %v4686_v63  ;;  %v5383_v6 = vld [vmem:[#allocation4 + $0xb4] sm:$0xff]  ;;  %v5977_v46 = vld [vmem:[%s12522_s4 + $0x68] sm:$0xff] }
 0xa0a   : > { %5203 = vrot.lane.b32.xlu1 %v5139_v40, %s9043_s26  ;;  %v5230_v40 = vadd.f32 %v11078_v18, %v5098_v37  ;;  %v4969_v18 = vadd.f32 %v11128_v7, %v4837_v25  ;;  %v8867_v37 = vpack.c.bf16 %v5977_v46, %v5976_v21  ;;  %v4838_v26 = vadd.f32 %v11168_v36, %v4706_v44  ;;  %v5627_v25 = vld [vmem:[#allocation4 + $0xae] sm:$0xff]  ;;  %v5628_v44 = vld [vmem:[#allocation4 + $0xb6] sm:$0xff] }
 0xa0b   : > { %v11435_v35 = vpop.permute.xlu0 %5673  ;;  %v5099_v47 = vadd.f32 %v11114_v55, %v4967_v30  ;;  %v4839_v55 = vadd.f32 %v11146_v19, %v4707_v56  ;;  %v5232_v7 = vadd.f32 %v11098_v27, %v5100_v38  ;;  %v5587_v36 = vadd.f32 %v11138_v57, %v5455_v41  ;;  %v12893_v46 = vld [vmem:[#allocation69_spill] sm:$0xff] }
 0xa0c   : > { %v11441_v11 = vpop.permute.xlu1 %5413  ;;  %v5362_v23 = vadd.f32 %v11120_v48, %v5230_v40  ;;  %v5101_v3 = vadd.f32 %v11180_v24, %v4969_v18  ;;  %8868 = vmatprep.subr.bf16.mxu0 %v8867_v37  ;;  %v4970_v15 = vadd.f32 %v11174_v51, %v4838_v26  ;;  %v4690_v24 = vld [vmem:[#allocation4 + $0x5a] sm:$0xff]  ;;  %v12891_v38 = vmov 0.0|0.0  }
 0xa0d   : > { %5559 = vrot.lane.b32.xlu0 %v5496_v14, %s9038_s28  ;;  %v5231_v54 = vadd.f32 %v11126_v8, %v5099_v47  ;;  %8870 = vmatpush3.bf16.msra.mxu0 %v8867_v37  ;;  %v4971_v27 = vadd.f32 %v11158_v52, %v4839_v55  ;;  %v5364_v57 = vadd.f32 %v11152_v12, %v5232_v7  ;;  %v12894_v47 = vld [vmem:[#allocation70_spill] sm:$0xff]  ;;  %v12895_v37 = vld [vmem:[#allocation61_spill] sm:$0xff]  ;;  %v12900_v7 = vld [vmem:[#allocation67_spill] sm:$0xff] }
 0xa0e   : > { %5427 = vrot.lane.b32.xlu1 %v5383_v6, %s9041_s12  ;;  %v5456_v48 = vadd.f32 %v11132_v1, %v5362_v23  ;;  %v5233_v19 = vadd.f32 %v11192_v17, %v5101_v3  ;;  %8904 = vmatprep.subr.bf16.mxu0 %v12891_v38  ;;  %v4840_v51 = vadd.f32 %v11182_v22, %v4708_v43  ;;  %v4691_v43 = vld [vmem:[#allocation4 + $0x62] sm:$0xff]  ;;  %v12897_v26 = vld [vmem:[#allocation66_spill] sm:$0xff] }
 0xa0f   : > { %v11462_v63 = vpop.permute.xlu0 %5675  ;;  %v5363_v8 = vadd.f32 %v11140_v28, %v5231_v54  ;;  %v5102_v56 = vadd.f32 %v11186_v0, %v4970_v15  ;;  %v5719_v28 = vadd.f32 %v11150_v32, %v5587_v36  ;;  %v4841_v17 = vadd.f32 %v11194_v33, %v4709_v50  ;;  %v12896_v23 = vld [vmem:[#allocation68_spill] sm:$0xff]  ;;  %v12899_v54 = vld [vmem:[#allocation65_spill] sm:$0xff]  ;;  %v12902_v36 = vld [vmem:[#allocation79_spill] sm:$0xff] }
 0xa10   : > { %v11468_v30 = vpop.permute.xlu1 %5415  ;;  %v5588_v1 = vadd.f32 %v11144_v45, %v5456_v48  ;;  %v5103_v40 = vadd.f32 %v11228_v5, %v4971_v27  ;;  %v5458_v12 = vadd.f32 %v11170_v20, %v5364_v57  ;;  %v4972_v22 = vadd.f32 %v11188_v29, %v4840_v51  ;;  %v12901_v3 = vld [vmem:[#allocation88_spill] sm:$0xff]  ;;  %v12904_v27 = vld [vmem:[#allocation71_spill] sm:$0xff] }
 0xa11   : > { %5689 = vrot.lane.b32.xlu0 %v5627_v25, %s9040_s11  ;;  %v5457_v52 = vadd.f32 %v11164_v58, %v5363_v8  ;;  %v4712_v0 = vadd.f32 %v11383_v60, %v4690_v24  ;;  %v4973_v58 = vadd.f32 %v11206_v49, %v4841_v17  ;;  %v5365_v33 = vadd.f32 %v11176_v4, %v5233_v19  ;;  %v4692_v48 = vld [vmem:[#allocation4 + $0x6a] sm:$0xff]  ;;  %v12905_v24 = vld [vmem:[#allocation82_spill] sm:$0xff] }
 0xa12   : > { %5335 = vrot.lane.b32.xlu1 %v5271_v31, %s9044_s15  ;;  %v5720_v45 = vadd.f32 %v11156_v34, %v5588_v1  ;;  %v5235_v5 = vadd.f32 %v11240_v39, %v5103_v40  ;;  %v5234_v34 = vadd.f32 %v11162_v2, %v5102_v56  ;;  %v5590_v20 = vadd.f32 %v11204_v59, %v5458_v12  ;;  %v12903_v31 = vld [vmem:[#allocation63_spill] sm:$0xff]  ;;  %v12906_v51 = vld [vmem:[#allocation80_spill] sm:$0xff]  ;;  %v12908_v17 = vld [vmem:[#allocation78_spill] sm:$0xff] }
 0xa13   : > { %v11483_v14 = vpop.permute.xlu0 %5193  ;;  %v5589_v32 = vadd.f32 %v11198_v16, %v5457_v52  ;;  %v4842_v29 = vadd.f32 %v11230_v61, %v4710_v10  ;;  %v5104_v6 = vadd.f32 %v11234_v9, %v4972_v22  ;;  %v12892_v16 = vld [vmem:[#allocation62_spill] sm:$0xff]  ;;  %v4843_v39 = vadd.f32 %v12893_v46, %v4711_v13  ;;  %v12898_v10 = vld [vmem:[#allocation72_spill] sm:$0xff]  ;;  %v12910_v22 = vld [vmem:[#allocation83_spill] sm:$0xff] }
 0xa14   : > { %v11489_v41 = vpop.permute.xlu1 %5323  ;;  %v5459_v4 = vadd.f32 %v12892_v16, %v5365_v33  ;;  %v5105_v18 = vadd.f32 %v12894_v47, %v4973_v58  ;;  %v5366_v2 = vadd.f32 %v12895_v37, %v5234_v34  ;;  %v5722_v59 = vadd.f32 %v12896_v23, %v5590_v20  ;;  %v12911_v58 = vld [vmem:[#allocation64_spill] sm:$0xff]  ;;  %v12913_v34 = vld [vmem:[#allocation99_spill] sm:$0xff] }
 0xa15   : > { %5691 = vrot.lane.b32.xlu0 %v5628_v44, %s9040_s11  ;;  %v5721_v49 = vadd.f32 %v11210_v53, %v5589_v32  ;;  %v4974_v61 = vadd.f32 %v12897_v26, %v4842_v29  ;;  %v4713_v9 = vadd.f32 %v11383_v60, %v4691_v43  ;;  %v4975_v55 = vadd.f32 %v12899_v54, %v4843_v39  ;;  %v12909_v44 = vld [vmem:[#allocation87_spill] sm:$0xff]  ;;  %v12914_v29 = vld [vmem:[#allocation77_spill] sm:$0xff] }
 0xa16   : > { %5763 = vrot.lane.b32.xlu1 %v5719_v28, %s9047_s22  ;;  %v5591_v53 = vadd.f32 %v12898_v10, %v5459_v4  ;;  %v5367_v13 = vadd.f32 %v12900_v7, %v5235_v5  ;;  %v5237_v25 = vadd.f32 %v12901_v3, %v5105_v18  ;;  %v5460_v15 = vadd.f32 %v12902_v36, %v5366_v2  ;;  %v12907_v28 = vld [vmem:[#allocation81_spill] sm:$0xff]  ;;  %v12916_v4 = vld [vmem:[#allocation115_spill] sm:$0xff]  ;;  %v12918_v18 = vld [vmem:[#allocation74_spill] sm:$0xff] }
 0xa17   : > { %v11505_v21 = vpop.permute.xlu0 %5059  ;;  %v5236_v8 = vadd.f32 %v12903_v31, %v5104_v6  ;;  %v4844_v19 = vadd.f32 %v12904_v27, %v4712_v0  ;;  %v5106_v1 = vadd.f32 %v12905_v24, %v4974_v61  ;;  %v4845_v40 = vadd.f32 %v12908_v17, %v4713_v9  ;;  %v12912_v5 = vld [vmem:[#allocation85_spill] sm:$0xff]  ;;  %v12919_v2 = vld [vmem:[#allocation84_spill] sm:$0xff] }
 0xa18   : > { %v11511_v50 = vpop.permute.xlu1 %4801  ;;  %v5723_v56 = vadd.f32 %v12906_v51, %v5591_v53  ;;  %v5461_v52 = vadd.f32 %v12907_v28, %v5367_v13  ;;  %v5592_v33 = vadd.f32 %v12911_v58, %v5460_v15  ;;  %v4714_v43 = vadd.f32 %v11383_v60, %v4692_v48  ;;  %v12917_v39 = vld [vmem:[#allocation73_spill] sm:$0xff]  ;;  %v12924_v13 = vld [vmem:[#allocation108_spill] sm:$0xff]  ;;  %v12925_v48 = vld [vmem:[#allocation75_spill] sm:$0xff] }
 0xa19   : > { %5765 = vrot.lane.b32.xlu0 %v5720_v45, %s9047_s22  ;;  %v5107_v45 = vadd.f32 %v12909_v44, %v4975_v55  ;;  %v5368_v32 = vadd.f32 %v12910_v22, %v5236_v8  ;;  %v4976_v0 = vadd.f32 %v12912_v5, %v4844_v19  ;;  %v4977_v6 = vadd.f32 %v12914_v29, %v4845_v40  ;;  %v12920_v26 = vld [vmem:[#allocation101_spill] sm:$0xff]  ;;  %v12923_v55 = vld [vmem:[#allocation98_spill] sm:$0xff]  ;;  %v12926_v15 = vld [vmem:[#allocation76_spill] sm:$0xff] }
 0xa1a   : > { %5767 = vrot.lane.b32.xlu1 %v5721_v49, %s9047_s22  ;;  %v5593_v20 = vadd.f32 %v12913_v34, %v5461_v52  ;;  %v12915_v49 = vld [vmem:[#allocation95_spill] sm:$0xff]  ;;  %v5724_v47 = vadd.f32 %v12917_v39, %v5592_v33  ;;  %v5238_v23 = vadd.f32 %v12919_v2, %v5106_v1  ;;  %v12922_v53 = vld [vmem:[#allocation89_spill] sm:$0xff]  ;;  %v4846_v7 = vadd.f32 %v12923_v55, %v4714_v43  ;;  %v12927_v8 = vld [vmem:[#allocation94_spill] sm:$0xff] }
 0xa1b   : > { %v11527_v57 = vpop.permute.xlu0 %5061  ;;  %v5369_v16 = vadd.f32 %v12915_v49, %v5237_v25  ;;  %v5239_v46 = vadd.f32 %v12916_v4, %v5107_v45  ;;  %v5462_v37 = vadd.f32 %v12918_v18, %v5368_v32  ;;  %v5108_v61 = vadd.f32 %v12920_v26, %v4976_v0  ;;  %v12928_v19 = vld [vmem:[#allocation92_spill] sm:$0xff]  ;;  %v12929_v1 = vld [vmem:[#allocation86_spill] sm:$0xff]  ;;  %v12933_v45 = vld [vmem:[#allocation111_spill] sm:$0xff] }
 0xa1c   : > { %v11533_v12 = vpop.permute.xlu1 %4933  ;;  %v5109_v3 = vadd.f32 %v12924_v13, %v4977_v6  ;;  %v5370_v36 = vadd.f32 %v12925_v48, %v5238_v23  ;;  %v4978_v27 = vadd.f32 %v12927_v8, %v4846_v7  ;;  %v12931_v52 = vld [vmem:[#allocation90_spill] sm:$0xff]  ;;  %v12932_v40 = vld [vmem:[#allocation96_spill] sm:$0xff]  ;;  %v12934_v58 = vld [vmem:[#allocation113_spill] sm:$0xff] }
 0xa1d   : > { %5769 = vrot.lane.b32.xlu0 %v5722_v59, %s9047_s22  ;;  %v12921_v59 = vld [vmem:[#allocation97_spill] sm:$0xff]  ;;  %v5463_v54 = vadd.f32 %v12922_v53, %v5369_v16  ;;  %v5594_v31 = vadd.f32 %v12926_v15, %v5462_v37  ;;  %v5371_v51 = vadd.f32 %v12929_v1, %v5239_v46  ;;  %v5240_v22 = vadd.f32 %v12933_v45, %v5108_v61  ;;  %v12935_v5 = vld [vmem:[#allocation102_spill] sm:$0xff]  ;;  %v12939_v46 = vld [vmem:[#allocation107_spill] sm:$0xff] }
 0xa1e   : > { %5771 = vrot.lane.b32.xlu1 %v5723_v56, %s9047_s22  ;;  %v5725_v10 = vadd.f32 %v12921_v59, %v5593_v20  ;;  %v12930_v56 = vld [vmem:[#allocation104_spill] sm:$0xff]  ;;  %v5464_v44 = vadd.f32 %v12932_v40, %v5370_v36  ;;  %v12936_v43 = vld [vmem:[#allocation118_spill] sm:$0xff]  ;;  %v12937_v29 = vld [vmem:[#allocation93_spill] sm:$0xff] }
 0xa1f   : > { %v11549_v9 = vpop.permute.xlu0 %5191  ;;  %v5595_v24 = vadd.f32 %v12928_v19, %v5463_v54  ;;  %v5241_v28 = vadd.f32 %v12930_v56, %v5109_v3  ;;  %v5726_v17 = vadd.f32 %v12931_v52, %v5594_v31  ;;  %v5465_v0 = vadd.f32 %v12935_v5, %v5371_v51  ;;  %v12938_v49 = vld [vmem:[#allocation105_spill] sm:$0xff]  ;;  %v12942_v26 = vld [vmem:[#allocation110_spill] sm:$0xff]  ;;  %v12944_v56 = vld [vmem:[#allocation91_spill] sm:$0xff] }
 0xa20   : > { %v11555_v25 = vpop.permute.xlu1 %4803  ;;  %v5110_v34 = vadd.f32 %v12936_v43, %v4978_v27  ;;  %v5372_v6 = vadd.f32 %v12937_v29, %v5240_v22  ;;  %v5596_v16 = vadd.f32 %v12938_v49, %v5464_v44  ;;  %v12941_v37 = vld [vmem:[#allocation117_spill] sm:$0xff]  ;;  %v4694_v1 = vld [vmem:[#allocation4 + $0x7a] sm:$0xff]  ;;  %v12947_v5 = vld [vmem:[#allocation100_spill] sm:$0xff] }
 0xa21   : > { %5773 = vrot.lane.b32.xlu0 %v5724_v47, %s9047_s22  ;;  %v5727_v33 = vadd.f32 %v12934_v58, %v5595_v24  ;;  %v5597_v4 = vadd.f32 %v11411_v62, %v5465_v0  ;;  %v5373_v39 = vadd.f32 %v12939_v46, %v5241_v28  ;;  %v12940_v47 = vld [vmem:[#allocation103_spill] sm:$0xff]  ;;  %v12943_v62 = vld [vmem:[#allocation114_spill] sm:$0xff]  ;;  %v4716_v44 = vadd.f32 %v11383_v60, %v4694_v1  ;;  %v12946_v22 = vld [vmem:[#allocation109_spill] sm:$0xff] }
 0xa22   : > { %5775 = vrot.lane.b32.xlu1 %v5725_v10, %s9047_s22  ;;  %v5728_v18 = vadd.f32 %v12940_v47, %v5596_v16  ;;  %v5466_v2 = vadd.f32 %v12941_v37, %v5372_v6  ;;  %v5242_v61 = vadd.f32 %v12942_v26, %v5110_v34  ;;  %v4693_v19 = vld [vmem:[#allocation4 + $0x72] sm:$0xff]  ;;  %v4695_v29 = vld [vmem:[#allocation4 + $0x82] sm:$0xff] }
 0xa23   : > { %v5546_v32 = vpop.permute.xlu0 %5545  ;;  %v5729_v59 = vadd.f32 %v11435_v35, %v5597_v4  ;;  %v5467_v10 = vadd.f32 %v11441_v11, %v5373_v39  ;;  %v4717_v4 = vadd.f32 %v11383_v60, %v4695_v29 }
 0xa24   : > { %v5326_v20 = vpop.permute.xlu1 %5325  ;;  %v5598_v54 = vadd.f32 %v11422_v42, %v5466_v2  ;;  %v5374_v55 = vadd.f32 %v12943_v62, %v5242_v61 }
 0xa25   : > { %5777 = vrot.lane.b32.xlu0 %v5726_v17, %s9047_s22  ;;  %v5599_v7 = vadd.f32 %v5546_v32, %v5467_v10  ;;  %v12945_v17 = vld [vmem:[#allocation106_spill] sm:$0xff]  ;;  %v4848_v32 = vadd.f32 %v12946_v22, %v4716_v44 }
 0xa26   : > { %5779 = vrot.lane.b32.xlu1 %v5727_v33, %s9047_s22  ;;  %v5730_v13 = vadd.f32 %v11462_v63, %v5598_v54  ;;  %v5468_v48 = vadd.f32 %v11468_v30, %v5374_v55  ;;  %v4715_v30 = vadd.f32 %v11383_v60, %v4693_v19 }
 0xa27   : > { %v5548_v23 = vpop.permute.xlu0 %5547  ;;  %v4980_v0 = vadd.f32 %v12947_v5, %v4848_v32 }
 0xa28   : > { %v11582_v53 = vpop.permute.xlu1 %4935  ;;  %v5600_v11 = vadd.f32 %v5548_v23, %v5468_v48  ;;  %v4847_v28 = vadd.f32 %v12944_v56, %v4715_v30 }
 0xa29   : > { %5781 = vrot.lane.b32.xlu0 %v5728_v18, %s9047_s22  ;;  %v5112_v6 = vadd.f32 %v11527_v57, %v4980_v0  ;;  %v12948_v18 = vld [vmem:[#allocation112_spill] sm:$0xff] }
 0xa2a   : > { %5783 = vrot.lane.b32.xlu1 %v5729_v59, %s9047_s22  ;;  %v4979_v40 = vadd.f32 %v12945_v17, %v4847_v28  ;;  %v4849_v37 = vadd.f32 %v12948_v18, %v4717_v4 }
 0xa2b   : > { %v5678_v3 = vpop.permute.xlu0 %5677  ;;  %v5244_v39 = vadd.f32 %v11483_v14, %v5112_v6  ;;  %v4697_v6 = vld [vmem:[#allocation4 + $0x92] sm:$0xff] }
 0xa2c   : > { %v5731_v36 = vadd.f32 %v5678_v3, %v5599_v7  ;;  %v5418_v35 = vpop.permute.xlu1 %5417  ;;  %v5111_v58 = vadd.f32 %v11505_v21, %v4979_v40 }
 0xa2d   : > { %5785 = vrot.lane.b32.xlu0 %v5730_v13, %s9047_s22  ;;  %v5376_v2 = vadd.f32 %v5326_v20, %v5244_v39 }
 0xa2e   : > { %5787 = vrot.lane.b32.xlu1 %v5731_v36, %s9047_s22  ;;  %v5243_v43 = vadd.f32 %v11549_v9, %v5111_v58  ;;  %v12949_v9 = vld [vmem:[#allocation116_spill] sm:$0xff] }
 0xa2f   : > { %v5680_v42 = vpop.permute.xlu0 %5679  ;;  %v4981_v26 = vadd.f32 %v12949_v9, %v4849_v37  ;;  %v4696_v36 = vld [vmem:[#allocation4 + $0x8a] sm:$0xff] }
 0xa30   : > { %v5732_v15 = vadd.f32 %v5680_v42, %v5600_v11  ;;  %v5420_v31 = vpop.permute.xlu1 %5419  ;;  %v5375_v16 = vadd.f32 %v11489_v41, %v5243_v43 }
 0xa31   : > { %v5470_v59 = vadd.f32 %v5420_v31, %v5376_v2  ;;  %v4718_v31 = vadd.f32 %v11383_v60, %v4696_v36 }
 0xa32   : > { %5789 = vrot.lane.b32.xlu0 %v5732_v15, %s9047_s22  ;;  %v5469_v47 = vadd.f32 %v5418_v35, %v5375_v16 }
 0xa33   : > { %v11593_v8 = vpop.permute.xlu0 %5197 }
 0xa34   : > { %v5328_v27 = vpop.permute.xlu1 %5327 }
 0xa37   : > { %v5064_v63 = vpop.permute.xlu0 %5063 }
 0xa38   : > { %v11595_v24 = vpop.permute.xlu1 %4805  ;;  %v5113_v54 = vadd.f32 %v5064_v63, %v4981_v26  ;;  %v4850_v63 = vadd.f32 %v11511_v50, %v4718_v31  ;;  %v4699_v26 = vld [vmem:[#allocation4 + $0xa2] sm:$0xff]  ;;  %v12950_v31 = vld [vmem:[#allocation33_spill] sm:$0xff] }
 0xa3a   : > { %v4982_v1 = vadd.f32 %v11533_v12, %v4850_v63 }
 0xa3b   : > { %v5066_v51 = vpop.permute.xlu0 %5065 }
 0xa3c   : > { %v11599_v52 = vpop.permute.xlu1 %4937 }
 0xa3f   : > { %v5196_v45 = vpop.permute.xlu0 %5195 }
 0xa40   : > { %v11605_v33 = vpop.permute.xlu1 %4807  ;;  %v5245_v62 = vadd.f32 %v5196_v45, %v5113_v54  ;;  %v4721_v54 = vadd.f32 %v11383_v60, %v4699_v26 }
 0xa42   : > { %v5377_v13 = vadd.f32 %v5328_v27, %v5245_v62  ;;  %v5114_v27 = vadd.f32 %v5066_v51, %v4982_v1 }
 0xa43   : > { %v5550_v34 = vpop.permute.xlu0 %5549 }
 0xa44   : > { %v5330_v49 = vpop.permute.xlu1 %5329  ;;  %v5601_v23 = vadd.f32 %v5550_v34, %v5469_v47  ;;  %v5246_v40 = vadd.f32 %v11593_v8, %v5114_v27  ;;  %v4700_v34 = vld [vmem:[#allocation4 + $0xaa] sm:$0xff]  ;;  %v4698_v8 = vld [vmem:[#allocation4 + $0x9a] sm:$0xff] }
 0xa45   : > { %v4722_v51 = vadd.f32 %v11383_v60, %v4700_v34  ;;  %v11660_v34 = vld [vmem:[%s12523_s5 + $0x10] ss:$0 sm:$0xff] }
 0xa46   : > { %v5378_v45 = vadd.f32 %v5330_v49, %v5246_v40  ;;  %v4719_v49 = vadd.f32 %v11383_v60, %v4697_v6 }
 0xa47   : > { %v5552_v46 = vpop.permute.xlu0 %5551 }
 0xa48   : > { %v11613_v21 = vpop.permute.xlu1 %4939  ;;  %v5602_v41 = vadd.f32 %v5552_v46, %v5470_v59  ;;  %v4720_v46 = vadd.f32 %v11383_v60, %v4698_v8  ;;  %v4851_v18 = vadd.f32 %v11555_v25, %v4719_v49  ;;  %v4853_v25 = vadd.f32 %v11605_v33, %v4721_v54  ;;  %v12954_v54 = vld [vmem:[#allocation5_spill] sm:$0xff] }
 0xa4a   : > { %v4852_v37 = vadd.f32 %v11595_v24, %v4720_v46 }
 0xa4b   : > { %v5682_v61 = vpop.permute.xlu0 %5681 }
 0xa4c   : > { %v5733_v57 = vadd.f32 %v5682_v61, %v5601_v23  ;;  %v5422_v10 = vpop.permute.xlu1 %5421  ;;  %v4983_v23 = vadd.f32 %v11582_v53, %v4851_v18  ;;  %v4984_v9 = vadd.f32 %v11599_v52, %v4852_v37  ;;  %v12953_v18 = vld [vmem:[#allocation8_spill] sm:$0xff] }
 0xa4d   : > { %v5471_v48 = vadd.f32 %v5422_v10, %v5377_v13  ;;  %v4985_v13 = vadd.f32 %v11613_v21, %v4853_v25 }
 0xa4e   : > { %5791 = vrot.lane.b32.xlu1 %v5733_v57, %s9047_s22 }
 0xa4f   : > { %v5684_v55 = vpop.permute.xlu0 %5683 }
 0xa50   : > { %v5734_v14 = vadd.f32 %v5684_v55, %v5602_v41  ;;  %v5424_v7 = vpop.permute.xlu1 %5423 }
 0xa51   : > { %v5472_v32 = vadd.f32 %v5424_v7, %v5378_v45 }
 0xa52   : > { %5793 = vrot.lane.b32.xlu0 %v5734_v14, %s9047_s22 }
 0xa53   : > { %v5202_v3 = vpop.permute.xlu0 %5201 }
 0xa54   : > { %v5554_v20 = vpop.permute.xlu1 %5553 }
 0xa55   : > { %v5603_v35 = vadd.f32 %v5554_v20, %v5471_v48 }
 0xa57   : > { %v5068_v11 = vpop.permute.xlu0 %5067 }
 0xa58   : > { %v5686_v42 = vpop.permute.xlu1 %5685  ;;  %v5115_v57 = vadd.f32 %v5068_v11, %v4983_v23 }
 0xa59   : > { %v5735_v15 = vadd.f32 %v5686_v42, %v5603_v35 }
 0xa5b   : > { %5795 = vrot.lane.b32.xlu1 %v5735_v15, %s9047_s22  ;;  %v5070_v19 = vpop.permute.xlu0 %5069 }
 0xa5c   : > { %v5338_v30 = vpop.permute.xlu1 %5337  ;;  %v5116_v10 = vadd.f32 %v5070_v19, %v4984_v9 }
 0xa5e   : > { %v5248_v24 = vadd.f32 %v5202_v3, %v5116_v10 }
 0xa5f   : > { %v5200_v56 = vpop.permute.xlu0 %5199 }
 0xa60   : > { %v5430_v28 = vpop.permute.xlu1 %5429  ;;  %v5247_v62 = vadd.f32 %v5200_v56, %v5115_v57 }
 0xa63   : > { %v5332_v17 = vpop.permute.xlu0 %5331 }
 0xa64   : > { %v11624_v44 = vpop.permute.xlu1 %5561  ;;  %v5379_v7 = vadd.f32 %v5332_v17, %v5247_v62  ;;  %v12951_v17 = vld [vmem:[#allocation32_spill] sm:$0xff] }
 0xa67   : > { %v5556_v22 = vpop.permute.xlu0 %5555 }
 0xa68   : > { %v11626_v58 = vpop.permute.xlu1 %5693  ;;  %v5604_v5 = vadd.f32 %v5556_v22, %v5472_v32 }
 0xa6b   : > { %v5688_v0 = vpop.permute.xlu0 %5687 }
 0xa6c   : > { %v5736_v43 = vadd.f32 %v5688_v0, %v5604_v5  ;;  %v4810_v50 = vpop.permute.xlu1 %4809  ;;  %v12952_v0 = vld [vmem:[#allocation34_spill] sm:$0xff] }
 0xa6d   : > { %v4854_v16 = vadd.f32 %v4810_v50, %v4722_v51 }
 0xa6e   : > { %5797 = vrot.lane.b32.xlu0 %v5736_v43, %s9047_s22 }
 0xa6f   : > { %v5206_v12 = vpop.permute.xlu0 %5205 }
 0xa70   : > { %v4942_v29 = vpop.permute.xlu1 %4941 }
 0xa71   : > { %v4986_v39 = vadd.f32 %v4942_v29, %v4854_v16 }
 0xa73   : > { %v5074_v4 = vpop.permute.xlu0 %5073 }
 0xa74   : > { %v5072_v47 = vpop.permute.xlu1 %5071  ;;  %v5118_v61 = vadd.f32 %v5074_v4, %v4986_v39 }
 0xa75   : > { %v5117_v35 = vadd.f32 %v5072_v47, %v4985_v13 }
 0xa76   : > { %v5250_v55 = vadd.f32 %v5206_v12, %v5118_v61 }
 0xa77   : > { %v5426_v2 = vpop.permute.xlu0 %5425 }
 0xa78   : > { %v5334_v59 = vpop.permute.xlu1 %5333  ;;  %v5382_v20 = vadd.f32 %v5338_v30, %v5250_v55  ;;  %v5473_v52 = vadd.f32 %v5426_v2, %v5379_v7 }
 0xa79   : > { %v5380_v48 = vadd.f32 %v5334_v59, %v5248_v24 }
 0xa7a   : > { %v5476_v19 = vadd.f32 %v12950_v31, %v5382_v20 }
 0xa7b   : > { %v5558_v41 = vpop.permute.xlu0 %5557 }
 0xa7c   : > { %v5204_v14 = vpop.permute.xlu1 %5203  ;;  %v5605_v11 = vadd.f32 %v5558_v41, %v5473_v52  ;;  %v5608_v40 = vadd.f32 %v12951_v17, %v5476_v19 }
 0xa7d   : > { %v5249_v15 = vadd.f32 %v5204_v14, %v5117_v35  ;;  %v12955_v14 = vld [vmem:[#allocation6_spill] sm:$0xff] }
 0xa7e   : > { %v5740_v43 = vadd.f32 %v12952_v0, %v5608_v40  ;;  %v12956_v35 = vld [vmem:[#allocation10_spill] sm:$0xff] }
 0xa7f   : > { %v5560_v53 = vpop.permute.xlu0 %5559 }
 0xa80   : > { %v5428_v36 = vpop.permute.xlu1 %5427 }
 0xa81   : > { %v5474_v42 = vadd.f32 %v5428_v36, %v5380_v48 }
 0xa83   : > { %v5690_v60 = vpop.permute.xlu0 %5689  ;;  %v5606_v33 = vadd.f32 %v5560_v53, %v5474_v42 }
 0xa84   : > { %v5737_v63 = vadd.f32 %v5690_v60, %v5605_v11  ;;  %v5336_v1 = vpop.permute.xlu1 %5335  ;;  %v12957_v60 = vld [vmem:[#allocation7_spill] sm:$0xff] }
 0xa85   : > { %v5381_v56 = vadd.f32 %v5336_v1, %v5249_v15 }
 0xa86   : > { %5799 = vrot.lane.b32.xlu1 %v5737_v63, %s9047_s22 }
 0xa87   : > { %v5475_v21 = vadd.f32 %v5430_v28, %v5381_v56  ;;  %v5692_v3 = vpop.permute.xlu0 %5691  ;;  %v11654_v28 = vld [vmem:[%s12523_s5 + $0xf] ss:$0 sm:$0xff] }
 0xa88   : > { %v5738_v30 = vadd.f32 %v5692_v3, %v5606_v33  ;;  %v5764_v27 = vpop.permute.xlu1 %5763 }
 0xa89   : > { %v5607_v45 = vadd.f32 %v11624_v44, %v5475_v21  ;;  %5830 = vst.msk [vmem:[#allocation3] sm:$0xff] %vm5829_vm12, %v5764_v27  ;;  %v12958_v27 = vld [vmem:[#allocation12_spill] sm:$0xff] }
 0xa8a   : > { %5801 = vrot.lane.b32.xlu0 %v5738_v30, %s9047_s22 }
 0xa8b   : > { %v5766_v22 = vpop.permute.xlu0 %5765  ;;  %v5739_v32 = vadd.f32 %v11626_v58, %v5607_v45  ;;  %v12959_v45 = vld [vmem:[#allocation9_spill] sm:$0xff] }
 0xa8c   : > { %5831 = vst.msk [vmem:[#allocation3 + $0x8] sm:$0xff] %vm5829_vm12, %v5766_v22  ;;  %v5768_v5 = vpop.permute.xlu1 %5767 }
 0xa8d   : > { %5832 = vst.msk [vmem:[#allocation3 + $0x10] sm:$0xff] %vm5829_vm12, %v5768_v5  ;;  %5803 = vrot.lane.b32.xlu1 %v5739_v32, %s9047_s22 }
 0xa8e   : > { %5805 = vrot.lane.b32.xlu0 %v5740_v43, %s9047_s22 }
 0xa8f   : > { %v5770_v44 = vpop.permute.xlu0 %5769 }
 0xa90   : > { %5833 = vst.msk [vmem:[#allocation3 + $0x18] sm:$0xff] %vm5829_vm12, %v5770_v44  ;;  %v5772_v58 = vpop.permute.xlu1 %5771  ;;  %v5852_v50 = vld [vmem:[#allocation3] sm:$0xff] }
 0xa91   : > { %5834 = vst.msk [vmem:[#allocation3 + $0x20] sm:$0xff] %vm5829_vm12, %v5772_v58  ;;  %v5879_v12 = vmul.f32 %v11654_v28, %v5852_v50 }
 0xa93   : > { %v5774_v51 = vpop.permute.xlu0 %5773  ;;  %v5906_v29 = vadd.f32 %v11660_v34, %v5879_v12  ;;  %v5853_v6 = vld [vmem:[#allocation3 + $0x8] sm:$0xff] }
 0xa94   : > { %5835 = vst.msk [vmem:[#allocation3 + $0x28] sm:$0xff] %vm5829_vm12, %v5774_v51  ;;  %v5776_v8 = vpop.permute.xlu1 %5775  ;;  %v5880_v16 = vmul.f32 %v11654_v28, %v5853_v6  ;;  %v5854_v4 = vld [vmem:[#allocation3 + $0x10] sm:$0xff]  ;;  %v12960_v51 = vld [vmem:[#allocation14_spill] sm:$0xff] }
 0xa95   : > { %5836 = vst.msk [vmem:[#allocation3 + $0x30] sm:$0xff] %vm5829_vm12, %v5776_v8  ;;  %v5928_v49 = vmax.f32 %v5906_v29, 0.0  ;;  %v5881_v46 = vmul.f32 %v11654_v28, %v5854_v4  ;;  %v12961_v8 = vld [vmem:[#allocation11_spill] sm:$0xff] }
 0xa96   : > { %v5907_v39 = vadd.f32 %v11660_v34, %v5880_v16 }
 0xa97   : > { %v5778_v47 = vpop.permute.xlu0 %5777  ;;  %v5950_v37 = vmul.f32 %v5928_v49, %v12953_v18  ;;  %v5908_v2 = vadd.f32 %v11660_v34, %v5881_v46  ;;  %v5855_v23 = vld [vmem:[#allocation3 + $0x18] sm:$0xff] }
 0xa98   : > { %5837 = vst.msk [vmem:[#allocation3 + $0x38] sm:$0xff] %vm5829_vm12, %v5778_v47  ;;  %v5780_v9 = vpop.permute.xlu1 %5779  ;;  %v5929_v26 = vmax.f32 %v5907_v39, 0.0  ;;  %v5882_v61 = vmul.f32 %v11654_v28, %v5855_v23  ;;  %v5856_v59 = vld [vmem:[#allocation3 + $0x20] sm:$0xff] }
 0xa99   : > { %5838 = vst.msk [vmem:[#allocation3 + $0x40] sm:$0xff] %vm5829_vm12, %v5780_v9  ;;  %8698 = vmatprep.mubr.msk.f32.mxu0 %vm1231_vm3, %v5950_v37  ;;  %v5930_v57 = vmax.f32 %v5908_v2, 0.0  ;;  %v5883_v10 = vmul.f32 %v11654_v28, %v5856_v59  ;;  %v12962_v2 = vld [vmem:[#allocation16_spill] sm:$0xff] }
 0xa9a   : > { %v5951_v41 = vmul.f32 %v5929_v26, %v12954_v54  ;;  %v5909_v62 = vadd.f32 %v11660_v34, %v5882_v61  ;;  %v12963_v26 = vld [vmem:[#allocation13_spill] sm:$0xff] }
 0xa9b   : > { %v5782_v55 = vpop.permute.xlu0 %5781  ;;  %v5952_v25 = vmul.f32 %v5930_v57, %v12955_v14  ;;  %v5910_v7 = vadd.f32 %v11660_v34, %v5883_v10  ;;  %v5857_v24 = vld [vmem:[#allocation3 + $0x28] sm:$0xff]  ;;  %v12965_v14 = vld [vmem:[#allocation15_spill] sm:$0xff] }
 0xa9c   : > { %5839 = vst.msk [vmem:[#allocation3 + $0x48] sm:$0xff] %vm5829_vm12, %v5782_v55  ;;  %v5784_v13 = vpop.permute.xlu1 %5783  ;;  %8699 = vmatmul.mubr.msk.f32.vlgmr.msra.gmra.mrb[88].mxu0 %vm1231_vm3, %v5951_v41  ;;  %v5931_v53 = vmax.f32 %v5909_v62, 0.0  ;;  %v5884_v20 = vmul.f32 %v11654_v28, %v5857_v24  ;;  %v5858_v52 = vld [vmem:[#allocation3 + $0x30] sm:$0xff]  ;;  %v12964_v62 = vld [vmem:[#allocation18_spill] sm:$0xff] }
 0xa9d   : > { %5840 = vst.msk [vmem:[#allocation3 + $0x50] sm:$0xff] %vm5829_vm12, %v5784_v13  ;;  %8701 = vmatprep.mubr.msk.f32.mxu0 %vm1231_vm3, %v5952_v25  ;;  %v5932_v48 = vmax.f32 %v5910_v7, 0.0  ;;  %v5885_v36 = vmul.f32 %v11654_v28, %v5858_v52  ;;  %v12966_v13 = vld [vmem:[#allocation20_spill] sm:$0xff] }
 0xa9e   : > { %v5953_v11 = vmul.f32 %v5931_v53, %v12956_v35  ;;  %v5911_v42 = vadd.f32 %v11660_v34, %v5884_v20 }
 0xa9f   : > { %v5786_v15 = vpop.permute.xlu0 %5785  ;;  %v5954_v31 = vmul.f32 %v5932_v48, %v12957_v60  ;;  %v5912_v19 = vadd.f32 %v11660_v34, %v5885_v36  ;;  %v5859_v63 = vld [vmem:[#allocation3 + $0x38] sm:$0xff] }
 0xaa0   : > { %5841 = vst.msk [vmem:[#allocation3 + $0x58] sm:$0xff] %vm5829_vm12, %v5786_v15  ;;  %v5788_v1 = vpop.permute.xlu1 %5787  ;;  %8702 = vmatmul.mubr.msk.f32.gmra.mrb[90].mxu0 %vm1231_vm3, %v5953_v11  ;;  %v5933_v56 = vmax.f32 %v5911_v42, 0.0  ;;  %v5886_v33 = vmul.f32 %v11654_v28, %v5859_v63  ;;  %v5860_v21 = vld [vmem:[#allocation3 + $0x40] sm:$0xff] }
 0xaa1   : > { %5842 = vst.msk [vmem:[#allocation3 + $0x60] sm:$0xff] %vm5829_vm12, %v5788_v1  ;;  %8704 = vmatprep.mubr.msk.f32.mxu0 %vm1231_vm3, %v5954_v31  ;;  %v5934_v3 = vmax.f32 %v5912_v19, 0.0  ;;  %v5887_v30 = vmul.f32 %v11654_v28, %v5860_v21  ;;  %v12967_v31 = vld [vmem:[#allocation17_spill] sm:$0xff] }
 0xaa2   : > { %v5955_v17 = vmul.f32 %v5933_v56, %v12958_v27  ;;  %v5913_v40 = vadd.f32 %v11660_v34, %v5886_v33  ;;  %v12968_v56 = vld [vmem:[#allocation22_spill] sm:$0xff] }
 0xaa3   : > { %v5956_v22 = vmul.f32 %v5934_v3, %v12959_v45  ;;  %v5914_v32 = vadd.f32 %v11660_v34, %v5887_v30  ;;  %v5861_v5 = vld [vmem:[#allocation3 + $0x48] sm:$0xff] }
 0xaa4   : > { %8705 = vmatmul.mubr.msk.f32.gmra.mrb[92].mxu0 %vm1231_vm3, %v5955_v17  ;;  %v5790_v0 = vpop.permute.xlu0 %5789  ;;  %v5935_v43 = vmax.f32 %v5913_v40, 0.0  ;;  %v5888_v44 = vmul.f32 %v11654_v28, %v5861_v5  ;;  %v5862_v58 = vld [vmem:[#allocation3 + $0x50] sm:$0xff] }
 0xaa5   : > { %5843 = vst.msk [vmem:[#allocation3 + $0x68] sm:$0xff] %vm5829_vm12, %v5790_v0  ;;  %8707 = vmatprep.mubr.msk.f32.mxu0 %vm1231_vm3, %v5956_v22  ;;  %v5936_v50 = vmax.f32 %v5914_v32, 0.0  ;;  %v5889_v12 = vmul.f32 %v11654_v28, %v5862_v58  ;;  %v12969_v17 = vld [vmem:[#allocation19_spill] sm:$0xff] }
 0xaa6   : > { %v5957_v29 = vmul.f32 %v5935_v43, %v12960_v51  ;;  %v5915_v6 = vadd.f32 %v11660_v34, %v5888_v44  ;;  %v12970_v43 = vld [vmem:[#allocation24_spill] sm:$0xff] }
 0xaa7   : > { %v5958_v16 = vmul.f32 %v5936_v50, %v12961_v8  ;;  %v5916_v4 = vadd.f32 %v11660_v34, %v5889_v12  ;;  %v5863_v49 = vld [vmem:[#allocation3 + $0x58] sm:$0xff] }
 0xaa8   : > { %8708 = vmatmul.mubr.msk.f32.gmra.mrb[94].mxu0 %vm1231_vm3, %v5957_v29  ;;  %v5937_v46 = vmax.f32 %v5915_v6, 0.0  ;;  %v5890_v39 = vmul.f32 %v11654_v28, %v5863_v49  ;;  %v5864_v47 = vld [vmem:[#allocation3 + $0x60] sm:$0xff] }
 0xaa9   : > { %8710 = vmatprep.mubr.msk.f32.mxu0 %vm1231_vm3, %v5958_v16  ;;  %v5938_v18 = vmax.f32 %v5916_v4, 0.0  ;;  %v5891_v37 = vmul.f32 %v11654_v28, %v5864_v47 }
 0xaaa   : > { %v5959_v23 = vmul.f32 %v5937_v46, %v12962_v2  ;;  %v5917_v9 = vadd.f32 %v11660_v34, %v5890_v39  ;;  %v12971_v46 = vld [vmem:[#allocation21_spill] sm:$0xff] }
 0xaab   : > { %v5960_v61 = vmul.f32 %v5938_v18, %v12963_v26  ;;  %v5918_v59 = vadd.f32 %v11660_v34, %v5891_v37 }
 0xaac   : > { %8711 = vmatmul.mubr.msk.f32.gmra.mrb[96].mxu0 %vm1231_vm3, %v5959_v23  ;;  %v5939_v57 = vmax.f32 %v5917_v9, 0.0  ;;  %v5865_v10 = vld [vmem:[#allocation3 + $0x68] sm:$0xff] }
 0xaad   : > { %8713 = vmatprep.mubr.msk.f32.mxu0 %vm1231_vm3, %v5960_v61  ;;  %v5940_v54 = vmax.f32 %v5918_v59, 0.0  ;;  %v5892_v41 = vmul.f32 %v11654_v28, %v5865_v10  ;;  %v12972_v61 = vld [vmem:[#allocation25_spill] sm:$0xff] }
 0xaae   : > { %v5961_v55 = vmul.f32 %v5939_v57, %v12964_v62 }
 0xaaf   : > { %v5962_v25 = vmul.f32 %v5940_v54, %v12965_v14  ;;  %v5919_v7 = vadd.f32 %v11660_v34, %v5892_v41  ;;  %v12973_v41 = vld [vmem:[#allocation23_spill] sm:$0xff] }
 0xab0   : > { %8714 = vmatmul.mubr.msk.f32.gmra.mrb[98].mxu0 %vm1231_vm3, %v5961_v55  ;;  %v12974_v55 = vld [vmem:[#allocation26_spill] sm:$0xff] }
 0xab1   : > { %8716 = vmatprep.mubr.msk.f32.mxu0 %vm1231_vm3, %v5962_v25  ;;  %v5941_v24 = vmax.f32 %v5919_v7, 0.0 }
 0xab3   : > { %v5963_v53 = vmul.f32 %v5941_v24, %v12966_v13 }
 0xab5   : > { %8717 = vmatmul.mubr.msk.f32.gmra.mrb[100].mxu0 %vm1231_vm3, %v5963_v53 }
 0xac0   : > { %v5792_v20 = vpop.permute.xlu1 %5791 }
 0xac1   : > { %5844 = vst.msk [vmem:[#allocation3 + $0x70] sm:$0xff] %vm5829_vm12, %v5792_v20 }
 0xac4   : > { %v5794_v52 = vpop.permute.xlu0 %5793 }
 0xac5   : > { %5845 = vst.msk [vmem:[#allocation3 + $0x78] sm:$0xff] %vm5829_vm12, %v5794_v52 }
 0xac8   : > { %v5866_v48 = vld [vmem:[#allocation3 + $0x70] sm:$0xff] }
 0xac9   : > { %v5893_v36 = vmul.f32 %v11654_v28, %v5866_v48 }
 0xacb   : > { %v5920_v35 = vadd.f32 %v11660_v34, %v5893_v36 }
 0xacc   : > { %v5867_v11 = vld [vmem:[#allocation3 + $0x78] sm:$0xff] }
 0xacd   : > { %v5796_v42 = vpop.permute.xlu1 %5795  ;;  %v5942_v15 = vmax.f32 %v5920_v35, 0.0  ;;  %v5894_v60 = vmul.f32 %v11654_v28, %v5867_v11 }
 0xace   : > { %5846 = vst.msk [vmem:[#allocation3 + $0x80] sm:$0xff] %vm5829_vm12, %v5796_v42 }
 0xacf   : > { %v5964_v19 = vmul.f32 %v5942_v15, %v12967_v31  ;;  %v5921_v63 = vadd.f32 %v11660_v34, %v5894_v60 }
 0xad1   : > { %8719 = vmatprep.mubr.msk.f32.mxu0 %vm1231_vm3, %v5964_v19  ;;  %v5943_v1 = vmax.f32 %v5921_v63, 0.0 }
 0xad3   : > { %v5965_v33 = vmul.f32 %v5943_v1, %v12968_v56 }
 0xad5   : > { %8720 = vmatmul.mubr.msk.f32.gmra.mrb[102].mxu0 %vm1231_vm3, %v5965_v33  ;;  %v5868_v21 = vld [vmem:[#allocation3 + $0x80] sm:$0xff] }
 0xad6   : > { %v5895_v3 = vmul.f32 %v11654_v28, %v5868_v21 }
 0xad8   : > { %v5922_v30 = vadd.f32 %v11660_v34, %v5895_v3 }
 0xada   : > { %v5944_v27 = vmax.f32 %v5922_v30, 0.0 }
 0xadc   : > { %v5966_v40 = vmul.f32 %v5944_v27, %v12969_v17 }
 0xade   : > { %8722 = vmatprep.mubr.msk.f32.mxu0 %vm1231_vm3, %v5966_v40 }
 0xae0   : > { %v5798_v45 = vpop.permute.xlu0 %5797 }
 0xae1   : > { %5847 = vst.msk [vmem:[#allocation3 + $0x88] sm:$0xff] %vm5829_vm12, %v5798_v45 }
 0xae8   : > { %v5869_v22 = vld [vmem:[#allocation3 + $0x88] sm:$0xff] }
 0xae9   : > { %v5896_v32 = vmul.f32 %v11654_v28, %v5869_v22 }
 0xaeb   : > { %v5923_v5 = vadd.f32 %v11660_v34, %v5896_v32 }
 0xaed   : > { %v5945_v0 = vmax.f32 %v5923_v5, 0.0 }
 0xaef   : > { %v5967_v44 = vmul.f32 %v5945_v0, %v12970_v43 }
 0xaf1   : > { %8723 = vmatmul.mubr.msk.f32.gmra.mrb[104].mxu0 %vm1231_vm3, %v5967_v44 }
 0xaf8   : > { %v5800_v58 = vpop.permute.xlu1 %5799 }
 0xaf9   : > { %5848 = vst.msk [vmem:[#allocation3 + $0x90] sm:$0xff] %vm5829_vm12, %v5800_v58 }
 0xafc   : > { %v5802_v50 = vpop.permute.xlu0 %5801 }
 0xafd   : > { %5849 = vst.msk [vmem:[#allocation3 + $0x98] sm:$0xff] %vm5829_vm12, %v5802_v50 }
 0xaff   : > { %v5804_v12 = vpop.permute.xlu1 %5803 }
 0xb00   : > { %5850 = vst.msk [vmem:[#allocation3 + $0xa0] sm:$0xff] %vm5829_vm12, %v5804_v12  ;;  %v5806_v51 = vpop.permute.xlu0 %5805  ;;  %v5870_v29 = vld [vmem:[#allocation3 + $0x90] sm:$0xff] }
 0xb01   : > { %5851 = vst.msk [vmem:[#allocation3 + $0xa8] sm:$0xff] %vm5829_vm12, %v5806_v51  ;;  %v5897_v6 = vmul.f32 %v11654_v28, %v5870_v29 }
 0xb03   : > { %v5924_v8 = vadd.f32 %v11660_v34, %v5897_v6 }
 0xb04   : > { %v5871_v16 = vld [vmem:[#allocation3 + $0x98] sm:$0xff] }
 0xb05   : > { %v5946_v4 = vmax.f32 %v5924_v8, 0.0  ;;  %v5898_v49 = vmul.f32 %v11654_v28, %v5871_v16 }
 0xb07   : > { %v5968_v39 = vmul.f32 %v5946_v4, %v12971_v46  ;;  %v5925_v47 = vadd.f32 %v11660_v34, %v5898_v49  ;;  %v5872_v18 = vld [vmem:[#allocation3 + $0xa0] sm:$0xff] }
 0xb08   : > { %v5899_v37 = vmul.f32 %v11654_v28, %v5872_v18  ;;  %v5873_v2 = vld [vmem:[#allocation3 + $0xa8] sm:$0xff] }
 0xb09   : > { %8725 = vmatprep.mubr.msk.f32.mxu0 %vm1231_vm3, %v5968_v39  ;;  %v5947_v23 = vmax.f32 %v5925_v47, 0.0  ;;  %v5900_v9 = vmul.f32 %v11654_v28, %v5873_v2 }
 0xb0a   : > { %v5926_v26 = vadd.f32 %v11660_v34, %v5899_v37 }
 0xb0b   : > { %v5969_v59 = vmul.f32 %v5947_v23, %v12972_v61  ;;  %v5927_v57 = vadd.f32 %v11660_v34, %v5900_v9 }
 0xb0c   : > { %v5948_v10 = vmax.f32 %v5926_v26, 0.0 }
 0xb0d   : > { %8726 = vmatmul.mubr.msk.f32.gmra.mrb[106].mxu0 %vm1231_vm3, %v5969_v59  ;;  %v5949_v54 = vmax.f32 %v5927_v57, 0.0 }
 0xb0e   : > { %v5970_v62 = vmul.f32 %v5948_v10, %v12973_v41 }
 0xb0f   : > { %v5971_v14 = vmul.f32 %v5949_v54, %v12974_v55 }
 0xb10   : > { %8728 = vmatprep.mubr.msk.f32.mxu0 %vm1231_vm3, %v5970_v62 }
 0xb11   : > { %8729 = vmatmul.mubr.msk.f32.gmra.mrb[108].mxu0 %vm1231_vm3, %v5971_v14 }
 0xb6f   : > { %v8700_v25 = vpop.f32.mrb[88].mxu0 }
 0xb70   : > { %6220 = vst.msk [vmem:[#allocation4 + $0x18] sm:$0xff] %vm358_vm4, %v8700_v25  ;;  %v6110_v28 = vpop.f32.mrb[89].mxu0 }
 0xb71   : > { %6219 = vst.msk [vmem:[#allocation4 + $0x10] sm:$0xff] %vm358_vm4, %v6110_v28 }
 0xb73   : > { %v8703_v7 = vpop.f32.mrb[90].mxu0 }
 0xb74   : > { %6222 = vst.msk [vmem:[#allocation4 + $0x28] sm:$0xff] %vm358_vm4, %v8703_v7  ;;  %v6120_v34 = vpop.f32.mrb[91].mxu0 }
 0xb75   : > { %6221 = vst.msk [vmem:[#allocation4 + $0x20] sm:$0xff] %vm358_vm4, %v6120_v34 }
 0xb77   : > { %v8706_v24 = vpop.f32.mrb[92].mxu0  ;;  %v6688_v13 = vld [vmem:[#allocation4 + $0x18] sm:$0xff] }
 0xb78   : > { %6224 = vst.msk [vmem:[#allocation4 + $0x38] sm:$0xff] %vm358_vm4, %v8706_v24  ;;  %6733 = vrot.lane.b32.xlu0 %v6688_v13, %s9043_s26  ;;  %v6130_v53 = vpop.f32.mrb[93].mxu0  ;;  %v6293_v20 = vld [vmem:[#allocation4 + $0x13] sm:$0xff]  ;;  %v6292_v48 = vld [vmem:[#allocation4 + $0xb] sm:$0xff] }
 0xb79   : > { %6223 = vst.msk [vmem:[#allocation4 + $0x30] sm:$0xff] %vm358_vm4, %v6130_v53  ;;  %6339 = vrot.lane.b32.xlu1 %v6293_v20, %s9037_s27  ;;  %v6555_v35 = vld [vmem:[#allocation4 + $0xf] sm:$0xff]  ;;  %v6556_v19 = vld [vmem:[#allocation4 + $0x17] sm:$0xff] }
 0xb7a   : > { %v6424_v42 = vld [vmem:[#allocation4 + $0xc] sm:$0xff]  ;;  %v6425_v60 = vld [vmem:[#allocation4 + $0x14] sm:$0xff] }
 0xb7b   : > { %v8709_v52 = vpop.f32.mrb[94].mxu0  ;;  %v6687_v1 = vld [vmem:[#allocation4 + $0x10] sm:$0xff]  ;;  %v6690_v56 = vld [vmem:[#allocation4 + $0x28] sm:$0xff] }
 0xb7c   : > { %6226 = vst.msk [vmem:[#allocation4 + $0x48] sm:$0xff] %vm358_vm4, %v8709_v52  ;;  %6337 = vrot.lane.b32.xlu0 %v6292_v48, %s9037_s27  ;;  %v6140_v36 = vpop.f32.mrb[95].mxu0  ;;  %v6819_v21 = vld [vmem:[#allocation4 + $0x11] sm:$0xff]  ;;  %v6294_v30 = vld [vmem:[#allocation4 + $0x1b] sm:$0xff]  ;;  %v6295_v27 = vld [vmem:[#allocation4 + $0x23] sm:$0xff] }
 0xb7d   : > { %6225 = vst.msk [vmem:[#allocation4 + $0x40] sm:$0xff] %vm358_vm4, %v6140_v36  ;;  %6599 = vrot.lane.b32.xlu1 %v6555_v35, %s9045_s16  ;;  %v6426_v17 = vld [vmem:[#allocation4 + $0x1c] sm:$0xff]  ;;  %v6558_v45 = vld [vmem:[#allocation4 + $0x27] sm:$0xff] }
 0xb7e   : > { %v6557_v40 = vld [vmem:[#allocation4 + $0x1f] sm:$0xff] }
 0xb7f   : > { %v8712_v11 = vpop.f32.mrb[96].mxu0  ;;  %v6427_v22 = vld [vmem:[#allocation4 + $0x24] sm:$0xff]  ;;  %v6820_v32 = vld [vmem:[#allocation4 + $0x19] sm:$0xff] }
 0xb80   : > { %6228 = vst.msk [vmem:[#allocation4 + $0x58] sm:$0xff] %vm358_vm4, %v8712_v11  ;;  %6469 = vrot.lane.b32.xlu0 %v6424_v42, %s9039_s30  ;;  %v6150_v15 = vpop.f32.mrb[97].mxu0  ;;  %v6689_v5 = vld [vmem:[#allocation4 + $0x20] sm:$0xff]  ;;  %v6692_v50 = vld [vmem:[#allocation4 + $0x38] sm:$0xff]  ;;  %v6296_v6 = vld [vmem:[#allocation4 + $0x2b] sm:$0xff] }
 0xb81   : > { %6227 = vst.msk [vmem:[#allocation4 + $0x50] sm:$0xff] %vm358_vm4, %v6150_v15  ;;  %6471 = vrot.lane.b32.xlu1 %v6425_v60, %s9039_s30  ;;  %v7046_v0 = vld [vmem:[#allocation4 + $0x25] sm:$0xff]  ;;  %v7045_v58 = vld [vmem:[#allocation4 + $0x1d] sm:$0xff]  ;;  %v6297_v8 = vld [vmem:[#allocation4 + $0x33] sm:$0xff] }
 0xb82   : > { %v6821_v43 = vld [vmem:[#allocation4 + $0x21] sm:$0xff]  ;;  %v6428_v16 = vld [vmem:[#allocation4 + $0x2c] sm:$0xff]  ;;  %v6560_v49 = vld [vmem:[#allocation4 + $0x37] sm:$0xff] }
 0xb83   : > { %v8715_v31 = vpop.f32.mrb[98].mxu0  ;;  %v7178_v44 = vld [vmem:[#allocation4 + $0x26] sm:$0xff]  ;;  %v7177_v51 = vld [vmem:[#allocation4 + $0x1e] sm:$0xff]  ;;  %v6559_v4 = vld [vmem:[#allocation4 + $0x2f] sm:$0xff] }
 0xb84   : > { %6230 = vst.msk [vmem:[#allocation4 + $0x68] sm:$0xff] %vm358_vm4, %v8715_v31  ;;  %6601 = vrot.lane.b32.xlu0 %v6556_v19, %s9045_s16  ;;  %v6160_v63 = vpop.f32.mrb[99].mxu0  ;;  %v6429_v46 = vld [vmem:[#allocation4 + $0x34] sm:$0xff]  ;;  %v6822_v39 = vld [vmem:[#allocation4 + $0x29] sm:$0xff]  ;;  %v6430_v54 = vld [vmem:[#allocation4 + $0x3c] sm:$0xff] }
 0xb85   : > { %6229 = vst.msk [vmem:[#allocation4 + $0x60] sm:$0xff] %vm358_vm4, %v6160_v63  ;;  %6731 = vrot.lane.b32.xlu1 %v6687_v1, %s9043_s26  ;;  %v6691_v47 = vld [vmem:[#allocation4 + $0x30] sm:$0xff]  ;;  %v6694_v61 = vld [vmem:[#allocation4 + $0x48] sm:$0xff]  ;;  %v6298_v57 = vld [vmem:[#allocation4 + $0x3b] sm:$0xff] }
 0xb86   : > { %v7048_v18 = vld [vmem:[#allocation4 + $0x35] sm:$0xff]  ;;  %v7047_v9 = vld [vmem:[#allocation4 + $0x2d] sm:$0xff]  ;;  %v6299_v10 = vld [vmem:[#allocation4 + $0x43] sm:$0xff] }
 0xb87   : > { %v6823_v37 = vld [vmem:[#allocation4 + $0x31] sm:$0xff]  ;;  %v6561_v41 = vld [vmem:[#allocation4 + $0x3f] sm:$0xff]  ;;  %v6562_v62 = vld [vmem:[#allocation4 + $0x47] sm:$0xff] }
 0xb88   : > { %6737 = vrot.lane.b32.xlu0 %v6690_v56, %s9043_s26  ;;  %v8718_v33 = vpop.f32.mrb[100].mxu0  ;;  %v7180_v2 = vld [vmem:[#allocation4 + $0x36] sm:$0xff]  ;;  %v7179_v59 = vld [vmem:[#allocation4 + $0x2e] sm:$0xff]  ;;  %v6431_v55 = vld [vmem:[#allocation4 + $0x44] sm:$0xff] }
 0xb89   : > { %6232 = vst.msk [vmem:[#allocation4 + $0x78] sm:$0xff] %vm358_vm4, %v8718_v33  ;;  %6863 = vrot.lane.b32.xlu1 %v6819_v21, %s9044_s15  ;;  %v6170_v3 = vpop.f32.mrb[101].mxu0  ;;  %v6824_v14 = vld [vmem:[#allocation4 + $0x39] sm:$0xff]  ;;  %v7050_v28 = vld [vmem:[#allocation4 + $0x45] sm:$0xff]  ;;  %v6563_v63 = vld [vmem:[#allocation4 + $0x4f] sm:$0xff] }
 0xb8a   : > { %6231 = vst.msk [vmem:[#allocation4 + $0x70] sm:$0xff] %vm358_vm4, %v6170_v3  ;;  %v6693_v25 = vld [vmem:[#allocation4 + $0x40] sm:$0xff]  ;;  %v6696_v48 = vld [vmem:[#allocation4 + $0x58] sm:$0xff]  ;;  %v6300_v42 = vld [vmem:[#allocation4 + $0x4b] sm:$0xff] }
 0xb8b   : > { %v6825_v34 = vld [vmem:[#allocation4 + $0x41] sm:$0xff]  ;;  %v6301_v15 = vld [vmem:[#allocation4 + $0x53] sm:$0xff] }
 0xb8c   : > { %6341 = vrot.lane.b32.xlu0 %v6294_v30, %s9037_s27  ;;  %v7182_v13 = vld [vmem:[#allocation4 + $0x46] sm:$0xff]  ;;  %v7049_v20 = vld [vmem:[#allocation4 + $0x3d] sm:$0xff]  ;;  %v6433_v21 = vld [vmem:[#allocation4 + $0x54] sm:$0xff] }
 0xb8d   : > { %6343 = vrot.lane.b32.xlu1 %v6295_v27, %s9037_s27  ;;  %v7181_v36 = vld [vmem:[#allocation4 + $0x3e] sm:$0xff]  ;;  %v6432_v19 = vld [vmem:[#allocation4 + $0x4c] sm:$0xff] }
 0xb8e   : > { %v6564_v33 = vld [vmem:[#allocation4 + $0x57] sm:$0xff]  ;;  %v6826_v27 = vld [vmem:[#allocation4 + $0x49] sm:$0xff] }
 0xb90   : > { %6473 = vrot.lane.b32.xlu0 %v6426_v17, %s9039_s30 }
 0xb91   : > { %6603 = vrot.lane.b32.xlu1 %v6557_v40, %s9045_s16 }
 0xb94   : > { %6605 = vrot.lane.b32.xlu0 %v6558_v45, %s9045_s16 }
 0xb95   : > { %6475 = vrot.lane.b32.xlu1 %v6427_v22, %s9039_s30 }
 0xb98   : > { %6865 = vrot.lane.b32.xlu0 %v6820_v32, %s9044_s15 }
 0xb99   : > { %6735 = vrot.lane.b32.xlu1 %v6689_v5, %s9043_s26  ;;  %v7052_v5 = vld [vmem:[#allocation4 + $0x55] sm:$0xff] }
 0xb9c   : > { %6959 = vrot.lane.b32.xlu0 %v6427_v22, %s9041_s12 }
 0xb9d   : > { %6957 = vrot.lane.b32.xlu1 %v6426_v17, %s9041_s12  ;;  %v6695_v17 = vld [vmem:[#allocation4 + $0x50] sm:$0xff] }
 0xba0   : > { %7091 = vrot.lane.b32.xlu0 %v7046_v0, %s9038_s28  ;;  %v6827_v0 = vld [vmem:[#allocation4 + $0x51] sm:$0xff] }
 0xba1   : > { %6867 = vrot.lane.b32.xlu1 %v6821_v43, %s9044_s15 }
 0xba4   : > { %7223 = vrot.lane.b32.xlu0 %v7178_v44, %s9040_s11 }
 0xba5   : > { %7089 = vrot.lane.b32.xlu1 %v7045_v58, %s9038_s28  ;;  %v7184_v58 = vld [vmem:[#allocation4 + $0x56] sm:$0xff] }
 0xba8   : > { %6741 = vrot.lane.b32.xlu0 %v6692_v50, %s9043_s26  ;;  %v8721_v12 = vpop.f32.mrb[102].mxu0  ;;  %v7051_v50 = vld [vmem:[#allocation4 + $0x4d] sm:$0xff] }
 0xba9   : > { %6234 = vst.msk [vmem:[#allocation4 + $0x88] sm:$0xff] %vm358_vm4, %v8721_v12  ;;  %7221 = vrot.lane.b32.xlu1 %v7177_v51, %s9040_s11  ;;  %v6180_v29 = vpop.f32.mrb[103].mxu0 }
 0xbaa   : > { %6233 = vst.msk [vmem:[#allocation4 + $0x80] sm:$0xff] %vm358_vm4, %v6180_v29  ;;  %v6698_v29 = vld [vmem:[#allocation4 + $0x68] sm:$0xff] }
 0xbac   : > { %6345 = vrot.lane.b32.xlu0 %v6296_v6, %s9037_s27  ;;  %v7183_v6 = vld [vmem:[#allocation4 + $0x4e] sm:$0xff] }
 0xbad   : > { %6347 = vrot.lane.b32.xlu1 %v6297_v8, %s9037_s27 }
 0xbb0   : > { %6477 = vrot.lane.b32.xlu0 %v6428_v16, %s9039_s30 }
 0xbb1   : > { %6607 = vrot.lane.b32.xlu1 %v6559_v4, %s9045_s16  ;;  %v6302_v4 = vld [vmem:[#allocation4 + $0x5b] sm:$0xff] }
 0xbb4   : > { %6609 = vrot.lane.b32.xlu0 %v6560_v49, %s9045_s16  ;;  %v6303_v49 = vld [vmem:[#allocation4 + $0x63] sm:$0xff] }
 0xbb5   : > { %6479 = vrot.lane.b32.xlu1 %v6429_v46, %s9039_s30 }
 0xbb8   : > { %6869 = vrot.lane.b32.xlu0 %v6822_v39, %s9044_s15 }
 0xbb9   : > { %6739 = vrot.lane.b32.xlu1 %v6691_v47, %s9043_s26  ;;  %v6434_v47 = vld [vmem:[#allocation4 + $0x5c] sm:$0xff] }
 0xbbc   : > { %6963 = vrot.lane.b32.xlu0 %v6429_v46, %s9041_s12 }
 0xbbd   : > { %6961 = vrot.lane.b32.xlu1 %v6428_v16, %s9041_s12 }
 0xbc0   : > { %7095 = vrot.lane.b32.xlu0 %v7048_v18, %s9038_s28  ;;  %v6565_v18 = vld [vmem:[#allocation4 + $0x5f] sm:$0xff] }
 0xbc1   : > { %6871 = vrot.lane.b32.xlu1 %v6823_v37, %s9044_s15 }
 0xbc4   : > { %7227 = vrot.lane.b32.xlu0 %v7180_v2, %s9040_s11  ;;  %v8724_v23 = vpop.f32.mrb[104].mxu0 }
 0xbc5   : > { %6236 = vst.msk [vmem:[#allocation4 + $0x98] sm:$0xff] %vm358_vm4, %v8724_v23  ;;  %7093 = vrot.lane.b32.xlu1 %v7047_v9, %s9038_s28  ;;  %v6190_v26 = vpop.f32.mrb[105].mxu0  ;;  %v6566_v23 = vld [vmem:[#allocation4 + $0x67] sm:$0xff] }
 0xbc6   : > { %6235 = vst.msk [vmem:[#allocation4 + $0x90] sm:$0xff] %vm358_vm4, %v6190_v26  ;;  %v6435_v9 = vld [vmem:[#allocation4 + $0x64] sm:$0xff] }
 0xbc8   : > { %6745 = vrot.lane.b32.xlu0 %v6694_v61, %s9043_s26 }
 0xbc9   : > { %7225 = vrot.lane.b32.xlu1 %v7179_v59, %s9040_s11  ;;  %v6828_v59 = vld [vmem:[#allocation4 + $0x59] sm:$0xff] }
 0xbcc   : > { %6349 = vrot.lane.b32.xlu0 %v6298_v57, %s9037_s27  ;;  %v6697_v57 = vld [vmem:[#allocation4 + $0x60] sm:$0xff] }
 0xbcd   : > { %6351 = vrot.lane.b32.xlu1 %v6299_v10, %s9037_s27 }
 0xbd0   : > { %6481 = vrot.lane.b32.xlu0 %v6430_v54, %s9039_s30 }
 0xbd1   : > { %6611 = vrot.lane.b32.xlu1 %v6561_v41, %s9045_s16 }
 0xbd4   : > { %6613 = vrot.lane.b32.xlu0 %v6562_v62, %s9045_s16 }
 0xbd5   : > { %6483 = vrot.lane.b32.xlu1 %v6431_v55, %s9039_s30 }
 0xbd8   : > { %6873 = vrot.lane.b32.xlu0 %v6824_v14, %s9044_s15  ;;  %v6829_v14 = vld [vmem:[#allocation4 + $0x61] sm:$0xff] }
 0xbd9   : > { %6743 = vrot.lane.b32.xlu1 %v6693_v25, %s9043_s26 }
 0xbdc   : > { %6967 = vrot.lane.b32.xlu0 %v6431_v55, %s9041_s12  ;;  %v7054_v55 = vld [vmem:[#allocation4 + $0x65] sm:$0xff] }
 0xbdd   : > { %6965 = vrot.lane.b32.xlu1 %v6430_v54, %s9041_s12 }
 0xbe0   : > { %7099 = vrot.lane.b32.xlu0 %v7050_v28, %s9038_s28  ;;  %v8727_v7 = vpop.f32.mrb[106].mxu0 }
 0xbe1   : > { %6238 = vst.msk [vmem:[#allocation4 + $0xa8] sm:$0xff] %vm358_vm4, %v8727_v7  ;;  %6875 = vrot.lane.b32.xlu1 %v6825_v34, %s9044_s15  ;;  %v6200_v24 = vpop.f32.mrb[107].mxu0  ;;  %v7186_v7 = vld [vmem:[#allocation4 + $0x66] sm:$0xff]  ;;  %v7053_v34 = vld [vmem:[#allocation4 + $0x5d] sm:$0xff] }
 0xbe2   : > { %6237 = vst.msk [vmem:[#allocation4 + $0xa0] sm:$0xff] %vm358_vm4, %v6200_v24 }
 0xbe4   : > { %7231 = vrot.lane.b32.xlu0 %v7182_v13, %s9040_s11  ;;  %v8730_v53 = vpop.f32.mrb[108].mxu0 }
 0xbe5   : > { %6240 = vst.msk [vmem:[#allocation4 + $0xb8] sm:$0xff] %vm358_vm4, %v8730_v53  ;;  %7097 = vrot.lane.b32.xlu1 %v7049_v20, %s9038_s28  ;;  %v6210_v52 = vpop.f32.mrb[109].mxu0  ;;  %v6700_v53 = vld [vmem:[#allocation4 + $0x78] sm:$0xff] }
 0xbe6   : > { %6239 = vst.msk [vmem:[#allocation4 + $0xb0] sm:$0xff] %vm358_vm4, %v6210_v52  ;;  %v7185_v20 = vld [vmem:[#allocation4 + $0x5e] sm:$0xff]  ;;  %vm7785_vm4 = vcmask 146432  }
 0xbe8   : > { %6749 = vrot.lane.b32.xlu0 %v6696_v48, %s9043_s26 }
 0xbe9   : > { %7229 = vrot.lane.b32.xlu1 %v7181_v36, %s9040_s11  ;;  %v6304_v36 = vld [vmem:[#allocation4 + $0x6b] sm:$0xff] }
 0xbea   : > { %v11848_v35 = vpop.permute.xlu0 %6733 }
 0xbeb   : > { %v11850_v11 = vpop.permute.xlu1 %6339 }
 0xbec   : > { %6353 = vrot.lane.b32.xlu0 %v6300_v42, %s9037_s27  ;;  %v6305_v42 = vld [vmem:[#allocation4 + $0x73] sm:$0xff] }
 0xbed   : > { %6355 = vrot.lane.b32.xlu1 %v6301_v15, %s9037_s27 }
 0xbee   : > { %v11854_v60 = vpop.permute.xlu0 %6337 }
 0xbef   : > { %v11856_v31 = vpop.permute.xlu1 %6599 }
 0xbf0   : > { %6485 = vrot.lane.b32.xlu0 %v6432_v19, %s9039_s30 }
 0xbf1   : > { %6615 = vrot.lane.b32.xlu1 %v6563_v63, %s9045_s16  ;;  %v6436_v63 = vld [vmem:[#allocation4 + $0x6c] sm:$0xff] }
 0xbf2   : > { %v11860_v1 = vpop.permute.xlu0 %6469 }
 0xbf3   : > { %v11862_v56 = vpop.permute.xlu1 %6471 }
 0xbf4   : > { %6617 = vrot.lane.b32.xlu0 %v6564_v33, %s9045_s16  ;;  %v6567_v33 = vld [vmem:[#allocation4 + $0x6f] sm:$0xff] }
 0xbf5   : > { %6487 = vrot.lane.b32.xlu1 %v6433_v21, %s9039_s30 }
 0xbf6   : > { %v11866_v3 = vpop.permute.xlu0 %6601 }
 0xbf7   : > { %v11868_v30 = vpop.permute.xlu1 %6731 }
 0xbf8   : > { %6877 = vrot.lane.b32.xlu0 %v6826_v27, %s9044_s15 }
 0xbf9   : > { %6747 = vrot.lane.b32.xlu1 %v6695_v17, %s9043_s26  ;;  %v6568_v17 = vld [vmem:[#allocation4 + $0x77] sm:$0xff] }
 0xbfa   : > { %v11872_v40 = vpop.permute.xlu0 %6737 }
 0xbfb   : > { %v11874_v45 = vpop.permute.xlu1 %6863 }
 0xbfc   : > { %6971 = vrot.lane.b32.xlu0 %v6433_v21, %s9041_s12 }
 0xbfd   : > { %6969 = vrot.lane.b32.xlu1 %v6432_v19, %s9041_s12 }
 0xbfe   : > { %v11878_v22 = vpop.permute.xlu0 %6341 }
 0xbff   : > { %v11880_v32 = vpop.permute.xlu1 %6343 }
 0xc00   : > { %7103 = vrot.lane.b32.xlu0 %v7052_v5, %s9038_s28  ;;  %v6437_v5 = vld [vmem:[#allocation4 + $0x74] sm:$0xff] }
 0xc01   : > { %6879 = vrot.lane.b32.xlu1 %v6827_v0, %s9044_s15 }
 0xc02   : > { %v11884_v43 = vpop.permute.xlu0 %6473 }
 0xc03   : > { %v11886_v44 = vpop.permute.xlu1 %6603 }
 0xc04   : > { %7235 = vrot.lane.b32.xlu0 %v7184_v58, %s9040_s11 }
 0xc05   : > { %7101 = vrot.lane.b32.xlu1 %v7051_v50, %s9038_s28  ;;  %v6830_v50 = vld [vmem:[#allocation4 + $0x69] sm:$0xff] }
 0xc06   : > { %v11890_v12 = vpop.permute.xlu0 %6605 }
 0xc07   : > { %v11892_v51 = vpop.permute.xlu1 %6475 }
 0xc08   : > { %6753 = vrot.lane.b32.xlu0 %v6698_v29, %s9043_s26  ;;  %v6699_v29 = vld [vmem:[#allocation4 + $0x70] sm:$0xff] }
 0xc09   : > { %7233 = vrot.lane.b32.xlu1 %v7183_v6, %s9040_s11 }
 0xc0a   : > { %v11896_v8 = vpop.permute.xlu0 %6865 }
 0xc0b   : > { %v11898_v16 = vpop.permute.xlu1 %6735 }
 0xc0c   : > { %6357 = vrot.lane.b32.xlu0 %v6302_v4, %s9037_s27 }
 0xc0d   : > { %6359 = vrot.lane.b32.xlu1 %v6303_v49, %s9037_s27 }
 0xc0e   : > { %v11902_v46 = vpop.permute.xlu0 %6959 }
 0xc0f   : > { %v11904_v39 = vpop.permute.xlu1 %6957 }
 0xc10   : > { %6489 = vrot.lane.b32.xlu0 %v6434_v47, %s9039_s30 }
 0xc11   : > { %6619 = vrot.lane.b32.xlu1 %v6565_v18, %s9045_s16  ;;  %v7056_v18 = vld [vmem:[#allocation4 + $0x75] sm:$0xff] }
 0xc12   : > { %v11908_v37 = vpop.permute.xlu0 %7091 }
 0xc13   : > { %v11910_v2 = vpop.permute.xlu1 %6867 }
 0xc14   : > { %6621 = vrot.lane.b32.xlu0 %v6566_v23, %s9045_s16  ;;  %v6831_v23 = vld [vmem:[#allocation4 + $0x71] sm:$0xff] }
 0xc15   : > { %6491 = vrot.lane.b32.xlu1 %v6435_v9, %s9039_s30 }
 0xc16   : > { %v11914_v26 = vpop.permute.xlu0 %7223 }
 0xc17   : > { %v11916_v61 = vpop.permute.xlu1 %7089 }
 0xc18   : > { %6881 = vrot.lane.b32.xlu0 %v6828_v59, %s9044_s15 }
 0xc19   : > { %6751 = vrot.lane.b32.xlu1 %v6697_v57, %s9043_s26  ;;  %v7188_v57 = vld [vmem:[#allocation4 + $0x76] sm:$0xff] }
 0xc1a   : > { %v11920_v10 = vpop.permute.xlu0 %6741 }
 0xc1b   : > { %v11922_v54 = vpop.permute.xlu1 %7221 }
 0xc1c   : > { %6975 = vrot.lane.b32.xlu0 %v6435_v9, %s9041_s12 }
 0xc1d   : > { %6973 = vrot.lane.b32.xlu1 %v6434_v47, %s9041_s12 }
 0xc1e   : > { %v11926_v41 = vpop.permute.xlu0 %6345 }
 0xc1f   : > { %v11928_v62 = vpop.permute.xlu1 %6347 }
 0xc20   : > { %7107 = vrot.lane.b32.xlu0 %v7054_v55, %s9038_s28  ;;  %v7055_v55 = vld [vmem:[#allocation4 + $0x6d] sm:$0xff] }
 0xc21   : > { %6883 = vrot.lane.b32.xlu1 %v6829_v14, %s9044_s15 }
 0xc22   : > { %v11932_v25 = vpop.permute.xlu0 %6477 }
 0xc23   : > { %v11934_v28 = vpop.permute.xlu1 %6607 }
 0xc24   : > { %7239 = vrot.lane.b32.xlu0 %v7186_v7, %s9040_s11 }
 0xc25   : > { %7105 = vrot.lane.b32.xlu1 %v7053_v34, %s9038_s28  ;;  %v6702_v34 = vld [vmem:[#allocation4 + $0x88] sm:$0xff] }
 0xc26   : > { %v11938_v24 = vpop.permute.xlu0 %6609 }
 0xc27   : > { %v11940_v13 = vpop.permute.xlu1 %6479 }
 0xc28   : > { %6757 = vrot.lane.b32.xlu0 %v6700_v53, %s9043_s26  ;;  %v7187_v53 = vld [vmem:[#allocation4 + $0x6e] sm:$0xff] }
 0xc29   : > { %7237 = vrot.lane.b32.xlu1 %v7185_v20, %s9040_s11 }
 0xc2a   : > { %v11944_v52 = vpop.permute.xlu0 %6869 }
 0xc2b   : > { %v11946_v48 = vpop.permute.xlu1 %6739 }
 0xc2c   : > { %6361 = vrot.lane.b32.xlu0 %v6304_v36, %s9037_s27 }
 0xc2d   : > { %6363 = vrot.lane.b32.xlu1 %v6305_v42, %s9037_s27  ;;  %v6306_v42 = vld [vmem:[#allocation4 + $0x7b] sm:$0xff] }
 0xc2e   : > { %v11950_v15 = vpop.permute.xlu0 %6963 }
 0xc2f   : > { %v11952_v19 = vpop.permute.xlu1 %6961 }
 0xc30   : > { %6493 = vrot.lane.b32.xlu0 %v6436_v63, %s9039_s30 }
 0xc31   : > { %6623 = vrot.lane.b32.xlu1 %v6567_v33, %s9045_s16 }
 0xc32   : > { %v11956_v21 = vpop.permute.xlu0 %7095 }
 0xc33   : > { %v11958_v27 = vpop.permute.xlu1 %6871 }
 0xc34   : > { %6625 = vrot.lane.b32.xlu0 %v6568_v17, %s9045_s16 }
 0xc35   : > { %6495 = vrot.lane.b32.xlu1 %v6437_v5, %s9039_s30 }
 0xc36   : > { %v11962_v0 = vpop.permute.xlu0 %7227 }
 0xc37   : > { %12975 = vst [vmem:[#allocation119_spill] sm:$0xff] %v11962_v0  ;;  %v11964_v58 = vpop.permute.xlu1 %7093 }
 0xc38   : > { %12976 = vst [vmem:[#allocation27_spill] sm:$0xff] %v11964_v58  ;;  %6885 = vrot.lane.b32.xlu0 %v6830_v50, %s9044_s15  ;;  %v6569_v50 = vld [vmem:[#allocation4 + $0x7f] sm:$0xff] }
 0xc39   : > { %6755 = vrot.lane.b32.xlu1 %v6699_v29, %s9043_s26  ;;  %v6254_v58 = vld [vmem:[#allocation4 + $0x3a] sm:$0xff] }
 0xc3a   : > { %v11968_v6 = vpop.permute.xlu0 %6745 }
 0xc3b   : > { %12977 = vst [vmem:[#allocation28_spill] sm:$0xff] %v11968_v6  ;;  %v11970_v4 = vpop.permute.xlu1 %7225 }
 0xc3c   : > { %12978 = vst [vmem:[#allocation30_spill] sm:$0xff] %v11970_v4  ;;  %6979 = vrot.lane.b32.xlu0 %v6437_v5, %s9041_s12  ;;  %v6438_v5 = vld [vmem:[#allocation4 + $0x7c] sm:$0xff]  ;;  %v6838_v4 = vld [vmem:[#allocation4 + $0xa9] sm:$0xff] }
 0xc3d   : > { %6977 = vrot.lane.b32.xlu1 %v6436_v63, %s9041_s12  ;;  %v6307_v63 = vld [vmem:[#allocation4 + $0x83] sm:$0xff] }
 0xc3e   : > { %v11974_v49 = vpop.permute.xlu0 %6349 }
 0xc3f   : > { %v11976_v47 = vpop.permute.xlu1 %6351 }
 0xc40   : > { %12979 = vst [vmem:[#allocation39_spill] sm:$0xff] %v11976_v47  ;;  %7111 = vrot.lane.b32.xlu0 %v7056_v18, %s9038_s28  ;;  %v6839_v47 = vld [vmem:[#allocation4 + $0xb1] sm:$0xff] }
 0xc41   : > { %6887 = vrot.lane.b32.xlu1 %v6831_v23, %s9044_s15  ;;  %v6570_v23 = vld [vmem:[#allocation4 + $0x87] sm:$0xff] }
 0xc42   : > { %v11980_v9 = vpop.permute.xlu0 %6481 }
 0xc43   : > { %v11982_v59 = vpop.permute.xlu1 %6611 }
 0xc44   : > { %7243 = vrot.lane.b32.xlu0 %v7188_v57, %s9040_s11  ;;  %v6439_v57 = vld [vmem:[#allocation4 + $0x84] sm:$0xff] }
 0xc45   : > { %7109 = vrot.lane.b32.xlu1 %v7055_v55, %s9038_s28 }
 0xc46   : > { %v11986_v14 = vpop.permute.xlu0 %6613 }
 0xc47   : > { %v11988_v7 = vpop.permute.xlu1 %6483 }
 0xc48   : > { %12980 = vst [vmem:[#allocation40_spill] sm:$0xff] %v11988_v7  ;;  %6761 = vrot.lane.b32.xlu0 %v6702_v34, %s9043_s26  ;;  %v6705_v7 = vld [vmem:[#allocation4 + $0xa0] sm:$0xff] }
 0xc49   : > { %7241 = vrot.lane.b32.xlu1 %v7187_v53, %s9040_s11  ;;  %v6832_v53 = vld [vmem:[#allocation4 + $0x79] sm:$0xff] }
 0xc4a   : > { %v11992_v20 = vpop.permute.xlu0 %6873 }
 0xc4b   : > { %v11994_v36 = vpop.permute.xlu1 %6743 }
 0xc4c   : > { %12981 = vst [vmem:[#allocation41_spill] sm:$0xff] %v11994_v36  ;;  %6365 = vrot.lane.b32.xlu0 %v6306_v42, %s9037_s27  ;;  %v6701_v42 = vld [vmem:[#allocation4 + $0x80] sm:$0xff] }
 0xc4d   : > { %6367 = vrot.lane.b32.xlu1 %v6307_v63, %s9037_s27 }
 0xc4e   : > { %v11998_v33 = vpop.permute.xlu0 %6967 }
 0xc4f   : > { %12982 = vst [vmem:[#allocation42_spill] sm:$0xff] %v11998_v33  ;;  %v12000_v17 = vpop.permute.xlu1 %6965  ;;  %v6951_v33 = vld [vmem:[#allocation4 + $0xb4] sm:$0xff] }
 0xc50   : > { %12983 = vst [vmem:[#allocation43_spill] sm:$0xff] %v12000_v17  ;;  %6497 = vrot.lane.b32.xlu0 %v6438_v5, %s9039_s30  ;;  %v6703_v17 = vld [vmem:[#allocation4 + $0x90] sm:$0xff] }
 0xc51   : > { %6627 = vrot.lane.b32.xlu1 %v6569_v50, %s9045_s16 }
 0xc52   : > { %v12004_v29 = vpop.permute.xlu0 %7099 }
 0xc53   : > { %12984 = vst [vmem:[#allocation44_spill] sm:$0xff] %v12004_v29  ;;  %v12006_v18 = vpop.permute.xlu1 %6875 }
 0xc54   : > { %12985 = vst [vmem:[#allocation45_spill] sm:$0xff] %v12006_v18  ;;  %6629 = vrot.lane.b32.xlu0 %v6570_v23, %s9045_s16 }
 0xc55   : > { %6499 = vrot.lane.b32.xlu1 %v6439_v57, %s9039_s30 }
 0xc56   : > { %v12010_v55 = vpop.permute.xlu0 %7231 }
 0xc57   : > { %12986 = vst [vmem:[#allocation46_spill] sm:$0xff] %v12010_v55  ;;  %v12012_v34 = vpop.permute.xlu1 %7097  ;;  %v7058_v55 = vld [vmem:[#allocation4 + $0x85] sm:$0xff] }
 0xc58   : > { %12987 = vst [vmem:[#allocation47_spill] sm:$0xff] %v12012_v34  ;;  %6889 = vrot.lane.b32.xlu0 %v6832_v53, %s9044_s15  ;;  %v6833_v34 = vld [vmem:[#allocation4 + $0x81] sm:$0xff] }
 0xc59   : > { %6759 = vrot.lane.b32.xlu1 %v6701_v42, %s9043_s26 }
 0xc5a   : > { %v12016_v63 = vpop.permute.xlu0 %6749 }
 0xc5b   : > { %12988 = vst [vmem:[#allocation48_spill] sm:$0xff] %v12016_v63  ;;  %v12018_v50 = vpop.permute.xlu1 %7229  ;;  %v7190_v63 = vld [vmem:[#allocation4 + $0x86] sm:$0xff] }
 0xc5c   : > { %12989 = vst [vmem:[#allocation49_spill] sm:$0xff] %v12018_v50  ;;  %6983 = vrot.lane.b32.xlu0 %v6439_v57, %s9041_s12  ;;  %v7057_v57 = vld [vmem:[#allocation4 + $0x7d] sm:$0xff] }
 0xc5d   : > { %6981 = vrot.lane.b32.xlu1 %v6438_v5, %s9041_s12 }
 0xc5e   : > { %v12022_v23 = vpop.permute.xlu0 %6353 }
 0xc5f   : > { %v12024_v38 = vpop.permute.xlu1 %6355 }
 0xc60   : > { %12990 = vst [vmem:[#allocation50_spill] sm:$0xff] %v12024_v38  ;;  %7115 = vrot.lane.b32.xlu0 %v7058_v55, %s9038_s28  ;;  %v6704_v38 = vld [vmem:[#allocation4 + $0x98] sm:$0xff] }
 0xc61   : > { %6891 = vrot.lane.b32.xlu1 %v6833_v34, %s9044_s15  ;;  %v7189_v55 = vld [vmem:[#allocation4 + $0x7e] sm:$0xff] }
 0xc62   : > { %v12028_v53 = vpop.permute.xlu0 %6485 }
 0xc63   : > { %v12030_v42 = vpop.permute.xlu1 %6615 }
 0xc64   : > { %12991 = vst [vmem:[#allocation51_spill] sm:$0xff] %v12030_v42  ;;  %7247 = vrot.lane.b32.xlu0 %v7190_v63, %s9040_s11  ;;  %v6308_v42 = vld [vmem:[#allocation4 + $0x8b] sm:$0xff]  ;;  %v6309_v63 = vld [vmem:[#allocation4 + $0x93] sm:$0xff] }
 0xc65   : > { %7113 = vrot.lane.b32.xlu1 %v7057_v57, %s9038_s28 }
 0xc66   : > { %v12034_v5 = vpop.permute.xlu0 %6617 }
 0xc67   : > { %12992 = vst [vmem:[#allocation52_spill] sm:$0xff] %v12034_v5  ;;  %v12036_v50 = vpop.permute.xlu1 %6487 }
 0xc68   : > { %12993 = vst [vmem:[#allocation53_spill] sm:$0xff] %v12036_v50  ;;  %6765 = vrot.lane.b32.xlu0 %v6704_v38, %s9043_s26  ;;  %v6440_v50 = vld [vmem:[#allocation4 + $0x8c] sm:$0xff] }
 0xc69   : > { %7245 = vrot.lane.b32.xlu1 %v7189_v55, %s9040_s11  ;;  %v6571_v38 = vld [vmem:[#allocation4 + $0x8f] sm:$0xff] }
 0xc6a   : > { %v12040_v34 = vpop.permute.xlu0 %6877 }
 0xc6b   : > { %12994 = vst [vmem:[#allocation54_spill] sm:$0xff] %v12040_v34  ;;  %v12042_v18 = vpop.permute.xlu1 %6747 }
 0xc6c   : > { %12995 = vst [vmem:[#allocation55_spill] sm:$0xff] %v12042_v18  ;;  %6369 = vrot.lane.b32.xlu0 %v6308_v42, %s9037_s27  ;;  %v6572_v18 = vld [vmem:[#allocation4 + $0x97] sm:$0xff] }
 0xc6d   : > { %6371 = vrot.lane.b32.xlu1 %v6309_v63, %s9037_s27  ;;  %v6441_v42 = vld [vmem:[#allocation4 + $0x94] sm:$0xff] }
 0xc6e   : > { %v12046_v57 = vpop.permute.xlu0 %6971 }
 0xc6f   : > { %12996 = vst [vmem:[#allocation56_spill] sm:$0xff] %v12046_v57  ;;  %v12048_v29 = vpop.permute.xlu1 %6969 }
 0xc70   : > { %12997 = vst [vmem:[#allocation57_spill] sm:$0xff] %v12048_v29  ;;  %6501 = vrot.lane.b32.xlu0 %v6440_v50, %s9039_s30  ;;  %v6834_v29 = vld [vmem:[#allocation4 + $0x89] sm:$0xff] }
 0xc71   : > { %6631 = vrot.lane.b32.xlu1 %v6571_v38, %s9045_s16 }
 0xc72   : > { %v12052_v55 = vpop.permute.xlu0 %7103 }
 0xc73   : > { %12998 = vst [vmem:[#allocation58_spill] sm:$0xff] %v12052_v55  ;;  %v12054_v34 = vpop.permute.xlu1 %6879 }
 0xc74   : > { %12999 = vst [vmem:[#allocation59_spill] sm:$0xff] %v12054_v34  ;;  %6633 = vrot.lane.b32.xlu0 %v6572_v18, %s9045_s16 }
 0xc75   : > { %6503 = vrot.lane.b32.xlu1 %v6441_v42, %s9039_s30 }
 0xc76   : > { %v12058_v63 = vpop.permute.xlu0 %7235 }
 0xc77   : > { %13000 = vst [vmem:[#allocation60_spill] sm:$0xff] %v12058_v63  ;;  %v12060_v57 = vpop.permute.xlu1 %7101  ;;  %v7060_v63 = vld [vmem:[#allocation4 + $0x95] sm:$0xff] }
 0xc78   : > { %13001 = vst [vmem:[#allocation29_spill] sm:$0xff] %v12060_v57  ;;  %6893 = vrot.lane.b32.xlu0 %v6834_v29, %s9044_s15  ;;  %v6835_v57 = vld [vmem:[#allocation4 + $0x91] sm:$0xff] }
 0xc79   : > { %6763 = vrot.lane.b32.xlu1 %v6703_v17, %s9043_s26 }
 0xc7a   : > { %v12064_v38 = vpop.permute.xlu0 %6753 }
 0xc7b   : > { %13002 = vst [vmem:[#allocation31_spill] sm:$0xff] %v12064_v38  ;;  %v12066_v55 = vpop.permute.xlu1 %7233  ;;  %v7192_v38 = vld [vmem:[#allocation4 + $0x96] sm:$0xff] }
 0xc7c   : > { %13003 = vst [vmem:[#allocation62_spill] sm:$0xff] %v12066_v55  ;;  %6987 = vrot.lane.b32.xlu0 %v6441_v42, %s9041_s12  ;;  %v7059_v42 = vld [vmem:[#allocation4 + $0x8d] sm:$0xff] }
 0xc7d   : > { %6985 = vrot.lane.b32.xlu1 %v6440_v50, %s9041_s12 }
 0xc7e   : > { %v12070_v18 = vpop.permute.xlu0 %6357 }
 0xc7f   : > { %13004 = vst [vmem:[#allocation69_spill] sm:$0xff] %v12070_v18  ;;  %v12072_v34 = vpop.permute.xlu1 %6359  ;;  %v6250_v18 = vld [vmem:[#allocation4 + $0x1a] sm:$0xff] }
 0xc80   : > { %13005 = vst [vmem:[#allocation70_spill] sm:$0xff] %v12072_v34  ;;  %7119 = vrot.lane.b32.xlu0 %v7060_v63, %s9038_s28  ;;  %v6706_v34 = vld [vmem:[#allocation4 + $0xa8] sm:$0xff] }
 0xc81   : > { %6895 = vrot.lane.b32.xlu1 %v6835_v57, %s9044_s15  ;;  %v7191_v63 = vld [vmem:[#allocation4 + $0x8e] sm:$0xff] }
 0xc82   : > { %v12076_v29 = vpop.permute.xlu0 %6489 }
 0xc83   : > { %13006 = vst [vmem:[#allocation61_spill] sm:$0xff] %v12076_v29  ;;  %v12078_v17 = vpop.permute.xlu1 %6619 }
 0xc84   : > { %13007 = vst [vmem:[#allocation68_spill] sm:$0xff] %v12078_v17  ;;  %7251 = vrot.lane.b32.xlu0 %v7192_v38, %s9040_s11  ;;  %v6310_v17 = vld [vmem:[#allocation4 + $0x9b] sm:$0xff]  ;;  %v6311_v38 = vld [vmem:[#allocation4 + $0xa3] sm:$0xff] }
 0xc85   : > { %7117 = vrot.lane.b32.xlu1 %v7059_v42, %s9038_s28 }
 0xc86   : > { %v12082_v50 = vpop.permute.xlu0 %6621 }
 0xc87   : > { %13008 = vst [vmem:[#allocation66_spill] sm:$0xff] %v12082_v50  ;;  %v12084_v55 = vpop.permute.xlu1 %6491 }
 0xc88   : > { %13009 = vst [vmem:[#allocation72_spill] sm:$0xff] %v12084_v55  ;;  %6769 = vrot.lane.b32.xlu0 %v6706_v34, %s9043_s26  ;;  %v6442_v55 = vld [vmem:[#allocation4 + $0x9c] sm:$0xff] }
 0xc89   : > { %7249 = vrot.lane.b32.xlu1 %v7191_v63, %s9040_s11  ;;  %v6573_v34 = vld [vmem:[#allocation4 + $0x9f] sm:$0xff] }
 0xc8a   : > { %v12088_v57 = vpop.permute.xlu0 %6881 }
 0xc8b   : > { %13010 = vst [vmem:[#allocation65_spill] sm:$0xff] %v12088_v57  ;;  %v12090_v29 = vpop.permute.xlu1 %6751 }
 0xc8c   : > { %13011 = vst [vmem:[#allocation67_spill] sm:$0xff] %v12090_v29  ;;  %6373 = vrot.lane.b32.xlu0 %v6310_v17, %s9037_s27  ;;  %v6574_v29 = vld [vmem:[#allocation4 + $0xa7] sm:$0xff] }
 0xc8d   : > { %6375 = vrot.lane.b32.xlu1 %v6311_v38, %s9037_s27  ;;  %v6443_v17 = vld [vmem:[#allocation4 + $0xa4] sm:$0xff] }
 0xc8e   : > { %v12094_v42 = vpop.permute.xlu0 %6975 }
 0xc8f   : > { %13012 = vst [vmem:[#allocation88_spill] sm:$0xff] %v12094_v42  ;;  %v12096_v50 = vpop.permute.xlu1 %6973 }
 0xc90   : > { %13013 = vst [vmem:[#allocation79_spill] sm:$0xff] %v12096_v50  ;;  %6505 = vrot.lane.b32.xlu0 %v6442_v55, %s9039_s30  ;;  %v6836_v50 = vld [vmem:[#allocation4 + $0x99] sm:$0xff] }
 0xc91   : > { %6635 = vrot.lane.b32.xlu1 %v6573_v34, %s9045_s16 }
 0xc92   : > { %v12100_v63 = vpop.permute.xlu0 %7107 }
 0xc93   : > { %13014 = vst [vmem:[#allocation63_spill] sm:$0xff] %v12100_v63  ;;  %v12102_v57 = vpop.permute.xlu1 %6883 }
 0xc94   : > { %13015 = vst [vmem:[#allocation71_spill] sm:$0xff] %v12102_v57  ;;  %6637 = vrot.lane.b32.xlu0 %v6574_v29, %s9045_s16 }
 0xc95   : > { %6507 = vrot.lane.b32.xlu1 %v6443_v17, %s9039_s30 }
 0xc96   : > { %v12106_v38 = vpop.permute.xlu0 %7239 }
 0xc97   : > { %13016 = vst [vmem:[#allocation82_spill] sm:$0xff] %v12106_v38  ;;  %v12108_v42 = vpop.permute.xlu1 %7105  ;;  %v7062_v38 = vld [vmem:[#allocation4 + $0xa5] sm:$0xff] }
 0xc98   : > { %13017 = vst [vmem:[#allocation80_spill] sm:$0xff] %v12108_v42  ;;  %6897 = vrot.lane.b32.xlu0 %v6836_v50, %s9044_s15  ;;  %v6837_v42 = vld [vmem:[#allocation4 + $0xa1] sm:$0xff] }
 0xc99   : > { %6767 = vrot.lane.b32.xlu1 %v6705_v7, %s9043_s26 }
 0xc9a   : > { %v12112_v34 = vpop.permute.xlu0 %6757 }
 0xc9b   : > { %13018 = vst [vmem:[#allocation81_spill] sm:$0xff] %v12112_v34  ;;  %v12114_v63 = vpop.permute.xlu1 %7237  ;;  %v7194_v34 = vld [vmem:[#allocation4 + $0xa6] sm:$0xff] }
 0xc9c   : > { %13019 = vst [vmem:[#allocation78_spill] sm:$0xff] %v12114_v63  ;;  %6991 = vrot.lane.b32.xlu0 %v6443_v17, %s9041_s12  ;;  %v7061_v17 = vld [vmem:[#allocation4 + $0x9d] sm:$0xff] }
 0xc9d   : > { %6989 = vrot.lane.b32.xlu1 %v6442_v55, %s9041_s12 }
 0xc9e   : > { %v12118_v29 = vpop.permute.xlu0 %6361 }
 0xc9f   : > { %13020 = vst [vmem:[#allocation87_spill] sm:$0xff] %v12118_v29  ;;  %v12120_v57 = vpop.permute.xlu1 %6363  ;;  %v9024_v29 = vld [vmem:[#allocation4 + $0x2] sm:$0xff] }
 0xca0   : > { %13021 = vst [vmem:[#allocation83_spill] sm:$0xff] %v12120_v57  ;;  %7123 = vrot.lane.b32.xlu0 %v7062_v38, %s9038_s28  ;;  %v6708_v57 = vld [vmem:[#allocation4 + $0xb8] sm:$0xff] }
 0xca1   : > { %6899 = vrot.lane.b32.xlu1 %v6837_v42, %s9044_s15  ;;  %v7193_v38 = vld [vmem:[#allocation4 + $0x9e] sm:$0xff] }
 0xca2   : > { %v12124_v50 = vpop.permute.xlu0 %6493 }
 0xca3   : > { %13022 = vst [vmem:[#allocation64_spill] sm:$0xff] %v12124_v50  ;;  %v12126_v7 = vpop.permute.xlu1 %6623 }
 0xca4   : > { %13023 = vst [vmem:[#allocation85_spill] sm:$0xff] %v12126_v7  ;;  %7255 = vrot.lane.b32.xlu0 %v7194_v34, %s9040_s11  ;;  %v6840_v7 = vld [vmem:[#allocation4 + $0xb9] sm:$0xff] }
 0xca5   : > { %7121 = vrot.lane.b32.xlu1 %v7061_v17, %s9038_s28  ;;  %v6952_v34 = vld [vmem:[#allocation4 + $0xbc] sm:$0xff] }
 0xca6   : > { %v12130_v55 = vpop.permute.xlu0 %6625 }
 0xca7   : > { %13024 = vst [vmem:[#allocation99_spill] sm:$0xff] %v12130_v55  ;;  %v12132_v63 = vpop.permute.xlu1 %6495 }
 0xca8   : > { %13025 = vst [vmem:[#allocation77_spill] sm:$0xff] %v12132_v63  ;;  %6773 = vrot.lane.b32.xlu0 %v6708_v57, %s9043_s26  ;;  %v6312_v63 = vld [vmem:[#allocation4 + $0xab] sm:$0xff]  ;;  %v7065_v57 = vld [vmem:[#allocation4 + $0xbd] sm:$0xff] }
 0xca9   : > { %7253 = vrot.lane.b32.xlu1 %v7193_v38, %s9040_s11 }
 0xcaa   : > { %v12136_v42 = vpop.permute.xlu0 %6885 }
 0xcab   : > { %13026 = vst [vmem:[#allocation95_spill] sm:$0xff] %v12136_v42  ;;  %v12138_v50 = vpop.permute.xlu1 %6755 }
 0xcac   : > { %13027 = vst [vmem:[#allocation115_spill] sm:$0xff] %v12138_v50  ;;  %6905 = vrot.lane.b32.xlu0 %v6840_v7, %s9044_s15  ;;  %v6444_v50 = vld [vmem:[#allocation4 + $0xac] sm:$0xff] }
 0xcad   : > { %6997 = vrot.lane.b32.xlu1 %v6952_v34, %s9041_s12  ;;  %v6575_v7 = vld [vmem:[#allocation4 + $0xaf] sm:$0xff] }
 0xcae   : > { %v12142_v17 = vpop.permute.xlu0 %6979 }
 0xcaf   : > { %13028 = vst [vmem:[#allocation73_spill] sm:$0xff] %v12142_v17  ;;  %v12144_v55 = vpop.permute.xlu1 %6977 }
 0xcb0   : > { %13029 = vst [vmem:[#allocation74_spill] sm:$0xff] %v12144_v55  ;;  %6377 = vrot.lane.b32.xlu0 %v6312_v63, %s9037_s27  ;;  %v6576_v55 = vld [vmem:[#allocation4 + $0xb7] sm:$0xff]  ;;  %v12161_v63 = vld [vmem:[%s12523_s5 + $0x12] ss:$0 sm:$0xff] }
 0xcb1   : > { %7129 = vrot.lane.b32.xlu1 %v7065_v57, %s9038_s28  ;;  %v6248_v57 = vld [vmem:[#allocation4 + $0xa] sm:$0xff] }
 0xcb2   : > { %v12148_v38 = vpop.permute.xlu0 %7111 }
 0xcb3   : > { %13030 = vst [vmem:[#allocation84_spill] sm:$0xff] %v12148_v38  ;;  %v12150_v42 = vpop.permute.xlu1 %6887 }
 0xcb4   : > { %13031 = vst [vmem:[#allocation101_spill] sm:$0xff] %v12150_v42  ;;  %6509 = vrot.lane.b32.xlu0 %v6444_v50, %s9039_s30  ;;  %v6707_v42 = vld [vmem:[#allocation4 + $0xb0] sm:$0xff] }
 0xcb5   : > { %6639 = vrot.lane.b32.xlu1 %v6575_v7, %s9045_s16  ;;  %v6269_v7 = vadd.f32 %v9024_v29, %v12161_v63  ;;  %v6272_v29 = vadd.f32 %v12161_v63, %v6250_v18 }
 0xcb6   : > { %v12154_v34 = vpop.permute.xlu0 %7243 }
 0xcb7   : > { %13032 = vst [vmem:[#allocation97_spill] sm:$0xff] %v12154_v34  ;;  %v12156_v17 = vpop.permute.xlu1 %7109  ;;  %v6270_v34 = vadd.f32 %v12161_v63, %v6248_v57 }
 0xcb8   : > { %13033 = vst [vmem:[#allocation89_spill] sm:$0xff] %v12156_v17  ;;  %6641 = vrot.lane.b32.xlu0 %v6576_v55, %s9045_s16 }
 0xcb9   : > { %6771 = vrot.lane.b32.xlu1 %v6707_v42, %s9043_s26  ;;  %v6402_v6 = vadd.f32 %v11854_v60, %v6270_v34  ;;  %v13037_v42 = vld [vmem:[#allocation35_spill] sm:$0xff]  ;;  %v6404_v60 = vadd.f32 %v11878_v22, %v6272_v29  ;;  %v7063_v29 = vld [vmem:[#allocation4 + $0xad] sm:$0xff] }
 0xcba   : > { %v12165_v38 = vpop.permute.xlu0 %6761  ;;  %v6401_v5 = vadd.f32 %v13037_v42, %v6269_v7  ;;  %v6263_v34 = vld [vmem:[#allocation4 + $0x82] sm:$0xff] }
 0xcbb   : > { %13034 = vst [vmem:[#allocation98_spill] sm:$0xff] %v12165_v38  ;;  %v12169_v17 = vpop.permute.xlu1 %7241  ;;  %v6249_v38 = vld [vmem:[#allocation4 + $0x12] sm:$0xff]  ;;  %v6534_v36 = vadd.f32 %v11860_v1, %v6402_v6  ;;  %v6536_v18 = vadd.f32 %v11884_v43, %v6404_v60 }
 0xcbc   : > { %13035 = vst [vmem:[#allocation108_spill] sm:$0xff] %v12169_v17  ;;  %6901 = vrot.lane.b32.xlu0 %v6838_v4, %s9044_s15  ;;  %v6252_v17 = vld [vmem:[#allocation4 + $0x2a] sm:$0xff]  ;;  %v6271_v7 = vadd.f32 %v12161_v63, %v6249_v38  ;;  %v6285_v38 = vadd.f32 %v12161_v63, %v6263_v34  ;;  %v6276_v34 = vadd.f32 %v12161_v63, %v6254_v58 }
 0xcbd   : > { %6993 = vrot.lane.b32.xlu1 %v6444_v50, %s9041_s12  ;;  %v6666_v4 = vadd.f32 %v11866_v3, %v6534_v36  ;;  %v6251_v50 = vld [vmem:[#allocation4 + $0x22] sm:$0xff]  ;;  %v13038_v1 = vld [vmem:[#allocation37_spill] sm:$0xff]  ;;  %v6668_v43 = vadd.f32 %v11890_v12, %v6536_v18 }
 0xcbe   : > { %v12174_v55 = vpop.permute.xlu0 %6365  ;;  %v6533_v6 = vadd.f32 %v13038_v1, %v6401_v5  ;;  %v7064_v3 = vld [vmem:[#allocation4 + $0xb5] sm:$0xff]  ;;  %v6403_v22 = vadd.f32 %v11850_v11, %v6271_v7  ;;  %v6273_v36 = vadd.f32 %v12161_v63, %v6251_v50  ;;  %v6256_v1 = vld [vmem:[#allocation4 + $0x4a] sm:$0xff] }
 0xcbf   : > { %13036 = vst [vmem:[#allocation75_spill] sm:$0xff] %v12174_v55  ;;  %v6368_v57 = vpop.permute.xlu1 %6367  ;;  %v6274_v55 = vadd.f32 %v12161_v63, %v6252_v17  ;;  %v6798_v17 = vadd.f32 %v11848_v35, %v6666_v4  ;;  %v6278_v58 = vadd.f32 %v12161_v63, %v6256_v1 }
 0xcc0   : > { %6995 = vrot.lane.b32.xlu0 %v6951_v33, %s9041_s12  ;;  %v6253_v33 = vld [vmem:[#allocation4 + $0x32] sm:$0xff]  ;;  %v6665_v5 = vadd.f32 %v11856_v31, %v6533_v6  ;;  %v6535_v11 = vadd.f32 %v11862_v56, %v6403_v22  ;;  %v6417_v7 = vadd.f32 %v6368_v57, %v6285_v38  ;;  %v6405_v56 = vadd.f32 %v11880_v32, %v6273_v36  ;;  %v6258_v57 = vld [vmem:[#allocation4 + $0x5a] sm:$0xff]  ;;  %v7198_v32 = vld [vmem:[#allocation4 + $0xc6] sm:$0xff] }
 0xcc1   : > { %6903 = vrot.lane.b32.xlu1 %v6839_v47, %s9044_s15  ;;  %v6255_v47 = vld [vmem:[#allocation4 + $0x42] sm:$0xff]  ;;  %v6406_v60 = vadd.f32 %v11926_v41, %v6274_v55  ;;  %v6275_v50 = vadd.f32 %v12161_v63, %v6253_v33  ;;  %v6930_v12 = vadd.f32 %v11896_v8, %v6798_v17  ;;  %v6257_v55 = vld [vmem:[#allocation4 + $0x52] sm:$0xff]  ;;  %v6408_v38 = vadd.f32 %v11974_v49, %v6276_v34 }
 0xcc2   : > { %v12184_v42 = vpop.permute.xlu0 %6497  ;;  %v6797_v31 = vadd.f32 %v11868_v30, %v6665_v5  ;;  %v6277_v41 = vadd.f32 %v12161_v63, %v6255_v47  ;;  %v7196_v6 = vld [vmem:[#allocation4 + $0xb6] sm:$0xff]  ;;  %v6667_v18 = vadd.f32 %v11886_v44, %v6535_v11  ;;  %v7195_v30 = vld [vmem:[#allocation4 + $0xae] sm:$0xff]  ;;  %v6800_v47 = vadd.f32 %v11872_v40, %v6668_v43  ;;  %v6259_v11 = vld [vmem:[#allocation4 + $0x62] sm:$0xff] }
 0xcc3   : > { %v12189_v0 = vpop.permute.xlu1 %6627  ;;  %v6538_v35 = vadd.f32 %v11932_v25, %v6406_v60  ;;  %v7024_v25 = vadd.f32 %v11902_v46, %v6930_v12  ;;  %v6537_v44 = vadd.f32 %v11892_v51, %v6405_v56  ;;  %v6280_v40 = vadd.f32 %v12161_v63, %v6258_v57  ;;  %v7197_v60 = vld [vmem:[#allocation4 + $0xbe] sm:$0xff] }
 0xcc4   : > { %7127 = vrot.lane.b32.xlu0 %v7064_v3, %s9038_s28  ;;  %v6929_v8 = vadd.f32 %v11874_v45, %v6797_v31  ;;  %v6799_v36 = vadd.f32 %v11898_v16, %v6667_v18  ;;  %v6407_v16 = vadd.f32 %v11928_v62, %v6275_v50  ;;  %v6540_v17 = vadd.f32 %v11980_v9, %v6408_v38  ;;  %v13040_v31 = vld [vmem:[#allocation27_spill] sm:$0xff]  ;;  %v13046_v18 = vld [vmem:[#allocation69_spill] sm:$0xff] }
 0xcc5   : > { %7125 = vrot.lane.b32.xlu1 %v7063_v29, %s9038_s28  ;;  %v6670_v22 = vadd.f32 %v11938_v24, %v6538_v35  ;;  %v6279_v29 = vadd.f32 %v12161_v63, %v6257_v55  ;;  %v7156_v46 = vadd.f32 %v11908_v37, %v7024_v25  ;;  %v6932_v24 = vadd.f32 %v11944_v52, %v6800_v47  ;;  %v13041_v12 = vld [vmem:[#allocation39_spill] sm:$0xff]  ;;  %v13042_v35 = vld [vmem:[#allocation42_spill] sm:$0xff]  ;;  %v6260_v55 = vld [vmem:[#allocation4 + $0x6a] sm:$0xff] }
 0xcc6   : > { %v12203_v3 = vpop.permute.xlu0 %6629  ;;  %v7023_v45 = vadd.f32 %v11904_v39, %v6929_v8  ;;  %v6931_v51 = vadd.f32 %v11910_v2, %v6799_v36  ;;  %v6669_v49 = vadd.f32 %v11934_v28, %v6537_v44  ;;  %v6539_v2 = vadd.f32 %v11940_v13, %v6407_v16  ;;  %v13048_v25 = vld [vmem:[#allocation40_spill] sm:$0xff]  ;;  %v13051_v38 = vld [vmem:[#allocation45_spill] sm:$0xff] }
 0xcc7   : > { %v6500_v4 = vpop.permute.xlu1 %6499  ;;  %v7288_v39 = vadd.f32 %v11914_v26, %v7156_v46  ;;  %v7026_v52 = vadd.f32 %v11950_v15, %v6932_v24  ;;  %v6802_v1 = vadd.f32 %v11920_v10, %v6670_v22  ;;  %v6672_v28 = vadd.f32 %v11986_v14, %v6540_v17  ;;  %v13052_v46 = vld [vmem:[#allocation54_spill] sm:$0xff] }
 0xcc8   : > { %v12212_v33 = vadd.f32 %v6500_v4, %v6417_v7  ;;  %7259 = vrot.lane.b32.xlu0 %v7196_v6, %s9040_s11  ;;  %v7155_v37 = vadd.f32 %v11916_v61, %v7023_v45  ;;  %v6801_v62 = vadd.f32 %v11946_v48, %v6669_v49  ;;  %v6410_v9 = vadd.f32 %v12022_v23, %v6278_v58  ;;  %v13039_v7 = vld [vmem:[#allocation119_spill] sm:$0xff]  ;;  %v13054_v49 = vld [vmem:[#allocation46_spill] sm:$0xff] }
 0xcc9   : > { %7257 = vrot.lane.b32.xlu1 %v7195_v30, %s9040_s11  ;;  %v7025_v61 = vadd.f32 %v11952_v19, %v6931_v51  ;;  %v7158_v15 = vadd.f32 %v11956_v21, %v7026_v52  ;;  %v6934_v10 = vadd.f32 %v11992_v20, %v6802_v1  ;;  %v6671_v48 = vadd.f32 %v11982_v59, %v6539_v2  ;;  %v13044_v59 = vld [vmem:[#allocation52_spill] sm:$0xff]  ;;  %v13047_v30 = vld [vmem:[#allocation30_spill] sm:$0xff]  ;;  %v13053_v51 = vld [vmem:[#allocation61_spill] sm:$0xff] }
 0xcca   : > { %v12224_v5 = vpop.permute.xlu0 %6889  ;;  %v7287_v26 = vadd.f32 %v11922_v54, %v7155_v37  ;;  %v6933_v13 = vadd.f32 %v11958_v27, %v6801_v62  ;;  %v6542_v14 = vadd.f32 %v12028_v53, %v6410_v9  ;;  %v6281_v23 = vadd.f32 %v12161_v63, %v6259_v11  ;;  %v13043_v27 = vld [vmem:[#allocation41_spill] sm:$0xff]  ;;  %v13045_v53 = vld [vmem:[#allocation28_spill] sm:$0xff]  ;;  %v13056_v37 = vld [vmem:[#allocation50_spill] sm:$0xff] }
 0xccb   : > { %v12230_v43 = vpop.permute.xlu1 %6759  ;;  %v7290_v54 = vadd.f32 %v13039_v7, %v7158_v15  ;;  %v7157_v19 = vadd.f32 %v13040_v31, %v7025_v61  ;;  %v6409_v21 = vadd.f32 %v13041_v12, %v6277_v41  ;;  %v7028_v20 = vadd.f32 %v13042_v35, %v6934_v10  ;;  %v13049_v41 = vld [vmem:[#allocation43_spill] sm:$0xff]  ;;  %v13058_v2 = vld [vmem:[#allocation56_spill] sm:$0xff]  ;;  %v13063_v7 = vld [vmem:[#allocation53_spill] sm:$0xff] }
 0xccc   : > { %7263 = vrot.lane.b32.xlu0 %v7198_v32, %s9040_s11  ;;  %v6803_v4 = vadd.f32 %v13043_v27, %v6671_v48  ;;  %v6674_v6 = vadd.f32 %v13044_v59, %v6542_v14  ;;  %v6804_v56 = vadd.f32 %v13045_v53, %v6672_v28  ;;  %v6412_v58 = vadd.f32 %v13046_v18, %v6280_v40  ;;  %v13050_v32 = vld [vmem:[#allocation44_spill] sm:$0xff]  ;;  %v13057_v1 = vld [vmem:[#allocation51_spill] sm:$0xff]  ;;  %v13059_v28 = vld [vmem:[#allocation66_spill] sm:$0xff] }
 0xccd   : > { %7261 = vrot.lane.b32.xlu1 %v7197_v60, %s9040_s11  ;;  %v7289_v8 = vadd.f32 %v13047_v30, %v7157_v19  ;;  %v6541_v22 = vadd.f32 %v13048_v25, %v6409_v21  ;;  %v7027_v47 = vadd.f32 %v13049_v41, %v6933_v13  ;;  %v7160_v44 = vadd.f32 %v13050_v32, %v7028_v20  ;;  %v13055_v60 = vld [vmem:[#allocation47_spill] sm:$0xff]  ;;  %v13062_v48 = vld [vmem:[#allocation49_spill] sm:$0xff]  ;;  %v13066_v35 = vld [vmem:[#allocation58_spill] sm:$0xff]  ;;  %s357_s11 = scalar_lea.vmem %s12528_s10, %s13108_s14 }
 0xcce   : > { %v12246_v50 = vpop.permute.xlu0 %6983  ;;  %v6935_v45 = vadd.f32 %v13051_v38, %v6803_v4  ;;  %v6936_v24 = vadd.f32 %v13052_v46, %v6804_v56  ;;  %v6544_v16 = vadd.f32 %v13053_v51, %v6412_v58  ;;  %v6282_v40 = vadd.f32 %v12161_v63, %v6260_v55  ;;  %v13061_v15 = vld [vmem:[#allocation87_spill] sm:$0xff]  ;;  %v13067_v55 = vld [vmem:[#allocation65_spill] sm:$0xff]  ;;  %v13068_v4 = vld [vmem:[#allocation64_spill] sm:$0xff] }
 0xccf   : > { %v12252_v34 = vpop.permute.xlu1 %6981  ;;  %v7292_v17 = vadd.f32 %v13054_v49, %v7160_v44  ;;  %v6411_v52 = vadd.f32 %v13056_v37, %v6279_v29  ;;  %v6673_v11 = vadd.f32 %v13057_v1, %v6541_v22  ;;  %v13064_v31 = vld [vmem:[#allocation55_spill] sm:$0xff]  ;;  %v13065_v29 = vld [vmem:[#allocation57_spill] sm:$0xff]  ;;  %v13071_v58 = vld [vmem:[#allocation70_spill] sm:$0xff] }
 0xcd0   : > { %7333 = vrot.lane.b32.xlu0 %v7288_v39, %s9034_s18  ;;  %v7159_v39 = vadd.f32 %v13055_v60, %v7027_v47  ;;  %v7030_v62 = vadd.f32 %v13058_v2, %v6936_v24  ;;  %v6676_v9 = vadd.f32 %v13059_v28, %v6544_v16  ;;  %v6414_v10 = vadd.f32 %v13061_v15, %v6282_v40  ;;  %v13070_v56 = vld [vmem:[#allocation29_spill] sm:$0xff]  ;;  %v13073_v22 = vld [vmem:[#allocation60_spill] sm:$0xff]  ;;  %v13075_v44 = vld [vmem:[#allocation99_spill] sm:$0xff] }
 0xcd1   : > { %7331 = vrot.lane.b32.xlu1 %v7287_v26, %s9034_s18  ;;  %v13060_v26 = vld [vmem:[#allocation48_spill] sm:$0xff]  ;;  %v6805_v19 = vadd.f32 %v13064_v31, %v6673_v11  ;;  %v7029_v12 = vadd.f32 %v13065_v29, %v6935_v45  ;;  %v6413_v30 = vadd.f32 %v13071_v58, %v6281_v23  ;;  %v13076_v45 = vld [vmem:[#allocation31_spill] sm:$0xff]  ;;  %v13077_v51 = vld [vmem:[#allocation62_spill] sm:$0xff] }
 0xcd2   : > { %v12268_v57 = vpop.permute.xlu0 %7115  ;;  %v6806_v61 = vadd.f32 %v13060_v26, %v6674_v6  ;;  %v7291_v14 = vadd.f32 %v13062_v48, %v7159_v39  ;;  %v7162_v20 = vadd.f32 %v13066_v35, %v7030_v62  ;;  %v6546_v59 = vadd.f32 %v13068_v4, %v6414_v10  ;;  %v13069_v6 = vld [vmem:[#allocation59_spill] sm:$0xff]  ;;  %v13074_v47 = vld [vmem:[#allocation88_spill] sm:$0xff]  ;;  %v13086_v10 = vld [vmem:[#allocation82_spill] sm:$0xff] }
 0xcd3   : > { %v12274_v36 = vpop.permute.xlu1 %6891  ;;  %v6937_v53 = vadd.f32 %v13069_v6, %v6805_v19  ;;  %v7161_v18 = vadd.f32 %v13070_v56, %v7029_v12  ;;  %v6808_v46 = vadd.f32 %v13076_v45, %v6676_v9  ;;  %v13078_v40 = vld [vmem:[#allocation72_spill] sm:$0xff]  ;;  %v13080_v60 = vld [vmem:[#allocation79_spill] sm:$0xff]  ;;  %v13089_v29 = vld [vmem:[#allocation78_spill] sm:$0xff] }
 0xcd4   : > { %7337 = vrot.lane.b32.xlu0 %v7290_v54, %s9034_s18  ;;  %v6543_v54 = vadd.f32 %v13063_v7, %v6411_v52  ;;  %v6938_v27 = vadd.f32 %v13067_v55, %v6806_v61  ;;  %v7294_v41 = vadd.f32 %v13073_v22, %v7162_v20  ;;  %v6678_v38 = vadd.f32 %v13075_v44, %v6546_v59  ;;  %v13081_v52 = vld [vmem:[#allocation63_spill] sm:$0xff]  ;;  %v13084_v9 = vld [vmem:[#allocation80_spill] sm:$0xff]  ;;  %v13085_v61 = vld [vmem:[#allocation85_spill] sm:$0xff] }
 0xcd5   : > { %7335 = vrot.lane.b32.xlu1 %v7289_v8, %s9034_s18  ;;  %v13072_v8 = vld [vmem:[#allocation68_spill] sm:$0xff]  ;;  %v7293_v16 = vadd.f32 %v13077_v51, %v7161_v18  ;;  %v6545_v49 = vadd.f32 %v13078_v40, %v6413_v30  ;;  %v7031_v39 = vadd.f32 %v13080_v60, %v6937_v53  ;;  %v13082_v11 = vld [vmem:[#allocation95_spill] sm:$0xff]  ;;  %v13091_v55 = vld [vmem:[#allocation74_spill] sm:$0xff] }
 0xcd6   : > { %v7248_v13 = vpop.permute.xlu0 %7247  ;;  %v6675_v25 = vadd.f32 %v13072_v8, %v6543_v54  ;;  %v7032_v32 = vadd.f32 %v13074_v47, %v6938_v27  ;;  %v6940_v2 = vadd.f32 %v13082_v11, %v6808_v46  ;;  %v13083_v62 = vld [vmem:[#allocation71_spill] sm:$0xff]  ;;  %v13088_v54 = vld [vmem:[#allocation81_spill] sm:$0xff]  ;;  %v13092_v59 = vld [vmem:[#allocation84_spill] sm:$0xff] }
 0xcd7   : > { %v7114_v21 = vpop.permute.xlu1 %7113  ;;  %v7163_v26 = vadd.f32 %v13084_v9, %v7031_v39  ;;  %v6677_v15 = vadd.f32 %v13085_v61, %v6545_v49  ;;  %v6810_v31 = vadd.f32 %v13088_v54, %v6678_v38  ;;  %v13090_v35 = vld [vmem:[#allocation115_spill] sm:$0xff]  ;;  %v13093_v56 = vld [vmem:[#allocation101_spill] sm:$0xff]  ;;  %v13096_v44 = vld [vmem:[#allocation108_spill] sm:$0xff] }
 0xcd8   : > { %7341 = vrot.lane.b32.xlu0 %v7292_v17, %s9034_s18  ;;  %v13079_v17 = vld [vmem:[#allocation67_spill] sm:$0xff]  ;;  %v7164_v1 = vadd.f32 %v13081_v52, %v7032_v32  ;;  %v13094_v58 = vld [vmem:[#allocation89_spill] sm:$0xff] }
 0xcd9   : > { %7339 = vrot.lane.b32.xlu1 %v7291_v14, %s9034_s18  ;;  %v6807_v23 = vadd.f32 %v13079_v17, %v6675_v25  ;;  %v13087_v14 = vld [vmem:[#allocation73_spill] sm:$0xff]  ;;  %v7295_v12 = vadd.f32 %v13089_v29, %v7163_v26  ;;  %v6809_v20 = vadd.f32 %v13090_v35, %v6677_v15  ;;  %v6942_v53 = vadd.f32 %v12224_v5, %v6810_v31 }
 0xcda   : > { %v12307_v24 = vpop.permute.xlu0 %6765  ;;  %v7296_v48 = vadd.f32 %v13086_v10, %v7164_v1  ;;  %v7034_v7 = vadd.f32 %v13087_v14, %v6940_v2  ;;  %v6265_v8 = vld [vmem:[#allocation4 + $0x92] sm:$0xff] }
 0xcdb   : > { %v7246_v37 = vpop.permute.xlu1 %7245  ;;  %v6939_v28 = vadd.f32 %v13083_v62, %v6807_v23  ;;  %v6941_v18 = vadd.f32 %v13093_v56, %v6809_v20  ;;  %v13095_v25 = vld [vmem:[#allocation97_spill] sm:$0xff]  ;;  %v7036_v47 = vadd.f32 %v12246_v50, %v6942_v53  ;;  %v6287_v51 = vadd.f32 %v12161_v63, %v6265_v8  ;;  %v13097_v23 = vld [vmem:[#allocation75_spill] sm:$0xff] }
 0xcdc   : > { %7345 = vrot.lane.b32.xlu0 %v7294_v41, %s9034_s18  ;;  %v7166_v6 = vadd.f32 %v13092_v59, %v7034_v7  ;;  %v6262_v41 = vld [vmem:[#allocation4 + $0x7a] sm:$0xff]  ;;  %v13100_v15 = vld [vmem:[#allocation77_spill] sm:$0xff] }
 0xcdd   : > { %7343 = vrot.lane.b32.xlu1 %v7293_v16, %s9034_s18  ;;  %v7033_v27 = vadd.f32 %v13091_v55, %v6939_v28  ;;  %v7035_v45 = vadd.f32 %v12252_v34, %v6941_v18  ;;  %v7168_v46 = vadd.f32 %v12268_v57, %v7036_v47  ;;  %v6284_v16 = vadd.f32 %v12161_v63, %v6262_v41  ;;  %v6261_v57 = vld [vmem:[#allocation4 + $0x72] sm:$0xff]  ;;  %v13098_v62 = vld [vmem:[#allocation83_spill] sm:$0xff]  ;;  %v6264_v56 = vld [vmem:[#allocation4 + $0x8a] sm:$0xff] }
 0xcde   : > { %v12323_v19 = vpop.permute.xlu0 %6369  ;;  %v7298_v22 = vadd.f32 %v13095_v25, %v7166_v6 }
 0xcdf   : > { %v6372_v4 = vpop.permute.xlu1 %6371  ;;  %v7165_v30 = vadd.f32 %v13094_v58, %v7033_v27  ;;  %v7167_v40 = vadd.f32 %v7114_v21, %v7035_v45  ;;  %v7300_v49 = vadd.f32 %v7248_v13, %v7168_v46  ;;  %v6416_v60 = vadd.f32 %v13097_v23, %v6284_v16 }
 0xce0   : > { %7349 = vrot.lane.b32.xlu0 %v7296_v48, %s9034_s18  ;;  %v6419_v17 = vadd.f32 %v6372_v4, %v6287_v51  ;;  %v6283_v13 = vadd.f32 %v12161_v63, %v6261_v57 }
 0xce1   : > { %7347 = vrot.lane.b32.xlu1 %v7295_v12, %s9034_s18  ;;  %v7297_v38 = vadd.f32 %v13096_v44, %v7165_v30  ;;  %v7299_v39 = vadd.f32 %v7246_v37, %v7167_v40  ;;  %v6548_v1 = vadd.f32 %v12184_v42, %v6416_v60  ;;  %v13099_v37 = vld [vmem:[#allocation98_spill] sm:$0xff] }
 0xce2   : > { %v6502_v32 = vpop.permute.xlu0 %6501  ;;  %v6415_v28 = vadd.f32 %v13098_v62, %v6283_v13  ;;  %v6268_v13 = vld [vmem:[#allocation4 + $0xaa] sm:$0xff] }
 0xce3   : > { %v6632_v5 = vpop.permute.xlu1 %6631  ;;  %v6680_v21 = vadd.f32 %v12203_v3, %v6548_v1 }
 0xce4   : > { %7353 = vrot.lane.b32.xlu0 %v7298_v22, %s9034_s18  ;;  %v6547_v10 = vadd.f32 %v13100_v15, %v6415_v28  ;;  %v6681_v51 = vadd.f32 %v6632_v5, %v12212_v33  ;;  %v6290_v28 = vadd.f32 %v12161_v63, %v6268_v13 }
 0xce5   : > { %7351 = vrot.lane.b32.xlu1 %v7297_v38, %s9034_s18  ;;  %v6812_v26 = vadd.f32 %v13099_v37, %v6680_v21 }
 0xce6   : > { %v6634_v50 = vpop.permute.xlu0 %6633  ;;  %v6679_v14 = vadd.f32 %v12189_v0, %v6547_v10 }
 0xce7   : > { %v6504_v52 = vpop.permute.xlu1 %6503 }
 0xce8   : > { %v12344_v34 = vadd.f32 %v6504_v52, %v6419_v17  ;;  %7357 = vrot.lane.b32.xlu0 %v7300_v49, %s9034_s18  ;;  %v6811_v31 = vadd.f32 %v12230_v43, %v6679_v14 }
 0xce9   : > { %7355 = vrot.lane.b32.xlu1 %v7299_v39, %s9034_s18 }
 0xcea   : > { %v6894_v11 = vpop.permute.xlu0 %6893  ;;  %v6943_v29 = vadd.f32 %v12274_v36, %v6811_v31  ;;  %v6286_v36 = vadd.f32 %v12161_v63, %v6264_v56 }
 0xceb   : > { %v6764_v2 = vpop.permute.xlu1 %6763  ;;  %v6944_v48 = vadd.f32 %v6894_v11, %v6812_v26  ;;  %v6267_v26 = vld [vmem:[#allocation4 + $0xa2] sm:$0xff] }
 0xcec   : > { %v6418_v30 = vadd.f32 %v12323_v19, %v6286_v36  ;;  %v6813_v17 = vadd.f32 %v6764_v2, %v6681_v51  ;;  %v6266_v2 = vld [vmem:[#allocation4 + $0x9a] sm:$0xff] }
 0xced   : > { %v6288_v37 = vadd.f32 %v12161_v63, %v6266_v2 }
 0xcee   : > { %v6988_v9 = vpop.permute.xlu0 %6987  ;;  %v6550_v25 = vadd.f32 %v6502_v32, %v6418_v30 }
 0xcef   : > { %v6986_v61 = vpop.permute.xlu1 %6985  ;;  %v7038_v7 = vadd.f32 %v6988_v9, %v6944_v48 }
 0xcf0   : > { %v7037_v55 = vadd.f32 %v6986_v61, %v6943_v29  ;;  %v6682_v41 = vadd.f32 %v6634_v50, %v6550_v25 }
 0xcf2   : > { %v7120_v42 = vpop.permute.xlu0 %7119  ;;  %v6814_v38 = vadd.f32 %v12307_v24, %v6682_v41 }
 0xcf3   : > { %v6896_v54 = vpop.permute.xlu1 %6895  ;;  %v7170_v3 = vadd.f32 %v7120_v42, %v7038_v7  ;;  %v6289_v42 = vadd.f32 %v12161_v63, %v6267_v26 }
 0xcf4   : > { %v6945_v60 = vadd.f32 %v6896_v54, %v6813_v17 }
 0xcf6   : > { %v7252_v12 = vpop.permute.xlu0 %7251 }
 0xcf7   : > { %v7302_v35 = vadd.f32 %v7252_v12, %v7170_v3  ;;  %v7118_v20 = vpop.permute.xlu1 %7117 }
 0xcf8   : > { %v7169_v27 = vadd.f32 %v7118_v20, %v7037_v55 }
 0xcf9   : > { %7361 = vrot.lane.b32.xlu0 %v7302_v35, %s9034_s18 }
 0xcfa   : > { %v12358_v4 = vpop.permute.xlu0 %6769 }
 0xcfb   : > { %v7250_v59 = vpop.permute.xlu1 %7249 }
 0xcfc   : > { %v7301_v6 = vadd.f32 %v7250_v59, %v7169_v27 }
 0xcfe   : > { %7359 = vrot.lane.b32.xlu1 %v7301_v6, %s9034_s18  ;;  %v6374_v0 = vpop.permute.xlu0 %6373 }
 0xcff   : > { %v6376_v53 = vpop.permute.xlu1 %6375  ;;  %v6420_v10 = vadd.f32 %v6374_v0, %v6288_v37 }
 0xd00   : > { %v6421_v31 = vadd.f32 %v6376_v53, %v6289_v42 }
 0xd02   : > { %v6506_v43 = vpop.permute.xlu0 %6505 }
 0xd03   : > { %v6636_v18 = vpop.permute.xlu1 %6635  ;;  %v6552_v7 = vadd.f32 %v6506_v43, %v6420_v10 }
 0xd04   : > { %v6683_v55 = vadd.f32 %v6636_v18, %v12344_v34 }
 0xd06   : > { %v6638_v58 = vpop.permute.xlu0 %6637 }
 0xd07   : > { %v6508_v8 = vpop.permute.xlu1 %6507  ;;  %v6684_v29 = vadd.f32 %v6638_v58, %v6552_v7 }
 0xd08   : > { %v6553_v35 = vadd.f32 %v6508_v8, %v6421_v31  ;;  %v13101_v8 = vld [vmem:[#allocation36_spill] sm:$0xff] }
 0xd09   : > { %v6816_v6 = vadd.f32 %v12358_v4, %v6684_v29 }
 0xd0a   : > { %v6898_v22 = vpop.permute.xlu0 %6897 }
 0xd0b   : > { %v6768_v47 = vpop.permute.xlu1 %6767  ;;  %v6946_v46 = vadd.f32 %v6898_v22, %v6814_v38 }
 0xd0c   : > { %v6815_v0 = vadd.f32 %v6768_v47, %v6683_v55  ;;  %v13102_v47 = vld [vmem:[#allocation38_spill] sm:$0xff] }
 0xd0e   : > { %v6992_v44 = vpop.permute.xlu0 %6991 }
 0xd0f   : > { %v6990_v45 = vpop.permute.xlu1 %6989  ;;  %v7040_v40 = vadd.f32 %v6992_v44, %v6946_v46 }
 0xd10   : > { %v7039_v32 = vadd.f32 %v6990_v45, %v6945_v60  ;;  %v7422_v60 = vlaneseq }
 0xd12   : > { %v7124_v16 = vpop.permute.xlu0 %7123 }
 0xd13   : > { %v6900_v49 = vpop.permute.xlu1 %6899  ;;  %v7172_v23 = vadd.f32 %v7124_v16, %v7040_v40 }
 0xd14   : > { %v6947_v63 = vadd.f32 %v6900_v49, %v6815_v0 }
 0xd16   : > { %v7256_v39 = vpop.permute.xlu0 %7255 }
 0xd17   : > { %v7304_v19 = vadd.f32 %v7256_v39, %v7172_v23  ;;  %v7122_v52 = vpop.permute.xlu1 %7121 }
 0xd18   : > { %v7171_v50 = vadd.f32 %v7122_v52, %v7039_v32  ;;  %v7420_v32 = vld [vmem:[%s12520_s2] sm:$0x3] }
 0xd19   : > { %7365 = vrot.lane.b32.xlu0 %v7304_v19, %s9034_s18  ;;  %v7423_v19 = vshrl.u32 %v7422_v60, 7  ;;  %v7601_v60 = vld [vmem:[%s12524_s6] sm:$0xff] }
 0xd1a   : > { %v6774_v57 = vpop.permute.xlu0 %6773 }
 0xd1b   : > { %v7254_v1 = vpop.permute.xlu1 %7253 }
 0xd1c   : > { %v7303_v24 = vadd.f32 %v7254_v1, %v7171_v50  ;;  %v7428_v1 = vsub.s32 1, %v7423_v19 }
 0xd1e   : > { %7363 = vrot.lane.b32.xlu1 %v7303_v24, %s9034_s18  ;;  %v6906_v11 = vpop.permute.xlu0 %6905  ;;  %v7429_v24 = vrot.slane %v7420_v32, %v7428_v1  ;;  %v7606_v1 = vld [vmem:[%s12524_s6 + $0x28] sm:$0xff] }
 0xd1f   : > { %v6998_v33 = vpop.permute.xlu1 %6997 }
 0xd20   : > { %8061 = vmatprep.mubr.msk.f32.mxu0 %vm1231_vm3, %v7429_v24  ;;  %8060 = vmatprep.mubr.msk.f32.mxu1 %vm1231_vm3, %v7429_v24  ;;  %vm7783_vm3 = vcmask 72704  }
 0xd22   : > { %v6378_v5 = vpop.permute.xlu0 %6377 }
 0xd23   : > { %v7130_v21 = vpop.permute.xlu1 %7129  ;;  %v6422_v61 = vadd.f32 %v6378_v5, %v6290_v28 }
 0xd26   : > { %v6510_v62 = vpop.permute.xlu0 %6509 }
 0xd27   : > { %v6640_v9 = vpop.permute.xlu1 %6639  ;;  %v6554_v48 = vadd.f32 %v6510_v62, %v6422_v61  ;;  %v13103_v61 = vmov 0.0|0.0  }
 0xd28   : > { %v6685_v27 = vadd.f32 %v6640_v9, %v6553_v35 }
 0xd2a   : > { %v6642_v15 = vpop.permute.xlu0 %6641 }
 0xd2b   : > { %v6772_v14 = vpop.permute.xlu1 %6771  ;;  %v6686_v54 = vadd.f32 %v6642_v15, %v6554_v48 }
 0xd2c   : > { %v6817_v36 = vadd.f32 %v6772_v14, %v6685_v27 }
 0xd2d   : > { %v6818_v20 = vadd.f32 %v6774_v57, %v6686_v54  ;;  %v7424_v57 = vsub.s32 0, %v7423_v19  ;;  %v7603_v19 = vld [vmem:[%s12524_s6 + $0x10] sm:$0xff] }
 0xd2e   : > { %v6902_v3 = vpop.permute.xlu0 %6901 }
 0xd2f   : > { %v6994_v12 = vpop.permute.xlu1 %6993  ;;  %v6950_v30 = vadd.f32 %v6906_v11, %v6818_v20  ;;  %v6948_v25 = vadd.f32 %v6902_v3, %v6816_v6 }
 0xd30   : > { %v7041_v58 = vadd.f32 %v6994_v12, %v6947_v63 }
 0xd31   : > { %v7044_v38 = vadd.f32 %v13101_v8, %v6950_v30 }
 0xd32   : > { %v6996_v59 = vpop.permute.xlu0 %6995 }
 0xd33   : > { %v6904_v56 = vpop.permute.xlu1 %6903  ;;  %v7042_v53 = vadd.f32 %v6996_v59, %v6948_v25  ;;  %v7176_v16 = vadd.f32 %v13102_v47, %v7044_v38 }
 0xd34   : > { %v6949_v43 = vadd.f32 %v6904_v56, %v6817_v36 }
 0xd36   : > { %v7128_v22 = vpop.permute.xlu0 %7127  ;;  %v7043_v45 = vadd.f32 %v6998_v33, %v6949_v43  ;;  %v12383_v33 = vrot.slane %v7420_v32, %v7424_v57  ;;  %v7604_v32 = vld [vmem:[%s12524_s6 + $0x18] sm:$0xff]  ;;  %v7605_v57 = vld [vmem:[%s12524_s6 + $0x20] sm:$0xff] }
 0xd37   : > { %v7126_v41 = vpop.permute.xlu1 %7125  ;;  %v7174_v44 = vadd.f32 %v7128_v22, %v7042_v53  ;;  %v8944_v24 = vpack.c.bf16 %v7606_v1, %v7605_v57 }
 0xd38   : > { %v7173_v34 = vadd.f32 %v7126_v41, %v7041_v58  ;;  %v7175_v49 = vadd.f32 %v7130_v21, %v7043_v45  ;;  %7498 = vmatmul.mubr.f32.vlgmr.msra.gmra.mrb[88].mxu1 %v12383_v33 }
 0xd3a   : > { %v7260_v18 = vpop.permute.xlu0 %7259 }
 0xd3b   : > { %v7306_v46 = vadd.f32 %v7260_v18, %v7174_v44  ;;  %v7258_v51 = vpop.permute.xlu1 %7257 }
 0xd3c   : > { %v7305_v4 = vadd.f32 %v7258_v51, %v7173_v34 }
 0xd3d   : > { %7369 = vrot.lane.b32.xlu0 %v7306_v46, %s9034_s18 }
 0xd3e   : > { %7367 = vrot.lane.b32.xlu1 %v7305_v4, %s9034_s18  ;;  %v7264_v40 = vpop.permute.xlu0 %7263 }
 0xd3f   : > { %v7308_v17 = vadd.f32 %v7264_v40, %v7176_v16  ;;  %v7262_v23 = vpop.permute.xlu1 %7261 }
 0xd40   : > { %v7307_v39 = vadd.f32 %v7262_v23, %v7175_v49 }
 0xd41   : > { %7373 = vrot.lane.b32.xlu0 %v7308_v17, %s9034_s18 }
 0xd42   : > { %7371 = vrot.lane.b32.xlu1 %v7307_v39, %s9034_s18  ;;  %v7334_v52 = vpop.permute.xlu0 %7333  ;;  %v7602_v39 = vld [vmem:[%s12524_s6 + $0x8] sm:$0xff] }
 0xd43   : > { %7399 = vst.msk [vmem:[#allocation3 + $0x8] sm:$0xff] %vm7397_vm13, %v7334_v52  ;;  %v7332_v50 = vpop.permute.xlu1 %7331  ;;  %v8938_v52 = vpack.c.bf16 %v7602_v39, %v7601_v60 }
 0xd44   : > { %7398 = vst.msk [vmem:[#allocation3] sm:$0xff] %vm7397_vm13, %v7332_v50  ;;  %v8941_v50 = vpack.c.bf16 %v7604_v32, %v7603_v19 }
 0xd45   : > { %8939 = vmatpush3.bf16.msra.mxu1 %v8938_v52 }
 0xd46   : > { %v7338_v11 = vpop.permute.xlu0 %7337  ;;  %8940 = vmatprep.subr.bf16.mxu1 %v13103_v61 }
 0xd47   : > { %7401 = vst.msk [vmem:[#allocation3 + $0x18] sm:$0xff] %vm7397_vm13, %v7338_v11  ;;  %v7336_v5 = vpop.permute.xlu1 %7335  ;;  %v7607_v11 = vld [vmem:[%s12524_s6 + $0x30] sm:$0xff] }
 0xd48   : > { %7400 = vst.msk [vmem:[#allocation3 + $0x10] sm:$0xff] %vm7397_vm13, %v7336_v5 }
 0xd49   : > { %8942 = vmatpush3.bf16.msra.mxu1 %v8941_v50 }
 0xd4a   : > { %v7342_v21 = vpop.permute.xlu0 %7341  ;;  %v7504_v13 = vld [vmem:[#allocation3 + $0x8] sm:$0xff]  ;;  %8943 = vmatprep.subr.bf16.mxu1 %v13103_v61 }
 0xd4b   : > { %7403 = vst.msk [vmem:[#allocation3 + $0x28] sm:$0xff] %vm7397_vm13, %v7342_v21  ;;  %v7340_v2 = vpop.permute.xlu1 %7339  ;;  %v7503_v62 = vld [vmem:[#allocation3] sm:$0xff]  ;;  %v7609_v21 = vld [vmem:[%s12524_s6 + $0x40] sm:$0xff] }
 0xd4c   : > { %7402 = vst.msk [vmem:[#allocation3 + $0x20] sm:$0xff] %vm7397_vm13, %v7340_v2  ;;  %v8905_v28 = vpack.c.bf16 %v7504_v13, %v7503_v62  ;;  %v7610_v13 = vld [vmem:[%s12524_s6 + $0x48] sm:$0xff]  ;;  %v7611_v62 = vld [vmem:[%s12524_s6 + $0x50] sm:$0xff] }
 0xd4d   : > { %8945 = vmatpush3.bf16.msra.mxu1 %v8944_v24  ;;  %v8950_v2 = vpack.c.bf16 %v7610_v13, %v7609_v21 }
 0xd4e   : > { %8906 = vmatpush1.bf16.msra.mxu0 %v8905_v28  ;;  %v7346_v9 = vpop.permute.xlu0 %7345  ;;  %v7506_v37 = vld [vmem:[#allocation3 + $0x18] sm:$0xff]  ;;  %8946 = vmatprep.subr.bf16.mxu1 %v13103_v61  ;;  %v7612_v28 = vld [vmem:[%s12524_s6 + $0x58] sm:$0xff] }
 0xd4f   : > { %7405 = vst.msk [vmem:[#allocation3 + $0x38] sm:$0xff] %vm7397_vm13, %v7346_v9  ;;  %v7344_v26 = vpop.permute.xlu1 %7343  ;;  %8907 = vmatprep.subr.bf16.mxu0 %v13103_v61  ;;  %v7505_v15 = vld [vmem:[#allocation3 + $0x10] sm:$0xff]  ;;  %v8953_v9 = vpack.c.bf16 %v7612_v28, %v7611_v62 }
 0xd50   : > { %7404 = vst.msk [vmem:[#allocation3 + $0x30] sm:$0xff] %vm7397_vm13, %v7344_v26  ;;  %v8908_v10 = vpack.c.bf16 %v7506_v37, %v7505_v15  ;;  %v7613_v37 = vld [vmem:[%s12524_s6 + $0x60] sm:$0xff]  ;;  %v7614_v26 = vld [vmem:[%s12524_s6 + $0x68] sm:$0xff] }
 0xd51   : > { %v8956_v15 = vpack.c.bf16 %v7614_v26, %v7613_v37 }
 0xd52   : > { %8909 = vmatpush1.bf16.msra.mxu0 %v8908_v10  ;;  %v7350_v48 = vpop.permute.xlu0 %7349  ;;  %v7508_v14 = vld [vmem:[#allocation3 + $0x28] sm:$0xff]  ;;  %v13104_v10 = vmov 0.0  }
 0xd53   : > { %7407 = vst.msk [vmem:[#allocation3 + $0x48] sm:$0xff] %vm7397_vm13, %v7350_v48  ;;  %v7348_v42 = vpop.permute.xlu1 %7347  ;;  %8910 = vmatprep.subr.bf16.mxu0 %v13103_v61  ;;  %v7507_v7 = vld [vmem:[#allocation3 + $0x20] sm:$0xff]  ;;  %8761 = vmatprep.mubr.msk.f32.mxu1 %vm9048_vm14, %v13104_v10 }
 0xd54   : > { %7406 = vst.msk [vmem:[#allocation3 + $0x40] sm:$0xff] %vm7397_vm13, %v7348_v42  ;;  %v8911_v54 = vpack.c.bf16 %v7508_v14, %v7507_v7  ;;  %v7615_v42 = vld [vmem:[%s12524_s6 + $0x70] sm:$0xff] }
 0xd56   : > { %8912 = vmatpush1.bf16.msra.mxu0 %v8911_v54  ;;  %v7354_v31 = vpop.permute.xlu0 %7353  ;;  %v7510_v3 = vld [vmem:[#allocation3 + $0x38] sm:$0xff] }
 0xd57   : > { %7409 = vst.msk [vmem:[#allocation3 + $0x58] sm:$0xff] %vm7397_vm13, %v7354_v31  ;;  %v7352_v29 = vpop.permute.xlu1 %7351  ;;  %8913 = vmatprep.subr.bf16.mxu0 %v13103_v61  ;;  %v7509_v12 = vld [vmem:[#allocation3 + $0x30] sm:$0xff] }
 0xd58   : > { %7408 = vst.msk [vmem:[#allocation3 + $0x50] sm:$0xff] %vm7397_vm13, %v7352_v29  ;;  %v8914_v35 = vpack.c.bf16 %v7510_v3, %v7509_v12  ;;  %v7692_v29 = vld [vmem:[%s12526_s8] sm:$0xff]  ;;  %v7693_v12 = vld [vmem:[%s12526_s8 + $0x8] sm:$0xff] }
 0xd5a   : > { %8915 = vmatpush1.bf16.msra.mxu0 %v8914_v35  ;;  %v7358_v20 = vpop.permute.xlu0 %7357  ;;  %v7512_v55 = vld [vmem:[#allocation3 + $0x48] sm:$0xff]  ;;  %v7694_v35 = vld [vmem:[%s12526_s8 + $0x10] sm:$0xff] }
 0xd5b   : > { %7411 = vst.msk [vmem:[#allocation3 + $0x68] sm:$0xff] %vm7397_vm13, %v7358_v20  ;;  %v7356_v27 = vpop.permute.xlu1 %7355  ;;  %8916 = vmatprep.subr.bf16.mxu0 %v13103_v61  ;;  %v7511_v59 = vld [vmem:[#allocation3 + $0x40] sm:$0xff]  ;;  %v8959_v20 = vpack.c.bf16 %v7693_v12, %v7692_v29 }
 0xd5c   : > { %7410 = vst.msk [vmem:[#allocation3 + $0x60] sm:$0xff] %vm7397_vm13, %v7356_v27  ;;  %v8917_v6 = vpack.c.bf16 %v7512_v55, %v7511_v59  ;;  %v7695_v55 = vld [vmem:[%s12526_s8 + $0x18] sm:$0xff]  ;;  %v7696_v59 = vld [vmem:[%s12526_s8 + $0x20] sm:$0xff] }
 0xd5d   : > { %v8962_v27 = vpack.c.bf16 %v7695_v55, %v7694_v35 }
 0xd5e   : > { %8918 = vmatpush1.bf16.msra.mxu0 %v8917_v6  ;;  %v7514_v56 = vld [vmem:[#allocation3 + $0x58] sm:$0xff] }
 0xd5f   : > { %8919 = vmatprep.subr.bf16.mxu0 %v13103_v61  ;;  %v7513_v0 = vld [vmem:[#allocation3 + $0x50] sm:$0xff]  ;;  %v7697_v6 = vld [vmem:[%s12526_s8 + $0x28] sm:$0xff] }
 0xd60   : > { %v8920_v36 = vpack.c.bf16 %v7514_v56, %v7513_v0  ;;  %v8965_v56 = vpack.c.bf16 %v7697_v6, %v7696_v59  ;;  %v7698_v0 = vld [vmem:[%s12526_s8 + $0x30] sm:$0xff] }
 0xd62   : > { %8921 = vmatpush1.bf16.msra.mxu0 %v8920_v36  ;;  %v7516_v30 = vld [vmem:[#allocation3 + $0x68] sm:$0xff] }
 0xd63   : > { %8922 = vmatprep.subr.bf16.mxu0 %v13103_v61  ;;  %v7515_v25 = vld [vmem:[#allocation3 + $0x60] sm:$0xff]  ;;  %v7699_v36 = vld [vmem:[%s12526_s8 + $0x38] sm:$0xf] }
 0xd64   : > { %v8923_v63 = vpack.c.bf16 %v7516_v30, %v7515_v25  ;;  %v8968_v30 = vpack.c.bf16 %v7699_v36, %v7698_v0  ;;  %v7616_v25 = vld [vmem:[%s12525_s7] sm:$0x1] }
 0xd66   : > { %8924 = vmatpush1.bf16.msra.mxu0 %v8923_v63 }
 0xd67   : > { %8925 = vmatprep.subr.bf16.mxu0 %v13103_v61 }
 0xd6b   : > { %v7362_v43 = vpop.permute.xlu0 %7361 }
 0xd6c   : > { %7413 = vst.msk [vmem:[#allocation3 + $0x78] sm:$0xff] %vm7397_vm13, %v7362_v43 }
 0xd70   : > { %v7360_v22 = vpop.permute.xlu1 %7359 }
 0xd71   : > { %7412 = vst.msk [vmem:[#allocation3 + $0x70] sm:$0xff] %vm7397_vm13, %v7360_v22 }
 0xd73   : > { %v7518_v41 = vld [vmem:[#allocation3 + $0x78] sm:$0xff] }
 0xd78   : > { %v7517_v53 = vld [vmem:[#allocation3 + $0x70] sm:$0xff] }
 0xd79   : > { %v8926_v58 = vpack.c.bf16 %v7518_v41, %v7517_v53 }
 0xd7b   : > { %8927 = vmatpush1.bf16.msra.mxu0 %v8926_v58 }
 0xd7c   : > { %8928 = vmatprep.subr.bf16.mxu0 %v13103_v61 }
 0xd8b   : > { %v7366_v44 = vpop.permute.xlu0 %7365 }
 0xd8c   : > { %7415 = vst.msk [vmem:[#allocation3 + $0x88] sm:$0xff] %vm7397_vm13, %v7366_v44 }
 0xd90   : > { %v7364_v8 = vpop.permute.xlu1 %7363 }
 0xd91   : > { %7414 = vst.msk [vmem:[#allocation3 + $0x80] sm:$0xff] %vm7397_vm13, %v7364_v8 }
 0xd93   : > { %v7520_v45 = vld [vmem:[#allocation3 + $0x88] sm:$0xff] }
 0xd98   : > { %v7519_v38 = vld [vmem:[#allocation3 + $0x80] sm:$0xff] }
 0xd99   : > { %v8929_v34 = vpack.c.bf16 %v7520_v45, %v7519_v38 }
 0xd9b   : > { %8930 = vmatpush1.bf16.msra.mxu0 %v8929_v34 }
 0xd9c   : > { %8931 = vmatprep.subr.bf16.mxu0 %v13103_v61 }
 0xdaf   : > { %v7370_v18 = vpop.permute.xlu0 %7369 }
 0xdb0   : > { %7417 = vst.msk [vmem:[#allocation3 + $0x98] sm:$0xff] %vm7397_vm13, %v7370_v18  ;;  %v7368_v46 = vpop.permute.xlu1 %7367 }
 0xdb1   : > { %7416 = vst.msk [vmem:[#allocation3 + $0x90] sm:$0xff] %vm7397_vm13, %v7368_v46 }
 0xdb3   : > { %v7374_v51 = vpop.permute.xlu0 %7373 }
 0xdb4   : > { %7419 = vst.msk [vmem:[#allocation3 + $0xa8] sm:$0xff] %vm7397_vm13, %v7374_v51  ;;  %v7372_v4 = vpop.permute.xlu1 %7371 }
 0xdb5   : > { %7418 = vst.msk [vmem:[#allocation3 + $0xa0] sm:$0xff] %vm7397_vm13, %v7372_v4 }
 0xdb7   : > { %v7522_v47 = vld [vmem:[#allocation3 + $0x98] sm:$0xff] }
 0xdb8   : > { %v7521_v16 = vld [vmem:[#allocation3 + $0x90] sm:$0xff] }
 0xdb9   : > { %v8932_v40 = vpack.c.bf16 %v7522_v47, %v7521_v16 }
 0xdbb   : > { %8933 = vmatpush1.bf16.msra.mxu0 %v8932_v40  ;;  %v7524_v49 = vld [vmem:[#allocation3 + $0xa8] sm:$0xff] }
 0xdbc   : > { %8934 = vmatprep.subr.bf16.mxu0 %v13103_v61  ;;  %v7523_v17 = vld [vmem:[#allocation3 + $0xa0] sm:$0xff] }
 0xdbd   : > { %v8935_v23 = vpack.c.bf16 %v7524_v49, %v7523_v17 }
 0xdbf   : > { %8936 = vmatpush1.bf16.msra.mxu0 %v8935_v23 }
 0xdc2   : > { %7590 = vmatmul.mubr.f32.vlgmr.msra.gmra.mrb[110].mxu0 %v12383_v33  ;;  %v7608_v33 = vld [vmem:[%s12524_s6 + $0x38] sm:$0xff] }
 0xdc3   : > { %v8947_v5 = vpack.c.bf16 %v7608_v33, %v7607_v11 }
 0xdc5   : > { %8948 = vmatpush3.bf16.msra.mxu1 %v8947_v5 }
 0xdc6   : > { %8949 = vmatprep.subr.bf16.mxu1 %v13103_v61 }
 0xdc9   : > { %8951 = vmatpush3.bf16.msra.mxu1 %v8950_v2 }
 0xdca   : > { %8952 = vmatprep.subr.bf16.mxu1 %v13103_v61 }
 0xdcd   : > { %8954 = vmatpush3.bf16.msra.mxu1 %v8953_v9 }
 0xdce   : > { %8955 = vmatprep.subr.bf16.mxu1 %v13103_v61 }
 0xdd1   : > { %8957 = vmatpush3.bf16.msra.mxu1 %v8956_v15 }
 0xdd2   : > { %8759 = vmatprep.subr.mxu1 %v13104_v10 }
 0xdd5   : > { %8760 = vmatpush3.msra.mxu1 %v7615_v42 }
 0xdd6   : > { %8958 = vmatprep.subr.bf16.mxu1 %v13103_v61 }
 0xe0b   : > { %v7499_v48 = vpop.f32.mrb[88].mxu1 }
 0xe0c   : > { %v7501_v14 = vpop.f32.mrb[89].mxu1 }
 0xe95   : > { %v7591_v7 = vpop.f32.mrb[110].mxu0 }
 0xe96   : > { %7596 = vrot.lane.b32.xlu1 %v7591_v7, %s9049_s25  ;;  %v7593_v54 = vpop.f32.mrb[111].mxu0 }
 0xf08   : > { %v7597_v31 = vpop.permute.xlu1 %7596 }
 0xf09   : > { %v7600_v3 = vsel %vm7599_vm15, %v7499_v48, %v7597_v31 }
 0xf0a   : > { %8762 = vmatmul.mubr.msk.f32.vlgmr.msra.gmra.mrb[90].mxu1 %vm7617_vm0, %v7600_v3 }
 0xf0b   : > { %8780 = vmatprep.mubr.msk.f32.mxu1 %vm9048_vm14, %v13104_v10  ;;  %8960 = vmatpush3.bf16.msra.mxu1 %v8959_v20 }
 0xf0c   : > { %8961 = vmatprep.subr.bf16.mxu1 %v13103_v61 }
 0xf0f   : > { %8963 = vmatpush3.bf16.msra.mxu1 %v8962_v27 }
 0xf10   : > { %8964 = vmatprep.subr.bf16.mxu1 %v13103_v61 }
 0xf13   : > { %8966 = vmatpush3.bf16.msra.mxu1 %v8965_v56 }
 0xf14   : > { %8967 = vmatprep.subr.bf16.mxu1 %v13103_v61  ;;  %v7700_v61 = vld [vmem:[%s12527_s9] sm:$0x1] }
 0xf17   : > { %8970 = vmatpush3.bf16.msk.msra.mxu1 %vm8969_vm2, %v8968_v30 }
 0xfdd   : > { %v7687_v63 = vpop.f32.mrb[90].mxu1 }
 0xfde   : > { %v7688_v43 = vadd.f32 %v7687_v63, %v7616_v25  ;;  %v8763_v22 = vpop.f32.mrb[91].mxu1 }
 0xfe0   : > { %v7691_v53 = vmax.f32 %v7688_v43, 0.0  ;;  %7780 = vrot.lane.b32.xlu1 %v7688_v43, %s9051_s29 }
 0xfe2   : > { %7702 = vrot.lane.b32.xlu0 %v7691_v53, %s9052_s17 }
0x1052   : > { %v7781_v38 = vpop.permute.xlu1 %7780 }
0x1054   : > { %v7703_v41 = vpop.permute.xlu0 %7702 }
0x1055   : > { %8781 = vmatmul.mubr.msk.f32.vlgmr.msra.gmra.mrb[92].mxu1 %vm7599_vm15, %v7703_v41 }
0x1128   : > { %v7775_v58 = vpop.f32.mrb[92].mxu1 }
0x1129   : > { %v7776_v44 = vadd.f32 %v7775_v58, %v7700_v61  ;;  %v8782_v8 = vpop.f32.mrb[93].mxu1 }
0x112b   : > { %v7784_v45 = vsel %vm7783_vm3, %v7776_v44, %v7781_v38 }
0x112c   : > { %v7786_v34 = vsel %vm7785_vm4, %v7784_v45, %v7781_v38 }
0x112d   : > { %7788 = vst.msk [vmem:[%s357_s11] sm:$0x1] %vm7787_vm5, %v7786_v34 }
0x112e PF: > { %s20_s13 = sadd.s32 1, %s9031_s13  }
0x112f   : > { %p17_p5 = scmp.ge.s32.totalorder %s20_s13, 4  }
0x1131   :  { %19 = sbr.rel (!%p17_p5) target bundleno = 1 (0x1), region = 90 }

</bundles_post_ra>
